<compile_context>
chip_gen: v5e
topology: v5e:2x2
jax: 0.10.0
libtpu: 0.0.40
codegen_flags: <defaults>
</compile_context>

<pallas_src>
import math

import jax
import jax.numpy as jnp
import numpy as np
from jax import lax
from jax.experimental import pallas as pl
from jax.experimental.pallas import tpu as pltpu

# ---- model hyper-parameters (small, TPU-friendly, consistent with module) ----
B = 2            # batch
T = 8            # sequence length
D_MODEL = 32     # embed_dim / d_model
HEADS = 4        # num_heads
VALUE_DIM = 128  # value_dim (lane-aligned so per-head slices are 128-wide)
HV = HEADS * VALUE_DIM     # 512  (attn inner dim & final output dim)
FF1 = 4 * HV               # 2048
BT = B * T                 # 16   (rows fed to every matmul)

_SCALE = 1.0 / math.sqrt(VALUE_DIM)


def _gelu_exact(x):
    # nn.GELU() default = exact erf-based GELU
    return 0.5 * x * (1.0 + lax.erf(x * (1.0 / math.sqrt(2.0))))


def transformer_block_kernel(
    x_ref,                     # (BT, D_MODEL)            f32
    wqkv_ref, bqkv_ref,        # (D_MODEL, 3*HV) bf16, (1, 3*HV)    f32
    wo_ref, bo_ref,            # (HV, D_MODEL)   bf16, (1, D_MODEL) f32
    w1_ref, b1_ref,            # (D_MODEL, FF1)  bf16, (1, FF1)     f32
    w2_ref, b2_ref,            # (FF1, HV)       bf16, (1, HV)      f32
    o_ref,                     # (BT, HV)                 f32
):
    x = x_ref[...]                                                   # (BT, D)

    # ---- fused QKV projection: one weight stream, one MXU pass ----
    qkv = jnp.dot(x, wqkv_ref[...].astype(jnp.float32),
                  preferred_element_type=jnp.float32) + bqkv_ref[...]  # (BT, 3*HV)
    q = qkv[:, 0 * HV:1 * HV] * _SCALE      # fold 1/sqrt(V) once, up front
    k = qkv[:, 1 * HV:2 * HV]
    v = qkv[:, 2 * HV:3 * HV]

    # ---- per-(batch, head) scaled dot-product attention ----
    # view(B,T,H,V).transpose(1,2) in PyTorch == head h occupies columns
    # [h*V, (h+1)*V) of the projection output; batch b occupies rows
    # [b*T, (b+1)*T).
    # TODO(synk): optional boolean `mask` argument (masked_fill -10000) not
    # wired through; forward is implemented for mask=None.
    batch_ctx = []
    for b in range(B):
        r0 = b * T
        head_ctx = []
        for h in range(HEADS):
            c0 = h * VALUE_DIM
            qh = q[r0:r0 + T, c0:c0 + VALUE_DIM]                     # (T, V)
            kh = k[r0:r0 + T, c0:c0 + VALUE_DIM]
            vh = v[r0:r0 + T, c0:c0 + VALUE_DIM]
            # contract on the V dim directly -> no kh.T (XLU transpose) needed
            s = lax.dot_general(
                qh, kh,
                dimension_numbers=(((1,), (1,)), ((), ())),
                preferred_element_type=jnp.float32)                  # (T, T)
            s = s - jnp.max(s, axis=-1, keepdims=True)
            p = jnp.exp(s)
            p = p / jnp.sum(p, axis=-1, keepdims=True)               # softmax
            head_ctx.append(
                jnp.dot(p, vh, preferred_element_type=jnp.float32))  # (T, V)
        batch_ctx.append(jnp.concatenate(head_ctx, axis=-1))         # (T, HV)
    ctx = jnp.concatenate(batch_ctx, axis=0)                         # (BT, HV)

    # ---- attention output projection ----
    attn_out = jnp.dot(ctx, wo_ref[...].astype(jnp.float32),
                       preferred_element_type=jnp.float32) + bo_ref[...]  # (BT, D)

    # ---- feed-forward: GELU(ff1) then GELU(ff2) (no residual, per module) ----
    h1 = _gelu_exact(
        jnp.dot(attn_out, w1_ref[...].astype(jnp.float32),
                preferred_element_type=jnp.float32) + b1_ref[...])   # (BT, FF1)
    h2 = _gelu_exact(
        jnp.dot(h1, w2_ref[...].astype(jnp.float32),
                preferred_element_type=jnp.float32) + b2_ref[...])   # (BT, HV)

    o_ref[...] = h2


def _pack_params(params):
    """Fuse q/k/v projection weights & biases into one (D, 3*HV) matmul."""
    (wq, bq, wk, bk, wv, bv, wo, bo, w1, b1, w2, b2) = params
    wqkv = jnp.concatenate([wq, wk, wv], axis=1)     # (D_MODEL, 3*HV) bf16
    bqkv = jnp.concatenate([bq, bk, bv], axis=1)     # (1, 3*HV)       f32
    return (wqkv, bqkv, wo, bo, w1, b1, w2, b2)


def transformer_block(x, packed):
    """x: (B, T, D_MODEL) f32 -> (B, T, HEADS*VALUE_DIM) f32."""
    # TODO(synk): if called per-layer in a loop, keep weights VMEM-resident
    # across calls (cross-call prefetch) to amortize the ~2.3 MiB weight DMA.
    wqkv, bqkv, wo, bo, w1, b1, w2, b2 = packed
    x2 = x.reshape(BT, D_MODEL)

    vspec = pl.BlockSpec(memory_space=pltpu.MemorySpace.VMEM)  # whole array in VMEM

    out = pl.pallas_call(
        transformer_block_kernel,
        out_shape=jax.ShapeDtypeStruct((BT, HV), jnp.float32),
        in_specs=[vspec] * 9,
        out_specs=vspec,
        compiler_params=pltpu.CompilerParams(vmem_limit_bytes=16 << 20),
    )(x2, wqkv, bqkv, wo, bo, w1, b1, w2, b2)
    return out.reshape(B, T, HV)


def _init_params(key):
    """Deterministic init (PyTorch-Linear-like uniform). Weights stored bf16."""
    def linear(key, fan_in, fan_out):
        kw, kb = jax.random.split(key)
        bound = 1.0 / math.sqrt(fan_in)
        w = jax.random.uniform(kw, (fan_in, fan_out), jnp.float32, -bound, bound)
        b = jax.random.uniform(kb, (1, fan_out), jnp.float32, -bound, bound)
        # weights streamed as bf16 (halves the dominant HBM cost); biases stay f32
        return w.astype(jnp.bfloat16), b

    keys = jax.random.split(key, 6)
    wq, bq = linear(keys[0], D_MODEL, HV)
    wk, bk = linear(keys[1], D_MODEL, HV)
    wv, bv = linear(keys[2], D_MODEL, HV)
    wo, bo = linear(keys[3], HV, D_MODEL)
    w1, b1 = linear(keys[4], D_MODEL, FF1)
    w2, b2 = linear(keys[5], FF1, HV)
    return (wq, bq, wk, bk, wv, bv, wo, bo, w1, b1, w2, b2)


def _reference(x, params):
    """Pure-JAX f32 reference of the PyTorch forward (mask=None)."""
    (wq, bq, wk, bk, wv, bv, wo, bo, w1, b1, w2, b2) = params
    f32 = lambda a: a.astype(jnp.float32)
    Bx, Tx, _ = x.shape
    q = (x @ f32(wq) + bq).reshape(Bx, Tx, HEADS, VALUE_DIM).transpose(0, 2, 1, 3)
    k = (x @ f32(wk) + bk).reshape(Bx, Tx, HEADS, VALUE_DIM).transpose(0, 2, 1, 3)
    v = (x @ f32(wv) + bv).reshape(Bx, Tx, HEADS, VALUE_DIM).transpose(0, 2, 1, 3)
    s = jnp.einsum("bhtd,bhsd->bhts", q, k) / math.sqrt(VALUE_DIM)
    p = jax.nn.softmax(s, axis=-1)
    ctx = jnp.einsum("bhts,bhsd->bhtd", p, v).transpose(0, 2, 1, 3).reshape(Bx, Tx, HV)
    attn_out = ctx @ f32(wo) + bo
    h1 = jax.nn.gelu(attn_out @ f32(w1) + b1, approximate=False)
    h2 = jax.nn.gelu(h1 @ f32(w2) + b2, approximate=False)
    return h2


if __name__ == "__main__":
    key = jax.random.PRNGKey(0)
    kx, kp = jax.random.split(key)
    x = jax.random.normal(kx, (B, T, D_MODEL), jnp.float32)
    params = _init_params(kp)
    packed = _pack_params(params)

    out = jax.block_until_ready(transformer_block(x, packed))
    ref = jax.block_until_ready(_reference(x, params))

    assert out.shape == (B, T, HV), out.shape
    np.testing.assert_allclose(np.asarray(out), np.asarray(ref), rtol=2e-4, atol=2e-4)

    print("KERNEL_OK")
</pallas_src>

<mosaic_0001>
module attributes {stable_mosaic.version = 11 : i64} {
  func.func @transformer_block_kernel(%arg0: memref<16x32xf32, #tpu.memory_space<vmem>>, %arg1: memref<32x1536xbf16, #tpu.memory_space<vmem>>, %arg2: memref<1x1536xf32, #tpu.memory_space<vmem>>, %arg3: memref<512x32xbf16, #tpu.memory_space<vmem>>, %arg4: memref<1x32xf32, #tpu.memory_space<vmem>>, %arg5: memref<32x2048xbf16, #tpu.memory_space<vmem>>, %arg6: memref<1x2048xf32, #tpu.memory_space<vmem>>, %arg7: memref<2048x512xbf16, #tpu.memory_space<vmem>>, %arg8: memref<1x512xf32, #tpu.memory_space<vmem>>, %arg9: memref<16x512xf32, #tpu.memory_space<vmem>>) attributes {dimension_semantics = [], scalar_prefetch = 0 : i64, scratch_operands = 0 : i64, tpu.core_type = #tpu.core_type<tc>} {
    %c0 = arith.constant 0 : index
    %c0_0 = arith.constant 0 : index
    %0 = vector.load %arg0[%c0, %c0_0] : memref<16x32xf32, #tpu.memory_space<vmem>>, vector<16x32xf32>
    %c0_1 = arith.constant 0 : index
    %c0_2 = arith.constant 0 : index
    %1 = vector.load %arg1[%c0_1, %c0_2] : memref<32x1536xbf16, #tpu.memory_space<vmem>>, vector<32x1536xbf16>
    %2 = arith.extf %1 : vector<32x1536xbf16> to vector<32x1536xf32>
    %cst = arith.constant dense<0.000000e+00> : vector<16x1536xf32>
    %3 = tpu.matmul %0, %2, %cst {dimension_numbers = #tpu.dot_dimension_numbers<[1], [0], [0], [1], [0, 0, 1, 1], [], []>} : vector<16x32xf32>, vector<32x1536xf32>, vector<16x1536xf32> -> vector<16x1536xf32>
    %c0_3 = arith.constant 0 : index
    %c0_4 = arith.constant 0 : index
    %4 = vector.load %arg2[%c0_3, %c0_4] : memref<1x1536xf32, #tpu.memory_space<vmem>>, vector<1x1536xf32>
    %5 = vector.broadcast %4 : vector<1x1536xf32> to vector<16x1536xf32>
    %6 = arith.addf %3, %5 : vector<16x1536xf32>
    %7 = vector.extract_strided_slice %6 {offsets = [0, 0], sizes = [16, 512], strides = [1, 1]} : vector<16x1536xf32> to vector<16x512xf32>
    %cst_5 = arith.constant 0.0883883461 : f32
    %8 = vector.broadcast %cst_5 : f32 to vector<16x512xf32>
    %9 = arith.mulf %7, %8 : vector<16x512xf32>
    %10 = vector.extract_strided_slice %6 {offsets = [0, 512], sizes = [16, 512], strides = [1, 1]} : vector<16x1536xf32> to vector<16x512xf32>
    %11 = vector.extract_strided_slice %6 {offsets = [0, 1024], sizes = [16, 512], strides = [1, 1]} : vector<16x1536xf32> to vector<16x512xf32>
    %12 = vector.extract_strided_slice %9 {offsets = [0, 0], sizes = [8, 128], strides = [1, 1]} : vector<16x512xf32> to vector<8x128xf32>
    %13 = vector.extract_strided_slice %10 {offsets = [0, 0], sizes = [8, 128], strides = [1, 1]} : vector<16x512xf32> to vector<8x128xf32>
    %14 = vector.extract_strided_slice %11 {offsets = [0, 0], sizes = [8, 128], strides = [1, 1]} : vector<16x512xf32> to vector<8x128xf32>
    %cst_6 = arith.constant dense<0.000000e+00> : vector<8x8xf32>
    %15 = tpu.matmul %12, %13, %cst_6 {dimension_numbers = #tpu.dot_dimension_numbers<[1], [1], [0], [0], [0, 0, 1, 0], [], []>} : vector<8x128xf32>, vector<8x128xf32>, vector<8x8xf32> -> vector<8x8xf32>
    %cst_7 = arith.constant dense<0xFF800000> : vector<8xf32>
    %16 = vector.multi_reduction <maximumf>, %15, %cst_7 [1] : vector<8x8xf32> to vector<8xf32>
    %17 = vector.shape_cast %16 : vector<8xf32> to vector<8x1xf32>
    %18 = vector.broadcast %17 : vector<8x1xf32> to vector<8x8xf32>
    %19 = arith.subf %15, %18 : vector<8x8xf32>
    %20 = math.exp %19 : vector<8x8xf32>
    %cst_8 = arith.constant dense<0.000000e+00> : vector<8xf32>
    %21 = vector.multi_reduction <add>, %20, %cst_8 [1] : vector<8x8xf32> to vector<8xf32>
    %22 = vector.shape_cast %21 : vector<8xf32> to vector<8x1xf32>
    %23 = vector.broadcast %22 : vector<8x1xf32> to vector<8x8xf32>
    %24 = arith.divf %20, %23 : vector<8x8xf32>
    %cst_9 = arith.constant dense<0.000000e+00> : vector<8x128xf32>
    %25 = tpu.matmul %24, %14, %cst_9 {dimension_numbers = #tpu.dot_dimension_numbers<[1], [0], [0], [1], [0, 0, 1, 1], [], []>} : vector<8x8xf32>, vector<8x128xf32>, vector<8x128xf32> -> vector<8x128xf32>
    %26 = vector.extract_strided_slice %9 {offsets = [0, 128], sizes = [8, 128], strides = [1, 1]} : vector<16x512xf32> to vector<8x128xf32>
    %27 = vector.extract_strided_slice %10 {offsets = [0, 128], sizes = [8, 128], strides = [1, 1]} : vector<16x512xf32> to vector<8x128xf32>
    %28 = vector.extract_strided_slice %11 {offsets = [0, 128], sizes = [8, 128], strides = [1, 1]} : vector<16x512xf32> to vector<8x128xf32>
    %cst_10 = arith.constant dense<0.000000e+00> : vector<8x8xf32>
    %29 = tpu.matmul %26, %27, %cst_10 {dimension_numbers = #tpu.dot_dimension_numbers<[1], [1], [0], [0], [0, 0, 1, 0], [], []>} : vector<8x128xf32>, vector<8x128xf32>, vector<8x8xf32> -> vector<8x8xf32>
    %cst_11 = arith.constant dense<0xFF800000> : vector<8xf32>
    %30 = vector.multi_reduction <maximumf>, %29, %cst_11 [1] : vector<8x8xf32> to vector<8xf32>
    %31 = vector.shape_cast %30 : vector<8xf32> to vector<8x1xf32>
    %32 = vector.broadcast %31 : vector<8x1xf32> to vector<8x8xf32>
    %33 = arith.subf %29, %32 : vector<8x8xf32>
    %34 = math.exp %33 : vector<8x8xf32>
    %cst_12 = arith.constant dense<0.000000e+00> : vector<8xf32>
    %35 = vector.multi_reduction <add>, %34, %cst_12 [1] : vector<8x8xf32> to vector<8xf32>
    %36 = vector.shape_cast %35 : vector<8xf32> to vector<8x1xf32>
    %37 = vector.broadcast %36 : vector<8x1xf32> to vector<8x8xf32>
    %38 = arith.divf %34, %37 : vector<8x8xf32>
    %cst_13 = arith.constant dense<0.000000e+00> : vector<8x128xf32>
    %39 = tpu.matmul %38, %28, %cst_13 {dimension_numbers = #tpu.dot_dimension_numbers<[1], [0], [0], [1], [0, 0, 1, 1], [], []>} : vector<8x8xf32>, vector<8x128xf32>, vector<8x128xf32> -> vector<8x128xf32>
    %40 = vector.extract_strided_slice %9 {offsets = [0, 256], sizes = [8, 128], strides = [1, 1]} : vector<16x512xf32> to vector<8x128xf32>
    %41 = vector.extract_strided_slice %10 {offsets = [0, 256], sizes = [8, 128], strides = [1, 1]} : vector<16x512xf32> to vector<8x128xf32>
    %42 = vector.extract_strided_slice %11 {offsets = [0, 256], sizes = [8, 128], strides = [1, 1]} : vector<16x512xf32> to vector<8x128xf32>
    %cst_14 = arith.constant dense<0.000000e+00> : vector<8x8xf32>
    %43 = tpu.matmul %40, %41, %cst_14 {dimension_numbers = #tpu.dot_dimension_numbers<[1], [1], [0], [0], [0, 0, 1, 0], [], []>} : vector<8x128xf32>, vector<8x128xf32>, vector<8x8xf32> -> vector<8x8xf32>
    %cst_15 = arith.constant dense<0xFF800000> : vector<8xf32>
    %44 = vector.multi_reduction <maximumf>, %43, %cst_15 [1] : vector<8x8xf32> to vector<8xf32>
    %45 = vector.shape_cast %44 : vector<8xf32> to vector<8x1xf32>
    %46 = vector.broadcast %45 : vector<8x1xf32> to vector<8x8xf32>
    %47 = arith.subf %43, %46 : vector<8x8xf32>
    %48 = math.exp %47 : vector<8x8xf32>
    %cst_16 = arith.constant dense<0.000000e+00> : vector<8xf32>
    %49 = vector.multi_reduction <add>, %48, %cst_16 [1] : vector<8x8xf32> to vector<8xf32>
    %50 = vector.shape_cast %49 : vector<8xf32> to vector<8x1xf32>
    %51 = vector.broadcast %50 : vector<8x1xf32> to vector<8x8xf32>
    %52 = arith.divf %48, %51 : vector<8x8xf32>
    %cst_17 = arith.constant dense<0.000000e+00> : vector<8x128xf32>
    %53 = tpu.matmul %52, %42, %cst_17 {dimension_numbers = #tpu.dot_dimension_numbers<[1], [0], [0], [1], [0, 0, 1, 1], [], []>} : vector<8x8xf32>, vector<8x128xf32>, vector<8x128xf32> -> vector<8x128xf32>
    %54 = vector.extract_strided_slice %9 {offsets = [0, 384], sizes = [8, 128], strides = [1, 1]} : vector<16x512xf32> to vector<8x128xf32>
    %55 = vector.extract_strided_slice %10 {offsets = [0, 384], sizes = [8, 128], strides = [1, 1]} : vector<16x512xf32> to vector<8x128xf32>
    %56 = vector.extract_strided_slice %11 {offsets = [0, 384], sizes = [8, 128], strides = [1, 1]} : vector<16x512xf32> to vector<8x128xf32>
    %cst_18 = arith.constant dense<0.000000e+00> : vector<8x8xf32>
    %57 = tpu.matmul %54, %55, %cst_18 {dimension_numbers = #tpu.dot_dimension_numbers<[1], [1], [0], [0], [0, 0, 1, 0], [], []>} : vector<8x128xf32>, vector<8x128xf32>, vector<8x8xf32> -> vector<8x8xf32>
    %cst_19 = arith.constant dense<0xFF800000> : vector<8xf32>
    %58 = vector.multi_reduction <maximumf>, %57, %cst_19 [1] : vector<8x8xf32> to vector<8xf32>
    %59 = vector.shape_cast %58 : vector<8xf32> to vector<8x1xf32>
    %60 = vector.broadcast %59 : vector<8x1xf32> to vector<8x8xf32>
    %61 = arith.subf %57, %60 : vector<8x8xf32>
    %62 = math.exp %61 : vector<8x8xf32>
    %cst_20 = arith.constant dense<0.000000e+00> : vector<8xf32>
    %63 = vector.multi_reduction <add>, %62, %cst_20 [1] : vector<8x8xf32> to vector<8xf32>
    %64 = vector.shape_cast %63 : vector<8xf32> to vector<8x1xf32>
    %65 = vector.broadcast %64 : vector<8x1xf32> to vector<8x8xf32>
    %66 = arith.divf %62, %65 : vector<8x8xf32>
    %cst_21 = arith.constant dense<0.000000e+00> : vector<8x128xf32>
    %67 = tpu.matmul %66, %56, %cst_21 {dimension_numbers = #tpu.dot_dimension_numbers<[1], [0], [0], [1], [0, 0, 1, 1], [], []>} : vector<8x8xf32>, vector<8x128xf32>, vector<8x128xf32> -> vector<8x128xf32>
    %68 = tpu.concatenate %25, %39, %53, %67 in 1 : vector<8x128xf32>, vector<8x128xf32>, vector<8x128xf32>, vector<8x128xf32> -> vector<8x512xf32>
    %69 = vector.extract_strided_slice %9 {offsets = [8, 0], sizes = [8, 128], strides = [1, 1]} : vector<16x512xf32> to vector<8x128xf32>
    %70 = vector.extract_strided_slice %10 {offsets = [8, 0], sizes = [8, 128], strides = [1, 1]} : vector<16x512xf32> to vector<8x128xf32>
    %71 = vector.extract_strided_slice %11 {offsets = [8, 0], sizes = [8, 128], strides = [1, 1]} : vector<16x512xf32> to vector<8x128xf32>
    %cst_22 = arith.constant dense<0.000000e+00> : vector<8x8xf32>
    %72 = tpu.matmul %69, %70, %cst_22 {dimension_numbers = #tpu.dot_dimension_numbers<[1], [1], [0], [0], [0, 0, 1, 0], [], []>} : vector<8x128xf32>, vector<8x128xf32>, vector<8x8xf32> -> vector<8x8xf32>
    %cst_23 = arith.constant dense<0xFF800000> : vector<8xf32>
    %73 = vector.multi_reduction <maximumf>, %72, %cst_23 [1] : vector<8x8xf32> to vector<8xf32>
    %74 = vector.shape_cast %73 : vector<8xf32> to vector<8x1xf32>
    %75 = vector.broadcast %74 : vector<8x1xf32> to vector<8x8xf32>
    %76 = arith.subf %72, %75 : vector<8x8xf32>
    %77 = math.exp %76 : vector<8x8xf32>
    %cst_24 = arith.constant dense<0.000000e+00> : vector<8xf32>
    %78 = vector.multi_reduction <add>, %77, %cst_24 [1] : vector<8x8xf32> to vector<8xf32>
    %79 = vector.shape_cast %78 : vector<8xf32> to vector<8x1xf32>
    %80 = vector.broadcast %79 : vector<8x1xf32> to vector<8x8xf32>
    %81 = arith.divf %77, %80 : vector<8x8xf32>
    %cst_25 = arith.constant dense<0.000000e+00> : vector<8x128xf32>
    %82 = tpu.matmul %81, %71, %cst_25 {dimension_numbers = #tpu.dot_dimension_numbers<[1], [0], [0], [1], [0, 0, 1, 1], [], []>} : vector<8x8xf32>, vector<8x128xf32>, vector<8x128xf32> -> vector<8x128xf32>
    %83 = vector.extract_strided_slice %9 {offsets = [8, 128], sizes = [8, 128], strides = [1, 1]} : vector<16x512xf32> to vector<8x128xf32>
    %84 = vector.extract_strided_slice %10 {offsets = [8, 128], sizes = [8, 128], strides = [1, 1]} : vector<16x512xf32> to vector<8x128xf32>
    %85 = vector.extract_strided_slice %11 {offsets = [8, 128], sizes = [8, 128], strides = [1, 1]} : vector<16x512xf32> to vector<8x128xf32>
    %cst_26 = arith.constant dense<0.000000e+00> : vector<8x8xf32>
    %86 = tpu.matmul %83, %84, %cst_26 {dimension_numbers = #tpu.dot_dimension_numbers<[1], [1], [0], [0], [0, 0, 1, 0], [], []>} : vector<8x128xf32>, vector<8x128xf32>, vector<8x8xf32> -> vector<8x8xf32>
    %cst_27 = arith.constant dense<0xFF800000> : vector<8xf32>
    %87 = vector.multi_reduction <maximumf>, %86, %cst_27 [1] : vector<8x8xf32> to vector<8xf32>
    %88 = vector.shape_cast %87 : vector<8xf32> to vector<8x1xf32>
    %89 = vector.broadcast %88 : vector<8x1xf32> to vector<8x8xf32>
    %90 = arith.subf %86, %89 : vector<8x8xf32>
    %91 = math.exp %90 : vector<8x8xf32>
    %cst_28 = arith.constant dense<0.000000e+00> : vector<8xf32>
    %92 = vector.multi_reduction <add>, %91, %cst_28 [1] : vector<8x8xf32> to vector<8xf32>
    %93 = vector.shape_cast %92 : vector<8xf32> to vector<8x1xf32>
    %94 = vector.broadcast %93 : vector<8x1xf32> to vector<8x8xf32>
    %95 = arith.divf %91, %94 : vector<8x8xf32>
    %cst_29 = arith.constant dense<0.000000e+00> : vector<8x128xf32>
    %96 = tpu.matmul %95, %85, %cst_29 {dimension_numbers = #tpu.dot_dimension_numbers<[1], [0], [0], [1], [0, 0, 1, 1], [], []>} : vector<8x8xf32>, vector<8x128xf32>, vector<8x128xf32> -> vector<8x128xf32>
    %97 = vector.extract_strided_slice %9 {offsets = [8, 256], sizes = [8, 128], strides = [1, 1]} : vector<16x512xf32> to vector<8x128xf32>
    %98 = vector.extract_strided_slice %10 {offsets = [8, 256], sizes = [8, 128], strides = [1, 1]} : vector<16x512xf32> to vector<8x128xf32>
    %99 = vector.extract_strided_slice %11 {offsets = [8, 256], sizes = [8, 128], strides = [1, 1]} : vector<16x512xf32> to vector<8x128xf32>
    %cst_30 = arith.constant dense<0.000000e+00> : vector<8x8xf32>
    %100 = tpu.matmul %97, %98, %cst_30 {dimension_numbers = #tpu.dot_dimension_numbers<[1], [1], [0], [0], [0, 0, 1, 0], [], []>} : vector<8x128xf32>, vector<8x128xf32>, vector<8x8xf32> -> vector<8x8xf32>
    %cst_31 = arith.constant dense<0xFF800000> : vector<8xf32>
    %101 = vector.multi_reduction <maximumf>, %100, %cst_31 [1] : vector<8x8xf32> to vector<8xf32>
    %102 = vector.shape_cast %101 : vector<8xf32> to vector<8x1xf32>
    %103 = vector.broadcast %102 : vector<8x1xf32> to vector<8x8xf32>
    %104 = arith.subf %100, %103 : vector<8x8xf32>
    %105 = math.exp %104 : vector<8x8xf32>
    %cst_32 = arith.constant dense<0.000000e+00> : vector<8xf32>
    %106 = vector.multi_reduction <add>, %105, %cst_32 [1] : vector<8x8xf32> to vector<8xf32>
    %107 = vector.shape_cast %106 : vector<8xf32> to vector<8x1xf32>
    %108 = vector.broadcast %107 : vector<8x1xf32> to vector<8x8xf32>
    %109 = arith.divf %105, %108 : vector<8x8xf32>
    %cst_33 = arith.constant dense<0.000000e+00> : vector<8x128xf32>
    %110 = tpu.matmul %109, %99, %cst_33 {dimension_numbers = #tpu.dot_dimension_numbers<[1], [0], [0], [1], [0, 0, 1, 1], [], []>} : vector<8x8xf32>, vector<8x128xf32>, vector<8x128xf32> -> vector<8x128xf32>
    %111 = vector.extract_strided_slice %9 {offsets = [8, 384], sizes = [8, 128], strides = [1, 1]} : vector<16x512xf32> to vector<8x128xf32>
    %112 = vector.extract_strided_slice %10 {offsets = [8, 384], sizes = [8, 128], strides = [1, 1]} : vector<16x512xf32> to vector<8x128xf32>
    %113 = vector.extract_strided_slice %11 {offsets = [8, 384], sizes = [8, 128], strides = [1, 1]} : vector<16x512xf32> to vector<8x128xf32>
    %cst_34 = arith.constant dense<0.000000e+00> : vector<8x8xf32>
    %114 = tpu.matmul %111, %112, %cst_34 {dimension_numbers = #tpu.dot_dimension_numbers<[1], [1], [0], [0], [0, 0, 1, 0], [], []>} : vector<8x128xf32>, vector<8x128xf32>, vector<8x8xf32> -> vector<8x8xf32>
    %cst_35 = arith.constant dense<0xFF800000> : vector<8xf32>
    %115 = vector.multi_reduction <maximumf>, %114, %cst_35 [1] : vector<8x8xf32> to vector<8xf32>
    %116 = vector.shape_cast %115 : vector<8xf32> to vector<8x1xf32>
    %117 = vector.broadcast %116 : vector<8x1xf32> to vector<8x8xf32>
    %118 = arith.subf %114, %117 : vector<8x8xf32>
    %119 = math.exp %118 : vector<8x8xf32>
    %cst_36 = arith.constant dense<0.000000e+00> : vector<8xf32>
    %120 = vector.multi_reduction <add>, %119, %cst_36 [1] : vector<8x8xf32> to vector<8xf32>
    %121 = vector.shape_cast %120 : vector<8xf32> to vector<8x1xf32>
    %122 = vector.broadcast %121 : vector<8x1xf32> to vector<8x8xf32>
    %123 = arith.divf %119, %122 : vector<8x8xf32>
    %cst_37 = arith.constant dense<0.000000e+00> : vector<8x128xf32>
    %124 = tpu.matmul %123, %113, %cst_37 {dimension_numbers = #tpu.dot_dimension_numbers<[1], [0], [0], [1], [0, 0, 1, 1], [], []>} : vector<8x8xf32>, vector<8x128xf32>, vector<8x128xf32> -> vector<8x128xf32>
    %125 = tpu.concatenate %82, %96, %110, %124 in 1 : vector<8x128xf32>, vector<8x128xf32>, vector<8x128xf32>, vector<8x128xf32> -> vector<8x512xf32>
    %126 = tpu.concatenate %68, %125 in 0 : vector<8x512xf32>, vector<8x512xf32> -> vector<16x512xf32>
    %c0_38 = arith.constant 0 : index
    %c0_39 = arith.constant 0 : index
    %127 = vector.load %arg3[%c0_38, %c0_39] : memref<512x32xbf16, #tpu.memory_space<vmem>>, vector<512x32xbf16>
    %128 = arith.extf %127 : vector<512x32xbf16> to vector<512x32xf32>
    %cst_40 = arith.constant dense<0.000000e+00> : vector<16x32xf32>
    %129 = tpu.matmul %126, %128, %cst_40 {dimension_numbers = #tpu.dot_dimension_numbers<[1], [0], [0], [1], [0, 0, 1, 1], [], []>} : vector<16x512xf32>, vector<512x32xf32>, vector<16x32xf32> -> vector<16x32xf32>
    %c0_41 = arith.constant 0 : index
    %c0_42 = arith.constant 0 : index
    %130 = vector.load %arg4[%c0_41, %c0_42] : memref<1x32xf32, #tpu.memory_space<vmem>>, vector<1x32xf32>
    %131 = vector.broadcast %130 : vector<1x32xf32> to vector<16x32xf32>
    %132 = arith.addf %129, %131 : vector<16x32xf32>
    %c0_43 = arith.constant 0 : index
    %c0_44 = arith.constant 0 : index
    %133 = vector.load %arg5[%c0_43, %c0_44] : memref<32x2048xbf16, #tpu.memory_space<vmem>>, vector<32x2048xbf16>
    %134 = arith.extf %133 : vector<32x2048xbf16> to vector<32x2048xf32>
    %cst_45 = arith.constant dense<0.000000e+00> : vector<16x2048xf32>
    %135 = tpu.matmul %132, %134, %cst_45 {dimension_numbers = #tpu.dot_dimension_numbers<[1], [0], [0], [1], [0, 0, 1, 1], [], []>} : vector<16x32xf32>, vector<32x2048xf32>, vector<16x2048xf32> -> vector<16x2048xf32>
    %c0_46 = arith.constant 0 : index
    %c0_47 = arith.constant 0 : index
    %136 = vector.load %arg6[%c0_46, %c0_47] : memref<1x2048xf32, #tpu.memory_space<vmem>>, vector<1x2048xf32>
    %137 = vector.broadcast %136 : vector<1x2048xf32> to vector<16x2048xf32>
    %138 = arith.addf %135, %137 : vector<16x2048xf32>
    %cst_48 = arith.constant 5.000000e-01 : f32
    %139 = vector.broadcast %cst_48 : f32 to vector<16x2048xf32>
    %140 = arith.mulf %139, %138 : vector<16x2048xf32>
    %cst_49 = arith.constant 0.707106769 : f32
    %141 = vector.broadcast %cst_49 : f32 to vector<16x2048xf32>
    %142 = arith.mulf %138, %141 : vector<16x2048xf32>
    %143 = math.erf %142 : vector<16x2048xf32>
    %cst_50 = arith.constant 1.000000e+00 : f32
    %144 = vector.broadcast %cst_50 : f32 to vector<16x2048xf32>
    %145 = arith.addf %144, %143 : vector<16x2048xf32>
    %146 = arith.mulf %140, %145 : vector<16x2048xf32>
    %c0_51 = arith.constant 0 : index
    %c0_52 = arith.constant 0 : index
    %147 = vector.load %arg7[%c0_51, %c0_52] : memref<2048x512xbf16, #tpu.memory_space<vmem>>, vector<2048x512xbf16>
    %148 = arith.extf %147 : vector<2048x512xbf16> to vector<2048x512xf32>
    %cst_53 = arith.constant dense<0.000000e+00> : vector<16x512xf32>
    %149 = tpu.matmul %146, %148, %cst_53 {dimension_numbers = #tpu.dot_dimension_numbers<[1], [0], [0], [1], [0, 0, 1, 1], [], []>} : vector<16x2048xf32>, vector<2048x512xf32>, vector<16x512xf32> -> vector<16x512xf32>
    %c0_54 = arith.constant 0 : index
    %c0_55 = arith.constant 0 : index
    %150 = vector.load %arg8[%c0_54, %c0_55] : memref<1x512xf32, #tpu.memory_space<vmem>>, vector<1x512xf32>
    %151 = vector.broadcast %150 : vector<1x512xf32> to vector<16x512xf32>
    %152 = arith.addf %149, %151 : vector<16x512xf32>
    %cst_56 = arith.constant 5.000000e-01 : f32
    %153 = vector.broadcast %cst_56 : f32 to vector<16x512xf32>
    %154 = arith.mulf %153, %152 : vector<16x512xf32>
    %cst_57 = arith.constant 0.707106769 : f32
    %155 = vector.broadcast %cst_57 : f32 to vector<16x512xf32>
    %156 = arith.mulf %152, %155 : vector<16x512xf32>
    %157 = math.erf %156 : vector<16x512xf32>
    %cst_58 = arith.constant 1.000000e+00 : f32
    %158 = vector.broadcast %cst_58 : f32 to vector<16x512xf32>
    %159 = arith.addf %158, %157 : vector<16x512xf32>
    %160 = arith.mulf %154, %159 : vector<16x512xf32>
    %c0_59 = arith.constant 0 : index
    %c0_60 = arith.constant 0 : index
    %161 = vector.load %arg9[%c0_59, %c0_60] : memref<16x512xf32, #tpu.memory_space<vmem>>, vector<16x512xf32>
    tpu.vector_store %arg9[%c0_59, %c0_60], %160 {strides = array<i32>} : memref<16x512xf32, #tpu.memory_space<vmem>>, vector<16x512xf32>,
    return
  }
}

</mosaic_0001>

<bundles_post_ra>
// kernel: tpu_custom_call.1
= control target key start
LH: loop header
LB: loop body
LE: loop exit
PB: predicated region body
PF: predicated region fallthrough
CT: control target
= control target key end

     0   :  { %14 = vsyncpa [#allocation3], 0  ;;  %s10608_s0 = inlined_call_operand.hbm [shape: f32[16,32], index: 0, kind: input, shape index: {}]   ;;  %s10609_s1 = inlined_call_operand.hbm [shape: bf16[32,1536], index: 1, kind: input, shape index: {}]   ;;  %s10610_s2 = inlined_call_operand.hbm [shape: f32[1,1536], index: 2, kind: input, shape index: {}]   ;;  %s10611_s3 = inlined_call_operand.vmem [shape: bf16[512,32], index: 3, kind: input, shape index: {}]   ;;  %s10612_s4 = inlined_call_operand.hbm [shape: f32[1,32], index: 4, kind: input, shape index: {}]   ;;  %s10613_s5 = inlined_call_operand.hbm [shape: bf16[32,2048], index: 5, kind: input, shape index: {}]   ;;  %s10614_s6 = inlined_call_operand.hbm [shape: f32[1,2048], index: 6, kind: input, shape index: {}]   ;;  %s10615_s7 = inlined_call_operand.hbm [shape: bf16[2048,512], index: 7, kind: input, shape index: {}]   ;;  %s10616_s8 = inlined_call_operand.hbm [shape: f32[1,512], index: 8, kind: input, shape index: {}]   ;;  %s10617_s9 = inlined_call_operand.hbm [shape: f32[16,512], index: 9, kind: output, shape index: {}]  }
   0x1   :  { %15 = vsyncpa [#allocation6], 0 }
   0x2   :  { %16 = vsyncpa [#allocation9], 0 }
   0x3   :  { %17 = vsyncpa [#allocation12], 0 }
   0x4   :  { %18 = vsyncpa [#allocation15], 0  ;;  %s37_s11 = sshll.u32 %s10609_s1, 4  ;;  %s38_s11 = int_to_ptr.hbm [resolvable:$true] %s37_s11 }
   0x5   :  { %19 = vsyncpa [#allocation4], 0  ;;  %s7757_s12 = smov [#allocation5]   ;;  %s64_s16 = sshll.u32 %s10612_s4, 4  ;;  %s65_s16 = int_to_ptr.hbm [resolvable:$true] %s64_s16 }
   0x6   :  { %s39_s13 = sshll.u32 %s7757_s12, 4  ;;  %s7758_s17 = smov 768   ;;  %s40_s13 = int_to_ptr.vmem [resolvable:$true] %s39_s13 }
   0x7   :  { %s7759_s18 = smov 48   ;;  %s7760_s19 = smov [#allocation8]  }
   0x8   :  { %45 = dma.hbm_to_vmem [thread:$0]  %s38_s11, 3072, %s40_s13, [#allocation6], %s7758_s17, %s7758_s17, %s7759_s18  }
   0x9   :  { %s66_s20 = sshll.u32 %s7760_s19, 4  ;;  %s88_s23 = sshll.u32 %s10614_s6, 4  ;;  %s67_s20 = int_to_ptr.vmem [resolvable:$true] %s66_s20  ;;  %s89_s23 = int_to_ptr.hbm [resolvable:$true] %s88_s23 }
   0xa   :  { %69 = dma.hbm_to_vmem [thread:$0]  %s65_s16, 16, %s67_s20, [#allocation9]  }
   0xb   :  { %s24_s25 = sshll.u32 %s10608_s0, 4  ;;  %s7761_s26 = smov [#allocation11]   ;;  %s25_s25 = int_to_ptr.hbm [resolvable:$true] %s24_s25 }
   0xc   :  { %s90_s27 = sshll.u32 %s7761_s26, 4  ;;  %s7762_s4 = smov [#allocation2]   ;;  %s91_s27 = int_to_ptr.vmem [resolvable:$true] %s90_s27 }
   0xd   :  { %93 = dma.hbm_to_vmem [thread:$0]  %s89_s23, 256, %s91_s27, [#allocation12]  }
   0xe   :  { %s26_s28 = sshll.u32 %s7762_s4, 4  ;;  %s7763_s29 = smov 128   ;;  %s27_s28 = int_to_ptr.vmem [resolvable:$true] %s26_s28 }
   0xf   :  { %s7764_s30 = smov 8   ;;  %s51_s11 = sshll.u32 %s10610_s2, 4  ;;  %s52_s11 = int_to_ptr.hbm [resolvable:$true] %s51_s11 }
  0x10   :  { %32 = dma.hbm_to_vmem [thread:$0]  %s25_s25, 256, %s27_s28, [#allocation3], %s7763_s29, %s7763_s29, %s7764_s30  }
  0x11   :  { %s7765_s12 = smov [#allocation7]   ;;  %s74_s15 = sshll.u32 %s10613_s5, 4  ;;  %s75_s15 = int_to_ptr.hbm [resolvable:$true] %s74_s15 }
  0x12   :  { %s53_s13 = sshll.u32 %s7765_s12, 4  ;;  %s7766_s16 = smov [#allocation10]   ;;  %s54_s13 = int_to_ptr.vmem [resolvable:$true] %s53_s13 }
  0x13   :  { %56 = dma.hbm_to_vmem [thread:$0]  %s52_s11, 192, %s54_s13, [#allocation6]  }
  0x14   :  { %s76_s17 = sshll.u32 %s7766_s16, 4  ;;  %s7767_s18 = smov 1024   ;;  %s77_s17 = int_to_ptr.vmem [resolvable:$true] %s76_s17 }
  0x15   :  { %s7768_s19 = smov 64   ;;  %s98_s2 = sshll.u32 %s10615_s7, 4  ;;  %s99_s2 = int_to_ptr.hbm [resolvable:$true] %s98_s2 }
  0x16   :  { %82 = dma.hbm_to_vmem [thread:$0]  %s75_s15, 4096, %s77_s17, [#allocation9], %s7767_s18, %s7767_s18, %s7768_s19  }
  0x17   :  { %s7769_s22 = smov [#allocation13]   ;;  %s112_s5 = sshll.u32 %s10616_s8, 4  ;;  %s113_s5 = int_to_ptr.hbm [resolvable:$true] %s112_s5 }
  0x18   :  { %s100_s23 = sshll.u32 %s7769_s22, 4  ;;  %s7770_s25 = smov 256   ;;  %s101_s23 = int_to_ptr.vmem [resolvable:$true] %s100_s23 }
  0x19   :  { %s7771_s26 = smov 16   ;;  %s7772_s27 = smov [#allocation14]  }
  0x1a   :  { %106 = dma.hbm_to_vmem [thread:$0]  %s99_s2, 65536, %s101_s23, [#allocation12], %s7770_s25, %s7770_s25, %s7771_s26  }
  0x1b   :  { %s114_s4 = sshll.u32 %s7772_s27, 4  ;;  %s115_s4 = int_to_ptr.vmem [resolvable:$true] %s114_s4 }
  0x1c   :  { %117 = dma.hbm_to_vmem [thread:$0]  %s113_s5, 64, %s115_s4, [#allocation15]  }
  0x1d   :  { %7745 = dma.done.wait [#allocation3], 256  }
  0x1e   :  { %7746 = vsyncadd [#allocation3], 4294967040 }
  0x1f   :  { %7747 = dma.done.wait [#allocation6], 3264  }
  0x20   :  { %7748 = vsyncadd [#allocation6], 4294964032 }
  0x21   :  { %7749 = dma.done.wait [#allocation9], 4112  }
  0x22   :  { %7750 = vsyncadd [#allocation9], 4294963184 }
  0x23   :  { %7751 = dma.done.wait [#allocation12], 65792  }
  0x24   :  { %7752 = vsyncadd [#allocation12], 4294901504 }
  0x25   :  { %7753 = dma.done.wait [#allocation15], 64  }
  0x26   :  { %7754 = vsyncadd [#allocation15], 4294967232  ;;  %v170_v0 = vld [vmem:[#allocation5 + $0x90] sm:$0xff]  ;;  %v164_v1 = vld [vmem:[#allocation5 + $0x60] sm:$0xff]  ;;  %vm252_vm0 = vcmask 261120   ;;  %vm563_vm1 = vcmask 64512  }
  0x27   :  { %v171_v2 = vld [vmem:[#allocation5 + $0x98] sm:$0xff]  ;;  %v212_v3 = vunpack.c.l.bf16 %v170_v0  ;;  %v213_v4 = vunpack.c.h.bf16 %v170_v0  ;;  %v200_v5 = vunpack.c.l.bf16 %v164_v1  ;;  %v201_v6 = vunpack.c.h.bf16 %v164_v1  ;;  %v158_v7 = vld [vmem:[#allocation5 + $0x30] sm:$0xff]  ;;  %v165_v8 = vld [vmem:[#allocation5 + $0x68] sm:$0xff]  ;;  %s6602_s13 = sshll.u32 %s10617_s9, 4  ;;  %s7774_s0 = smov 512   ;;  %s6603_s13 = int_to_ptr.hbm [resolvable:$true] %s6602_s13 }
  0x28   :  { %v214_v9 = vunpack.c.l.bf16 %v171_v2  ;;  %v215_v10 = vunpack.c.h.bf16 %v171_v2  ;;  %v152_v11 = vld [vmem:[#allocation5] sm:$0xff]  ;;  %v159_v12 = vld [vmem:[#allocation5 + $0x38] sm:$0xff]  ;;  %v188_v13 = vunpack.c.l.bf16 %v158_v7  ;;  %v189_v14 = vunpack.c.h.bf16 %v158_v7  ;;  %v153_v19 = vld [vmem:[#allocation5 + $0x8] sm:$0xff]  ;;  %s7775_s14 = smov 32  }
  0x29   :  { %271 = vmatpush.msra.mxu0 %v212_v3  ;;  %294 = vmatpush.msra.mxu1 %v213_v4  ;;  %v202_v15 = vunpack.c.l.bf16 %v165_v8  ;;  %v203_v16 = vunpack.c.h.bf16 %v165_v8  ;;  %v190_v17 = vunpack.c.l.bf16 %v159_v12  ;;  %v191_v18 = vunpack.c.h.bf16 %v159_v12  ;;  %v172_v22 = vld [vmem:[#allocation5 + $0xa0] sm:$0xff]  ;;  %v7850_v23 = vld [vmem:[#allocation2] sm:$0xff]  ;;  %v173_v26 = vld [vmem:[#allocation5 + $0xa8] sm:$0xff] }
  0x2a   :  { %317 = vmatpush.msra.mxu2 %v214_v9  ;;  %340 = vmatpush.msra.mxu3 %v215_v10  ;;  %v176_v20 = vunpack.c.l.bf16 %v152_v11  ;;  %v177_v21 = vunpack.c.h.bf16 %v152_v11  ;;  %v178_v24 = vunpack.c.l.bf16 %v153_v19  ;;  %v179_v25 = vunpack.c.h.bf16 %v153_v19  ;;  %v166_v27 = vld [vmem:[#allocation5 + $0x70] sm:$0xff]  ;;  %v167_v30 = vld [vmem:[#allocation5 + $0x78] sm:$0xff]  ;;  %v160_v33 = vld [vmem:[#allocation5 + $0x40] sm:$0xff] }
  0x2b   :  { %272 = vmatpush.msra.mxu0 %v200_v5  ;;  %295 = vmatpush.msra.mxu1 %v201_v6  ;;  %v216_v28 = vunpack.c.l.bf16 %v172_v22  ;;  %v217_v29 = vunpack.c.h.bf16 %v172_v22  ;;  %v218_v31 = vunpack.c.l.bf16 %v173_v26  ;;  %v219_v32 = vunpack.c.h.bf16 %v173_v26  ;;  %v154_v38 = vld [vmem:[#allocation5 + $0x10] sm:$0xff]  ;;  %v161_v41 = vld [vmem:[#allocation5 + $0x48] sm:$0xff]  ;;  %v7860_v42 = vld [vmem:[#allocation2 + $0x8] sm:$0xff] }
  0x2c   :  { %318 = vmatpush.msra.mxu2 %v202_v15  ;;  %341 = vmatpush.msra.mxu3 %v203_v16  ;;  %v204_v34 = vunpack.c.l.bf16 %v166_v27  ;;  %v205_v35 = vunpack.c.h.bf16 %v166_v27  ;;  %v206_v36 = vunpack.c.l.bf16 %v167_v30  ;;  %v207_v37 = vunpack.c.h.bf16 %v167_v30  ;;  %v7862_v45 = vld [vmem:[#allocation5 + $0xb0] sm:$0xff]  ;;  %v155_v46 = vld [vmem:[#allocation5 + $0x18] sm:$0xff]  ;;  %v7892_v54 = vld [vmem:[#allocation5 + $0x80] sm:$0xff] }
  0x2d   :  { %273 = vmatpush.msra.mxu0 %v188_v13  ;;  %296 = vmatpush.msra.mxu1 %v189_v14  ;;  %v192_v39 = vunpack.c.l.bf16 %v160_v33  ;;  %v193_v40 = vunpack.c.h.bf16 %v160_v33  ;;  %v180_v43 = vunpack.c.l.bf16 %v154_v38  ;;  %v181_v44 = vunpack.c.h.bf16 %v154_v38  ;;  %v7864_v49 = vld [vmem:[#allocation5 + $0xb8] sm:$0xff]  ;;  %v7894_v55 = vld [vmem:[#allocation5 + $0x88] sm:$0xff]  ;;  %v7898_v58 = vld [vmem:[#allocation5 + $0x50] sm:$0xff] }
  0x2e   :  { %319 = vmatpush.msra.mxu2 %v190_v17  ;;  %342 = vmatpush.msra.mxu3 %v191_v18  ;;  %v194_v47 = vunpack.c.l.bf16 %v161_v41  ;;  %v195_v48 = vunpack.c.h.bf16 %v161_v41  ;;  %v220_v50 = vunpack.c.l.bf16 %v7862_v45  ;;  %v182_v51 = vunpack.c.l.bf16 %v155_v46  ;;  %v7900_v59 = vld [vmem:[#allocation5 + $0x58] sm:$0xff]  ;;  %v7904_v62 = vld [vmem:[#allocation5 + $0x20] sm:$0xff]  ;;  %v7906_v63 = vld [vmem:[#allocation5 + $0x28] sm:$0xff] }
  0x2f   :  { %274 = vmatpush.msra.mxu0 %v176_v20  ;;  %297 = vmatpush.msra.mxu1 %v177_v21  ;;  %v183_v52 = vunpack.c.h.bf16 %v155_v46  ;;  %v222_v53 = vunpack.c.l.bf16 %v7864_v49  ;;  %v208_v56 = vunpack.c.l.bf16 %v7892_v54  ;;  %v210_v57 = vunpack.c.l.bf16 %v7894_v55  ;;  %v224_v6 = vld [vmem:[#allocation7] sm:$0xff] }
  0x30   :  { %6619 = vmatmul.msk.f32.vlgmr.msra.gmra.mxu0 %vm252_vm0, %v7850_v23  ;;  %6621 = vmatmul.msk.f32.vlgmr.msra.gmra.mxu1 %vm252_vm0, %v7850_v23  ;;  %v196_v60 = vunpack.c.l.bf16 %v7898_v58  ;;  %v198_v61 = vunpack.c.l.bf16 %v7900_v59  ;;  %v184_v0 = vunpack.c.l.bf16 %v7904_v62  ;;  %v186_v1 = vunpack.c.l.bf16 %v7906_v63 }
  0x31   :  { %320 = vmatpush.msra.mxu2 %v178_v24  ;;  %343 = vmatpush.msra.mxu3 %v179_v25  ;;  %v228_v9 = vperm.slane %v224_v6, 0  ;;  %v229_v10 = vperm.slane %v224_v6, 1  ;;  %v232_v11 = vperm.slane %v224_v6, 4  ;;  %v233_v12 = vperm.slane %v224_v6, 5 }
  0x32   :  { %6623 = vmatmul.msk.f32.vlgmr.msra.gmra.mxu2 %vm252_vm0, %v7850_v23  ;;  %6625 = vmatmul.msk.f32.vlgmr.msra.gmra.mxu3 %vm252_vm0, %v7850_v23  ;;  %v230_v24 = vperm.slane %v224_v6, 2  ;;  %v231_v25 = vperm.slane %v224_v6, 3  ;;  %v234_v26 = vperm.slane %v224_v6, 6  ;;  %v235_v27 = vperm.slane %v224_v6, 7 }
  0x33   :  { %363 = vmatpush.msrb.mxu0 %v216_v28  ;;  %386 = vmatpush.msrb.mxu1 %v217_v29 }
  0x34   :  { %409 = vmatpush.msrb.mxu2 %v218_v31  ;;  %432 = vmatpush.msrb.mxu3 %v219_v32 }
  0x35   :  { %364 = vmatpush.msrb.mxu0 %v204_v34  ;;  %387 = vmatpush.msrb.mxu1 %v205_v35 }
  0x36   :  { %410 = vmatpush.msrb.mxu2 %v206_v36  ;;  %433 = vmatpush.msrb.mxu3 %v207_v37 }
  0x37   :  { %365 = vmatpush.msrb.mxu0 %v192_v39  ;;  %388 = vmatpush.msrb.mxu1 %v193_v40 }
  0x38   :  { %6620 = vmatmul.msk.f32.gmra.mxu0 %vm252_vm0, %v7860_v42  ;;  %6622 = vmatmul.msk.f32.gmra.mxu1 %vm252_vm0, %v7860_v42 }
  0x39   :  { %366 = vmatpush.msrb.mxu0 %v180_v43  ;;  %389 = vmatpush.msrb.mxu1 %v181_v44 }
  0x3a   :  { %6624 = vmatmul.msk.f32.gmra.mxu2 %vm252_vm0, %v7860_v42  ;;  %6626 = vmatmul.msk.f32.gmra.mxu3 %vm252_vm0, %v7860_v42 }
  0x3b   :  { %411 = vmatpush.msrb.mxu2 %v194_v47  ;;  %434 = vmatpush.msrb.mxu3 %v195_v48 }
  0x3c   :  { %455 = vmatpush.msra.mxu0 %v220_v50 }
  0x3d   :  { %412 = vmatpush.msrb.mxu2 %v182_v51  ;;  %435 = vmatpush.msrb.mxu3 %v183_v52 }
  0x3e   :  { %456 = vmatpush.msra.mxu0 %v208_v56 }
  0x3f   :  { %501 = vmatpush.msra.mxu2 %v222_v53 }
  0x40   :  { %6627 = vmatmul.msk.f32.vlgmr.msrb.gmra.mxu0 %vm252_vm0, %v7850_v23  ;;  %6629 = vmatmul.msk.f32.vlgmr.msrb.gmra.mxu1 %vm252_vm0, %v7850_v23 }
  0x41   :  { %502 = vmatpush.msra.mxu2 %v210_v57  ;;  %457 = vmatpush.msra.mxu0 %v196_v60  ;;  %v221_v57 = vunpack.c.h.bf16 %v7862_v45  ;;  %v209_v60 = vunpack.c.h.bf16 %v7892_v54 }
  0x42   :  { %6631 = vmatmul.msk.f32.vlgmr.msrb.gmra.mxu2 %vm252_vm0, %v7850_v23  ;;  %6633 = vmatmul.msk.f32.vlgmr.msrb.gmra.mxu3 %vm252_vm0, %v7850_v23 }
  0x43   :  { %503 = vmatpush.msra.mxu2 %v198_v61  ;;  %458 = vmatpush.msra.mxu0 %v184_v0  ;;  %v197_v61 = vunpack.c.h.bf16 %v7898_v58  ;;  %v185_v0 = vunpack.c.h.bf16 %v7904_v62 }
  0x44   :  { %478 = vmatpush.msra.mxu1 %v221_v57 }
  0x45   :  { %504 = vmatpush.msra.mxu2 %v186_v1  ;;  %v7926_v1 = vld [vmem:[#allocation7 + $0x8] sm:$0xf] }
  0x46   :  { %479 = vmatpush.msra.mxu1 %v209_v60  ;;  %v236_v45 = vperm.slane %v7926_v1, 0  ;;  %v238_v58 = vperm.slane %v7926_v1, 2 }
  0x48   :  { %6628 = vmatmul.msk.f32.gmra.mxu0 %vm252_vm0, %v7860_v42  ;;  %6630 = vmatmul.msk.f32.gmra.mxu1 %vm252_vm0, %v7860_v42 }
  0x49   :  { %480 = vmatpush.msra.mxu1 %v197_v61 }
  0x4a   :  { %6632 = vmatmul.msk.f32.gmra.mxu2 %vm252_vm0, %v7860_v42  ;;  %6634 = vmatmul.msk.f32.gmra.mxu3 %vm252_vm0, %v7860_v42 }
  0x4b   :  { %481 = vmatpush.msra.mxu1 %v185_v0 }
  0x50   :  { %6635 = vmatmul.msk.f32.vlgmr.msra.gmra.mxu0 %vm252_vm0, %v7850_v23  ;;  %6637 = vmatmul.msk.f32.vlgmr.msra.gmra.mxu1 %vm252_vm0, %v7850_v23 }
  0x52   :  { %6639 = vmatmul.msk.f32.vlgmr.msra.gmra.mxu2 %vm252_vm0, %v7850_v23 }
  0x58   :  { %6636 = vmatmul.msk.f32.gmra.mxu0 %vm252_vm0, %v7860_v42  ;;  %6638 = vmatmul.msk.f32.gmra.mxu1 %vm252_vm0, %v7860_v42 }
  0x5a   :  { %6640 = vmatmul.msk.f32.gmra.mxu2 %vm252_vm0, %v7860_v42 }
  0xad   :  { %v276_v2 = vpop.f32.mrf.mxu0  ;;  %v299_v3 = vpop.f32.mrf.mxu1 }
  0xae   :  { %v277_v13 = vadd.f32 %v276_v2, %v228_v9  ;;  %v300_v14 = vadd.f32 %v299_v3, %v229_v10 }
  0xb0   :  { %v535_v21 = vmul.f32 0.088388346, %v277_v13  ;;  %v536_v22 = vmul.f32 0.088388346, %v300_v14 }
  0xb5   :  { %v279_v4 = vpop.f32.mrf.mxu0  ;;  %v302_v5 = vpop.f32.mrf.mxu1 }
  0xb6   :  { %v322_v7 = vpop.f32.mrf.mxu2  ;;  %v345_v8 = vpop.f32.mrf.mxu3  ;;  %v280_v40 = vadd.f32 %v279_v4, %v228_v9  ;;  %v303_v41 = vadd.f32 %v302_v5, %v229_v10 }
  0xb7   :  { %v323_v30 = vadd.f32 %v322_v7, %v230_v24  ;;  %v346_v31 = vadd.f32 %v345_v8, %v231_v25 }
  0xb8   :  { %v539_v48 = vmul.f32 0.088388346, %v280_v40  ;;  %v540_v50 = vmul.f32 0.088388346, %v303_v41 }
  0xb9   :  { %v537_v38 = vmul.f32 0.088388346, %v323_v30  ;;  %v538_v39 = vmul.f32 0.088388346, %v346_v31 }
  0xbd   :  { %v368_v15 = vpop.f32.mrf.mxu0  ;;  %v391_v16 = vpop.f32.mrf.mxu1 }
  0xbe   :  { %v325_v17 = vpop.f32.mrf.mxu2  ;;  %v348_v18 = vpop.f32.mrf.mxu3  ;;  %v369_v19 = vadd.f32 %v368_v15, %v232_v11  ;;  %v392_v20 = vadd.f32 %v391_v16, %v233_v12 }
  0xbf   :  { %v326_v51 = vadd.f32 %v325_v17, %v230_v24  ;;  %v349_v52 = vadd.f32 %v348_v18, %v231_v25  ;;  %v211_v24 = vunpack.c.h.bf16 %v7894_v55  ;;  %v199_v25 = vunpack.c.h.bf16 %v7900_v59 }
  0xc0   :  { %558 = vmatpush.xpose.msrb.mxu0 %v369_v19  ;;  %626 = vmatpush.xpose.msrb.mxu2 %v392_v20 }
  0xc1   :  { %v541_v53 = vmul.f32 0.088388346, %v326_v51  ;;  %v542_v56 = vmul.f32 0.088388346, %v349_v52 }
  0xc3   :  { %559 = vmatmul.f32.vlgmr.msrb.gmra.mxu0 %v535_v21  ;;  %627 = vmatmul.f32.vlgmr.msrb.gmra.mxu2 %v536_v22  ;;  %v223_v22 = vunpack.c.h.bf16 %v7864_v49 }
  0xc5   :  { %v371_v28 = vpop.f32.mrf.mxu0  ;;  %v394_v29 = vpop.f32.mrf.mxu1  ;;  %524 = vmatpush.msra.mxu3 %v223_v22 }
  0xc6   :  { %v414_v32 = vpop.f32.mrf.mxu2  ;;  %v437_v33 = vpop.f32.mrf.mxu3  ;;  %v372_v34 = vadd.f32 %v371_v28, %v232_v11  ;;  %v395_v35 = vadd.f32 %v394_v29, %v233_v12 }
  0xc7   :  { %v415_v36 = vadd.f32 %v414_v32, %v234_v26  ;;  %v438_v37 = vadd.f32 %v437_v33, %v235_v27  ;;  %525 = vmatpush.msra.mxu3 %v211_v24 }
  0xc9   :  { %693 = vmatpush.xpose.msra.mxu0 %v415_v36  ;;  %760 = vmatpush.xpose.msra.mxu2 %v438_v37 }
  0xca   :  { %526 = vmatpush.msra.mxu3 %v199_v25 }
  0xcc   :  { %694 = vmatmul.f32.vlgmr.msra.gmra.mxu0 %v537_v38  ;;  %761 = vmatmul.f32.vlgmr.msra.gmra.mxu2 %v538_v39 }
  0xcd   :  { %827 = vmatpush.xpose.msrb.mxu0 %v372_v34  ;;  %894 = vmatpush.xpose.msrb.mxu2 %v395_v35  ;;  %v460_v2 = vpop.f32.mrf.mxu0 }
  0xce   :  { %v417_v43 = vpop.f32.mrf.mxu2  ;;  %v440_v44 = vpop.f32.mrf.mxu3  ;;  %v461_v54 = vadd.f32 %v460_v2, %v236_v45 }
  0xcf   :  { %v418_v46 = vadd.f32 %v417_v43, %v234_v26  ;;  %v441_v47 = vadd.f32 %v440_v44, %v235_v27  ;;  %v187_v26 = vunpack.c.h.bf16 %v7906_v63 }
  0xd0   :  { %606 = vmatpush.msrb.mxu1 %v461_v54 }
  0xd1   :  { %961 = vmatpush.xpose.msra.mxu0 %v418_v46  ;;  %1028 = vmatpush.xpose.msra.mxu2 %v441_v47 }
  0xd2   :  { %527 = vmatpush.msra.mxu3 %v187_v26 }
  0xd3   :  { %6641 = vmatmul.msk.f32.vlgmr.msra.gmra.mxu3 %vm252_vm0, %v7850_v23 }
  0xd4   :  { %828 = vmatmul.f32.vlgmr.msrb.gmra.mxu0 %v539_v48  ;;  %895 = vmatmul.f32.vlgmr.msrb.gmra.mxu2 %v540_v50 }
  0xd5   :  { %v7934_v4 = vpop.f32.mrf.mxu0 }
  0xd6   :  { %v506_v3 = vpop.f32.mrf.mxu2 }
  0xd7   :  { %v507_v62 = vadd.f32 %v506_v3, %v238_v58 }
  0xd9   :  { %740 = vmatpush.msra.mxu1 %v507_v62 }
  0xdb   :  { %6642 = vmatmul.msk.f32.gmra.mxu3 %vm252_vm0, %v7860_v42 }
  0xdc   :  { %962 = vmatmul.f32.vlgmr.msra.gmra.mxu0 %v541_v53  ;;  %1029 = vmatmul.f32.vlgmr.msra.gmra.mxu2 %v542_v56 }
  0xde   :  { %v7936_v5 = vpop.f32.mrf.mxu2 }
 0x140   :  { %v560_v6 = vpop.f32.mrf.mxu0 }
 0x141   :  { %v564_v11 = vsel %vm563_vm1, %v560_v6, -inf }
 0x146   :  { %v628_v7 = vpop.f32.mrf.mxu2 }
 0x147   :  { %v631_v8 = vsel %vm563_vm1, %v628_v7, -inf }
 0x148   :  { %632 = vmax.xlane.f32.xlu0 %v631_v8  ;;  %v483_v8 = vpop.f32.mrf.mxu1 }
 0x149   :  { %v695_v9 = vpop.f32.mrf.mxu0 }
 0x14a   :  { %v698_v16 = vsel %vm563_vm1, %v695_v9, -inf }
 0x14f   :  { %v762_v10 = vpop.f32.mrf.mxu2 }
 0x150   :  { %v765_v12 = vsel %vm563_vm1, %v762_v10, -inf  ;;  %565 = vmax.xlane.f32.xlu0 %v564_v11 }
 0x151   :  { %766 = vmax.xlane.f32.xlu1 %v765_v12  ;;  %v829_v13 = vpop.f32.mrf.mxu0 }
 0x152   :  { %v832_v19 = vsel %vm563_vm1, %v829_v13, -inf }
 0x156   :  { %v529_v11 = vpop.f32.mrf.mxu3 }
 0x157   :  { %v896_v14 = vpop.f32.mrf.mxu2 }
 0x158   :  { %v899_v15 = vsel %vm563_vm1, %v896_v14, -inf }
 0x159   :  { %900 = vmax.xlane.f32.xlu2 %v899_v15  ;;  %699 = vmax.xlane.f32.xlu1 %v698_v16  ;;  %v963_v17 = vpop.f32.mrf.mxu0 }
 0x15a   :  { %v966_v20 = vsel %vm563_vm1, %v963_v17, -inf }
 0x15f   :  { %v1030_v18 = vpop.f32.mrf.mxu2 }
 0x160   :  { %v1033_v21 = vsel %vm563_vm1, %v1030_v18, -inf }
 0x161   :  { %833 = vmax.xlane.f32.xlu2 %v832_v19  ;;  %967 = vmax.xlane.f32.xlu1 %v966_v20 }
 0x162   :  { %1034 = vmax.xlane.f32.xlu0 %v1033_v21 }
 0x1bb   :  { %v633_v27 = vpop.xlane.xlu0 %632 }
 0x1bc   :  { %v634_v28 = vsub.f32 %v628_v7, %v633_v27  ;;  %v237_v7 = vperm.slane %v7926_v1, 1 }
 0x1be   :  { %v635_v29 = vmul.f32 1.442695, %v634_v28 }
 0x1c0   :  { %6902 = vpow2.f32 %v635_v29 }
 0x1c3   :  { %v566_v49 = vpop.xlane.xlu0 %565 }
 0x1c4   :  { %v767_v55 = vpop.xlane.xlu1 %766  ;;  %v567_v30 = vsub.f32 %v560_v6, %v566_v49 }
 0x1c5   :  { %v768_v31 = vsub.f32 %v762_v10, %v767_v55  ;;  %v239_v10 = vperm.slane %v7926_v1, 3  ;;  %v486_v55 = vpop.f32.mrf.mxu1 }
 0x1c6   :  { %v7954_v32 = vpop.eup %6902  ;;  %v568_v59 = vmul.f32 1.442695, %v567_v30 }
 0x1c7   :  { %v769_v33 = vmul.f32 1.442695, %v768_v31  ;;  %v637_v63 = vsel %vm563_vm1, %v7954_v32, 0.0  ;;  %v530_v12 = vadd.f32 %v529_v11, %v239_v10 }
 0x1c8   :  { %6904 = vpow2.f32 %v568_v59  ;;  %638 = vadd.xlane.f32.xlu2 %v637_v63 }
 0x1c9   :  { %6906 = vpow2.f32 %v769_v33 }
 0x1cc   :  { %v901_v23 = vpop.xlane.xlu2 %900  ;;  %v700_v42 = vpop.xlane.xlu1 %699 }
 0x1cd   :  { %v902_v34 = vsub.f32 %v896_v14, %v901_v23  ;;  %v701_v35 = vsub.f32 %v695_v9, %v700_v42  ;;  %v484_v9 = vadd.f32 %v483_v8, %v237_v7 }
 0x1ce   :  { %v7958_v36 = vpop.eup %6904 }
 0x1cf   :  { %v7960_v37 = vpop.eup %6906  ;;  %v903_v38 = vmul.f32 1.442695, %v902_v34  ;;  %v702_v39 = vmul.f32 1.442695, %v701_v35  ;;  %v570_v40 = vsel %vm563_vm1, %v7958_v36, 0.0  ;;  %673 = vmatpush.msrb.mxu3 %v484_v9  ;;  %v487_v34 = vadd.f32 %v486_v55, %v237_v7 }
 0x1d0   :  { %v771_v41 = vsel %vm563_vm1, %v7960_v37, 0.0  ;;  %571 = vadd.xlane.f32.xlu0 %v570_v40 }
 0x1d1   :  { %6908 = vpow2.f32 %v903_v38  ;;  %772 = vadd.xlane.f32.xlu1 %v771_v41  ;;  %807 = vmatpush.msra.mxu3 %v530_v12 }
 0x1d2   :  { %6910 = vpow2.f32 %v702_v39 }
 0x1d4   :  { %v834_v43 = vpop.xlane.xlu2 %833  ;;  %v968_v44 = vpop.xlane.xlu1 %967 }
 0x1d5   :  { %v835_v46 = vsub.f32 %v829_v13, %v834_v43  ;;  %v969_v47 = vsub.f32 %v963_v17, %v968_v44  ;;  %v1035_v48 = vpop.xlane.xlu0 %1034 }
 0x1d6   :  { %v1036_v50 = vsub.f32 %v1030_v18, %v1035_v48 }
 0x1d7   :  { %v7966_v51 = vpop.eup %6908  ;;  %v836_v52 = vmul.f32 1.442695, %v835_v46  ;;  %v970_v53 = vmul.f32 1.442695, %v969_v47  ;;  %v464_v46 = vadd.f32 %v7934_v4, %v236_v45  ;;  %v8004_v47 = vadd.f32 %v7936_v5, %v238_v58 }
 0x1d8   :  { %v7968_v56 = vpop.eup %6910  ;;  %v1037_v57 = vmul.f32 1.442695, %v1036_v50  ;;  %v905_v60 = vsel %vm563_vm1, %v7966_v51, 0.0 }
 0x1d9   :  { %6912 = vpow2.f32 %v836_v52  ;;  %v704_v61 = vsel %vm563_vm1, %v7968_v56, 0.0  ;;  %906 = vadd.xlane.f32.xlu0 %v905_v60  ;;  %v6855_v52 = vld [vmem:[%s10611_s3 + $0x28] sm:$0xff]  }
 0x1da   :  { %6914 = vpow2.f32 %v970_v53  ;;  %705 = vadd.xlane.f32.xlu2 %v704_v61  ;;  %v532_v61 = vpop.f32.mrf.mxu3 }
 0x1db   :  { %6916 = vpow2.f32 %v1037_v57 }
 0x1df   :  { %v7974_v0 = vpop.eup %6912 }
 0x1e0   :  { %v7976_v2 = vpop.eup %6914  ;;  %v838_v54 = vsel %vm563_vm1, %v7974_v0, 0.0 }
 0x1e1   :  { %v7980_v3 = vpop.eup %6916  ;;  %839 = vadd.xlane.f32.xlu1 %v838_v54  ;;  %v972_v62 = vsel %vm563_vm1, %v7976_v2, 0.0 }
 0x1e2   :  { %973 = vadd.xlane.f32.xlu0 %v972_v62  ;;  %v1039_v6 = vsel %vm563_vm1, %v7980_v3, 0.0 }
 0x1e3   :  { %1040 = vadd.xlane.f32.xlu2 %v1039_v6 }
 0x23b   :  { %v639_v13 = vpop.xlane.xlu2 %638 }
 0x23c   :  { %6918 = vrcp.f32 %v639_v13  ;;  %v651_v20 = vand.u32 2147483648, %v639_v13  ;;  %v649_v21 = vand.u32 2147483647, %v639_v13  ;;  %vm645_vm3 = vweird.f32 %v639_v13 }
 0x23e   :  { %v652_v27 = vor.u32 1.1754944e-38, %v651_v20  ;;  %vm650_vm5 = vcmp.eq.f32.partialorder %v649_v21, 8.507059e+37  ;;  %v6857_v21 = vld [vmem:[%s10611_s3 + $0x38] sm:$0xff]  }
 0x242   :  { %v6919_v14 = vpop.eup %6918 }
 0x243   :  { %v641_v15 = vmul.f32 %v6919_v14, %v639_v13  ;;  %v572_v16 = vpop.xlane.xlu0 %571  ;;  %vm646_vm2 = vweird.f32 %v6919_v14 }
 0x244   :  { %v773_v17 = vpop.xlane.xlu1 %772  ;;  %6920 = vrcp.f32 %v572_v16  ;;  %vm647_vm4 = vmor %vm645_vm3, %vm646_vm2  ;;  %v582_v23 = vand.u32 2147483647, %v572_v16  ;;  %v584_v42 = vand.u32 2147483648, %v572_v16  ;;  %vm578_vm8 = vweird.f32 %v572_v16 }
 0x245   :  { %v642_v18 = vsub.f32 1.0, %v641_v15  ;;  %6922 = vrcp.f32 %v773_v17  ;;  %v783_v38 = vand.u32 2147483647, %v773_v17  ;;  %v785_v43 = vand.u32 2147483648, %v773_v17 }
 0x246   :  { %vm779_vm9 = vweird.f32 %v773_v17  ;;  %vm8018_vm13 = vcmp.eq.f32.partialorder %v582_v23, 8.507059e+37  ;;  %v585_v58 = vor.u32 1.1754944e-38, %v584_v42  ;;  %v6856_v23 = vld [vmem:[%s10611_s3 + $0x30] sm:$0xff]  }
 0x247   :  { %v643_v19 = vmul.f32 %v6919_v14, %v642_v18  ;;  %vm8014_vm12 = vcmp.eq.f32.partialorder %v783_v38, 8.507059e+37  ;;  %v786_v54 = vor.u32 1.1754944e-38, %v785_v43  ;;  %v533_v18 = vadd.f32 %v532_v61, %v239_v10 }
 0x248   :  { %v6750_v50 = vunpack.c.h.bf16 %v6856_v23 }
 0x249   :  { %v644_v22 = vadd.f32 %v6919_v14, %v643_v19 }
 0x24a   :  { %v6921_v24 = vpop.eup %6920 }
 0x24b   :  { %v6923_v25 = vpop.eup %6922  ;;  %v648_v26 = vsel %vm647_vm4, %v6919_v14, %v644_v22  ;;  %v574_v28 = vmul.f32 %v6921_v24, %v572_v16  ;;  %vm579_vm6 = vweird.f32 %v6921_v24 }
 0x24c   :  { %v775_v29 = vmul.f32 %v6923_v25, %v773_v17  ;;  %v7990_v49 = vpop.xlane.xlu0 %906  ;;  %v653_v30 = vsel %vm650_vm5, %v652_v27, %v648_v26  ;;  %vm780_vm7 = vweird.f32 %v6923_v25  ;;  %vm8006_vm10 = vmor %vm578_vm8, %vm579_vm6 }
 0x24d   :  { %v575_v31 = vsub.f32 1.0, %v574_v28  ;;  %v7992_v59 = vpop.xlane.xlu2 %705  ;;  %6924 = vrcp.f32 %v7990_v49  ;;  %v654_v39 = vmul.f32 %v7954_v32, %v653_v30  ;;  %vm8010_vm11 = vmor %vm779_vm9, %vm780_vm7  ;;  %v917_v7 = vand.u32 2147483647, %v7990_v49 }
 0x24e   :  { %v776_v33 = vsub.f32 1.0, %v775_v29  ;;  %6926 = vrcp.f32 %v7992_v59  ;;  %v716_v62 = vand.u32 2147483647, %v7992_v59  ;;  %v718_v12 = vand.u32 2147483648, %v7992_v59 }
 0x24f   :  { %v576_v63 = vmul.f32 %v6921_v24, %v575_v31  ;;  %6644 = vmatmul.msk.f32.vlgmr.msrb.gmra.mxu3 %vm563_vm1, %v654_v39  ;;  %v919_v13 = vand.u32 2147483648, %v7990_v49  ;;  %vm712_vm2 = vweird.f32 %v7992_v59  ;;  %vm913_vm3 = vweird.f32 %v7990_v49 }
 0x250   :  { %v777_v35 = vmul.f32 %v6923_v25, %v776_v33  ;;  %941 = vmatpush.msrb.mxu3 %v487_v34  ;;  %vm8049_vm4 = vcmp.eq.f32.partialorder %v917_v7, 8.507059e+37  ;;  %vm8058_vm5 = vcmp.eq.f32.partialorder %v716_v62, 8.507059e+37  ;;  %v719_v27 = vor.u32 1.1754944e-38, %v718_v12  ;;  %v6872_v7 = vld [vmem:[%s10611_s3 + $0xb0] sm:$0xff]  }
 0x251   :  { %v577_v40 = vadd.f32 %v6921_v24, %v576_v63  ;;  %v920_v29 = vor.u32 1.1754944e-38, %v919_v13  ;;  %v6753_v39 = vunpack.c.l.bf16 %v6857_v21  ;;  %v6746_v62 = vunpack.c.h.bf16 %v6855_v52 }
 0x252   :  { %v778_v41 = vadd.f32 %v6923_v25, %v777_v35 }
 0x253   :  { %v6925_v44 = vpop.eup %6924  ;;  %v581_v57 = vsel %vm8006_vm10, %v6921_v24, %v577_v40 }
 0x254   :  { %v6927_v48 = vpop.eup %6926  ;;  %v909_v4 = vmul.f32 %v6925_v44, %v7990_v49  ;;  %v8023_v5 = vpop.xlane.xlu1 %839  ;;  %v782_v53 = vsel %vm8010_vm11, %v6923_v25, %v778_v41  ;;  %v586_v15 = vsel %vm8018_vm13, %v585_v58, %v581_v57  ;;  %vm914_vm14 = vweird.f32 %v6925_v44 }
 0x255   :  { %v708_v60 = vmul.f32 %v6927_v48, %v7992_v59  ;;  %6928 = vrcp.f32 %v8023_v5  ;;  %v8035_v9 = vpop.xlane.xlu0 %973  ;;  %v787_v14 = vsel %vm8014_vm12, %v786_v54, %v782_v53  ;;  %vm713_vm15 = vweird.f32 %v6927_v48  ;;  %vm8062_vm6 = vmor %vm913_vm3, %vm914_vm14 }
 0x256   :  { %v910_v6 = vsub.f32 1.0, %v909_v4  ;;  %v8033_v8 = vpop.xlane.xlu2 %1040  ;;  %v587_v10 = vmul.f32 %v7958_v36, %v586_v15  ;;  %v788_v26 = vmul.f32 %v7960_v37, %v787_v14  ;;  %vm714_vm7 = vmor %vm712_vm2, %vm713_vm15  ;;  %vm846_vm8 = vweird.f32 %v8023_v5  ;;  %v6854_v14 = vld [vmem:[%s10611_s3 + $0x20] sm:$0xff]  }
 0x257   :  { %v709_v11 = vsub.f32 1.0, %v708_v60  ;;  %6930 = vrcp.f32 %v8033_v8  ;;  %v850_v31 = vand.u32 2147483647, %v8023_v5  ;;  %v6754_v36 = vunpack.c.h.bf16 %v6857_v21 }
 0x258   :  { %v911_v16 = vmul.f32 %v6925_v44, %v910_v6  ;;  %6932 = vrcp.f32 %v8035_v9  ;;  %6643 = vmatmul.msk.f32.vlgmr.msrb.gmra.mxu1 %vm563_vm1, %v587_v10  ;;  %6646 = vmatmul.msk.f32.vlgmr.msra.gmra.mxu3 %vm563_vm1, %v788_v26  ;;  %v852_v34 = vand.u32 2147483648, %v8023_v5  ;;  %v1051_v35 = vand.u32 2147483647, %v8033_v8  ;;  %v6880_v6 = vld [vmem:[%s10611_s3 + $0xf0] sm:$0xff]  }
 0x259   :  { %v710_v17 = vmul.f32 %v6927_v48, %v709_v11  ;;  %874 = vmatpush.msrb.mxu1 %v464_v46  ;;  %1075 = vmatpush.msra.mxu3 %v533_v18  ;;  %v1053_v38 = vand.u32 2147483648, %v8033_v8  ;;  %v6873_v46 = vld [vmem:[%s10611_s3 + $0xb8] sm:$0xff]   ;;  %v6749_v53 = vunpack.c.l.bf16 %v6856_v23  ;;  %vm8118_vm12 = vcmp.eq.f32.partialorder %v850_v31, 8.507059e+37 }
 0x25a   :  { %v912_v19 = vadd.f32 %v6925_v44, %v911_v16  ;;  %1212 = vmatpush.msrb.mxu0 %v6754_v36  ;;  %vm1047_vm13 = vweird.f32 %v8033_v8  ;;  %v6818_v60 = vunpack.c.h.bf16 %v6873_v46  ;;  %v853_v54 = vor.u32 1.1754944e-38, %v852_v34 }
 0x25b   :  { %v8056_v22 = vpop.eup %6928  ;;  %v711_v24 = vadd.f32 %v6927_v48, %v710_v17  ;;  %v6817_v13 = vunpack.c.l.bf16 %v6873_v46  ;;  %vm1052_vm15 = vcmp.eq.f32.partialorder %v1051_v35, 8.507059e+37  ;;  %v6745_v17 = vunpack.c.l.bf16 %v6855_v52  ;;  %v6852_v35 = vld [vmem:[%s10611_s3 + $0x10] sm:$0xff]   ;;  %v6851_v52 = vld [vmem:[%s10611_s3 + $0x8] sm:$0xff]  }
 0x25c   :  { %v916_v28 = vsel %vm8062_vm6, %v6925_v44, %v912_v19  ;;  %v842_v49 = vmul.f32 %v8056_v22, %v8023_v5  ;;  %vm847_vm9 = vweird.f32 %v8056_v22  ;;  %v6881_v44 = vld [vmem:[%s10611_s3 + $0xf8] sm:$0xff]   ;;  %1213 = vmatpush.msrb.mxu0 %v6753_v39  ;;  %1258 = vmatpush.msrb.mxu2 %v6818_v60  ;;  %v6846_v20 = vunpack.c.h.bf16 %v6880_v6 }
 0x25d   :  { %v8072_v55 = vpop.eup %6930  ;;  %v715_v30 = vsel %vm714_vm7, %v6927_v48, %v711_v24  ;;  %v921_v59 = vsel %vm8049_vm4, %v920_v29, %v916_v28  ;;  %vm8114_vm11 = vmor %vm846_vm8, %vm847_vm9  ;;  %v6850_v57 = vunpack.c.h.bf16 %v6881_v44  ;;  %v6849_v12 = vunpack.c.l.bf16 %v6881_v44  ;;  %v6865_v19 = vld [vmem:[%s10611_s3 + $0x78] sm:$0xff]   ;;  %v6864_v29 = vld [vmem:[%s10611_s3 + $0x70] sm:$0xff]  }
 0x25e   :  { %v720_v37 = vsel %vm8058_vm5, %v719_v27, %v715_v30  ;;  %v843_v33 = vsub.f32 1.0, %v842_v49  ;;  %v1043_v63 = vmul.f32 %v8072_v55, %v8033_v8  ;;  %v8087_v42 = vpop.eup %6932  ;;  %vm1048_vm10 = vweird.f32 %v8072_v55  ;;  %1214 = vmatpush.msrb.mxu0 %v6750_v50  ;;  %1259 = vmatpush.msrb.mxu2 %v6817_v13  ;;  %v6877_v50 = vld [vmem:[%s10611_s3 + $0xd8] sm:$0xff]  }
 0x25f   :  { %v976_v43 = vmul.f32 %v8087_v42, %v8035_v9  ;;  %v721_v32 = vmul.f32 %v7968_v56, %v720_v37  ;;  %v922_v48 = vmul.f32 %v7966_v51, %v921_v59  ;;  %vm1049_vm14 = vmor %vm1047_vm13, %vm1048_vm10  ;;  %v1054_v8 = vor.u32 1.1754944e-38, %v1053_v38  ;;  %v6869_v56 = vld [vmem:[%s10611_s3 + $0x98] sm:$0xff]  }
 0x260   :  { %v844_v40 = vmul.f32 %v8056_v22, %v843_v33  ;;  %v1044_v41 = vsub.f32 1.0, %v1043_v63  ;;  %1215 = vmatpush.msrb.mxu0 %v6749_v53  ;;  %v6814_v21 = vunpack.c.h.bf16 %v6872_v7  ;;  %vm981_vm2 = vweird.f32 %v8087_v42  ;;  %v6878_v33 = vld [vmem:[%s10611_s3 + $0xe0] sm:$0xff]  }
 0x261   :  { %v977_v4 = vsub.f32 1.0, %v976_v43  ;;  %6645 = vmatmul.msk.f32.vlgmr.msra.gmra.mxu1 %vm563_vm1, %v721_v32  ;;  %6648 = vmatmul.msk.f32.vlgmr.msrb.gmra.mxu3 %vm563_vm1, %v922_v48  ;;  %v986_v10 = vand.u32 2147483648, %v8035_v9  ;;  %v6786_v26 = vunpack.c.h.bf16 %v6865_v19  ;;  %v6845_v27 = vunpack.c.l.bf16 %v6880_v6 }
 0x262   :  { %v845_v45 = vadd.f32 %v8056_v22, %v844_v40  ;;  %v1045_v58 = vmul.f32 %v8072_v55, %v1044_v41  ;;  %1008 = vmatpush.msra.mxu1 %v8004_v47  ;;  %1281 = vmatpush.msrb.mxu3 %v6850_v57  ;;  %v6879_v47 = vld [vmem:[%s10611_s3 + $0xe8] sm:$0xff]   ;;  %vm980_vm3 = vweird.f32 %v8035_v9  ;;  %v984_v28 = vand.u32 2147483647, %v8035_v9  ;;  %v6870_v40 = vld [vmem:[%s10611_s3 + $0xa0] sm:$0xff]  }
 0x263   :  { %v978_v11 = vmul.f32 %v8087_v42, %v977_v4  ;;  %1216 = vmatpush.msrb.mxu0 %v6746_v62  ;;  %1260 = vmatpush.msrb.mxu2 %v6814_v21  ;;  %v6741_v49 = vunpack.c.l.bf16 %v6854_v14  ;;  %vm8169_vm4 = vmor %vm980_vm3, %vm981_vm2  ;;  %v6785_v31 = vunpack.c.l.bf16 %v6865_v19  ;;  %v6842_v36 = vunpack.c.h.bf16 %v6879_v47  ;;  %v6861_v62 = vld [vmem:[%s10611_s3 + $0x58] sm:$0xff]  }
 0x264   :  { %v849_v61 = vsel %vm8114_vm11, %v8056_v22, %v845_v45  ;;  %v1046_v5 = vadd.f32 %v8072_v55, %v1045_v58  ;;  %v6742_v22 = vunpack.c.h.bf16 %v6854_v14  ;;  %1282 = vmatpush.msrb.mxu3 %v6849_v12  ;;  %v987_v63 = vor.u32 1.1754944e-38, %v986_v10  ;;  %v6862_v58 = vld [vmem:[%s10611_s3 + $0x60] sm:$0xff]   ;;  %v6860_v14 = vld [vmem:[%s10611_s3 + $0x50] sm:$0xff]  }
 0x265   :  { %v854_v15 = vsel %vm8118_vm12, %v853_v54, %v849_v61  ;;  %v979_v1 = vadd.f32 %v8087_v42, %v978_v11  ;;  %1217 = vmatpush.msrb.mxu0 %v6745_v17  ;;  %v6782_v23 = vunpack.c.h.bf16 %v6864_v29  ;;  %v6841_v34 = vunpack.c.l.bf16 %v6879_v47  ;;  %v6859_v17 = vld [vmem:[%s10611_s3 + $0x48] sm:$0xff]  }
 0x266   :  { %v1050_v16 = vsel %vm1049_vm14, %v8072_v55, %v1046_v5  ;;  %v855_v24 = vmul.f32 %v7974_v0, %v854_v15  ;;  %v6853_v0 = vld [vmem:[%s10611_s3 + $0x18] sm:$0xff]   ;;  %1283 = vmatpush.msrb.mxu3 %v6846_v20  ;;  %v6813_v55 = vunpack.c.l.bf16 %v6872_v7  ;;  %vm985_vm5 = vcmp.eq.f32.partialorder %v984_v28, 8.507059e+37  ;;  %v6876_v5 = vld [vmem:[%s10611_s3 + $0xd0] sm:$0xff]   ;;  %v6858_v20 = vld [vmem:[%s10611_s3 + $0x40] sm:$0xff]  }
 0x267   :  { %v1055_v18 = vsel %vm1052_vm15, %v1054_v8, %v1050_v16  ;;  %1218 = vmatpush.msrb.mxu0 %v6742_v22  ;;  %v983_v9 = vsel %vm8169_vm4, %v8087_v42, %v979_v1  ;;  %v6738_v37 = vunpack.c.h.bf16 %v6853_v0  ;;  %v6863_v42 = vld [vmem:[%s10611_s3 + $0x68] sm:$0xff]   ;;  %v6737_v38 = vunpack.c.l.bf16 %v6853_v0  ;;  %v6868_v1 = vld [vmem:[%s10611_s3 + $0x90] sm:$0xff]  }
 0x268   :  { %v1056_v25 = vmul.f32 %v7980_v3, %v1055_v18  ;;  %v6871_v3 = vld [vmem:[%s10611_s3 + $0xa8] sm:$0xff]   ;;  %1284 = vmatpush.msrb.mxu3 %v6845_v27  ;;  %1261 = vmatpush.msrb.mxu2 %v6813_v55  ;;  %v988_v41 = vsel %vm985_vm5, %v987_v63, %v983_v9  ;;  %v6781_v43 = vunpack.c.l.bf16 %v6864_v29  ;;  %v6838_v44 = vunpack.c.h.bf16 %v6878_v33  ;;  %v6866_v9 = vld [vmem:[%s10611_s3 + $0x80] sm:$0xff]  }
 0x269   :  { %6647 = vmatmul.msk.f32.vlgmr.msrb.gmra.mxu1 %vm563_vm1, %v855_v24  ;;  %v6810_v59 = vunpack.c.h.bf16 %v6871_v3  ;;  %1219 = vmatpush.msrb.mxu0 %v6741_v49  ;;  %v6809_v39 = vunpack.c.l.bf16 %v6871_v3  ;;  %v6734_v46 = vunpack.c.h.bf16 %v6852_v35  ;;  %v6778_v32 = vunpack.c.h.bf16 %v6863_v42  ;;  %v6724_v24 = vld [vmem:[%s10611_s3] sm:$0xff]   ;;  %v6875_v27 = vld [vmem:[%s10611_s3 + $0xc8] sm:$0xff]  }
 0x26a   :  { %6650 = vmatmul.msk.f32.vlgmr.msra.gmra.mxu3 %vm563_vm1, %v1056_v25  ;;  %1235 = vmatpush.msrb.mxu1 %v6786_v26  ;;  %v6806_v48 = vunpack.c.h.bf16 %v6870_v40  ;;  %v989_v45 = vmul.f32 %v7976_v2, %v988_v41  ;;  %v6837_v4 = vunpack.c.l.bf16 %v6878_v33  ;;  %v6733_v53 = vunpack.c.l.bf16 %v6852_v35  ;;  %v6867_v29 = vld [vmem:[%s10611_s3 + $0x88] sm:$0xff]   ;;  %v1328_v41 = vld [vmem:[#allocation10 + $0xc0] sm:$0xff] }
 0x26b   :  { %1285 = vmatpush.msrb.mxu3 %v6842_v36  ;;  %1220 = vmatpush.msrb.mxu0 %v6738_v37  ;;  %v6777_v51 = vunpack.c.l.bf16 %v6863_v42  ;;  %v6805_v57 = vunpack.c.l.bf16 %v6870_v40  ;;  %v6834_v2 = vunpack.c.h.bf16 %v6877_v50  ;;  %v6730_v60 = vunpack.c.h.bf16 %v6851_v52 }
 0x26c   :  { %1236 = vmatpush.msrb.mxu1 %v6785_v31  ;;  %1262 = vmatpush.msrb.mxu2 %v6810_v59  ;;  %v6774_v61 = vunpack.c.h.bf16 %v6862_v58  ;;  %v6802_v54 = vunpack.c.h.bf16 %v6869_v56  ;;  %v6833_v6 = vunpack.c.l.bf16 %v6877_v50  ;;  %v6729_v7 = vunpack.c.l.bf16 %v6851_v52  ;;  %v6874_v31 = vld [vmem:[%s10611_s3 + $0xc0] sm:$0xff]   ;;  %s7773_s3 = smov [#allocation16]  }
 0x26d   :  { %1286 = vmatpush.msrb.mxu3 %v6841_v34  ;;  %1221 = vmatpush.msrb.mxu0 %v6737_v38  ;;  %v6773_v8 = vunpack.c.l.bf16 %v6862_v58  ;;  %v6801_v11 = vunpack.c.l.bf16 %v6869_v56  ;;  %v6830_v12 = vunpack.c.h.bf16 %v6876_v5  ;;  %v6770_v13 = vunpack.c.h.bf16 %v6861_v62  ;;  %v1320_v50 = vld [vmem:[#allocation10 + $0x80] sm:$0xff]  ;;  %v1321_v52 = vld [vmem:[#allocation10 + $0x88] sm:$0xff]  ;;  %s6600_s6 = sshll.u32 %s7773_s3, 4  ;;  %s6601_s6 = int_to_ptr.vmem [resolvable:$true] %s6600_s6 }
 0x26e   :  { %1237 = vmatpush.msrb.mxu1 %v6782_v23  ;;  %1263 = vmatpush.msrb.mxu2 %v6809_v39  ;;  %v6769_v15 = vunpack.c.l.bf16 %v6861_v62  ;;  %v6766_v16 = vunpack.c.h.bf16 %v6860_v14  ;;  %v6765_v18 = vunpack.c.l.bf16 %v6860_v14  ;;  %v6762_v19 = vunpack.c.h.bf16 %v6859_v17  ;;  %v1312_v56 = vld [vmem:[#allocation10 + $0x40] sm:$0xff] }
 0x26f   :  { %1287 = vmatpush.msrb.mxu3 %v6838_v44  ;;  %1222 = vmatpush.msrb.mxu0 %v6734_v46  ;;  %v6761_v21 = vunpack.c.l.bf16 %v6859_v17  ;;  %v6758_v22 = vunpack.c.h.bf16 %v6858_v20  ;;  %v6757_v25 = vunpack.c.l.bf16 %v6858_v20  ;;  %v6829_v47 = vunpack.c.l.bf16 %v6876_v5  ;;  %v1305_v5 = vld [vmem:[#allocation10 + $0x8] sm:$0xff]  ;;  %v1314_v20 = vld [vmem:[#allocation10 + $0x50] sm:$0xff] }
 0x270   :  { %1238 = vmatpush.msrb.mxu1 %v6781_v43  ;;  %1264 = vmatpush.msrb.mxu2 %v6806_v48  ;;  %v6726_v10 = vunpack.c.h.bf16 %v6724_v24  ;;  %v6798_v26 = vunpack.c.h.bf16 %v6868_v1  ;;  %v6725_v0 = vunpack.c.l.bf16 %v6724_v24  ;;  %v6797_v3 = vunpack.c.l.bf16 %v6868_v1  ;;  %v1329_v43 = vld [vmem:[#allocation10 + $0xc8] sm:$0xff]  ;;  %v1315_v1 = vld [vmem:[#allocation10 + $0x58] sm:$0xff] }
 0x271   :  { %6649 = vmatmul.msk.f32.vlgmr.msra.gmra.mxu1 %vm563_vm1, %v989_v45  ;;  %1288 = vmatpush.msrb.mxu3 %v6837_v4  ;;  %v6826_v28 = vunpack.c.h.bf16 %v6875_v27  ;;  %v6794_v49 = vunpack.c.h.bf16 %v6867_v29  ;;  %v6825_v55 = vunpack.c.l.bf16 %v6875_v27  ;;  %v6793_v30 = vunpack.c.l.bf16 %v6867_v29 }
 0x272   :  { %1239 = vmatpush.msrb.mxu1 %v6778_v32  ;;  %1223 = vmatpush.msrb.mxu0 %v6733_v53  ;;  %v6822_v36 = vunpack.c.h.bf16 %v6874_v31  ;;  %v6790_v37 = vunpack.c.h.bf16 %v6866_v9  ;;  %v6821_v59 = vunpack.c.l.bf16 %v6874_v31  ;;  %v6789_v33 = vunpack.c.l.bf16 %v6866_v9 }
 0x273   :  { %1265 = vmatpush.msrb.mxu2 %v6805_v57  ;;  %1289 = vmatpush.msrb.mxu3 %v6834_v2  ;;  %v1384_v44 = vunpack.c.l.bf16 %v1328_v41  ;;  %v1385_v46 = vunpack.c.h.bf16 %v1328_v41  ;;  %v1386_v32 = vunpack.c.l.bf16 %v1329_v43  ;;  %v1387_v48 = vunpack.c.h.bf16 %v1329_v43  ;;  %v1325_v41 = vld [vmem:[#allocation10 + $0xa8] sm:$0xff]  ;;  %v1316_v43 = vld [vmem:[#allocation10 + $0x60] sm:$0xff] }
 0x274   :  { %1240 = vmatpush.msrb.mxu1 %v6777_v51  ;;  %1224 = vmatpush.msrb.mxu0 %v6730_v60  ;;  %v1368_v45 = vunpack.c.l.bf16 %v1320_v50  ;;  %v1369_v58 = vunpack.c.h.bf16 %v1320_v50  ;;  %v1370_v4 = vunpack.c.l.bf16 %v1321_v52  ;;  %v1371_v53 = vunpack.c.h.bf16 %v1321_v52  ;;  %v1313_v51 = vld [vmem:[#allocation10 + $0x48] sm:$0xff]  ;;  %v1308_v52 = vld [vmem:[#allocation10 + $0x20] sm:$0xff] }
 0x275   :  { %1266 = vmatpush.msrb.mxu2 %v6802_v54  ;;  %1290 = vmatpush.msrb.mxu3 %v6833_v6  ;;  %v1352_v57 = vunpack.c.l.bf16 %v1312_v56  ;;  %v1353_v2 = vunpack.c.h.bf16 %v1312_v56  ;;  %v1354_v60 = vunpack.c.l.bf16 %v1313_v51  ;;  %v1304_v54 = vld [vmem:[#allocation10] sm:$0xff]  ;;  %v1356_v27 = vunpack.c.l.bf16 %v1314_v20  ;;  %v1317_v50 = vld [vmem:[#allocation10 + $0x68] sm:$0xff] }
 0x276   :  { %1241 = vmatpush.msrb.mxu1 %v6774_v61  ;;  %1225 = vmatpush.msrb.mxu0 %v6729_v7  ;;  %v1355_v61 = vunpack.c.h.bf16 %v1313_v51  ;;  %v1336_v62 = vunpack.c.l.bf16 %v1304_v54  ;;  %v1337_v6 = vunpack.c.h.bf16 %v1304_v54  ;;  %v1338_v7 = vunpack.c.l.bf16 %v1305_v5 }
 0x277   :  { %1267 = vmatpush.msrb.mxu2 %v6801_v11  ;;  %1291 = vmatpush.msrb.mxu3 %v6830_v12  ;;  %v1330_v11 = vld [vmem:[#allocation10 + $0xd0] sm:$0xff]  ;;  %v1331_v12 = vld [vmem:[#allocation10 + $0xd8] sm:$0xff]  ;;  %v1362_v56 = vunpack.c.l.bf16 %v1317_v50  ;;  %v1363_v51 = vunpack.c.h.bf16 %v1317_v50  ;;  %v3240_v50 = vld [vmem:[#allocation13 + $0xb0] sm:$0xff] }
 0x278   :  { %1242 = vmatpush.msrb.mxu1 %v6773_v8  ;;  %1226 = vmatpush.msrb.mxu0 %v6726_v10  ;;  %v1339_v8 = vunpack.c.h.bf16 %v1305_v5  ;;  %v1388_v14 = vunpack.c.l.bf16 %v1330_v11  ;;  %v1391_v17 = vunpack.c.h.bf16 %v1331_v12  ;;  %v1307_v10 = vld [vmem:[#allocation10 + $0x18] sm:$0xff] }
 0x279   :  { %1292 = vmatpush.msrb.mxu3 %v6829_v47  ;;  %1268 = vmatpush.msrb.mxu2 %v6798_v26  ;;  %v1306_v47 = vld [vmem:[#allocation10 + $0x10] sm:$0xff] }
 0x27a   :  { %1243 = vmatpush.msrb.mxu1 %v6770_v13  ;;  %1227 = vmatpush.msrb.mxu0 %v6725_v0  ;;  %v8237_v13 = vld [vmem:[#allocation8] ss:$0 sm:$0xff]  ;;  %v1357_v0 = vunpack.c.h.bf16 %v1314_v20  ;;  %v1340_v29 = vunpack.c.l.bf16 %v1306_v47  ;;  %v1318_v20 = vld [vmem:[#allocation10 + $0x70] sm:$0xff] }
 0x27b   :  { %1269 = vmatpush.msrb.mxu2 %v6797_v3  ;;  %1293 = vmatpush.msrb.mxu3 %v6826_v28  ;;  %v1358_v3 = vunpack.c.l.bf16 %v1315_v1  ;;  %v1359_v28 = vunpack.c.h.bf16 %v1315_v1 }
 0x27c   :  { %1244 = vmatpush.msrb.mxu1 %v6769_v15  ;;  %1454 = vmatpush.msra.mxu0 %v1384_v44  ;;  %v1389_v15 = vunpack.c.h.bf16 %v1330_v11 }
 0x27d   :  { %1270 = vmatpush.msrb.mxu2 %v6794_v49  ;;  %1294 = vmatpush.msrb.mxu3 %v6825_v55  ;;  %v1341_v49 = vunpack.c.h.bf16 %v1306_v47  ;;  %v1342_v55 = vunpack.c.l.bf16 %v1307_v10  ;;  %v1364_v47 = vunpack.c.l.bf16 %v1318_v20 }
 0x27e   :  { %1245 = vmatpush.msrb.mxu1 %v6766_v16  ;;  %1455 = vmatpush.msra.mxu0 %v1368_v45  ;;  %v1390_v16 = vunpack.c.l.bf16 %v1331_v12  ;;  %v1309_v45 = vld [vmem:[#allocation10 + $0x28] sm:$0xff]  ;;  %v1334_v12 = vld [vmem:[#allocation10 + $0xf0] sm:$0xff] }
 0x27f   :  { %1271 = vmatpush.msrb.mxu2 %v6793_v30  ;;  %1295 = vmatpush.msrb.mxu3 %v6822_v36  ;;  %v1343_v30 = vunpack.c.h.bf16 %v1307_v10  ;;  %v1365_v10 = vunpack.c.h.bf16 %v1318_v20 }
 0x280   :  { %1246 = vmatpush.msrb.mxu1 %v6765_v18  ;;  %1456 = vmatpush.msra.mxu0 %v1352_v57  ;;  %v1322_v18 = vld [vmem:[#allocation10 + $0x90] sm:$0xff]  ;;  %v1344_v57 = vunpack.c.l.bf16 %v1308_v52 }
 0x281   :  { %1272 = vmatpush.msrb.mxu2 %v6790_v37  ;;  %1296 = vmatpush.msrb.mxu3 %v6821_v59 }
 0x282   :  { %1247 = vmatpush.msrb.mxu1 %v6762_v19  ;;  %1457 = vmatpush.msra.mxu0 %v1336_v62  ;;  %v1323_v19 = vld [vmem:[#allocation10 + $0x98] sm:$0xff] }
 0x283   :  { %1273 = vmatpush.msrb.mxu2 %v6789_v33  ;;  %1523 = vmatpush.msra.mxu3 %v1387_v48  ;;  %v1374_v24 = vunpack.c.l.bf16 %v1323_v19  ;;  %v1379_v48 = vunpack.c.h.bf16 %v1325_v41 }
 0x284   :  { %1248 = vmatpush.msrb.mxu1 %v6761_v21  ;;  %v1372_v21 = vunpack.c.l.bf16 %v1322_v18 }
 0x285   :  { %1500 = vmatpush.msra.mxu2 %v1386_v32  ;;  %1524 = vmatpush.msra.mxu3 %v1371_v53  ;;  %v1378_v32 = vunpack.c.l.bf16 %v1325_v41  ;;  %v1361_v53 = vunpack.c.h.bf16 %v1316_v43 }
 0x286   :  { %1249 = vmatpush.msrb.mxu1 %v6758_v22  ;;  %v1373_v22 = vunpack.c.h.bf16 %v1322_v18 }
 0x287   :  { %1501 = vmatpush.msra.mxu2 %v1370_v4  ;;  %1525 = vmatpush.msra.mxu3 %v1355_v61  ;;  %v1360_v4 = vunpack.c.l.bf16 %v1316_v43  ;;  %v1347_v61 = vunpack.c.h.bf16 %v1309_v45 }
 0x288   :  { %1250 = vmatpush.msrb.mxu1 %v6757_v25  ;;  %v1375_v25 = vunpack.c.h.bf16 %v1323_v19 }
 0x289   :  { %1502 = vmatpush.msra.mxu2 %v1354_v60  ;;  %1526 = vmatpush.msra.mxu3 %v1339_v8  ;;  %v1346_v60 = vunpack.c.l.bf16 %v1309_v45  ;;  %v3310_v45 = vld [vmem:[#allocation13 + $0x2e0] sm:$0xff] }
 0x28a   :  { %1477 = vmatpush.msra.mxu1 %v1385_v46 }
 0x28b   :  { %1503 = vmatpush.msra.mxu2 %v1338_v7 }
 0x28c   :  { %1478 = vmatpush.msra.mxu1 %v1369_v58 }
 0x28e   :  { %1479 = vmatpush.msra.mxu1 %v1353_v2  ;;  %v1345_v2 = vunpack.c.h.bf16 %v1308_v52  ;;  %v3272_v52 = vld [vmem:[#allocation13 + $0x1b0] sm:$0xff] }
 0x290   :  { %1480 = vmatpush.msra.mxu1 %v1337_v6 }
 0x2d2   :  { %v675_v63 = vpop.f32.mrf.mxu3 }
 0x2d3   :  { %1251 = vmatmul.f32.vlgmr.msrb.gmra.mxu1 %v675_v63 }
 0x2d4   :  { %1569 = vmatpush.msrb.mxu1 %v1389_v15  ;;  %v1396_v15 = vunpack.c.l.bf16 %v1334_v12 }
 0x2d5   :  { %v608_v23 = vpop.f32.mrf.mxu1 }
 0x2d6   :  { %1228 = vmatmul.f32.vlgmr.msrb.gmra.mxu0 %v608_v23  ;;  %1570 = vmatpush.msrb.mxu1 %v1373_v22  ;;  %v1332_v23 = vld [vmem:[#allocation10 + $0xe0] sm:$0xff] }
 0x2d7   :  { %1546 = vmatpush.msrb.mxu0 %v1388_v14  ;;  %v1326_v14 = vld [vmem:[#allocation10 + $0xb0] sm:$0xff] }
 0x2d8   :  { %1571 = vmatpush.msrb.mxu1 %v1357_v0  ;;  %v1381_v22 = vunpack.c.h.bf16 %v1326_v14  ;;  %v1310_v0 = vld [vmem:[#allocation10 + $0x30] sm:$0xff] }
 0x2d9   :  { %1547 = vmatpush.msrb.mxu0 %v1372_v21  ;;  %v1380_v21 = vunpack.c.l.bf16 %v1326_v14  ;;  %v3338_v14 = vld [vmem:[#allocation13 + $0x3c0] sm:$0xff] }
 0x2da   :  { %1572 = vmatpush.msrb.mxu1 %v1341_v49 }
 0x2db   :  { %v809_v34 = vpop.f32.mrf.mxu3  ;;  %1548 = vmatpush.msrb.mxu0 %v1356_v27 }
 0x2dc   :  { %1297 = vmatmul.f32.vlgmr.msrb.gmra.mxu3 %v809_v34  ;;  %v1333_v34 = vld [vmem:[#allocation10 + $0xe8] sm:$0xff] }
 0x2dd   :  { %1615 = vmatpush.msrb.mxu3 %v1391_v17  ;;  %1549 = vmatpush.msrb.mxu0 %v1340_v29  ;;  %v1327_v17 = vld [vmem:[#allocation10 + $0xb8] sm:$0xff]  ;;  %v1349_v29 = vunpack.c.h.bf16 %v1310_v0 }
 0x2de   :  { %v742_v35 = vpop.f32.mrf.mxu1  ;;  %v1383_v1 = vunpack.c.h.bf16 %v1327_v17 }
 0x2df   :  { %1274 = vmatmul.f32.vlgmr.msrb.gmra.mxu2 %v742_v35  ;;  %1616 = vmatpush.msrb.mxu3 %v1375_v25  ;;  %v1392_v35 = vunpack.c.l.bf16 %v1332_v23  ;;  %v1382_v25 = vunpack.c.l.bf16 %v1327_v17  ;;  %v3266_v17 = vld [vmem:[#allocation13 + $0x180] sm:$0xff] }
 0x2e0   :  { %1592 = vmatpush.msrb.mxu2 %v1390_v16  ;;  %v1397_v16 = vunpack.c.h.bf16 %v1334_v12  ;;  %v3826_v20 = vunpack.c.l.bf16 %v3266_v17 }
 0x2e1   :  { %1617 = vmatpush.msrb.mxu3 %v1359_v28  ;;  %v1348_v28 = vunpack.c.l.bf16 %v1310_v0  ;;  %v3334_v0 = vld [vmem:[#allocation13 + $0x3a0] sm:$0xff] }
 0x2e2   :  { %1593 = vmatpush.msrb.mxu2 %v1374_v24  ;;  %v1319_v24 = vld [vmem:[#allocation10 + $0x78] sm:$0xff] }
 0x2e3   :  { %1618 = vmatpush.msrb.mxu3 %v1343_v30  ;;  %v1367_v27 = vunpack.c.h.bf16 %v1319_v24  ;;  %v3248_v30 = vld [vmem:[#allocation13 + $0xf0] sm:$0xff] }
 0x2e4   :  { %v943_v42 = vpop.f32.mrf.mxu3  ;;  %1594 = vmatpush.msrb.mxu2 %v1358_v3  ;;  %v1311_v3 = vld [vmem:[#allocation10 + $0x38] sm:$0xff] }
 0x2e5   :  { %1254 = vmatmul.f32.gmra.mxu1 %v943_v42  ;;  %v1393_v42 = vunpack.c.h.bf16 %v1332_v23  ;;  %v1350_v49 = vunpack.c.l.bf16 %v1311_v3 }
 0x2e6   :  { %v876_v38 = vpop.f32.mrf.mxu1  ;;  %1595 = vmatpush.msrb.mxu2 %v1342_v55  ;;  %v1351_v55 = vunpack.c.h.bf16 %v1311_v3  ;;  %v3962_v3 = vunpack.c.l.bf16 %v3334_v0 }
 0x2e7   :  { %1231 = vmatmul.f32.gmra.mxu0 %v876_v38  ;;  %v1394_v38 = vunpack.c.l.bf16 %v1333_v34 }
 0x2ed   :  { %v1077_v39 = vpop.f32.mrf.mxu3 }
 0x2ee   :  { %1300 = vmatmul.f32.gmra.mxu3 %v1077_v39  ;;  %v1010_v40 = vpop.f32.mrf.mxu1  ;;  %v1395_v39 = vunpack.c.h.bf16 %v1333_v34  ;;  %v3244_v34 = vld [vmem:[#allocation13 + $0xd0] sm:$0xff] }
 0x2ef   :  { %1277 = vmatmul.f32.gmra.mxu2 %v1010_v40  ;;  %v1324_v40 = vld [vmem:[#allocation10 + $0xa0] sm:$0xff]  ;;  %v3782_v41 = vunpack.c.l.bf16 %v3244_v34 }
 0x2f0   :  { %v1376_v44 = vunpack.c.l.bf16 %v1324_v40  ;;  %v1377_v46 = vunpack.c.h.bf16 %v1324_v40 }
 0x350   :  { %v1252_v36 = vpop.f32.mrf.mxu1 }
 0x353   :  { %v1229_v26 = vpop.f32.mrf.mxu0 }
 0x354   :  { %v1230_v31 = vadd.f32 %v8237_v13, %v1229_v26  ;;  %v1366_v26 = vunpack.c.l.bf16 %v1319_v24 }
 0x356   :  { %v1253_v9 = vadd.f32 %v1252_v36, %v1230_v31  ;;  %v3280_v31 = vld [vmem:[#allocation13 + $0x1f0] sm:$0xff] }
 0x357   :  { %v3312_v36 = vld [vmem:[#allocation13 + $0x2f0] sm:$0xff]  ;;  %v3854_v23 = vunpack.c.l.bf16 %v3280_v31 }
 0x35f   :  { %v1298_v33 = vpop.f32.mrf.mxu3 }
 0x362   :  { %v1275_v37 = vpop.f32.mrf.mxu2  ;;  %v1255_v5 = vpop.f32.mrf.mxu1 }
 0x363   :  { %v1276_v59 = vadd.f32 %v1275_v37, %v1253_v9  ;;  %v3344_v9 = vld [vmem:[#allocation13 + $0x3f0] sm:$0xff]  ;;  %v3246_v37 = vld [vmem:[#allocation13 + $0xe0] sm:$0xff] }
 0x364   :  { %v1232_v58 = vpop.f32.mrf.mxu0 }
 0x365   :  { %v8240_v63 = vadd.f32 %v1298_v33, %v1276_v59  ;;  %v1233_v54 = vadd.f32 %v8237_v13, %v1232_v58  ;;  %v1335_v13 = vld [vmem:[#allocation10 + $0xf8] sm:$0xff]  ;;  %v3278_v59 = vld [vmem:[#allocation13 + $0x1e0] sm:$0xff]  ;;  %v3790_v33 = vunpack.c.l.bf16 %v3248_v30  ;;  %v3774_v58 = vunpack.c.l.bf16 %v3240_v50 }
 0x366   :  { %v1398_v18 = vunpack.c.l.bf16 %v1335_v13  ;;  %v1399_v19 = vunpack.c.h.bf16 %v1335_v13  ;;  %v3850_v40 = vunpack.c.l.bf16 %v3278_v59  ;;  %v3260_v59 = vld [vmem:[#allocation13 + $0x150] sm:$0xff] }
 0x367   :  { %6651 = vmatmul.msk.f32.vlgmr.msra.gmra.mxu0 %vm252_vm0, %v8240_v63  ;;  %6653 = vmatmul.msk.f32.vlgmr.msra.gmra.mxu1 %vm252_vm0, %v8240_v63  ;;  %v1256_v62 = vadd.f32 %v1255_v5, %v1233_v54  ;;  %v3340_v5 = vld [vmem:[#allocation13 + $0x3d0] sm:$0xff]  ;;  %v3814_v34 = vunpack.c.l.bf16 %v3260_v59 }
 0x368   :  { %6655 = vmatmul.msk.f32.vlgmr.msra.gmra.mxu2 %vm252_vm0, %v8240_v63  ;;  %6657 = vmatmul.msk.f32.vlgmr.msra.gmra.mxu3 %vm252_vm0, %v8240_v63 }
 0x369   :  { %1638 = vmatpush.msra.mxu0 %v1392_v35  ;;  %1661 = vmatpush.msra.mxu1 %v1393_v42  ;;  %v3276_v35 = vld [vmem:[#allocation13 + $0x1d0] sm:$0xff]  ;;  %v3918_v42 = vunpack.c.l.bf16 %v3312_v36 }
 0x36a   :  { %1684 = vmatpush.msra.mxu2 %v1394_v38  ;;  %1707 = vmatpush.msra.mxu3 %v1395_v39  ;;  %v3982_v38 = vunpack.c.l.bf16 %v3344_v9  ;;  %v3786_v39 = vunpack.c.l.bf16 %v3246_v37  ;;  %v3846_v43 = vunpack.c.l.bf16 %v3276_v35  ;;  %v3332_v36 = vld [vmem:[#allocation13 + $0x390] sm:$0xff] }
 0x36b   :  { %1639 = vmatpush.msra.mxu0 %v1376_v44  ;;  %1662 = vmatpush.msra.mxu1 %v1377_v46  ;;  %v3242_v44 = vld [vmem:[#allocation13 + $0xc0] sm:$0xff]  ;;  %v3958_v9 = vunpack.c.l.bf16 %v3332_v36  ;;  %v3228_v37 = vld [vmem:[#allocation13 + $0x50] sm:$0xff] }
 0x36c   :  { %1685 = vmatpush.msra.mxu2 %v1378_v32  ;;  %1708 = vmatpush.msra.mxu3 %v1379_v48  ;;  %v3274_v46 = vld [vmem:[#allocation13 + $0x1c0] sm:$0xff]  ;;  %v3778_v32 = vunpack.c.l.bf16 %v3242_v44 }
 0x36d   :  { %1640 = vmatpush.msra.mxu0 %v1360_v4  ;;  %1663 = vmatpush.msra.mxu1 %v1361_v53  ;;  %v3842_v48 = vunpack.c.l.bf16 %v3274_v46  ;;  %v3838_v4 = vunpack.c.l.bf16 %v3272_v52  ;;  %v3914_v53 = vunpack.c.l.bf16 %v3310_v45 }
 0x36e   :  { %1686 = vmatpush.msra.mxu2 %v1362_v56  ;;  %1709 = vmatpush.msra.mxu3 %v1363_v51  ;;  %v3342_v56 = vld [vmem:[#allocation13 + $0x3e0] sm:$0xff] }
 0x36f   :  { %1641 = vmatpush.msra.mxu0 %v1344_v57  ;;  %1664 = vmatpush.msra.mxu1 %v1345_v2  ;;  %v3238_v51 = vld [vmem:[#allocation13 + $0xa0] sm:$0xff]  ;;  %v3308_v2 = vld [vmem:[#allocation13 + $0x2d0] sm:$0xff] }
 0x370   :  { %1687 = vmatpush.msra.mxu2 %v1346_v60  ;;  %1710 = vmatpush.msra.mxu3 %v1347_v61  ;;  %v3270_v57 = vld [vmem:[#allocation13 + $0x1a0] sm:$0xff]  ;;  %v3770_v60 = vunpack.c.l.bf16 %v3238_v51  ;;  %v3910_v54 = vunpack.c.l.bf16 %v3308_v2 }
 0x371   :  { %v1301_v8 = vpop.f32.mrf.mxu3  ;;  %v3834_v61 = vunpack.c.l.bf16 %v3270_v57 }
 0x372   :  { %v1278_v6 = vpop.f32.mrf.mxu2 }
 0x373   :  { %v1279_v7 = vadd.f32 %v1278_v6, %v1256_v62  ;;  %v3974_v62 = vunpack.c.l.bf16 %v3340_v5  ;;  %v3236_v6 = vld [vmem:[#allocation13 + $0x90] sm:$0xff] }
 0x375   :  { %v8251_v11 = vadd.f32 %v1301_v8, %v1279_v7  ;;  %v3268_v7 = vld [vmem:[#allocation13 + $0x190] sm:$0xff]  ;;  %v3306_v8 = vld [vmem:[#allocation13 + $0x2c0] sm:$0xff] }
 0x376   :  { %v3830_v12 = vunpack.c.l.bf16 %v3268_v7  ;;  %v3906_v13 = vunpack.c.l.bf16 %v3306_v8 }
 0x377   :  { %6652 = vmatmul.msk.f32.gmra.mxu0 %vm252_vm0, %v8251_v11  ;;  %6654 = vmatmul.msk.f32.gmra.mxu1 %vm252_vm0, %v8251_v11 }
 0x378   :  { %6656 = vmatmul.msk.f32.gmra.mxu2 %vm252_vm0, %v8251_v11  ;;  %6658 = vmatmul.msk.f32.gmra.mxu3 %vm252_vm0, %v8251_v11 }
 0x37f   :  { %6659 = vmatmul.msk.f32.vlgmr.msrb.gmra.mxu0 %vm252_vm0, %v8240_v63  ;;  %6661 = vmatmul.msk.f32.vlgmr.msrb.gmra.mxu1 %vm252_vm0, %v8240_v63 }
 0x380   :  { %6663 = vmatmul.msk.f32.vlgmr.msrb.gmra.mxu2 %vm252_vm0, %v8240_v63  ;;  %6665 = vmatmul.msk.f32.vlgmr.msrb.gmra.mxu3 %vm252_vm0, %v8240_v63 }
 0x381   :  { %1730 = vmatpush.msrb.mxu0 %v1396_v15  ;;  %1753 = vmatpush.msrb.mxu1 %v1397_v16  ;;  %v3970_v15 = vunpack.c.l.bf16 %v3338_v14  ;;  %v3234_v16 = vld [vmem:[#allocation13 + $0x80] sm:$0xff] }
 0x382   :  { %1776 = vmatpush.msrb.mxu2 %v1398_v18  ;;  %1799 = vmatpush.msrb.mxu3 %v1399_v19  ;;  %v3304_v18 = vld [vmem:[#allocation13 + $0x2b0] sm:$0xff]  ;;  %v3762_v19 = vunpack.c.l.bf16 %v3234_v16 }
 0x383   :  { %1731 = vmatpush.msrb.mxu0 %v1380_v21  ;;  %1754 = vmatpush.msrb.mxu1 %v1381_v22  ;;  %v3902_v21 = vunpack.c.l.bf16 %v3304_v18  ;;  %v3336_v22 = vld [vmem:[#allocation13 + $0x3b0] sm:$0xff] }
 0x384   :  { %1777 = vmatpush.msrb.mxu2 %v1382_v25  ;;  %1800 = vmatpush.msrb.mxu3 %v1383_v1  ;;  %v3966_v24 = vunpack.c.l.bf16 %v3336_v22  ;;  %v3232_v25 = vld [vmem:[#allocation13 + $0x70] sm:$0xff] }
 0x385   :  { %1732 = vmatpush.msrb.mxu0 %v1364_v47  ;;  %1755 = vmatpush.msrb.mxu1 %v1365_v10  ;;  %v3264_v1 = vld [vmem:[#allocation13 + $0x170] sm:$0xff]  ;;  %v3302_v47 = vld [vmem:[#allocation13 + $0x2a0] sm:$0xff]  ;;  %v3758_v10 = vunpack.c.l.bf16 %v3232_v25 }
 0x386   :  { %1778 = vmatpush.msrb.mxu2 %v1366_v26  ;;  %1801 = vmatpush.msrb.mxu3 %v1367_v27  ;;  %v3822_v26 = vunpack.c.l.bf16 %v3264_v1  ;;  %v3898_v27 = vunpack.c.l.bf16 %v3302_v47  ;;  %v3224_v22 = vld [vmem:[#allocation13 + $0x30] sm:$0xff] }
 0x387   :  { %6660 = vmatmul.msk.f32.gmra.mxu0 %vm252_vm0, %v8251_v11  ;;  %6662 = vmatmul.msk.f32.gmra.mxu1 %vm252_vm0, %v8251_v11 }
 0x388   :  { %6664 = vmatmul.msk.f32.gmra.mxu2 %vm252_vm0, %v8251_v11  ;;  %6666 = vmatmul.msk.f32.gmra.mxu3 %vm252_vm0, %v8251_v11 }
 0x389   :  { %1733 = vmatpush.msrb.mxu0 %v1348_v28  ;;  %1756 = vmatpush.msrb.mxu1 %v1349_v29  ;;  %v3230_v28 = vld [vmem:[#allocation13 + $0x60] sm:$0xff] }
 0x38a   :  { %1779 = vmatpush.msrb.mxu2 %v1350_v49  ;;  %1802 = vmatpush.msrb.mxu3 %v1351_v55  ;;  %v3262_v29 = vld [vmem:[#allocation13 + $0x160] sm:$0xff]  ;;  %v3300_v49 = vld [vmem:[#allocation13 + $0x290] sm:$0xff]  ;;  %v3754_v55 = vunpack.c.l.bf16 %v3230_v28 }
 0x38b   :  { %v3818_v30 = vunpack.c.l.bf16 %v3262_v29  ;;  %v3894_v31 = vunpack.c.l.bf16 %v3300_v49 }
 0x38f   :  { %6667 = vmatmul.msk.f32.vlgmr.msra.gmra.mxu0 %vm252_vm0, %v8240_v63  ;;  %6669 = vmatmul.msk.f32.vlgmr.msra.gmra.mxu1 %vm252_vm0, %v8240_v63 }
 0x390   :  { %6671 = vmatmul.msk.f32.vlgmr.msra.gmra.mxu2 %vm252_vm0, %v8240_v63  ;;  %6673 = vmatmul.msk.f32.vlgmr.msra.gmra.mxu3 %vm252_vm0, %v8240_v63 }
 0x391   :  { %4764 = vmatpush.msra.mxu0 %v3790_v33  ;;  %4787 = vmatpush.msra.mxu1 %v3854_v23  ;;  %v3298_v33 = vld [vmem:[#allocation13 + $0x280] sm:$0xff]  ;;  %v3750_v23 = vunpack.c.l.bf16 %v3228_v37 }
 0x392   :  { %4810 = vmatpush.msra.mxu2 %v3918_v42  ;;  %4833 = vmatpush.msra.mxu3 %v3982_v38  ;;  %v3890_v35 = vunpack.c.l.bf16 %v3298_v33  ;;  %v3330_v42 = vld [vmem:[#allocation13 + $0x380] sm:$0xff] }
 0x393   :  { %4765 = vmatpush.msra.mxu0 %v3786_v39  ;;  %4788 = vmatpush.msra.mxu1 %v3850_v40  ;;  %v3954_v38 = vunpack.c.l.bf16 %v3330_v42  ;;  %v3226_v39 = vld [vmem:[#allocation13 + $0x40] sm:$0xff] }
 0x394   :  { %4811 = vmatpush.msra.mxu2 %v3914_v53  ;;  %v3258_v40 = vld [vmem:[#allocation13 + $0x140] sm:$0xff]  ;;  %v3746_v44 = vunpack.c.l.bf16 %v3226_v39 }
 0x395   :  { %4766 = vmatpush.msra.mxu0 %v3782_v41  ;;  %4789 = vmatpush.msra.mxu1 %v3846_v43  ;;  %v3296_v41 = vld [vmem:[#allocation13 + $0x270] sm:$0xff]  ;;  %v3810_v46 = vunpack.c.l.bf16 %v3258_v40 }
 0x396   :  { %4812 = vmatpush.msra.mxu2 %v3910_v54  ;;  %v8309_v43 = vld [vmem:[#allocation11] sm:$0xff] }
 0x397   :  { %6668 = vmatmul.msk.f32.gmra.mxu0 %vm252_vm0, %v8251_v11  ;;  %6670 = vmatmul.msk.f32.gmra.mxu1 %vm252_vm0, %v8251_v11  ;;  %v1404_v52 = vperm.slane %v8309_v43, 0  ;;  %v1405_v45 = vperm.slane %v8309_v43, 1  ;;  %v1406_v57 = vperm.slane %v8309_v43, 2  ;;  %v1407_v2 = vperm.slane %v8309_v43, 3 }
 0x398   :  { %6672 = vmatmul.msk.f32.gmra.mxu2 %vm252_vm0, %v8251_v11  ;;  %6674 = vmatmul.msk.f32.gmra.mxu3 %vm252_vm0, %v8251_v11 }
 0x399   :  { %4767 = vmatpush.msra.mxu0 %v3778_v32  ;;  %4790 = vmatpush.msra.mxu1 %v3842_v48  ;;  %v3886_v32 = vunpack.c.l.bf16 %v3296_v41  ;;  %v3328_v48 = vld [vmem:[#allocation13 + $0x370] sm:$0xff] }
 0x39a   :  { %4813 = vmatpush.msra.mxu2 %v3906_v13  ;;  %v3950_v50 = vunpack.c.l.bf16 %v3328_v48 }
 0x39b   :  { %4768 = vmatpush.msra.mxu0 %v3774_v58  ;;  %4791 = vmatpush.msra.mxu1 %v3838_v4 }
 0x39c   :  { %4814 = vmatpush.msra.mxu2 %v3902_v21 }
 0x39d   :  { %4769 = vmatpush.msra.mxu0 %v3770_v60  ;;  %4792 = vmatpush.msra.mxu1 %v3834_v61 }
 0x39e   :  { %4815 = vmatpush.msra.mxu2 %v3898_v27  ;;  %v3326_v27 = vld [vmem:[#allocation13 + $0x360] sm:$0xff] }
 0x39f   :  { %6675 = vmatmul.msk.f32.vlgmr.msrb.gmra.mxu0 %vm252_vm0, %v8240_v63  ;;  %6677 = vmatmul.msk.f32.vlgmr.msrb.gmra.mxu1 %vm252_vm0, %v8240_v63  ;;  %v3946_v59 = vunpack.c.l.bf16 %v3326_v27 }
 0x3a0   :  { %6679 = vmatmul.msk.f32.vlgmr.msrb.gmra.mxu2 %vm252_vm0, %v8240_v63  ;;  %6681 = vmatmul.msk.f32.vlgmr.msrb.gmra.mxu3 %vm252_vm0, %v8240_v63  ;;  %v3978_v63 = vunpack.c.l.bf16 %v3342_v56 }
 0x3a1   :  { %4793 = vmatpush.msra.mxu1 %v3830_v12  ;;  %4816 = vmatpush.msra.mxu2 %v3894_v31 }
 0x3a2   :  { %4834 = vmatpush.msra.mxu3 %v3978_v63 }
 0x3a3   :  { %4794 = vmatpush.msra.mxu1 %v3826_v20  ;;  %4817 = vmatpush.msra.mxu2 %v3890_v35 }
 0x3a4   :  { %4835 = vmatpush.msra.mxu3 %v3974_v62 }
 0x3a5   :  { %4795 = vmatpush.msra.mxu1 %v3822_v26  ;;  %4818 = vmatpush.msra.mxu2 %v3886_v32  ;;  %v3294_v26 = vld [vmem:[#allocation13 + $0x260] sm:$0xff] }
 0x3a6   :  { %4836 = vmatpush.msra.mxu3 %v3970_v15  ;;  %v3882_v31 = vunpack.c.l.bf16 %v3294_v26 }
 0x3a7   :  { %6676 = vmatmul.msk.f32.gmra.mxu0 %vm252_vm0, %v8251_v11  ;;  %6678 = vmatmul.msk.f32.gmra.mxu1 %vm252_vm0, %v8251_v11 }
 0x3a8   :  { %6680 = vmatmul.msk.f32.gmra.mxu2 %vm252_vm0, %v8251_v11  ;;  %6682 = vmatmul.msk.f32.gmra.mxu3 %vm252_vm0, %v8251_v11  ;;  %v3766_v11 = vunpack.c.l.bf16 %v3236_v6 }
 0x3a9   :  { %4837 = vmatpush.msra.mxu3 %v3966_v24  ;;  %4796 = vmatpush.msra.mxu1 %v3818_v30  ;;  %v3256_v24 = vld [vmem:[#allocation13 + $0x130] sm:$0xff] }
 0x3aa   :  { %4770 = vmatpush.msra.mxu0 %v3766_v11  ;;  %v3806_v29 = vunpack.c.l.bf16 %v3256_v24  ;;  %4819 = vmatpush.msra.mxu2 %v3882_v31 }
 0x3ab   :  { %4838 = vmatpush.msra.mxu3 %v3962_v3  ;;  %4797 = vmatpush.msra.mxu1 %v3814_v34 }
 0x3ac   :  { %4771 = vmatpush.msra.mxu0 %v3762_v19 }
 0x3ad   :  { %4839 = vmatpush.msra.mxu3 %v3958_v9  ;;  %4798 = vmatpush.msra.mxu1 %v3810_v46 }
 0x3ae   :  { %4772 = vmatpush.msra.mxu0 %v3758_v10  ;;  %v3742_v10 = vunpack.c.l.bf16 %v3224_v22 }
 0x3af   :  { %4840 = vmatpush.msra.mxu3 %v3954_v38  ;;  %4799 = vmatpush.msra.mxu1 %v3806_v29 }
 0x3b0   :  { %4773 = vmatpush.msra.mxu0 %v3754_v55 }
 0x3b1   :  { %4841 = vmatpush.msra.mxu3 %v3950_v50 }
 0x3b2   :  { %4774 = vmatpush.msra.mxu0 %v3750_v23 }
 0x3b3   :  { %4842 = vmatpush.msra.mxu3 %v3946_v59 }
 0x3b4   :  { %4775 = vmatpush.msra.mxu0 %v3746_v44 }
 0x3b6   :  { %4776 = vmatpush.msra.mxu0 %v3742_v10 }
 0x3e4   :  { %v1459_v58 = vpop.f32.mrf.mxu0  ;;  %v1482_v4 = vpop.f32.mrf.mxu1 }
 0x3e5   :  { %v8315_v53 = vadd.f32 %v1459_v58, %v1404_v52  ;;  %v8319_v56 = vadd.f32 %v1482_v4, %v1405_v45  ;;  %v3222_v58 = vld [vmem:[#allocation13 + $0x20] sm:$0xff] }
 0x3e7   :  { %v8322_v63 = vmul.f32 0.70710677, %v8315_v53  ;;  %v8325_v51 = vmul.f32 0.70710677, %v8319_v56 }
 0x3e9   :  { %v1874_v60 = vmul.f32 %v8322_v63, %v8322_v63  ;;  %v1914_v61 = vmul.f32 %v8325_v51, %v8325_v51 }
 0x3eb   :  { %v8333_v54 = vmin.f32 %v1874_v60, 16.0  ;;  %v8335_v5 = vmin.f32 %v1914_v61, 16.0  ;;  %v1505_v62 = vpop.f32.mrf.mxu2  ;;  %v1528_v6 = vpop.f32.mrf.mxu3 }
 0x3ec   :  { %v8339_v7 = vadd.f32 %v1505_v62, %v1406_v57  ;;  %v8343_v8 = vadd.f32 %v1528_v6, %v1407_v2 }
 0x3ed   :  { %v1876_v11 = vmul.f32 2.1237322e-06, %v8333_v54  ;;  %v1887_v12 = vmul.f32 3.8918573e-05, %v8333_v54  ;;  %v1916_v13 = vmul.f32 2.1237322e-06, %v8335_v5 }
 0x3ee   :  { %v1927_v14 = vmul.f32 3.8918573e-05, %v8335_v5  ;;  %v8350_v15 = vmul.f32 0.70710677, %v8339_v7  ;;  %v8355_v21 = vmul.f32 0.70710677, %v8343_v8 }
 0x3ef   :  { %v1877_v16 = vadd.f32 0.00028619796, %v1876_v11  ;;  %v1888_v17 = vadd.f32 0.001143296, %v1887_v12  ;;  %v1917_v18 = vadd.f32 0.00028619796, %v1916_v13 }
 0x3f0   :  { %v1928_v19 = vadd.f32 0.001143296, %v1927_v14  ;;  %v1954_v20 = vmul.f32 %v8350_v15, %v8350_v15  ;;  %v1994_v28 = vmul.f32 %v8355_v21, %v8355_v21 }
 0x3f1   :  { %v1878_v25 = vmul.f32 %v1877_v16, %v8333_v54  ;;  %v1889_v1 = vmul.f32 %v1888_v17, %v8333_v54  ;;  %v1918_v47 = vmul.f32 %v1917_v18, %v8335_v5  ;;  %v3738_v18 = vunpack.c.l.bf16 %v3222_v58 }
 0x3f2   :  { %v1929_v0 = vmul.f32 %v1928_v19, %v8335_v5  ;;  %v8361_v3 = vmin.f32 %v1954_v20, 16.0  ;;  %v8370_v35 = vmin.f32 %v1994_v28, 16.0 }
 0x3f3   :  { %v1879_v49 = vadd.f32 0.0036580483, %v1878_v25  ;;  %v1890_v55 = vadd.f32 0.014752088, %v1889_v1  ;;  %v1919_v30 = vadd.f32 0.0036580483, %v1918_v47  ;;  %4777 = vmatpush.msra.mxu0 %v3738_v18 }
 0x3f4   :  { %v1930_v36 = vadd.f32 0.014752088, %v1929_v0  ;;  %v1956_v9 = vmul.f32 2.1237322e-06, %v8361_v3  ;;  %v1967_v37 = vmul.f32 3.8918573e-05, %v8361_v3 }
 0x3f5   :  { %v1880_v33 = vmul.f32 %v1879_v49, %v8333_v54  ;;  %v1891_v23 = vmul.f32 %v1890_v55, %v8333_v54  ;;  %v1920_v34 = vmul.f32 %v1919_v30, %v8335_v5  ;;  %v1996_v50 = vmul.f32 2.1237322e-06, %v8370_v35 }
 0x3f6   :  { %v1931_v42 = vmul.f32 %v1930_v36, %v8335_v5  ;;  %v1957_v38 = vadd.f32 0.00028619796, %v1956_v9  ;;  %v1968_v39 = vadd.f32 0.001143296, %v1967_v37  ;;  %v2007_v62 = vmul.f32 3.8918573e-05, %v8370_v35  ;;  %v1485_v36 = vpop.f32.mrf.mxu1 }
 0x3f7   :  { %v1881_v40 = vadd.f32 0.05243302, %v1880_v33  ;;  %v1892_v41 = vadd.f32 0.112945676, %v1891_v23  ;;  %v1921_v44 = vadd.f32 0.05243302, %v1920_v34 }
 0x3f8   :  { %v1932_v46 = vadd.f32 0.112945676, %v1931_v42  ;;  %v1958_v32 = vmul.f32 %v1957_v38, %v8361_v3  ;;  %v1969_v48 = vmul.f32 %v1968_v39, %v8361_v3  ;;  %v1997_v13 = vadd.f32 0.00028619796, %v1996_v50  ;;  %v3254_v38 = vld [vmem:[#allocation13 + $0x120] sm:$0xff] }
 0x3f9   :  { %v1882_v4 = vmul.f32 %v1881_v40, %v8333_v54  ;;  %v1893_v60 = vmul.f32 %v1892_v41, %v8333_v54  ;;  %v1922_v61 = vmul.f32 %v1921_v44, %v8335_v5  ;;  %v2008_v1 = vadd.f32 0.001143296, %v2007_v62 }
 0x3fa   :  { %v1933_v6 = vmul.f32 %v1932_v46, %v8335_v5  ;;  %v1959_v11 = vadd.f32 0.0036580483, %v1958_v32  ;;  %v1970_v12 = vadd.f32 0.014752088, %v1969_v48  ;;  %v1998_v24 = vmul.f32 %v1997_v13, %v8370_v35 }
 0x3fb   :  { %v1883_v14 = vadd.f32 0.18741608, %v1882_v4  ;;  %v1894_v16 = vadd.f32 0.4994258, %v1893_v60  ;;  %v1923_v17 = vadd.f32 0.18741608, %v1922_v61  ;;  %v2009_v31 = vmul.f32 %v2008_v1, %v8370_v35 }
 0x3fc   :  { %v1934_v19 = vadd.f32 0.4994258, %v1933_v6  ;;  %v1960_v20 = vmul.f32 %v1959_v11, %v8361_v3  ;;  %v1971_v22 = vmul.f32 %v1970_v12, %v8361_v3  ;;  %v1999_v28 = vadd.f32 0.0036580483, %v1998_v24 }
 0x3fd   :  { %v1895_v25 = vmul.f32 %v1894_v16, %v8333_v54  ;;  %v1884_v47 = vmul.f32 %v1883_v14, %v8333_v54  ;;  %v1924_v29 = vmul.f32 %v1923_v17, %v8335_v5  ;;  %v1462_v54 = vpop.f32.mrf.mxu0  ;;  %v8398_v37 = vmul.f32 0.5, %v8315_v53 }
 0x3fe   :  { %v1935_v10 = vmul.f32 %v1934_v19, %v8335_v5  ;;  %v1961_v26 = vadd.f32 0.05243302, %v1960_v20  ;;  %v1972_v27 = vadd.f32 0.112945676, %v1971_v22  ;;  %v8401_v5 = vmul.f32 0.5, %v8319_v56  ;;  %v3292_v20 = vld [vmem:[#allocation13 + $0x250] sm:$0xff] }
 0x3ff   :  { %v8387_v0 = vadd.f32 1.0, %v1895_v25  ;;  %v1885_v9 = vadd.f32 1.1283791, %v1884_v47  ;;  %v2000_v59 = vmul.f32 %v1999_v28, %v8370_v35  ;;  %v8404_v33 = vadd.f32 1.1283791, %v1924_v29  ;;  %v3324_v25 = vld [vmem:[#allocation13 + $0x350] sm:$0xff] }
 0x400   :  { %v8390_v49 = vadd.f32 1.0, %v1935_v10  ;;  %v1973_v55 = vmul.f32 %v1972_v27, %v8361_v3  ;;  %v1962_v30 = vmul.f32 %v1961_v26, %v8361_v3  ;;  %v8408_v34 = vadd.f32 %v1462_v54, %v1404_v52 }
 0x401   :  { %6934 = vrcp.f32 %v8387_v0  ;;  %v8412_v42 = vadd.f32 %v1485_v36, %v1405_v45  ;;  %v1906_v53 = vand.u32 2147483647, %v8387_v0  ;;  %v2010_v40 = vadd.f32 0.014752088, %v2009_v31 }
 0x402   :  { %6936 = vrcp.f32 %v8390_v49  ;;  %v1974_v23 = vadd.f32 0.4994258, %v1973_v55  ;;  %v1963_v39 = vadd.f32 0.18741608, %v1962_v30  ;;  %v8416_v56 = vmul.f32 %v1885_v9, %v8322_v63 }
 0x403   :  { %vm1902_vm0 = vweird.f32 %v8387_v0  ;;  %v1908_v41 = vand.u32 2147483648, %v8387_v0  ;;  %vm1942_vm1 = vweird.f32 %v8390_v49  ;;  %v1946_v45 = vand.u32 2147483647, %v8390_v49 }
 0x404   :  { %v1975_v44 = vmul.f32 %v1974_v23, %v8361_v3  ;;  %v2001_v46 = vadd.f32 0.05243302, %v2000_v59  ;;  %v2011_v32 = vmul.f32 %v2010_v40, %v8370_v35  ;;  %v3802_v48 = vunpack.c.l.bf16 %v3254_v38 }
 0x405   :  { %v8428_v4 = vmul.f32 0.70710677, %v8408_v34  ;;  %v8431_v60 = vmul.f32 0.70710677, %v8412_v42  ;;  %vm8433_vm6 = vcmp.eq.f32.partialorder %v1906_v53, 8.507059e+37  ;;  %v1964_v6 = vmul.f32 %v1963_v39, %v8361_v3 }
 0x406   :  { %v8425_v63 = vadd.f32 1.0, %v1975_v44  ;;  %v2012_v11 = vadd.f32 0.112945676, %v2011_v32  ;;  %4800 = vmatpush.msra.mxu1 %v3802_v48  ;;  %v1909_v13 = vor.u32 1.1754944e-38, %v1908_v41  ;;  %v1948_v14 = vand.u32 2147483648, %v8390_v49 }
 0x407   :  { %v6935_v52 = vpop.eup %6934  ;;  %vm8441_vm7 = vcmp.eq.f32.partialorder %v1946_v45, 8.507059e+37  ;;  %v2002_v18 = vmul.f32 %v2001_v46, %v8370_v35  ;;  %v2514_v3 = vmul.f32 %v8428_v4, %v8428_v4  ;;  %v2554_v24 = vmul.f32 %v8431_v60, %v8431_v60 }
 0x408   :  { %v6937_v50 = vpop.eup %6936  ;;  %v1898_v58 = vmul.f32 %v6935_v52, %v8387_v0  ;;  %6938 = vrcp.f32 %v8425_v63  ;;  %v2013_v19 = vmul.f32 %v2012_v11, %v8370_v35  ;;  %vm1903_vm8 = vweird.f32 %v6935_v52 }
 0x409   :  { %v1938_v62 = vmul.f32 %v6937_v50, %v8390_v49  ;;  %vm1943_vm9 = vweird.f32 %v6937_v50  ;;  %v1965_v47 = vadd.f32 1.1283791, %v1964_v6  ;;  %v8451_v27 = vmin.f32 %v2514_v3, 16.0  ;;  %vm8457_vm10 = vmor %vm1902_vm0, %vm1903_vm8 }
 0x40a   :  { %v1899_v12 = vsub.f32 1.0, %v1898_v58  ;;  %v2014_v10 = vadd.f32 0.4994258, %v2013_v19  ;;  %v8453_v28 = vmin.f32 %v2554_v24, 16.0  ;;  %v3878_v29 = vunpack.c.l.bf16 %v3292_v20  ;;  %vm8468_vm11 = vmor %vm1942_vm1, %vm1943_vm9 }
 0x40b   :  { %v1939_v16 = vsub.f32 1.0, %v1938_v62  ;;  %v2003_v31 = vadd.f32 0.18741608, %v2002_v18  ;;  %v3942_v36 = vunpack.c.l.bf16 %v3324_v25  ;;  %v2516_v0 = vmul.f32 2.1237322e-06, %v8451_v27 }
 0x40c   :  { %v1900_v22 = vmul.f32 %v6935_v52, %v1899_v12  ;;  %v2015_v54 = vmul.f32 %v2014_v10, %v8370_v35  ;;  %v2527_v38 = vmul.f32 3.8918573e-05, %v8451_v27  ;;  %v2556_v53 = vmul.f32 2.1237322e-06, %v8453_v28  ;;  %4820 = vmatpush.msra.mxu2 %v3878_v29  ;;  %v3252_v10 = vld [vmem:[#allocation13 + $0x110] sm:$0xff] }
 0x40d   :  { %v1940_v1 = vmul.f32 %v6937_v50, %v1939_v16  ;;  %v1949_v40 = vor.u32 1.1754944e-38, %v1948_v14  ;;  %v1986_v49 = vand.u32 2147483647, %v8425_v63  ;;  %4843 = vmatpush.msra.mxu3 %v3942_v36  ;;  %v2517_v46 = vadd.f32 0.00028619796, %v2516_v0  ;;  %v3220_v14 = vld [vmem:[#allocation13 + $0x10] sm:$0xff] }
 0x40e   :  { %v1901_v26 = vadd.f32 %v6935_v52, %v1900_v22  ;;  %v8462_v9 = vpop.eup %6938  ;;  %v8483_v45 = vadd.f32 1.0, %v2015_v54  ;;  %v2004_v48 = vmul.f32 %v2003_v31, %v8370_v35  ;;  %v2528_v58 = vadd.f32 0.001143296, %v2527_v38  ;;  %v3290_v31 = vld [vmem:[#allocation13 + $0x240] sm:$0xff] }
 0x40f   :  { %v1941_v30 = vadd.f32 %v6937_v50, %v1940_v1  ;;  %v1978_v41 = vmul.f32 %v8462_v9, %v8425_v63  ;;  %v1926_v62 = vmul.f32 %v8404_v33, %v8325_v51  ;;  %v8491_v11 = vmul.f32 %v1965_v47, %v8350_v15  ;;  %v3322_v0 = vld [vmem:[#allocation13 + $0x340] sm:$0xff] }
 0x410   :  { %v1905_v59 = vsel %vm8457_vm10, %v6935_v52, %v1901_v26  ;;  %v1988_v52 = vand.u32 2147483648, %v8425_v63  ;;  %6940 = vrcp.f32 %v8483_v45  ;;  %vm8496_vm12 = vcmp.eq.f32.partialorder %v1986_v49, 8.507059e+37 }
 0x411   :  { %v1945_v39 = vsel %vm8468_vm11, %v6937_v50, %v1941_v30  ;;  %v1910_v44 = vsel %vm8433_vm6, %v1909_v13, %v1905_v59  ;;  %v1979_v32 = vsub.f32 1.0, %v1978_v41  ;;  %v2557_v50 = vadd.f32 0.00028619796, %v2556_v53 }
 0x412   :  { %v1950_v6 = vsel %vm8441_vm7, %v1949_v40, %v1945_v39  ;;  %v1911_v61 = vmul.f32 %v1910_v44, %v8416_v56  ;;  %v2518_v35 = vmul.f32 %v2517_v46, %v8451_v27  ;;  %vm1983_vm13 = vweird.f32 %v8462_v9  ;;  %v1531_v46 = vpop.f32.mrf.mxu3 }
 0x413   :  { %v1980_v12 = vmul.f32 %v8462_v9, %v1979_v32  ;;  %v1989_v51 = vor.u32 1.1754944e-38, %v1988_v52  ;;  %v2529_v33 = vmul.f32 %v2528_v58, %v8451_v27  ;;  %v2558_v15 = vmul.f32 %v2557_v50, %v8453_v28 }
 0x414   :  { %v1951_v16 = vmul.f32 %v1950_v6, %v1926_v62  ;;  %v8505_v56 = vadd.f32 1.1283791, %v2004_v48  ;;  %v2519_v18 = vadd.f32 0.0036580483, %v2518_v35  ;;  %vm1982_vm14 = vweird.f32 %v8425_v63 }
 0x415   :  { %v1981_v17 = vadd.f32 %v8462_v9, %v1980_v12  ;;  %v2530_v19 = vadd.f32 0.014752088, %v2529_v33  ;;  %v2559_v20 = vadd.f32 0.0036580483, %v2558_v15  ;;  %v2567_v22 = vmul.f32 3.8918573e-05, %v8453_v28  ;;  %vm8509_vm15 = vmor %vm1982_vm14, %vm1983_vm13 }
 0x416   :  { %v6683_v3 = vclamps-f32 %v1911_v61, 1.0  ;;  %v2026_v25 = vand.u32 2147483647, %v8483_v45  ;;  %v2520_v1 = vmul.f32 %v2519_v18, %v8451_v27  ;;  %v3734_v47 = vunpack.c.l.bf16 %v3220_v14  ;;  %v6941_v26 = vpop.eup %6940 }
 0x417   :  { %v1985_v63 = vsel %vm8509_vm15, %v8462_v9, %v1981_v17  ;;  %v2531_v29 = vmul.f32 %v2530_v19, %v8451_v27  ;;  %v2560_v55 = vmul.f32 %v2559_v20, %v8453_v28  ;;  %v2568_v30 = vadd.f32 0.001143296, %v2567_v22  ;;  %v1508_v9 = vpop.f32.mrf.mxu2 }
 0x418   :  { %v6684_v54 = vclamps-f32 %v1951_v16, 1.0  ;;  %v2018_v36 = vmul.f32 %v6941_v26, %v8483_v45  ;;  %v2028_v59 = vand.u32 2147483648, %v8483_v45  ;;  %v2521_v23 = vadd.f32 0.05243302, %v2520_v1  ;;  %4778 = vmatpush.msra.mxu0 %v3734_v47 }
 0x419   :  { %v2532_v38 = vadd.f32 0.112945676, %v2531_v29  ;;  %v2561_v53 = vadd.f32 0.05243302, %v2560_v55  ;;  %v2569_v39 = vmul.f32 %v2568_v30, %v8453_v28  ;;  %v3798_v40 = vunpack.c.l.bf16 %v3252_v10  ;;  %v3218_v10 = vld [vmem:[#allocation13] sm:$0xff]  ;;  %v3288_v29 = vld [vmem:[#allocation13 + $0x230] sm:$0xff] }
 0x41a   :  { %v1990_v41 = vsel %vm8496_vm12, %v1989_v51, %v1985_v63  ;;  %v2019_v49 = vsub.f32 1.0, %v2018_v36  ;;  %v2522_v44 = vmul.f32 %v2521_v23, %v8451_v27  ;;  %v3874_v52 = vunpack.c.l.bf16 %v3290_v31  ;;  %v3320_v23 = vld [vmem:[#allocation13 + $0x330] sm:$0xff] }
 0x41b   :  { %v2533_v32 = vmul.f32 %v2532_v38, %v8451_v27  ;;  %v2562_v48 = vmul.f32 %v2561_v53, %v8453_v28  ;;  %v2570_v58 = vadd.f32 0.014752088, %v2569_v39  ;;  %4801 = vmatpush.msra.mxu1 %v3798_v40  ;;  %v3938_v50 = vunpack.c.l.bf16 %v3322_v0  ;;  %v3376_v0 = vld [vmem:[#allocation13 + $0x4f0] sm:$0xff] }
 0x41c   :  { %v2020_v62 = vmul.f32 %v6941_v26, %v2019_v49  ;;  %vm2023_vm2 = vweird.f32 %v6941_v26  ;;  %v2523_v6 = vadd.f32 0.18741608, %v2522_v44  ;;  %4821 = vmatpush.msra.mxu2 %v3874_v52  ;;  %v8530_v61 = vadd.f32 %v1508_v9, %v1406_v57 }
 0x41d   :  { %v2534_v12 = vadd.f32 0.4994258, %v2533_v32  ;;  %v2563_v13 = vadd.f32 0.18741608, %v2562_v48  ;;  %v2571_v35 = vmul.f32 %v2570_v58, %v8453_v28  ;;  %4844 = vmatpush.msra.mxu3 %v3938_v50  ;;  %v8535_v51 = vadd.f32 %v1531_v46, %v1407_v2 }
 0x41e   :  { %v3154_v33 = vadd.f32 1.0, %v6683_v3  ;;  %v3155_v15 = vadd.f32 1.0, %v6684_v54  ;;  %v2021_v14 = vadd.f32 %v6941_v26, %v2020_v62  ;;  %vm2022_vm3 = vweird.f32 %v8483_v45  ;;  %v3408_v62 = vld [vmem:[#allocation13 + $0x5f0] sm:$0xff] }
 0x41f   :  { %vm2024_vm4 = vmor %vm2022_vm3, %vm2023_vm2  ;;  %v2029_v16 = vor.u32 1.1754944e-38, %v2028_v59  ;;  %v2535_v17 = vmul.f32 %v2534_v12, %v8451_v27  ;;  %v2572_v57 = vadd.f32 0.112945676, %v2571_v35  ;;  %v8540_v18 = vmul.f32 0.70710677, %v8530_v61 }
 0x420   :  { %v8543_v19 = vmul.f32 %v1990_v41, %v8491_v11  ;;  %v2025_v20 = vsel %vm2024_vm4, %v6941_v26, %v2021_v14  ;;  %v2524_v2 = vmul.f32 %v2523_v6, %v8451_v27  ;;  %v8547_v22 = vmul.f32 0.70710677, %v8535_v51 }
 0x421   :  { %vm2027_vm5 = vcmp.eq.f32.partialorder %v2026_v25, 8.507059e+37  ;;  %v8549_v3 = vadd.f32 1.0, %v2535_v17  ;;  %v2564_v45 = vmul.f32 %v2563_v13, %v8453_v28  ;;  %v2573_v24 = vmul.f32 %v2572_v57, %v8453_v28  ;;  %v3286_v57 = vld [vmem:[#allocation13 + $0x220] sm:$0xff] }
 0x422   :  { %v2030_v1 = vsel %vm2027_vm5, %v2029_v16, %v2025_v20  ;;  %v8554_v47 = vmul.f32 0.5, %v8408_v34  ;;  %v2594_v11 = vmul.f32 %v8540_v18, %v8540_v18  ;;  %v2634_v27 = vmul.f32 %v8547_v22, %v8547_v22  ;;  %v3250_v34 = vld [vmem:[#allocation13 + $0x100] sm:$0xff] }
 0x423   :  { %v8561_v26 = vmul.f32 %v3154_v33, %v8398_v37  ;;  %v8564_v25 = vmul.f32 %v3155_v15, %v8401_v5  ;;  %v2006_v63 = vmul.f32 %v8505_v56, %v8355_v21  ;;  %6942 = vrcp.f32 %v8549_v3 }
 0x424   :  { %v6685_v55 = vclamps-f32 %v8543_v19, 1.0  ;;  %v2525_v30 = vadd.f32 1.1283791, %v2524_v2  ;;  %v2574_v31 = vadd.f32 0.4994258, %v2573_v24  ;;  %v8570_v54 = vmin.f32 %v2594_v11, 16.0  ;;  %v1551_v24 = vpop.f32.mrf.mxu0 }
 0x425   :  { %10706 = vst [vmem:[#allocation23_spill] sm:$0xff] %v8561_v26  ;;  %v8572_v36 = vmul.f32 %v2030_v1, %v2006_v63  ;;  %v8574_v37 = vadd.f32 1.1283791, %v2564_v45  ;;  %v8576_v59 = vmin.f32 %v2634_v27, 16.0  ;;  %v3730_v5 = vunpack.c.l.bf16 %v3218_v10  ;;  %v3374_v19 = vld [vmem:[#allocation13 + $0x4e0] sm:$0xff] }
 0x426   :  { %10707 = vst [vmem:[#allocation24_spill] sm:$0xff] %v8564_v25  ;;  %v2546_v21 = vand.u32 2147483647, %v8549_v3  ;;  %v2575_v56 = vmul.f32 %v2574_v31, %v8453_v28  ;;  %v2596_v38 = vmul.f32 2.1237322e-06, %v8570_v54  ;;  %v3794_v9 = vunpack.c.l.bf16 %v3250_v34 }
 0x427   :  { %v2607_v53 = vmul.f32 3.8918573e-05, %v8570_v54  ;;  %v2636_v39 = vmul.f32 2.1237322e-06, %v8576_v59  ;;  %v2647_v40 = vmul.f32 3.8918573e-05, %v8576_v59  ;;  %4779 = vmatpush.msra.mxu0 %v3730_v5  ;;  %v3870_v41 = vunpack.c.l.bf16 %v3288_v29 }
 0x428   :  { %v2548_v49 = vand.u32 2147483648, %v8549_v3  ;;  %v8585_v44 = vadd.f32 1.0, %v2575_v56  ;;  %v2597_v52 = vadd.f32 0.00028619796, %v2596_v38  ;;  %4780 = vmatmul.f32.vlgmr.msra.gmra.mxu0 %v8561_v26  ;;  %4802 = vmatpush.msra.mxu1 %v3794_v9  ;;  %v3934_v58 = vunpack.c.l.bf16 %v3320_v23 }
 0x429   :  { %v2608_v46 = vadd.f32 0.001143296, %v2607_v53  ;;  %v6943_v28 = vpop.eup %6942  ;;  %v2637_v32 = vadd.f32 0.00028619796, %v2636_v39  ;;  %v2648_v48 = vadd.f32 0.001143296, %v2647_v40  ;;  %4822 = vmatpush.msra.mxu2 %v3870_v41  ;;  %v4046_v50 = vunpack.c.l.bf16 %v3376_v0  ;;  %4803 = vmatmul.f32.vlgmr.msra.gmra.mxu1 %v8564_v25 }
 0x42a   :  { %v2526_v6 = vmul.f32 %v2525_v30, %v8428_v4  ;;  %v2538_v12 = vmul.f32 %v6943_v28, %v8549_v3  ;;  %vm2542_vm0 = vweird.f32 %v8549_v3  ;;  %6944 = vrcp.f32 %v8585_v44  ;;  %4845 = vmatpush.msra.mxu3 %v3934_v58 }
 0x42b   :  { %v6686_v13 = vclamps-f32 %v8572_v36, 1.0  ;;  %vm8594_vm1 = vcmp.eq.f32.partialorder %v2546_v21, 8.507059e+37  ;;  %v2598_v33 = vmul.f32 %v2597_v52, %v8570_v54  ;;  %v2609_v15 = vmul.f32 %v2608_v46, %v8570_v54  ;;  %4856 = vmatpush.msrb.mxu0 %v4046_v50 }
 0x42c   :  { %v2539_v4 = vsub.f32 1.0, %v2538_v12  ;;  %v2638_v14 = vmul.f32 %v2637_v32, %v8576_v59  ;;  %v2649_v16 = vmul.f32 %v2648_v48, %v8576_v59  ;;  %v4110_v17 = vunpack.c.l.bf16 %v3408_v62 }
 0x42d   :  { %vm2543_vm6 = vweird.f32 %v6943_v28  ;;  %v2549_v20 = vor.u32 1.1754944e-38, %v2548_v49  ;;  %v2599_v2 = vadd.f32 0.0036580483, %v2598_v33  ;;  %v2610_v45 = vadd.f32 0.014752088, %v2609_v15 }
 0x42e   :  { %v2540_v1 = vmul.f32 %v6943_v28, %v2539_v4  ;;  %v2639_v11 = vadd.f32 0.0036580483, %v2638_v14  ;;  %v2650_v27 = vadd.f32 0.014752088, %v2649_v16  ;;  %4879 = vmatpush.msrb.mxu1 %v4110_v17  ;;  %v1408_v10 = vperm.slane %v8309_v43, 4  ;;  %vm2544_vm7 = vmor %vm2542_vm0, %vm2543_vm6 }
 0x42f   :  { %v2586_v63 = vand.u32 2147483647, %v8585_v44  ;;  %v2600_v34 = vmul.f32 %v2599_v2, %v8570_v54  ;;  %v2611_v29 = vmul.f32 %v2610_v45, %v8570_v54  ;;  %v3866_v30 = vunpack.c.l.bf16 %v3286_v57 }
 0x430   :  { %v6945_v31 = vpop.eup %6944  ;;  %v2541_v5 = vadd.f32 %v6943_v28, %v2540_v1  ;;  %v2640_v23 = vmul.f32 %v2639_v11, %v8576_v59  ;;  %v2651_v0 = vmul.f32 %v2650_v27, %v8576_v59  ;;  %v8610_v21 = vadd.f32 %v1551_v24, %v1408_v10 }
 0x431   :  { %v2578_v56 = vmul.f32 %v6945_v31, %v8585_v44  ;;  %v2588_v38 = vand.u32 2147483648, %v8585_v44  ;;  %v2601_v53 = vadd.f32 0.05243302, %v2600_v34  ;;  %v2612_v39 = vadd.f32 0.112945676, %v2611_v29  ;;  %4823 = vmatpush.msra.mxu2 %v3866_v30 }
 0x432   :  { %v2545_v40 = vsel %vm2544_vm7, %v6943_v28, %v2541_v5  ;;  %v2641_v9 = vadd.f32 0.05243302, %v2640_v23  ;;  %v2652_v41 = vadd.f32 0.112945676, %v2651_v0  ;;  %v1409_v49 = vperm.slane %v8309_v43, 5  ;;  %v1574_v28 = vpop.f32.mrf.mxu1  ;;  %v3318_v23 = vld [vmem:[#allocation13 + $0x320] sm:$0xff] }
 0x433   :  { %v2550_v52 = vsel %vm8594_vm1, %v2549_v20, %v2545_v40  ;;  %v2579_v46 = vsub.f32 1.0, %v2578_v56  ;;  %v2602_v32 = vmul.f32 %v2601_v53, %v8570_v54  ;;  %v2613_v3 = vmul.f32 %v2612_v39, %v8570_v54  ;;  %v3284_v53 = vld [vmem:[#allocation13 + $0x210] sm:$0xff] }
 0x434   :  { %v2551_v48 = vmul.f32 %v2550_v52, %v2526_v6  ;;  %v2642_v58 = vmul.f32 %v2641_v9, %v8576_v59  ;;  %v2653_v50 = vmul.f32 %v2652_v41, %v8576_v59  ;;  %v8625_v62 = vmul.f32 0.70710677, %v8610_v21 }
 0x435   :  { %v2580_v12 = vmul.f32 %v6945_v31, %v2579_v46  ;;  %vm2583_vm8 = vweird.f32 %v6945_v31  ;;  %v2603_v33 = vadd.f32 0.18741608, %v2602_v32  ;;  %v2614_v15 = vadd.f32 0.4994258, %v2613_v3 }
 0x436   :  { %v6699_v35 = vclamps-f32 %v2551_v48, 1.0  ;;  %v2566_v4 = vmul.f32 %v8574_v37, %v8431_v60  ;;  %v2654_v14 = vadd.f32 0.4994258, %v2653_v50  ;;  %v2034_v6 = vmul.f32 %v8625_v62, %v8625_v62  ;;  %v3316_v48 = vld [vmem:[#allocation13 + $0x310] sm:$0xff] }
 0x437   :  { %v2581_v16 = vadd.f32 %v6945_v31, %v2580_v12  ;;  %vm2582_vm9 = vweird.f32 %v8585_v44  ;;  %v2615_v17 = vmul.f32 %v2614_v15, %v8570_v54  ;;  %v8635_v57 = vadd.f32 %v1574_v28, %v1409_v49  ;;  %v3372_v12 = vld [vmem:[#allocation13 + $0x4d0] sm:$0xff] }
 0x438   :  { %v3170_v20 = vadd.f32 1.0, %v6699_v35  ;;  %vm2584_vm10 = vmor %vm2582_vm9, %vm2583_vm8  ;;  %v2589_v2 = vor.u32 1.1754944e-38, %v2588_v38  ;;  %v2643_v45 = vadd.f32 0.18741608, %v2642_v58  ;;  %v2655_v24 = vmul.f32 %v2654_v14, %v8576_v59 }
 0x439   :  { %v2585_v60 = vsel %vm2584_vm10, %v6945_v31, %v2581_v16  ;;  %vm2587_vm11 = vcmp.eq.f32.partialorder %v2586_v63, 8.507059e+37  ;;  %v2604_v37 = vmul.f32 %v2603_v33, %v8570_v54  ;;  %v8639_v1 = vadd.f32 1.0, %v2615_v17 }
 0x43a   :  { %v8642_v44 = vmul.f32 %v3170_v20, %v8554_v47  ;;  %v2590_v11 = vsel %vm2587_vm11, %v2589_v2, %v2585_v60  ;;  %v8644_v27 = vadd.f32 1.0, %v2655_v24  ;;  %v8646_v34 = vmin.f32 %v2034_v6, 16.0  ;;  %v3282_v20 = vld [vmem:[#allocation13 + $0x200] sm:$0xff] }
 0x43b   :  { %v3156_v29 = vadd.f32 1.0, %v6685_v55  ;;  %v2591_v30 = vmul.f32 %v2590_v11, %v2566_v4  ;;  %6946 = vrcp.f32 %v8639_v1  ;;  %v8652_v63 = vmul.f32 0.70710677, %v8635_v57  ;;  %v3406_v55 = vld [vmem:[#allocation13 + $0x5e0] sm:$0xff] }
 0x43c   :  { %10710 = vst [vmem:[#allocation25_spill] sm:$0xff] %v8642_v44  ;;  %v2644_v54 = vmul.f32 %v2643_v45, %v8576_v59  ;;  %6948 = vrcp.f32 %v8644_v27  ;;  %4783 = vmatmul.f32.gmra.mxu0 %v8642_v44  ;;  %v1812_v47 = vmul.f32 0.5, %v8339_v7  ;;  %v1813_v31 = vmul.f32 0.5, %v8343_v8 }
 0x43d   :  { %v6700_v5 = vclamps-f32 %v2591_v30, 1.0  ;;  %v3157_v0 = vadd.f32 1.0, %v6686_v13  ;;  %v2605_v56 = vadd.f32 1.1283791, %v2604_v37  ;;  %v2047_v38 = vmul.f32 3.8918573e-05, %v8646_v34 }
 0x43e   :  { %v8662_v59 = vmul.f32 %v3156_v29, %v1812_v47  ;;  %v1827_v39 = vmul.f32 0.5, %v8412_v42  ;;  %v2074_v7 = vmul.f32 %v8652_v63, %v8652_v63  ;;  %v2645_v8 = vadd.f32 1.1283791, %v2644_v54  ;;  %v3314_v37 = vld [vmem:[#allocation13 + $0x300] sm:$0xff] }
 0x43f   :  { %v3171_v40 = vadd.f32 1.0, %v6700_v5  ;;  %v2048_v9 = vadd.f32 0.001143296, %v2047_v38  ;;  %v3930_v41 = vunpack.c.l.bf16 %v3318_v23  ;;  %v4042_v52 = vunpack.c.l.bf16 %v3374_v19  ;;  %v3370_v54 = vld [vmem:[#allocation13 + $0x4c0] sm:$0xff] }
 0x440   :  { %10711 = vst [vmem:[#allocation26_spill] sm:$0xff] %v8662_v59  ;;  %v8671_v13 = vmin.f32 %v2074_v7, 16.0  ;;  %v4106_v32 = vunpack.c.l.bf16 %v3406_v55  ;;  %v3862_v3 = vunpack.c.l.bf16 %v3284_v53  ;;  %v8675_v42 = vmul.f32 %v3157_v0, %v1813_v31  ;;  %v3402_v5 = vld [vmem:[#allocation13 + $0x5c0] sm:$0xff]  ;;  %v3440_v7 = vld [vmem:[#allocation13 + $0x6f0] sm:$0xff] }
 0x441   :  { %v8667_v46 = vpop.eup %6946  ;;  %v8669_v36 = vmul.f32 %v3171_v40, %v1827_v39  ;;  %v2606_v50 = vmul.f32 %v2605_v56, %v8540_v18  ;;  %vm2622_vm12 = vweird.f32 %v8639_v1  ;;  %4846 = vmatpush.msra.mxu3 %v3930_v41  ;;  %4857 = vmatpush.msrb.mxu0 %v4042_v52  ;;  %v2626_v33 = vand.u32 2147483647, %v8639_v1  ;;  %v3404_v18 = vld [vmem:[#allocation13 + $0x5d0] sm:$0xff] }
 0x442   :  { %v8673_v58 = vpop.eup %6948  ;;  %10713 = vst [vmem:[#allocation28_spill] sm:$0xff] %v8675_v42  ;;  %v2618_v28 = vmul.f32 %v8667_v46, %v8639_v1  ;;  %v2049_v35 = vmul.f32 %v2048_v9, %v8646_v34  ;;  %v2087_v4 = vmul.f32 3.8918573e-05, %v8671_v13  ;;  %4880 = vmatpush.msrb.mxu1 %v4106_v32  ;;  %4824 = vmatpush.msra.mxu2 %v3862_v3  ;;  %v2628_v6 = vand.u32 2147483648, %v8639_v1  ;;  %v3472_v41 = vld [vmem:[#allocation13 + $0x7f0] sm:$0xff] }
 0x443   :  { %10712 = vst [vmem:[#allocation27_spill] sm:$0xff] %v8669_v36  ;;  %v2658_v15 = vmul.f32 %v8673_v58, %v8644_v27  ;;  %v2646_v16 = vmul.f32 %v2645_v8, %v8547_v22  ;;  %v3926_v17 = vunpack.c.l.bf16 %v3316_v48  ;;  %4806 = vmatmul.f32.gmra.mxu1 %v8669_v36  ;;  %v2666_v45 = vand.u32 2147483647, %v8644_v27 }
 0x444   :  { %v2619_v14 = vsub.f32 1.0, %v2618_v28  ;;  %v2088_v24 = vadd.f32 0.001143296, %v2087_v4  ;;  %v4038_v60 = vunpack.c.l.bf16 %v3372_v12  ;;  %vm2623_vm13 = vweird.f32 %v8667_v46 }
 0x445   :  { %v2659_v2 = vsub.f32 1.0, %v2658_v15  ;;  %v2668_v29 = vand.u32 2147483648, %v8644_v27  ;;  %4847 = vmatpush.msra.mxu3 %v3926_v17  ;;  %v4102_v30 = vunpack.c.l.bf16 %v3404_v18  ;;  %vm2663_vm14 = vweird.f32 %v8673_v58  ;;  %vm2624_vm2 = vmor %vm2622_vm12, %vm2623_vm13  ;;  %v1597_v15 = vpop.f32.mrf.mxu2 }
 0x446   :  { %v2620_v11 = vmul.f32 %v8667_v46, %v2619_v14  ;;  %v2050_v47 = vadd.f32 0.014752088, %v2049_v35  ;;  %4858 = vmatpush.msrb.mxu0 %v4038_v60  ;;  %v3858_v31 = vunpack.c.l.bf16 %v3282_v20  ;;  %vm2662_vm15 = vweird.f32 %v8644_v27  ;;  %v3368_v60 = vld [vmem:[#allocation13 + $0x4b0] sm:$0xff] }
 0x447   :  { %v2660_v22 = vmul.f32 %v8673_v58, %v2659_v2  ;;  %v2089_v19 = vmul.f32 %v2088_v24, %v8671_v13  ;;  %4881 = vmatpush.msrb.mxu1 %v4102_v30  ;;  %v3922_v55 = vunpack.c.l.bf16 %v3314_v37  ;;  %vm2627_vm3 = vcmp.eq.f32.partialorder %v2626_v33, 8.507059e+37  ;;  %vm2664_vm4 = vmor %vm2662_vm15, %vm2663_vm14  ;;  %v1620_v2 = vpop.f32.mrf.mxu3  ;;  %v3470_v30 = vld [vmem:[#allocation13 + $0x7e0] sm:$0xff] }
 0x448   :  { %v2621_v23 = vadd.f32 %v8667_v46, %v2620_v11  ;;  %v2629_v0 = vor.u32 1.1754944e-38, %v2628_v6  ;;  %4825 = vmatpush.msra.mxu2 %v3858_v31  ;;  %v4034_v38 = vunpack.c.l.bf16 %v3370_v54  ;;  %v2669_v27 = vor.u32 1.1754944e-38, %v2668_v29  ;;  %v3400_v11 = vld [vmem:[#allocation13 + $0x5b0] sm:$0xff]  ;;  %v3438_v29 = vld [vmem:[#allocation13 + $0x6e0] sm:$0xff] }
 0x449   :  { %v2661_v56 = vadd.f32 %v8673_v58, %v2660_v22  ;;  %v2036_v39 = vmul.f32 2.1237322e-06, %v8646_v34  ;;  %4848 = vmatpush.msra.mxu3 %v3922_v55  ;;  %v4098_v40 = vunpack.c.l.bf16 %v3402_v5  ;;  %4826 = vmatmul.f32.vlgmr.msra.gmra.mxu2 %v8662_v59  ;;  %vm2667_vm5 = vcmp.eq.f32.partialorder %v2666_v45, 8.507059e+37 }
 0x44a   :  { %v2625_v53 = vsel %vm2624_vm2, %v8667_v46, %v2621_v23  ;;  %v2051_v9 = vmul.f32 %v2050_v47, %v8646_v34  ;;  %4859 = vmatpush.msrb.mxu0 %v4034_v38  ;;  %v2090_v32 = vadd.f32 0.014752088, %v2089_v19  ;;  %4849 = vmatmul.f32.vlgmr.msra.gmra.mxu3 %v8675_v42  ;;  %v4174_v48 = vunpack.c.l.bf16 %v3440_v7 }
 0x44b   :  { %v2630_v1 = vsel %vm2627_vm3, %v2629_v0, %v2625_v53  ;;  %v2665_v8 = vsel %vm2664_vm4, %v8673_v58, %v2661_v56  ;;  %4882 = vmatpush.msrb.mxu1 %v4098_v40  ;;  %v2037_v12 = vadd.f32 0.00028619796, %v2036_v39  ;;  %v4238_v33 = vunpack.c.l.bf16 %v3472_v41  ;;  %v1554_v53 = vpop.f32.mrf.mxu0 }
 0x44c   :  { %v2631_v52 = vmul.f32 %v2630_v1, %v2606_v50  ;;  %v2670_v46 = vsel %vm2667_vm5, %v2669_v27, %v2665_v8  ;;  %v2052_v4 = vadd.f32 0.112945676, %v2051_v9  ;;  %4902 = vmatpush.msrb.mxu2 %v4174_v48  ;;  %v1410_v58 = vperm.slane %v8309_v43, 6 }
 0x44d   :  { %v2671_v3 = vmul.f32 %v2670_v46, %v2646_v16  ;;  %v1828_v18 = vmul.f32 0.5, %v8530_v61  ;;  %v2091_v50 = vmul.f32 %v2090_v32, %v8671_v13  ;;  %4925 = vmatpush.msrb.mxu3 %v4238_v33  ;;  %v1411_v6 = vperm.slane %v8309_v43, 7 }
 0x44e   :  { %v6701_v28 = vclamps-f32 %v2631_v52, 1.0  ;;  %v1829_v16 = vmul.f32 0.5, %v8535_v51  ;;  %v8718_v20 = vadd.f32 %v1597_v15, %v1410_v58  ;;  %v2038_v24 = vmul.f32 %v2037_v12, %v8646_v34  ;;  %v3366_v52 = vld [vmem:[#allocation13 + $0x4a0] sm:$0xff] }
 0x44f   :  { %v6702_v35 = vclamps-f32 %v2671_v3, 1.0  ;;  %v2053_v37 = vmul.f32 %v2052_v4, %v8646_v34  ;;  %v2076_v51 = vmul.f32 2.1237322e-06, %v8671_v13  ;;  %v2092_v54 = vadd.f32 0.112945676, %v2091_v50  ;;  %v1577_v50 = vpop.f32.mrf.mxu1 }
 0x450   :  { %v3172_v14 = vadd.f32 1.0, %v6701_v28  ;;  %v8728_v22 = vmul.f32 0.70710677, %v8718_v20  ;;  %v8732_v47 = vadd.f32 %v1620_v2, %v1411_v6  ;;  %v4030_v31 = vunpack.c.l.bf16 %v3368_v60 }
 0x451   :  { %v3173_v17 = vadd.f32 1.0, %v6702_v35  ;;  %v2039_v5 = vadd.f32 0.0036580483, %v2038_v24  ;;  %v2054_v55 = vadd.f32 0.4994258, %v2053_v37  ;;  %v4094_v0 = vunpack.c.l.bf16 %v3400_v11 }
 0x452   :  { %v8720_v45 = vmul.f32 %v3172_v14, %v1828_v18  ;;  %v2114_v23 = vmul.f32 %v8728_v22, %v8728_v22  ;;  %v8739_v19 = vmul.f32 0.70710677, %v8732_v47  ;;  %4860 = vmatpush.msrb.mxu0 %v4030_v31  ;;  %v4170_v56 = vunpack.c.l.bf16 %v3438_v29 }
 0x453   :  { %v8723_v61 = vmul.f32 %v3173_v17, %v1829_v16  ;;  %v4234_v38 = vunpack.c.l.bf16 %v3470_v30  ;;  %v2077_v27 = vadd.f32 0.00028619796, %v2076_v51  ;;  %v2093_v39 = vmul.f32 %v2092_v54, %v8671_v13  ;;  %4883 = vmatpush.msrb.mxu1 %v4094_v0 }
 0x454   :  { %10714 = vst [vmem:[#allocation29_spill] sm:$0xff] %v8720_v45  ;;  %4829 = vmatmul.f32.gmra.mxu2 %v8720_v45  ;;  %v8742_v40 = vmin.f32 %v2114_v23, 16.0  ;;  %v2154_v7 = vmul.f32 %v8739_v19, %v8739_v19  ;;  %v8748_v1 = vadd.f32 %v1554_v53, %v1408_v10  ;;  %v2040_v8 = vmul.f32 %v2039_v5, %v8646_v34  ;;  %v3386_v45 = vld [vmem:[#allocation13 + $0x540] sm:$0xff] }
 0x455   :  { %10715 = vst [vmem:[#allocation30_spill] sm:$0xff] %v8723_v61  ;;  %4852 = vmatmul.f32.gmra.mxu3 %v8723_v61  ;;  %4903 = vmatpush.msrb.mxu2 %v4170_v56  ;;  %v2055_v9 = vmul.f32 %v2054_v55, %v8646_v34  ;;  %v2078_v46 = vmul.f32 %v2077_v27, %v8671_v13  ;;  %v2094_v32 = vadd.f32 0.4994258, %v2093_v39  ;;  %v4026_v12 = vunpack.c.l.bf16 %v3366_v52  ;;  %v3398_v55 = vld [vmem:[#allocation13 + $0x5a0] sm:$0xff] }
 0x456   :  { %4926 = vmatpush.msrb.mxu3 %v4234_v38  ;;  %v2127_v41 = vmul.f32 3.8918573e-05, %v8742_v40  ;;  %v8754_v3 = vmin.f32 %v2154_v7, 16.0  ;;  %v8757_v28 = vmul.f32 0.70710677, %v8748_v1  ;;  %v8773_v37 = vadd.f32 %v1577_v50, %v1409_v49 }
 0x457   :  { %v2041_v33 = vadd.f32 0.05243302, %v2040_v8  ;;  %v8759_v10 = vadd.f32 1.0, %v2055_v9  ;;  %v2079_v15 = vadd.f32 0.0036580483, %v2078_v46  ;;  %v2095_v35 = vmul.f32 %v2094_v32, %v8671_v13  ;;  %4861 = vmatpush.msrb.mxu0 %v4026_v12 }
 0x458   :  { %v2128_v48 = vadd.f32 0.001143296, %v2127_v41  ;;  %v2167_v18 = vmul.f32 3.8918573e-05, %v8754_v3  ;;  %v2674_v14 = vmul.f32 %v8757_v28, %v8757_v28  ;;  %v8781_v31 = vmul.f32 0.70710677, %v8773_v37 }
 0x459   :  { %v2042_v16 = vmul.f32 %v2041_v33, %v8646_v34  ;;  %6950 = vrcp.f32 %v8759_v10  ;;  %v2080_v2 = vmul.f32 %v2079_v15, %v8671_v13  ;;  %v8769_v24 = vadd.f32 1.0, %v2095_v35 }
 0x45a   :  { %v2129_v4 = vmul.f32 %v2128_v48, %v8742_v40  ;;  %v2168_v60 = vadd.f32 0.001143296, %v2167_v18  ;;  %v8775_v11 = vmin.f32 %v2674_v14, 16.0  ;;  %v2714_v27 = vmul.f32 %v8781_v31, %v8781_v31 }
 0x45b   :  { %v2043_v29 = vadd.f32 0.18741608, %v2042_v16  ;;  %v2081_v51 = vadd.f32 0.05243302, %v2080_v2  ;;  %6952 = vrcp.f32 %v8769_v24  ;;  %v4090_v7 = vunpack.c.l.bf16 %v3398_v55  ;;  %v3468_v16 = vld [vmem:[#allocation13 + $0x7d0] sm:$0xff] }
 0x45c   :  { %v2130_v17 = vadd.f32 0.014752088, %v2129_v4  ;;  %v2169_v54 = vmul.f32 %v2168_v60, %v8754_v3  ;;  %v2687_v23 = vmul.f32 3.8918573e-05, %v8775_v11  ;;  %v2116_v9 = vmul.f32 2.1237322e-06, %v8742_v40 }
 0x45d   :  { %v2044_v49 = vmul.f32 %v2043_v29, %v8646_v34  ;;  %v2082_v38 = vmul.f32 %v2081_v51, %v8671_v13  ;;  %v2156_v41 = vmul.f32 2.1237322e-06, %v8754_v3  ;;  %4884 = vmatpush.msrb.mxu1 %v4090_v7  ;;  %v8798_v12 = vmin.f32 %v2714_v27, 16.0  ;;  %v3436_v4 = vld [vmem:[#allocation13 + $0x6d0] sm:$0xff] }
 0x45e   :  { %v2131_v30 = vmul.f32 %v2130_v17, %v8742_v40  ;;  %v2170_v53 = vadd.f32 0.014752088, %v2169_v54  ;;  %v2688_v39 = vadd.f32 0.001143296, %v2687_v23  ;;  %v2066_v33 = vand.u32 2147483647, %v8759_v10 }
 0x45f   :  { %v8783_v5 = vpop.eup %6950  ;;  %v2045_v52 = vadd.f32 1.1283791, %v2044_v49  ;;  %v2083_v32 = vadd.f32 0.18741608, %v2082_v38  ;;  %v2068_v18 = vand.u32 2147483648, %v8759_v10  ;;  %vm2062_vm0 = vweird.f32 %v8759_v10  ;;  %v3364_v54 = vld [vmem:[#allocation13 + $0x490] sm:$0xff] }
 0x460   :  { %v2132_v0 = vadd.f32 0.112945676, %v2131_v30  ;;  %v2058_v56 = vmul.f32 %v8783_v5, %v8759_v10  ;;  %v2171_v48 = vmul.f32 %v2170_v53, %v8754_v3  ;;  %v2689_v35 = vmul.f32 %v2688_v39, %v8775_v11  ;;  %v3434_v39 = vld [vmem:[#allocation13 + $0x6c0] sm:$0xff] }
 0x461   :  { %v8792_v8 = vpop.eup %6952  ;;  %v2117_v14 = vadd.f32 0.00028619796, %v2116_v9  ;;  %v2157_v50 = vadd.f32 0.00028619796, %v2156_v41  ;;  %v8806_v17 = vmul.f32 %v2045_v52, %v8625_v62  ;;  %v2084_v29 = vmul.f32 %v2083_v32, %v8671_v13  ;;  %v3466_v13 = vld [vmem:[#allocation13 + $0x7c0] sm:$0xff] }
 0x462   :  { %v2133_v34 = vmul.f32 %v2132_v0, %v8742_v40  ;;  %v2059_v46 = vsub.f32 1.0, %v2058_v56  ;;  %v2098_v15 = vmul.f32 %v8792_v8, %v8769_v24  ;;  %v2172_v30 = vadd.f32 0.112945676, %v2171_v48  ;;  %v3396_v56 = vld [vmem:[#allocation13 + $0x590] sm:$0xff]  ;;  %v3362_v48 = vld [vmem:[#allocation13 + $0x480] sm:$0xff] }
 0x463   :  { %v2727_v51 = vmul.f32 3.8918573e-05, %v8798_v12  ;;  %v2690_v55 = vadd.f32 0.014752088, %v2689_v35  ;;  %v4166_v49 = vunpack.c.l.bf16 %v3436_v4  ;;  %v4230_v0 = vunpack.c.l.bf16 %v3468_v16 }
 0x464   :  { %v2134_v2 = vadd.f32 0.4994258, %v2133_v34  ;;  %v2060_v60 = vmul.f32 %v8783_v5, %v2059_v46  ;;  %v2099_v23 = vsub.f32 1.0, %v2098_v15  ;;  %vm8812_vm1 = vcmp.eq.f32.partialorder %v2066_v33, 8.507059e+37  ;;  %v3394_v33 = vld [vmem:[#allocation13 + $0x580] sm:$0xff] }
 0x465   :  { %v2069_v62 = vor.u32 1.1754944e-38, %v2068_v18  ;;  %v2118_v53 = vmul.f32 %v2117_v14, %v8742_v40  ;;  %v2158_v27 = vmul.f32 %v2157_v50, %v8754_v3  ;;  %vm2063_vm6 = vweird.f32 %v8783_v5  ;;  %4904 = vmatpush.msrb.mxu2 %v4166_v49  ;;  %4927 = vmatpush.msrb.mxu3 %v4230_v0 }
 0x466   :  { %v2135_v7 = vmul.f32 %v2134_v2, %v8742_v40  ;;  %v2676_v9 = vmul.f32 2.1237322e-06, %v8775_v11  ;;  %v4022_v41 = vunpack.c.l.bf16 %v3364_v54  ;;  %v2061_v52 = vadd.f32 %v8783_v5, %v2060_v60  ;;  %vm8830_vm8 = vmor %vm2062_vm0, %vm2063_vm6  ;;  %v3432_v54 = vld [vmem:[#allocation13 + $0x6b0] sm:$0xff] }
 0x467   :  { %v2173_v34 = vmul.f32 %v2172_v30, %v8754_v3  ;;  %v2728_v46 = vadd.f32 0.001143296, %v2727_v51  ;;  %v4086_v32 = vunpack.c.l.bf16 %v3396_v56  ;;  %v2100_v15 = vmul.f32 %v8792_v8, %v2099_v23  ;;  %v3464_v23 = vld [vmem:[#allocation13 + $0x7b0] sm:$0xff] }
 0x468   :  { %v2691_v35 = vmul.f32 %v2690_v55, %v8775_v11  ;;  %4862 = vmatpush.msrb.mxu0 %v4022_v41  ;;  %v4162_v4 = vunpack.c.l.bf16 %v3434_v39  ;;  %v4226_v18 = vunpack.c.l.bf16 %v3466_v13  ;;  %v2085_v14 = vadd.f32 1.1283791, %v2084_v29  ;;  %v1600_v39 = vpop.f32.mrf.mxu2  ;;  %v3360_v13 = vld [vmem:[#allocation13 + $0x470] sm:$0xff] }
 0x469   :  { %vm2102_vm7 = vweird.f32 %v8769_v24  ;;  %v2119_v50 = vadd.f32 0.0036580483, %v2118_v53  ;;  %v2159_v16 = vadd.f32 0.0036580483, %v2158_v27  ;;  %4885 = vmatpush.msrb.mxu1 %v4086_v32  ;;  %v8834_v60 = vadd.f32 1.0, %v2135_v7 }
 0x46a   :  { %v2677_v30 = vadd.f32 0.00028619796, %v2676_v9  ;;  %4905 = vmatpush.msrb.mxu2 %v4162_v4  ;;  %4928 = vmatpush.msrb.mxu3 %v4226_v18  ;;  %v4018_v51 = vunpack.c.l.bf16 %v3362_v48  ;;  %v4082_v29 = vunpack.c.l.bf16 %v3394_v33  ;;  %v2065_v55 = vsel %vm8830_vm8, %v8783_v5, %v2061_v52  ;;  %v1623_v52 = vpop.f32.mrf.mxu3  ;;  %v3392_v48 = vld [vmem:[#allocation13 + $0x570] sm:$0xff] }
 0x46b   :  { %v2106_v49 = vand.u32 2147483647, %v8769_v24  ;;  %v2174_v10 = vadd.f32 0.4994258, %v2173_v34  ;;  %v2729_v0 = vmul.f32 %v2728_v46, %v8798_v12  ;;  %v2101_v56 = vadd.f32 %v8792_v8, %v2100_v15 }
 0x46c   :  { %vm2103_vm9 = vweird.f32 %v8792_v8  ;;  %v2692_v53 = vadd.f32 0.112945676, %v2691_v35  ;;  %v2716_v27 = vmul.f32 2.1237322e-06, %v8798_v12  ;;  %4863 = vmatpush.msrb.mxu0 %v4018_v51  ;;  %4886 = vmatpush.msrb.mxu1 %v4082_v29  ;;  %v2108_v7 = vand.u32 2147483648, %v8769_v24 }
 0x46d   :  { %v2120_v5 = vmul.f32 %v2119_v50, %v8742_v40  ;;  %v4158_v9 = vunpack.c.l.bf16 %v3432_v54  ;;  %v4222_v41 = vunpack.c.l.bf16 %v3464_v23  ;;  %v2070_v34 = vsel %vm8812_vm1, %v2069_v62, %v2065_v55  ;;  %vm8855_vm10 = vmor %vm2102_vm7, %vm2103_vm9  ;;  %v3430_v54 = vld [vmem:[#allocation13 + $0x6a0] sm:$0xff] }
 0x46e   :  { %6954 = vrcp.f32 %v8834_v60  ;;  %v2160_v46 = vmul.f32 %v2159_v16, %v8754_v3  ;;  %v2678_v32 = vmul.f32 %v2677_v30, %v8775_v11  ;;  %v2175_v15 = vmul.f32 %v2174_v10, %v8754_v3  ;;  %v3462_v10 = vld [vmem:[#allocation13 + $0x7a0] sm:$0xff] }
 0x46f   :  { %v2730_v35 = vadd.f32 0.014752088, %v2729_v0  ;;  %4906 = vmatpush.msrb.mxu2 %v4158_v9  ;;  %4929 = vmatpush.msrb.mxu3 %v4222_v41  ;;  %v8862_v38 = vadd.f32 %v1600_v39, %v1410_v58  ;;  %v4014_v62 = vunpack.c.l.bf16 %v3360_v13  ;;  %v2105_v4 = vsel %vm8855_vm10, %v8792_v8, %v2101_v56  ;;  %v8893_v41 = vld [vmem:[#allocation11 + $0x8] sm:$0xff] }
 0x470   :  { %v2693_v24 = vmul.f32 %v2692_v53, %v8775_v11  ;;  %v2717_v18 = vadd.f32 0.00028619796, %v2716_v27  ;;  %v8870_v50 = vadd.f32 %v1623_v52, %v1411_v6  ;;  %v2109_v16 = vor.u32 1.1754944e-38, %v2108_v7 }
 0x471   :  { %v2121_v2 = vadd.f32 0.05243302, %v2120_v5  ;;  %v8873_v30 = vmul.f32 0.70710677, %v8862_v38  ;;  %4864 = vmatpush.msrb.mxu0 %v4014_v62  ;;  %v4078_v58 = vunpack.c.l.bf16 %v3392_v48  ;;  %v2071_v51 = vmul.f32 %v2070_v34, %v8806_v17 }
 0x472   :  { %v2086_v29 = vmul.f32 %v2085_v14, %v8652_v63  ;;  %vm2107_vm11 = vcmp.eq.f32.partialorder %v2106_v49, 8.507059e+37  ;;  %v2679_v8 = vadd.f32 0.0036580483, %v2678_v32  ;;  %v8877_v55 = vadd.f32 1.0, %v2175_v15  ;;  %v1643_v15 = vpop.f32.mrf.mxu0 }
 0x473   :  { %v2110_v23 = vsel %vm2107_vm11, %v2109_v16, %v2105_v4  ;;  %v2731_v43 = vmul.f32 %v2730_v35, %v8798_v12  ;;  %v2754_v6 = vmul.f32 %v8873_v30, %v8873_v30  ;;  %4887 = vmatpush.msrb.mxu1 %v4078_v58  ;;  %v2161_v56 = vadd.f32 0.05243302, %v2160_v46  ;;  %v3358_v58 = vld [vmem:[#allocation13 + $0x460] sm:$0xff] }
 0x474   :  { %v8882_v0 = vpop.eup %6954  ;;  %v2694_v53 = vadd.f32 0.4994258, %v2693_v24  ;;  %v2718_v17 = vmul.f32 %v2717_v18, %v8798_v12  ;;  %v8886_v63 = vmul.f32 0.70710677, %v8870_v50  ;;  %v1814_v14 = vmul.f32 0.5, %v8610_v21 }
 0x475   :  { %v2122_v49 = vmul.f32 %v2121_v2, %v8742_v40  ;;  %v8890_v27 = vmin.f32 %v2754_v6, 16.0  ;;  %v4154_v39 = vunpack.c.l.bf16 %v3430_v54  ;;  %v6687_v13 = vclamps-f32 %v2071_v51, 1.0 }
 0x476   :  { %v2111_v7 = vmul.f32 %v2110_v23, %v2086_v29  ;;  %v2680_v5 = vmul.f32 %v2679_v8, %v8775_v11  ;;  %v4218_v9 = vunpack.c.l.bf16 %v3462_v10  ;;  %v2138_v52 = vmul.f32 %v8882_v0, %v8834_v60 }
 0x477   :  { %6956 = vrcp.f32 %v8877_v55  ;;  %v2732_v34 = vadd.f32 0.112945676, %v2731_v43  ;;  %v2794_v21 = vmul.f32 %v8886_v63, %v8886_v63  ;;  %4907 = vmatpush.msrb.mxu2 %v4154_v39  ;;  %v1815_v46 = vmul.f32 0.5, %v8635_v57 }
 0x478   :  { %v2162_v32 = vmul.f32 %v2161_v56, %v8754_v3  ;;  %v2695_v48 = vmul.f32 %v2694_v53, %v8775_v11  ;;  %v2719_v33 = vadd.f32 0.0036580483, %v2718_v17  ;;  %4930 = vmatpush.msrb.mxu3 %v4218_v9  ;;  %v8904_v35 = vmul.f32 0.5, %v8718_v20 }
 0x479   :  { %v2123_v62 = vadd.f32 0.18741608, %v2122_v49  ;;  %v2767_v4 = vmul.f32 3.8918573e-05, %v8890_v27  ;;  %v10619_v24 = vperm.slane %v8893_v41, 0  ;;  %v3158_v18 = vadd.f32 1.0, %v6687_v13 }
 0x47a   :  { %v6688_v16 = vclamps-f32 %v2111_v7, 1.0  ;;  %v8909_v2 = vmul.f32 0.5, %v8732_v47  ;;  %v2681_v57 = vadd.f32 0.05243302, %v2680_v5  ;;  %v2139_v51 = vsub.f32 1.0, %v2138_v52 }
 0x47b   :  { %v2733_v29 = vmul.f32 %v2732_v34, %v8798_v12  ;;  %v8912_v8 = vmin.f32 %v2794_v21, 16.0  ;;  %v8916_v20 = vadd.f32 %v1643_v15, %v10619_v24  ;;  %v2163_v54 = vadd.f32 0.18741608, %v2162_v32  ;;  %v3390_v15 = vld [vmem:[#allocation13 + $0x560] sm:$0xff] }
 0x47c   :  { %v8919_v23 = vmul.f32 0.5, %v8748_v1  ;;  %v8921_v43 = vadd.f32 1.0, %v2695_v48  ;;  %v2720_v47 = vmul.f32 %v2719_v33, %v8798_v12  ;;  %v2124_v10 = vmul.f32 %v2123_v62, %v8742_v40  ;;  %v1666_v40 = vpop.f32.mrf.mxu1 }
 0x47d   :  { %v8924_v6 = vpop.eup %6956  ;;  %v8928_v56 = vmul.f32 0.5, %v8773_v37  ;;  %v2768_v53 = vadd.f32 0.001143296, %v2767_v4  ;;  %v4010_v17 = vunpack.c.l.bf16 %v3358_v58  ;;  %v8930_v49 = vmul.f32 %v3158_v18, %v1814_v14 }
 0x47e   :  { %v3159_v39 = vadd.f32 1.0, %v6688_v16  ;;  %v2682_v13 = vmul.f32 %v2681_v57, %v8775_v11  ;;  %v10618_v1 = vperm.slane %v8893_v41, 1  ;;  %v2140_v7 = vmul.f32 %v8882_v0, %v2139_v51 }
 0x47f   :  { %10722 = vst [vmem:[#allocation31_spill] sm:$0xff] %v8930_v49  ;;  %v2734_v5 = vadd.f32 0.4994258, %v2733_v29  ;;  %v2807_v9 = vmul.f32 3.8918573e-05, %v8912_v8  ;;  %4865 = vmatpush.msrb.mxu0 %v4010_v17  ;;  %v2164_v37 = vmul.f32 %v2163_v54, %v8754_v3  ;;  %v2178_v14 = vmul.f32 %v8924_v6, %v8877_v55 }
 0x480   :  { %v8937_v52 = vmul.f32 0.70710677, %v8916_v20  ;;  %6958 = vrcp.f32 %v8921_v43  ;;  %v2721_v34 = vadd.f32 0.05243302, %v2720_v47  ;;  %v2125_v21 = vadd.f32 1.1283791, %v2124_v10 }
 0x481   :  { %v2146_v32 = vand.u32 2147483647, %v8834_v60  ;;  %v2769_v48 = vmul.f32 %v2768_v53, %v8890_v27  ;;  %vm2143_vm12 = vweird.f32 %v8882_v0  ;;  %v2148_v62 = vand.u32 2147483648, %v8834_v60 }
 0x482   :  { %v2194_v33 = vmul.f32 %v8937_v52, %v8937_v52  ;;  %v2683_v3 = vadd.f32 0.18741608, %v2682_v13  ;;  %v8951_v4 = vadd.f32 %v1666_v40, %v10618_v1  ;;  %v2141_v18 = vadd.f32 %v8882_v0, %v2140_v7 }
 0x483   :  { %v2735_v16 = vmul.f32 %v2734_v5, %v8798_v12  ;;  %v2808_v57 = vadd.f32 0.001143296, %v2807_v9  ;;  %v2165_v51 = vadd.f32 1.1283791, %v2164_v37  ;;  %v2179_v29 = vsub.f32 1.0, %v2178_v14 }
 0x484   :  { %v8955_v58 = vmin.f32 %v2194_v33, 16.0  ;;  %v2722_v54 = vmul.f32 %v2721_v34, %v8798_v12  ;;  %v4074_v47 = vunpack.c.l.bf16 %v3390_v15  ;;  %v8958_v10 = vmul.f32 %v3159_v39, %v1815_v46 }
 0x485   :  { %v2126_v53 = vmul.f32 %v2125_v21, %v8728_v22  ;;  %vm2142_vm13 = vweird.f32 %v8834_v60  ;;  %v2770_v17 = vadd.f32 0.014752088, %v2769_v48  ;;  %vm8970_vm15 = vcmp.eq.f32.partialorder %v2146_v32, 8.507059e+37 }
 0x486   :  { %10723 = vst [vmem:[#allocation32_spill] sm:$0xff] %v8958_v10  ;;  %v8962_v13 = vpop.eup %6958  ;;  %vm8966_vm14 = vmor %vm2142_vm13, %vm2143_vm12  ;;  %v2684_v46 = vmul.f32 %v2683_v3, %v8775_v11  ;;  %v2207_v39 = vmul.f32 3.8918573e-05, %v8955_v58  ;;  %v8977_v22 = vmul.f32 0.70710677, %v8951_v4  ;;  %4888 = vmatpush.msrb.mxu1 %v4074_v47  ;;  %v8983_v40 = vadd.f32 1.0, %v2735_v16 }
 0x487   :  { %v2145_v60 = vsel %vm8966_vm14, %v8882_v0, %v2141_v18  ;;  %v2186_v9 = vand.u32 2147483647, %v8877_v55  ;;  %v2809_v37 = vmul.f32 %v2808_v57, %v8912_v8  ;;  %v2149_v14 = vor.u32 1.1754944e-38, %v2148_v62 }
 0x488   :  { %v8987_v34 = vmul.f32 %v2165_v51, %v8739_v19  ;;  %v2180_v11 = vmul.f32 %v8924_v6, %v2179_v29  ;;  %v2723_v21 = vadd.f32 0.18741608, %v2722_v54  ;;  %v2188_v32 = vand.u32 2147483648, %v8877_v55 }
 0x489   :  { %v2698_v48 = vmul.f32 %v8962_v13, %v8921_v43  ;;  %v2756_v0 = vmul.f32 2.1237322e-06, %v8890_v27  ;;  %v2771_v33 = vmul.f32 %v2770_v17, %v8890_v27  ;;  %v2150_v15 = vsel %vm8970_vm15, %v2149_v14, %v2145_v60  ;;  %v3460_v14 = vld [vmem:[#allocation13 + $0x790] sm:$0xff] }
 0x48a   :  { %v2685_v3 = vadd.f32 1.1283791, %v2684_v46  ;;  %v2208_v62 = vadd.f32 0.001143296, %v2207_v39  ;;  %v2234_v19 = vmul.f32 %v8977_v22, %v8977_v22  ;;  %vm2182_vm2 = vweird.f32 %v8877_v55 }
 0x48b   :  { %vm9000_vm3 = vcmp.eq.f32.partialorder %v2186_v9, 8.507059e+37  ;;  %6960 = vrcp.f32 %v8983_v40  ;;  %v2810_v16 = vadd.f32 0.014752088, %v2809_v37  ;;  %v2181_v57 = vadd.f32 %v8924_v6, %v2180_v11  ;;  %v3426_v9 = vld [vmem:[#allocation13 + $0x680] sm:$0xff] }
 0x48c   :  { %vm2183_vm4 = vweird.f32 %v8924_v6  ;;  %v2708_v51 = vand.u32 2147483648, %v8921_v43  ;;  %v2724_v29 = vmul.f32 %v2723_v21, %v8798_v12  ;;  %v9009_v54 = vmul.f32 %v2150_v15, %v2126_v53 }
 0x48d   :  { %v2699_v47 = vsub.f32 1.0, %v2698_v48  ;;  %v2757_v17 = vadd.f32 0.00028619796, %v2756_v0  ;;  %v2772_v7 = vadd.f32 0.112945676, %v2771_v33  ;;  %v2189_v5 = vor.u32 1.1754944e-38, %v2188_v32  ;;  %vm9019_vm5 = vmor %vm2182_vm2, %vm2183_vm4 }
 0x48e   :  { %v9012_v46 = vmul.f32 %v2685_v3, %v8757_v28  ;;  %v2209_v39 = vmul.f32 %v2208_v62, %v8955_v58  ;;  %v9015_v60 = vmin.f32 %v2234_v19, 16.0  ;;  %vm2702_vm0 = vweird.f32 %v8921_v43  ;;  %v3428_v28 = vld [vmem:[#allocation13 + $0x690] sm:$0xff] }
 0x48f   :  { %v2706_v12 = vand.u32 2147483647, %v8921_v43  ;;  %v2796_v53 = vmul.f32 2.1237322e-06, %v8912_v8  ;;  %v2811_v37 = vmul.f32 %v2810_v16, %v8912_v8  ;;  %v2185_v11 = vsel %vm9019_vm5, %v8924_v6, %v2181_v57  ;;  %v3356_v62 = vld [vmem:[#allocation13 + $0x450] sm:$0xff] }
 0x490   :  { %v9030_v21 = vor.u32 1.1754944e-38, %v2708_v51  ;;  %v2725_v55 = vadd.f32 1.1283791, %v2724_v29  ;;  %v9033_v32 = vmul.f32 0.5, %v8862_v38  ;;  %v6689_v0 = vclamps-f32 %v9009_v54, 1.0  ;;  %v3388_v51 = vld [vmem:[#allocation13 + $0x550] sm:$0xff] }
 0x491   :  { %v9035_v48 = vpop.eup %6960  ;;  %v2700_v33 = vmul.f32 %v8962_v13, %v2699_v47  ;;  %v2758_v15 = vmul.f32 %v2757_v17, %v8890_v27  ;;  %v2773_v3 = vmul.f32 %v2772_v7, %v8890_v27  ;;  %v2210_v19 = vadd.f32 0.014752088, %v2209_v39  ;;  %v3458_v47 = vld [vmem:[#allocation13 + $0x780] sm:$0xff] }
 0x492   :  { %v2247_v6 = vmul.f32 3.8918573e-05, %v9015_v60  ;;  %v4150_v16 = vunpack.c.l.bf16 %v3428_v28  ;;  %v4214_v57 = vunpack.c.l.bf16 %v3460_v14  ;;  %v2190_v38 = vsel %vm9000_vm3, %v2189_v5, %v2185_v11  ;;  %v3354_v11 = vld [vmem:[#allocation13 + $0x440] sm:$0xff] }
 0x493   :  { %vm2703_vm1 = vweird.f32 %v8962_v13  ;;  %v2797_v29 = vadd.f32 0.00028619796, %v2796_v53  ;;  %v2812_v54 = vadd.f32 0.112945676, %v2811_v37  ;;  %vm9045_vm6 = vcmp.eq.f32.partialorder %v2706_v12, 8.507059e+37 }
 0x494   :  { %v2738_v7 = vmul.f32 %v9035_v48, %v8983_v40  ;;  %v2196_v39 = vmul.f32 2.1237322e-06, %v8955_v58  ;;  %v2248_v28 = vadd.f32 0.001143296, %v2247_v6  ;;  %4908 = vmatpush.msrb.mxu2 %v4150_v16  ;;  %4931 = vmatpush.msrb.mxu3 %v4214_v57  ;;  %v4006_v18 = vunpack.c.l.bf16 %v3356_v62  ;;  %vm9067_vm7 = vmor %vm2702_vm0, %vm2703_vm1 }
 0x495   :  { %v2701_v5 = vadd.f32 %v8962_v13, %v2700_v33  ;;  %v2759_v14 = vadd.f32 0.0036580483, %v2758_v15  ;;  %v2774_v53 = vadd.f32 0.4994258, %v2773_v3  ;;  %v4070_v37 = vunpack.c.l.bf16 %v3388_v51  ;;  %v3424_v3 = vld [vmem:[#allocation13 + $0x670] sm:$0xff] }
 0x496   :  { %v2211_v12 = vmul.f32 %v2210_v19, %v8955_v58  ;;  %v2249_v1 = vmul.f32 %v2248_v28, %v9015_v60  ;;  %4866 = vmatpush.msrb.mxu0 %v4006_v18  ;;  %v4146_v24 = vunpack.c.l.bf16 %v3426_v9  ;;  %v4210_v61 = vunpack.c.l.bf16 %v3458_v47 }
 0x497   :  { %v9056_v36 = vmul.f32 %v2190_v38, %v8987_v34  ;;  %v9059_v6 = vmul.f32 %v2725_v55, %v8781_v31  ;;  %v2798_v33 = vmul.f32 %v2797_v29, %v8912_v8  ;;  %v2813_v15 = vmul.f32 %v2812_v54, %v8912_v8  ;;  %4889 = vmatpush.msrb.mxu1 %v4070_v37 }
 0x498   :  { %v2739_v19 = vsub.f32 1.0, %v2738_v7  ;;  %v2197_v34 = vadd.f32 0.00028619796, %v2196_v39  ;;  %v2250_v16 = vadd.f32 0.014752088, %v2249_v1  ;;  %4909 = vmatpush.msrb.mxu2 %v4146_v24  ;;  %4932 = vmatpush.msrb.mxu3 %v4210_v61  ;;  %v4002_v31 = vunpack.c.l.bf16 %v3354_v11  ;;  %v3456_v1 = vld [vmem:[#allocation13 + $0x770] sm:$0xff]  ;;  %v1689_v11 = vpop.f32.mrf.mxu2 }
 0x499   :  { %v9071_v55 = vadd.f32 1.0, %v6689_v0  ;;  %v2705_v57 = vsel %vm9067_vm7, %v8962_v13, %v2701_v5  ;;  %v2760_v51 = vmul.f32 %v2759_v14, %v8890_v27  ;;  %v4066_v38 = vunpack.c.l.bf16 %v3386_v45  ;;  %v3352_v5 = vld [vmem:[#allocation13 + $0x430] sm:$0xff] }
 0x49a   :  { %v2775_v43 = vmul.f32 %v2774_v53, %v8890_v27  ;;  %v2212_v29 = vadd.f32 0.112945676, %v2211_v12  ;;  %v2251_v54 = vmul.f32 %v2250_v16, %v9015_v60  ;;  %4867 = vmatpush.msrb.mxu0 %v4002_v31  ;;  %v4142_v9 = vunpack.c.l.bf16 %v3424_v3  ;;  %v1712_v12 = vpop.f32.mrf.mxu3 }
 0x49b   :  { %v6690_v61 = vclamps-f32 %v9056_v36, 1.0  ;;  %v9081_v24 = vmul.f32 0.5, %v8870_v50  ;;  %v2799_v0 = vadd.f32 0.0036580483, %v2798_v33  ;;  %v2814_v47 = vadd.f32 0.4994258, %v2813_v15  ;;  %4890 = vmatpush.msrb.mxu1 %v4066_v38 }
 0x49c   :  { %v2740_v13 = vmul.f32 %v9035_v48, %v2739_v19  ;;  %vm2742_vm8 = vweird.f32 %v8983_v40  ;;  %v2746_v45 = vand.u32 2147483647, %v8983_v40  ;;  %v2198_v7 = vmul.f32 %v2197_v34, %v8955_v58  ;;  %4910 = vmatpush.msrb.mxu2 %v4142_v9 }
 0x49d   :  { %v2710_v39 = vsel %vm9045_vm6, %v9030_v21, %v2705_v57  ;;  %v2748_v28 = vand.u32 2147483648, %v8983_v40  ;;  %v2252_v50 = vadd.f32 0.112945676, %v2251_v54  ;;  %v4206_v18 = vunpack.c.l.bf16 %v3456_v1  ;;  %v3422_v54 = vld [vmem:[#allocation13 + $0x660] sm:$0xff] }
 0x49e   :  { %vm2743_vm9 = vweird.f32 %v9035_v48  ;;  %v2761_v14 = vadd.f32 0.05243302, %v2760_v51  ;;  %v9092_v53 = vadd.f32 1.0, %v2775_v43  ;;  %v2213_v37 = vmul.f32 %v2212_v29, %v8955_v58 }
 0x49f   :  { %v2800_v33 = vmul.f32 %v2799_v0, %v8912_v8  ;;  %v2815_v15 = vmul.f32 %v2814_v47, %v8912_v8  ;;  %4933 = vmatpush.msrb.mxu3 %v4206_v18  ;;  %v10627_v21 = vperm.slane %v8893_v41, 2  ;;  %v10626_v17 = vperm.slane %v8893_v41, 3  ;;  %vm9120_vm11 = vmor %vm2742_vm8, %vm2743_vm9 }
 0x4a0   :  { %v2741_v3 = vadd.f32 %v9035_v48, %v2740_v13  ;;  %v2199_v62 = vadd.f32 0.0036580483, %v2198_v7  ;;  %v2236_v19 = vmul.f32 2.1237322e-06, %v9015_v60  ;;  %v3998_v34 = vunpack.c.l.bf16 %v3352_v5 }
 0x4a1   :  { %v2711_v16 = vmul.f32 %v2710_v39, %v9012_v46  ;;  %v2253_v31 = vmul.f32 %v2252_v50, %v9015_v60  ;;  %v9105_v57 = vadd.f32 %v1689_v11, %v10627_v21  ;;  %v9109_v51 = vadd.f32 %v1712_v12, %v10626_v17  ;;  %v3384_v46 = vld [vmem:[#allocation13 + $0x530] sm:$0xff] }
 0x4a2   :  { %vm9111_vm10 = vcmp.eq.f32.partialorder %v2746_v45, 8.507059e+37  ;;  %v2749_v43 = vor.u32 1.1754944e-38, %v2748_v28  ;;  %6962 = vrcp.f32 %v9092_v53  ;;  %v2214_v29 = vadd.f32 0.4994258, %v2213_v37  ;;  %4868 = vmatpush.msrb.mxu0 %v3998_v34  ;;  %v3454_v45 = vld [vmem:[#allocation13 + $0x760] sm:$0xff] }
 0x4a3   :  { %v2762_v1 = vmul.f32 %v2761_v14, %v8890_v27  ;;  %v2801_v0 = vadd.f32 0.05243302, %v2800_v33  ;;  %v9125_v47 = vadd.f32 1.0, %v2815_v15  ;;  %v9128_v13 = vmul.f32 0.70710677, %v9105_v57  ;;  %v3350_v15 = vld [vmem:[#allocation13 + $0x420] sm:$0xff] }
 0x4a4   :  { %v2745_v7 = vsel %vm9120_vm11, %v9035_v48, %v2741_v3  ;;  %v2200_v39 = vmul.f32 %v2199_v62, %v8955_v58  ;;  %v2237_v40 = vadd.f32 0.00028619796, %v2236_v19  ;;  %v9135_v28 = vmul.f32 0.70710677, %v9109_v51  ;;  %v1646_v48 = vpop.f32.mrf.mxu0 }
 0x4a5   :  { %v6703_v50 = vclamps-f32 %v2711_v16, 1.0  ;;  %v2254_v18 = vadd.f32 0.4994258, %v2253_v31  ;;  %v2274_v5 = vmul.f32 %v9128_v13, %v9128_v13  ;;  %v4062_v14 = vunpack.c.l.bf16 %v3384_v46 }
 0x4a6   :  { %v2215_v37 = vmul.f32 %v2214_v29, %v8955_v58  ;;  %v2314_v11 = vmul.f32 %v9135_v28, %v9135_v28  ;;  %v4138_v12 = vunpack.c.l.bf16 %v3422_v54  ;;  %v4202_v33 = vunpack.c.l.bf16 %v3454_v45 }
 0x4a7   :  { %v2750_v3 = vsel %vm9111_vm10, %v2749_v43, %v2745_v7  ;;  %v2763_v62 = vadd.f32 0.18741608, %v2762_v1  ;;  %v2802_v19 = vmul.f32 %v2801_v0, %v8912_v8  ;;  %6964 = vrcp.f32 %v9125_v47  ;;  %4891 = vmatpush.msrb.mxu1 %v4062_v14 }
 0x4a8   :  { %v9146_v34 = vpop.eup %6962  ;;  %v2201_v16 = vadd.f32 0.05243302, %v2200_v39  ;;  %v2238_v31 = vmul.f32 %v2237_v40, %v9015_v60  ;;  %v9149_v29 = vmin.f32 %v2274_v5, 16.0  ;;  %v9151_v46 = vmin.f32 %v2314_v11, 16.0  ;;  %4911 = vmatpush.msrb.mxu2 %v4138_v12  ;;  %4934 = vmatpush.msrb.mxu3 %v4202_v33  ;;  %v3382_v40 = vld [vmem:[#allocation13 + $0x520] sm:$0xff] }
 0x4a9   :  { %v3161_v38 = vadd.f32 1.0, %v6690_v61  ;;  %v2255_v43 = vmul.f32 %v2254_v18, %v9015_v60  ;;  %v10740_v54 = vperm.slane %v8893_v41, 0  ;;  %v3994_v1 = vunpack.c.l.bf16 %v3350_v15 }
 0x4aa   :  { %v3174_v0 = vadd.f32 1.0, %v6703_v50  ;;  %v2751_v45 = vmul.f32 %v2750_v3, %v9059_v6  ;;  %v9161_v7 = vadd.f32 1.0, %v2215_v37  ;;  %v2287_v39 = vmul.f32 3.8918573e-05, %v9149_v29  ;;  %v3420_v3 = vld [vmem:[#allocation13 + $0x650] sm:$0xff] }
 0x4ab   :  { %v9158_v9 = vadd.f32 %v1646_v48, %v10740_v54  ;;  %v2764_v5 = vmul.f32 %v2763_v62, %v8890_v27  ;;  %v2778_v36 = vmul.f32 %v9146_v34, %v9092_v53  ;;  %v2803_v61 = vadd.f32 0.18741608, %v2802_v19  ;;  %4869 = vmatpush.msrb.mxu0 %v3994_v1 }
 0x4ac   :  { %v2327_v18 = vmul.f32 3.8918573e-05, %v9151_v46  ;;  %v9170_v14 = vmul.f32 %v9071_v55, %v8904_v35  ;;  %v2202_v6 = vmul.f32 %v2201_v16, %v8955_v58  ;;  %v2239_v50 = vadd.f32 0.0036580483, %v2238_v31  ;;  %v1669_v31 = vpop.f32.mrf.mxu1 }
 0x4ad   :  { %v9174_v37 = vmul.f32 0.70710677, %v9158_v9  ;;  %v9176_v11 = vpop.eup %6964  ;;  %v9179_v27 = vmul.f32 %v3161_v38, %v8909_v2  ;;  %v9181_v12 = vadd.f32 1.0, %v2255_v43  ;;  %v2288_v33 = vadd.f32 0.001143296, %v2287_v39 }
 0x4ae   :  { %10741 = vst [vmem:[#allocation33_spill] sm:$0xff] %v9170_v14  ;;  %v4058_v48 = vunpack.c.l.bf16 %v3382_v40  ;;  %v9184_v15 = vmul.f32 %v3174_v0, %v8919_v23  ;;  %v6704_v35 = vclamps-f32 %v2751_v45, 1.0  ;;  %6966 = vrcp.f32 %v9161_v7 }
 0x4af   :  { %10742 = vst [vmem:[#allocation34_spill] sm:$0xff] %v9179_v27  ;;  %v2328_v55 = vadd.f32 0.001143296, %v2327_v18  ;;  %v2765_v62 = vadd.f32 1.1283791, %v2764_v5  ;;  %v2779_v19 = vsub.f32 1.0, %v2778_v36  ;;  %v2804_v16 = vmul.f32 %v2803_v61, %v8912_v8 }
 0x4b0   :  { %10743 = vst [vmem:[#allocation35_spill] sm:$0xff] %v9184_v15  ;;  %v2834_v2 = vmul.f32 %v9174_v37, %v9174_v37  ;;  %4892 = vmatpush.msrb.mxu1 %v4058_v48  ;;  %v2786_v38 = vand.u32 2147483647, %v9092_v53  ;;  %v2788_v43 = vand.u32 2147483648, %v9092_v53  ;;  %v2203_v23 = vadd.f32 0.18741608, %v2202_v6 }
 0x4b1   :  { %v2240_v54 = vmul.f32 %v2239_v50, %v9015_v60  ;;  %v2818_v1 = vmul.f32 %v9176_v11, %v9125_v47  ;;  %6968 = vrcp.f32 %v9181_v12  ;;  %v2289_v0 = vmul.f32 %v2288_v33, %v9149_v29  ;;  %v3452_v61 = vld [vmem:[#allocation13 + $0x750] sm:$0xff] }
 0x4b2   :  { %v4134_v8 = vunpack.c.l.bf16 %v3420_v3  ;;  %v3175_v45 = vadd.f32 1.0, %v6704_v35  ;;  %v2329_v39 = vmul.f32 %v2328_v55, %v9151_v46  ;;  %v9198_v40 = vmin.f32 %v2834_v2, 16.0 }
 0x4b3   :  { %v10744_v5 = vperm.slane %v8893_v41, 1  ;;  %v9205_v18 = vmul.f32 %v2765_v62, %v8873_v30  ;;  %v2780_v6 = vmul.f32 %v9146_v34, %v2779_v19  ;;  %vm2782_vm12 = vweird.f32 %v9092_v53 }
 0x4b4   :  { %v2805_v50 = vadd.f32 1.1283791, %v2804_v16  ;;  %4912 = vmatpush.msrb.mxu2 %v4134_v8  ;;  %v9209_v33 = vpop.eup %6966  ;;  %v2789_v48 = vor.u32 1.1754944e-38, %v2788_v43  ;;  %v2204_v35 = vmul.f32 %v2203_v23, %v8955_v58  ;;  %v2276_v55 = vmul.f32 2.1237322e-06, %v9149_v29  ;;  %v3348_v23 = vld [vmem:[#allocation13 + $0x410] sm:$0xff] }
 0x4b5   :  { %v9202_v36 = vadd.f32 %v1669_v31, %v10744_v5  ;;  %v2847_v3 = vmul.f32 3.8918573e-05, %v9198_v40  ;;  %vm9214_vm13 = vcmp.eq.f32.partialorder %v2786_v38, 8.507059e+37  ;;  %v2819_v30 = vsub.f32 1.0, %v2818_v1 }
 0x4b6   :  { %v2241_v62 = vadd.f32 0.05243302, %v2240_v54  ;;  %v2290_v19 = vadd.f32 0.014752088, %v2289_v0  ;;  %v4198_v31 = vunpack.c.l.bf16 %v3452_v61  ;;  %v9219_v16 = vmul.f32 %v3175_v45, %v8928_v56 }
 0x4b7   :  { %v2828_v8 = vand.u32 2147483648, %v9125_v47  ;;  %v2330_v43 = vadd.f32 0.014752088, %v2329_v39  ;;  %v9223_v58 = vmul.f32 0.70710677, %v9202_v36  ;;  %v9225_v5 = vpop.eup %6968  ;;  %v2781_v38 = vadd.f32 %v9146_v34, %v2780_v6 }
 0x4b8   :  { %10747 = vst [vmem:[#allocation36_spill] sm:$0xff] %v9219_v16  ;;  %vm2783_vm14 = vweird.f32 %v9146_v34  ;;  %v2218_v54 = vmul.f32 %v9209_v33, %v9161_v7  ;;  %v2848_v1 = vadd.f32 0.001143296, %v2847_v3  ;;  %4935 = vmatpush.msrb.mxu3 %v4198_v31  ;;  %v9232_v56 = vmul.f32 %v2805_v50, %v8886_v63 }
 0x4b9   :  { %10748 = vst [vmem:[#allocation37_spill] sm:$0xff] %v9223_v58  ;;  %v2205_v0 = vadd.f32 1.1283791, %v2204_v35  ;;  %v2277_v45 = vadd.f32 0.00028619796, %v2276_v55  ;;  %v2820_v61 = vmul.f32 %v9176_v11, %v2819_v30  ;;  %v2242_v17 = vmul.f32 %v2241_v62, %v9015_v60  ;;  %vm9240_vm15 = vmor %vm2782_vm12, %vm2783_vm14 }
 0x4ba   :  { %v2316_v39 = vmul.f32 2.1237322e-06, %v9151_v46  ;;  %v2291_v6 = vmul.f32 %v2290_v19, %v9149_v29  ;;  %v3990_v21 = vunpack.c.l.bf16 %v3348_v23  ;;  %v2826_v63 = vand.u32 2147483647, %v9125_v47 }
 0x4bb   :  { %v2258_v50 = vmul.f32 %v9225_v5, %v9181_v12  ;;  %v2331_v35 = vmul.f32 %v2330_v43, %v9151_v46  ;;  %v2874_v55 = vmul.f32 %v9223_v58, %v9223_v58  ;;  %v2785_v3 = vsel %vm9240_vm15, %v9146_v34, %v2781_v38 }
 0x4bc   :  { %vm2822_vm2 = vweird.f32 %v9125_v47  ;;  %v2219_v53 = vsub.f32 1.0, %v2218_v54  ;;  %v2849_v30 = vmul.f32 %v2848_v1, %v9198_v40  ;;  %4870 = vmatpush.msrb.mxu0 %v3990_v21  ;;  %vm2823_vm3 = vweird.f32 %v9176_v11 }
 0x4bd   :  { %v2829_v62 = vor.u32 1.1754944e-38, %v2828_v8  ;;  %v2278_v19 = vmul.f32 %v2277_v45, %v9149_v29  ;;  %v2317_v31 = vadd.f32 0.00028619796, %v2316_v39  ;;  %v2821_v43 = vadd.f32 %v9176_v11, %v2820_v61  ;;  %vm9276_vm0 = vmor %vm2822_vm2, %vm2823_vm3 }
 0x4be   :  { %v9259_v23 = vmul.f32 %v2205_v0, %v8937_v52  ;;  %v2243_v42 = vadd.f32 0.18741608, %v2242_v17  ;;  %v2292_v44 = vadd.f32 0.112945676, %v2291_v6  ;;  %v2790_v34 = vsel %vm9214_vm13, %v2789_v48, %v2785_v3  ;;  %v3380_v17 = vld [vmem:[#allocation13 + $0x510] sm:$0xff]  ;;  %v3418_v6 = vld [vmem:[#allocation13 + $0x640] sm:$0xff] }
 0x4bf   :  { %vm9263_vm4 = vcmp.eq.f32.partialorder %v2826_v63, 8.507059e+37  ;;  %v2259_v21 = vsub.f32 1.0, %v2258_v50  ;;  %v2332_v54 = vadd.f32 0.112945676, %v2331_v35  ;;  %v9267_v8 = vmin.f32 %v2874_v55, 16.0  ;;  %v3450_v55 = vld [vmem:[#allocation13 + $0x740] sm:$0xff] }
 0x4c0   :  { %v2220_v1 = vmul.f32 %v9209_v33, %v2219_v53  ;;  %vm2222_vm5 = vweird.f32 %v9161_v7  ;;  %v2226_v52 = vand.u32 2147483647, %v9161_v7  ;;  %v2850_v0 = vadd.f32 0.014752088, %v2849_v30 }
 0x4c1   :  { %v2228_v2 = vand.u32 2147483648, %v9161_v7  ;;  %v2279_v45 = vadd.f32 0.0036580483, %v2278_v19  ;;  %v2318_v39 = vmul.f32 %v2317_v31, %v9151_v46  ;;  %v2836_v61 = vmul.f32 2.1237322e-06, %v9198_v40  ;;  %v3346_v19 = vld [vmem:[#allocation13 + $0x400] sm:$0xff] }
 0x4c2   :  { %v9284_v63 = vmul.f32 %v2790_v34, %v9205_v18  ;;  %v2825_v50 = vsel %vm9276_vm0, %v9176_v11, %v2821_v43  ;;  %v2244_v47 = vmul.f32 %v2243_v42, %v9015_v60  ;;  %v2293_v35 = vmul.f32 %v2292_v44, %v9149_v29  ;;  %v3378_v18 = vld [vmem:[#allocation13 + $0x500] sm:$0xff]  ;;  %v3416_v31 = vld [vmem:[#allocation13 + $0x630] sm:$0xff] }
 0x4c3   :  { %vm2223_vm1 = vweird.f32 %v9209_v33  ;;  %v2260_v3 = vmul.f32 %v9225_v5, %v2259_v21  ;;  %v2333_v53 = vmul.f32 %v2332_v54, %v9151_v46  ;;  %v2887_v30 = vmul.f32 3.8918573e-05, %v9267_v8 }
 0x4c4   :  { %v2221_v34 = vadd.f32 %v9209_v33, %v2220_v1  ;;  %vm9296_vm6 = vcmp.eq.f32.partialorder %v2226_v52, 8.507059e+37  ;;  %v2851_v42 = vmul.f32 %v2850_v0, %v9198_v40  ;;  %v4054_v60 = vunpack.c.l.bf16 %v3380_v17  ;;  %v3448_v1 = vld [vmem:[#allocation13 + $0x730] sm:$0xff]  ;;  %v1692_v17 = vpop.f32.mrf.mxu2  ;;  %vm9310_vm8 = vmor %vm2222_vm5, %vm2223_vm1 }
 0x4c5   :  { %v4130_v43 = vunpack.c.l.bf16 %v3418_v6  ;;  %v2280_v44 = vmul.f32 %v2279_v45, %v9149_v29  ;;  %v2319_v21 = vadd.f32 0.0036580483, %v2318_v39  ;;  %v2837_v48 = vadd.f32 0.00028619796, %v2836_v61 }
 0x4c6   :  { %v4194_v54 = vunpack.c.l.bf16 %v3450_v55  ;;  %v2294_v59 = vadd.f32 0.4994258, %v2293_v35  ;;  %4893 = vmatpush.msrb.mxu1 %v4054_v60  ;;  %v3986_v25 = vunpack.c.l.bf16 %v3346_v19  ;;  %v4050_v26 = vunpack.c.l.bf16 %v3378_v18 }
 0x4c7   :  { %4913 = vmatpush.msrb.mxu2 %v4130_v43  ;;  %v4126_v58 = vunpack.c.l.bf16 %v3416_v31  ;;  %v2261_v52 = vadd.f32 %v9225_v5, %v2260_v3  ;;  %vm2263_vm7 = vweird.f32 %v9225_v5  ;;  %v2334_v27 = vadd.f32 0.4994258, %v2333_v53 }
 0x4c8   :  { %v2888_v0 = vadd.f32 0.001143296, %v2887_v30  ;;  %4936 = vmatpush.msrb.mxu3 %v4194_v54  ;;  %v2830_v45 = vsel %vm9263_vm4, %v2829_v62, %v2825_v50  ;;  %vm2262_vm9 = vweird.f32 %v9181_v12  ;;  %v2268_v61 = vand.u32 2147483648, %v9181_v12  ;;  %4871 = vmatpush.msrb.mxu0 %v3986_v25 }
 0x4c9   :  { %v2852_v6 = vadd.f32 0.112945676, %v2851_v42  ;;  %4894 = vmatpush.msrb.mxu1 %v4050_v26  ;;  %v2225_v38 = vsel %vm9310_vm8, %v9209_v33, %v2221_v34  ;;  %v2266_v62 = vand.u32 2147483647, %v9181_v12  ;;  %v2320_v50 = vmul.f32 %v2319_v21, %v9151_v46  ;;  %4914 = vmatpush.msrb.mxu2 %v4126_v58  ;;  %vm9324_vm10 = vmor %vm2262_vm9, %vm2263_vm7  ;;  %v3504_v34 = vld [vmem:[#allocation13 + $0x8f0] sm:$0xff] }
 0x4ca   :  { %v4190_v7 = vunpack.c.l.bf16 %v3448_v1  ;;  %4872 = vmatmul.f32.vlgmr.msrb.gmra.mxu0 %v8930_v49  ;;  %v2281_v25 = vadd.f32 0.05243302, %v2280_v44  ;;  %v2295_v26 = vmul.f32 %v2294_v59, %v9149_v29  ;;  %v2838_v55 = vmul.f32 %v2837_v48, %v9198_v40  ;;  %4895 = vmatmul.f32.vlgmr.msrb.gmra.mxu1 %v8958_v10  ;;  %v3696_v49 = vld [vmem:[#allocation13 + $0xef0] sm:$0xff] }
 0x4cb   :  { %v10761_v33 = vperm.slane %v8893_v41, 2  ;;  %v2229_v58 = vor.u32 1.1754944e-38, %v2228_v2  ;;  %v2265_v3 = vsel %vm9324_vm10, %v9225_v5, %v2261_v52  ;;  %v2335_v53 = vmul.f32 %v2334_v27, %v9151_v46  ;;  %v3728_v10 = vld [vmem:[#allocation13 + $0xff0] sm:$0xff] }
 0x4cc   :  { %v2889_v30 = vmul.f32 %v2888_v0, %v9267_v8  ;;  %4937 = vmatpush.msrb.mxu3 %v4190_v7  ;;  %v2831_v59 = vmul.f32 %v2830_v45, %v9232_v56  ;;  %v2245_v19 = vadd.f32 1.1283791, %v2244_v47  ;;  %v2269_v18 = vor.u32 1.1754944e-38, %v2268_v61  ;;  %v1715_v56 = vpop.f32.mrf.mxu3 }
 0x4cd   :  { %v9332_v12 = vadd.f32 %v1692_v17, %v10761_v33  ;;  %v2853_v31 = vmul.f32 %v2852_v6, %v9198_v40  ;;  %v2230_v42 = vsel %vm9296_vm6, %v2229_v58, %v2225_v38  ;;  %vm2267_vm11 = vcmp.eq.f32.partialorder %v2266_v62, 8.507059e+37  ;;  %v3536_v17 = vld [vmem:[#allocation13 + $0x9f0] sm:$0xff] }
 0x4ce   :  { %v2321_v2 = vadd.f32 0.05243302, %v2320_v50  ;;  %v2270_v5 = vsel %vm2267_vm11, %v2269_v18, %v2265_v3  ;;  %v2282_v27 = vmul.f32 %v2281_v25, %v9149_v29  ;;  %v9348_v43 = vadd.f32 1.0, %v2295_v26 }
 0x4cf   :  { %v9345_v60 = vmul.f32 0.70710677, %v9332_v12  ;;  %v2839_v44 = vadd.f32 0.0036580483, %v2838_v55  ;;  %v9350_v47 = vadd.f32 1.0, %v2335_v53  ;;  %v4302_v11 = vunpack.c.l.bf16 %v3504_v34 }
 0x4d0   :  { %v2890_v21 = vadd.f32 0.014752088, %v2889_v30  ;;  %v6705_v54 = vclamps-f32 %v9284_v63, 1.0  ;;  %v6706_v1 = vclamps-f32 %v2831_v59, 1.0  ;;  %v2246_v52 = vmul.f32 %v2245_v19, %v8977_v22  ;;  %v3414_v30 = vld [vmem:[#allocation13 + $0x620] sm:$0xff] }
 0x4d1   :  { %v2914_v48 = vmul.f32 %v9345_v60, %v9345_v60  ;;  %v2854_v0 = vadd.f32 0.4994258, %v2853_v31  ;;  %v2231_v45 = vmul.f32 %v2230_v42, %v9259_v23  ;;  %v2322_v39 = vmul.f32 %v2321_v2, %v9151_v46  ;;  %4948 = vmatpush.msra.mxu0 %v4302_v11 }
 0x4d2   :  { %v10762_v6 = vperm.slane %v8893_v41, 3  ;;  %v2271_v62 = vmul.f32 %v2270_v5, %v2246_v52  ;;  %v2283_v50 = vadd.f32 0.18741608, %v2282_v27  ;;  %6970 = vrcp.f32 %v9348_v43  ;;  %4875 = vmatmul.f32.gmra.mxu0 %v9184_v15  ;;  %4898 = vmatmul.f32.gmra.mxu1 %v9219_v16  ;;  %v3492_v15 = vld [vmem:[#allocation13 + $0x890] sm:$0xff] }
 0x4d3   :  { %v9358_v61 = vmin.f32 %v2914_v48, 16.0  ;;  %v2840_v63 = vmul.f32 %v2839_v44, %v9198_v40  ;;  %6972 = vrcp.f32 %v9350_v47  ;;  %v2876_v22 = vmul.f32 2.1237322e-06, %v9267_v8 }
 0x4d4   :  { %v9362_v38 = vadd.f32 %v1715_v56, %v10762_v6  ;;  %v2891_v23 = vmul.f32 %v2890_v21, %v9267_v8  ;;  %v4366_v7 = vunpack.c.l.bf16 %v3536_v17  ;;  %v3176_v35 = vadd.f32 1.0, %v6705_v54  ;;  %v3502_v17 = vld [vmem:[#allocation13 + $0x8e0] sm:$0xff] }
 0x4d5   :  { %v1818_v25 = vmul.f32 0.5, %v8916_v20  ;;  %v2855_v26 = vmul.f32 %v2854_v0, %v9198_v40  ;;  %v2927_v55 = vmul.f32 3.8918573e-05, %v9358_v61  ;;  %v3177_v33 = vadd.f32 1.0, %v6706_v1 }
 0x4d6   :  { %v6691_v58 = vclamps-f32 %v2231_v45, 1.0  ;;  %v1819_v3 = vmul.f32 0.5, %v8951_v4  ;;  %v9376_v53 = vmul.f32 0.70710677, %v9362_v38  ;;  %4971 = vmatpush.msra.mxu1 %v4366_v7  ;;  %v6692_v59 = vclamps-f32 %v2271_v62, 1.0 }
 0x4d7   :  { %v9379_v19 = vmul.f32 0.5, %v9105_v57  ;;  %v2284_v18 = vmul.f32 %v2283_v50, %v9149_v29  ;;  %v2323_v20 = vadd.f32 0.18741608, %v2322_v39  ;;  %v2841_v31 = vadd.f32 0.05243302, %v2840_v63  ;;  %v3446_v57 = vld [vmem:[#allocation13 + $0x720] sm:$0xff]  ;;  %v1735_v50 = vpop.f32.mrf.mxu0 }
 0x4d8   :  { %v2877_v34 = vadd.f32 0.00028619796, %v2876_v22  ;;  %v2892_v42 = vadd.f32 0.112945676, %v2891_v23  ;;  %v2954_v2 = vmul.f32 %v9376_v53, %v9376_v53  ;;  %v9384_v5 = vpop.eup %6970  ;;  %v9387_v4 = vmul.f32 %v3176_v35, %v9033_v32 }
 0x4d9   :  { %v9389_v27 = vadd.f32 1.0, %v2855_v26  ;;  %v2928_v44 = vadd.f32 0.001143296, %v2927_v55  ;;  %v4122_v56 = vunpack.c.l.bf16 %v3414_v30  ;;  %v9391_v21 = vpop.eup %6972  ;;  %v9394_v29 = vmul.f32 %v3177_v33, %v9081_v24  ;;  %v1758_v33 = vpop.f32.mrf.mxu1 }
 0x4da   :  { %10763 = vst [vmem:[#allocation38_spill] sm:$0xff] %v9387_v4  ;;  %v3162_v48 = vadd.f32 1.0, %v6691_v58  ;;  %v9397_v11 = vmul.f32 0.5, %v9109_v51  ;;  %v9400_v54 = vmul.f32 0.5, %v9158_v9  ;;  %v3163_v1 = vadd.f32 1.0, %v6692_v59  ;;  %v3534_v51 = vld [vmem:[#allocation13 + $0x9e0] sm:$0xff] }
 0x4db   :  { %10764 = vst [vmem:[#allocation39_spill] sm:$0xff] %v9394_v29  ;;  %v2285_v32 = vadd.f32 1.1283791, %v2284_v18  ;;  %v2324_v52 = vmul.f32 %v2323_v20, %v9151_v46  ;;  %v9403_v0 = vmin.f32 %v2954_v2, 16.0  ;;  %4915 = vmatpush.msrb.mxu2 %v4122_v56  ;;  %v2842_v45 = vmul.f32 %v2841_v31, %v9198_v40 }
 0x4dc   :  { %v2878_v24 = vmul.f32 %v2877_v34, %v9267_v8  ;;  %v2893_v39 = vmul.f32 %v2892_v42, %v9267_v8  ;;  %v4186_v6 = vunpack.c.l.bf16 %v3446_v57  ;;  %v2298_v9 = vmul.f32 %v9384_v5, %v9348_v43 }
 0x4dd   :  { %v2338_v62 = vmul.f32 %v9391_v21, %v9350_v47  ;;  %6974 = vrcp.f32 %v9389_v27  ;;  %v2929_v46 = vmul.f32 %v2928_v44, %v9358_v61  ;;  %v2967_v63 = vmul.f32 3.8918573e-05, %v9403_v0 }
 0x4de   :  { %4938 = vmatpush.msrb.mxu3 %v4186_v6  ;;  %v10643_v22 = vperm.slane %v8893_v41, 4  ;;  %v10640_v23 = vperm.slane %v8893_v41, 5  ;;  %v4298_v7 = vunpack.c.l.bf16 %v3502_v17  ;;  %v9417_v35 = vmul.f32 %v3162_v48, %v1818_v25 }
 0x4df   :  { %v2325_v26 = vadd.f32 1.1283791, %v2324_v52  ;;  %v9420_v55 = vmul.f32 0.5, %v9202_v36  ;;  %v4362_v58 = vunpack.c.l.bf16 %v3534_v51  ;;  %v9422_v30 = vmul.f32 %v3163_v1, %v1819_v3  ;;  %v3412_v36 = vld [vmem:[#allocation13 + $0x610] sm:$0xff] }
 0x4e0   :  { %v2894_v59 = vadd.f32 0.4994258, %v2893_v39  ;;  %v2968_v18 = vadd.f32 0.001143296, %v2967_v63  ;;  %v9426_v20 = vadd.f32 %v1735_v50, %v10643_v22  ;;  %4949 = vmatpush.msra.mxu0 %v4298_v7  ;;  %v9429_v31 = vmul.f32 %v2285_v32, %v9128_v13 }
 0x4e1   :  { %v2299_v25 = vsub.f32 1.0, %v2298_v9  ;;  %v2843_v34 = vadd.f32 0.18741608, %v2842_v45  ;;  %v2879_v42 = vadd.f32 0.0036580483, %v2878_v24  ;;  %4972 = vmatpush.msra.mxu1 %v4362_v58  ;;  %v2339_v44 = vsub.f32 1.0, %v2338_v62 }
 0x4e2   :  { %v2306_v2 = vand.u32 2147483647, %v9348_v43  ;;  %v2930_v3 = vadd.f32 0.014752088, %v2929_v46  ;;  %v9434_v56 = vadd.f32 %v1758_v33, %v10640_v23  ;;  %vm2302_vm12 = vweird.f32 %v9348_v43  ;;  %v3444_v24 = vld [vmem:[#allocation13 + $0x710] sm:$0xff]  ;;  %v10777_v23 = vld [vmem:[#allocation34_spill] sm:$0xff] }
 0x4e3   :  { %v9436_v57 = vpop.eup %6974  ;;  %v2308_v13 = vand.u32 2147483648, %v9348_v43  ;;  %v9441_v48 = vmul.f32 %v2325_v26, %v9135_v28  ;;  %v2969_v1 = vmul.f32 %v2968_v18, %v9403_v0  ;;  %v9445_v32 = vmul.f32 0.70710677, %v9426_v20 }
 0x4e4   :  { %vm2342_vm13 = vweird.f32 %v9350_v47  ;;  %v2346_v52 = vand.u32 2147483647, %v9350_v47  ;;  %v2895_v17 = vmul.f32 %v2894_v59, %v9267_v8  ;;  %v4118_v45 = vunpack.c.l.bf16 %v3412_v36 }
 0x4e5   :  { %v2300_v39 = vmul.f32 %v9384_v5, %v2299_v25  ;;  %v2844_v6 = vmul.f32 %v2843_v34, %v9198_v40  ;;  %v2880_v28 = vmul.f32 %v2879_v42, %v9267_v8  ;;  %v2354_v51 = vmul.f32 %v9445_v32, %v9445_v32 }
 0x4e6   :  { %v2340_v9 = vmul.f32 %v9391_v21, %v2339_v44  ;;  %v2858_v62 = vmul.f32 %v9436_v57, %v9389_v27  ;;  %v2931_v46 = vmul.f32 %v2930_v3, %v9358_v61  ;;  %v9460_v50 = vmul.f32 0.70710677, %v9434_v56  ;;  %4916 = vmatpush.msrb.mxu2 %v4118_v45 }
 0x4e7   :  { %v2916_v63 = vmul.f32 2.1237322e-06, %v9358_v61  ;;  %v2970_v7 = vadd.f32 0.014752088, %v2969_v1  ;;  %v9463_v40 = vmin.f32 %v2354_v51, 16.0  ;;  %v4182_v26 = vunpack.c.l.bf16 %v3444_v24 }
 0x4e8   :  { %vm2303_vm14 = vweird.f32 %v9384_v5  ;;  %vm9466_vm15 = vcmp.eq.f32.partialorder %v2306_v2, 8.507059e+37  ;;  %v2348_v58 = vand.u32 2147483648, %v9350_v47  ;;  %v9471_v59 = vadd.f32 1.0, %v2895_v17 }
 0x4e9   :  { %v2394_v18 = vmul.f32 %v9460_v50, %v9460_v50  ;;  %v2301_v25 = vadd.f32 %v9384_v5, %v2300_v39  ;;  %v2845_v34 = vadd.f32 1.1283791, %v2844_v6  ;;  %v2881_v42 = vadd.f32 0.05243302, %v2880_v28  ;;  %4939 = vmatpush.msrb.mxu3 %v4182_v26  ;;  %vm9488_vm4 = vmor %vm2302_vm12, %vm2303_vm14  ;;  %v3410_v39 = vld [vmem:[#allocation13 + $0x600] sm:$0xff] }
 0x4ea   :  { %v2367_v36 = vmul.f32 3.8918573e-05, %v9463_v40  ;;  %v2341_v44 = vadd.f32 %v9391_v21, %v2340_v9  ;;  %vm2343_vm2 = vweird.f32 %v9391_v21  ;;  %v2859_v2 = vsub.f32 1.0, %v2858_v62 }
 0x4eb   :  { %v2932_v3 = vadd.f32 0.112945676, %v2931_v46  ;;  %v2309_v1 = vor.u32 1.1754944e-38, %v2308_v13  ;;  %vm9479_vm3 = vcmp.eq.f32.partialorder %v2346_v52, 8.507059e+37  ;;  %v2917_v45 = vadd.f32 0.00028619796, %v2916_v63  ;;  %vm9500_vm5 = vmor %vm2342_vm13, %vm2343_vm2 }
 0x4ec   :  { %v2971_v24 = vmul.f32 %v2970_v7, %v9403_v0  ;;  %v2349_v6 = vor.u32 1.1754944e-38, %v2348_v58  ;;  %6976 = vrcp.f32 %v9471_v59  ;;  %v2368_v28 = vadd.f32 0.001143296, %v2367_v36  ;;  %v3500_v52 = vld [vmem:[#allocation13 + $0x8d0] sm:$0xff] }
 0x4ed   :  { %v9493_v13 = vmin.f32 %v2394_v18, 16.0  ;;  %v2305_v51 = vsel %vm9488_vm4, %v9384_v5, %v2301_v25  ;;  %v9505_v43 = vmul.f32 %v2845_v34, %v9174_v37  ;;  %vm2862_vm0 = vweird.f32 %v9389_v27  ;;  %v3532_v46 = vld [vmem:[#allocation13 + $0x9d0] sm:$0xff] }
 0x4ee   :  { %v2882_v62 = vmul.f32 %v2881_v42, %v9267_v8  ;;  %v2345_v63 = vsel %vm9500_vm5, %v9391_v21, %v2341_v44  ;;  %v2860_v5 = vmul.f32 %v9436_v57, %v2859_v2  ;;  %v2933_v47 = vmul.f32 %v2932_v3, %v9358_v61 }
 0x4ef   :  { %v2369_v7 = vmul.f32 %v2368_v28, %v9463_v40  ;;  %v2918_v26 = vmul.f32 %v2917_v45, %v9358_v61  ;;  %v2972_v58 = vadd.f32 0.112945676, %v2971_v24  ;;  %v2407_v37 = vmul.f32 3.8918573e-05, %v9493_v13 }
 0x4f0   :  { %v4294_v18 = vunpack.c.l.bf16 %v3500_v52  ;;  %v2866_v25 = vand.u32 2147483647, %v9389_v27  ;;  %v2868_v34 = vand.u32 2147483648, %v9389_v27  ;;  %v4358_v36 = vunpack.c.l.bf16 %v3532_v46 }
 0x4f1   :  { %v2370_v42 = vadd.f32 0.014752088, %v2369_v7  ;;  %v2310_v21 = vsel %vm9466_vm15, %v2309_v1, %v2305_v51  ;;  %v2350_v44 = vsel %vm9479_vm3, %v2349_v6, %v2345_v63  ;;  %v2883_v2 = vadd.f32 0.18741608, %v2882_v62  ;;  %v3442_v6 = vld [vmem:[#allocation13 + $0x700] sm:$0xff] }
 0x4f2   :  { %v2956_v3 = vmul.f32 2.1237322e-06, %v9403_v0  ;;  %4950 = vmatpush.msra.mxu0 %v4294_v18  ;;  %v9524_v45 = vpop.eup %6976  ;;  %v2861_v24 = vadd.f32 %v9436_v57, %v2860_v5  ;;  %vm2863_vm1 = vweird.f32 %v9436_v57  ;;  %v2934_v28 = vadd.f32 0.4994258, %v2933_v47  ;;  %4973 = vmatpush.msra.mxu1 %v4358_v36  ;;  %v3498_v5 = vld [vmem:[#allocation13 + $0x8c0] sm:$0xff]  ;;  %v3568_v18 = vld [vmem:[#allocation13 + $0xaf0] sm:$0xff] }
 0x4f3   :  { %v2371_v52 = vmul.f32 %v2370_v42, %v9463_v40  ;;  %v2919_v9 = vadd.f32 0.0036580483, %v2918_v26  ;;  %v2973_v33 = vmul.f32 %v2972_v58, %v9403_v0  ;;  %v2408_v1 = vadd.f32 0.001143296, %v2407_v37  ;;  %v3530_v37 = vld [vmem:[#allocation13 + $0x9c0] sm:$0xff]  ;;  %vm9545_vm7 = vmor %vm2862_vm0, %vm2863_vm1 }
 0x4f4   :  { %v4114_v17 = vunpack.c.l.bf16 %v3410_v39  ;;  %v2311_v51 = vmul.f32 %v2310_v21, %v9429_v31  ;;  %vm9531_vm6 = vcmp.eq.f32.partialorder %v2866_v25, 8.507059e+37  ;;  %v2869_v46 = vor.u32 1.1754944e-38, %v2868_v34  ;;  %v3600_v21 = vld [vmem:[#allocation13 + $0xbf0] sm:$0xff] }
 0x4f5   :  { %v9536_v63 = vmul.f32 0.5, %v9332_v12  ;;  %v2351_v47 = vmul.f32 %v2350_v44, %v9441_v48  ;;  %v2898_v7 = vmul.f32 %v9524_v45, %v9471_v59  ;;  %v2957_v26 = vadd.f32 0.00028619796, %v2956_v3 }
 0x4f6   :  { %v2372_v58 = vadd.f32 0.112945676, %v2371_v52  ;;  %4917 = vmatpush.msrb.mxu2 %v4114_v17  ;;  %v2884_v12 = vmul.f32 %v2883_v2, %v9267_v8  ;;  %v2935_v48 = vmul.f32 %v2934_v28, %v9358_v61  ;;  %v2409_v25 = vmul.f32 %v2408_v1, %v9493_v13 }
 0x4f7   :  { %v4178_v34 = vunpack.c.l.bf16 %v3442_v6  ;;  %4918 = vmatmul.f32.vlgmr.msrb.gmra.mxu2 %v9170_v14  ;;  %v2865_v42 = vsel %vm9545_vm7, %v9436_v57, %v2861_v24  ;;  %v2920_v36 = vmul.f32 %v2919_v9, %v9358_v61  ;;  %v2974_v27 = vadd.f32 0.4994258, %v2973_v33  ;;  %v1781_v6 = vpop.f32.mrf.mxu2  ;;  %v9563_v33 = vld [vmem:[#allocation11 + $0x8] sm:$0xff]  ;;  %v3572_v14 = vld [vmem:[#allocation13 + $0xb10] sm:$0xff] }
 0x4f8   :  { %v2373_v39 = vmul.f32 %v2372_v58, %v9463_v40  ;;  %v2410_v44 = vadd.f32 0.014752088, %v2409_v25  ;;  %v4290_v8 = vunpack.c.l.bf16 %v3498_v5  ;;  %v4354_v2 = vunpack.c.l.bf16 %v3530_v37 }
 0x4f9   :  { %4940 = vmatpush.msrb.mxu3 %v4178_v34  ;;  %v4430_v3 = vunpack.c.l.bf16 %v3568_v18  ;;  %v6693_v28 = vclamps-f32 %v2311_v51, 1.0  ;;  %v6694_v52 = vclamps-f32 %v2351_v47, 1.0  ;;  %v2899_v1 = vsub.f32 1.0, %v2898_v7 }
 0x4fa   :  { %v2958_v17 = vmul.f32 %v2957_v26, %v9403_v0  ;;  %4941 = vmatmul.f32.vlgmr.msrb.gmra.mxu3 %v10777_v23  ;;  %v9560_v57 = vadd.f32 1.0, %v2935_v48  ;;  %v2356_v24 = vmul.f32 2.1237322e-06, %v9463_v40  ;;  %4951 = vmatpush.msra.mxu0 %v4290_v8  ;;  %v4494_v9 = vunpack.c.l.bf16 %v3600_v21 }
 0x4fb   :  { %4974 = vmatpush.msra.mxu1 %v4354_v2  ;;  %v10642_v5 = vperm.slane %v9563_v33, 6  ;;  %v2870_v51 = vsel %vm9531_vm6, %v2869_v46, %v2865_v42  ;;  %v2885_v47 = vadd.f32 1.1283791, %v2884_v12  ;;  %v2921_v7 = vadd.f32 0.05243302, %v2920_v36  ;;  %4994 = vmatpush.msra.mxu2 %v4430_v3  ;;  %v10778_v42 = vld [vmem:[#allocation37_spill] sm:$0xff] }
 0x4fc   :  { %v2975_v26 = vmul.f32 %v2974_v27, %v9403_v0  ;;  %v9570_v58 = vmul.f32 0.5, %v9362_v38  ;;  %v2374_v37 = vadd.f32 0.4994258, %v2373_v39  ;;  %v2411_v18 = vmul.f32 %v2410_v44, %v9493_v13  ;;  %5017 = vmatpush.msra.mxu3 %v4494_v9  ;;  %v1804_v44 = vpop.f32.mrf.mxu3  ;;  %v3496_v3 = vld [vmem:[#allocation13 + $0x8b0] sm:$0xff] }
 0x4fd   :  { %v9575_v31 = vadd.f32 %v1781_v6, %v10642_v5  ;;  %v3164_v48 = vadd.f32 1.0, %v6693_v28  ;;  %v3165_v25 = vadd.f32 1.0, %v6694_v52  ;;  %v2900_v62 = vmul.f32 %v9524_v45, %v2899_v1 }
 0x4fe   :  { %v2959_v46 = vadd.f32 0.0036580483, %v2958_v17  ;;  %v2871_v12 = vmul.f32 %v2870_v51, %v9505_v43  ;;  %6978 = vrcp.f32 %v9560_v57  ;;  %v2357_v34 = vadd.f32 0.00028619796, %v2356_v24  ;;  %v3528_v51 = vld [vmem:[#allocation13 + $0x9b0] sm:$0xff] }
 0x4ff   :  { %v10641_v38 = vperm.slane %v9563_v33, 7  ;;  %4921 = vmatmul.f32.gmra.mxu2 %v9387_v4  ;;  %v9583_v36 = vmul.f32 %v2885_v47, %v10778_v42  ;;  %v2922_v27 = vmul.f32 %v2921_v7, %v9358_v61  ;;  %v9586_v39 = vadd.f32 1.0, %v2975_v26 }
 0x500   :  { %v9589_v21 = vmul.f32 0.70710677, %v9575_v31  ;;  %vm2902_vm8 = vweird.f32 %v9471_v59  ;;  %v2906_v43 = vand.u32 2147483647, %v9471_v59  ;;  %v2375_v8 = vmul.f32 %v2374_v37, %v9463_v40  ;;  %v3566_v37 = vld [vmem:[#allocation13 + $0xae0] sm:$0xff] }
 0x501   :  { %v2412_v2 = vadd.f32 0.112945676, %v2411_v18  ;;  %v2901_v28 = vadd.f32 %v9524_v45, %v2900_v62  ;;  %vm2903_vm9 = vweird.f32 %v9524_v45  ;;  %v2908_v52 = vand.u32 2147483648, %v9471_v59  ;;  %v3598_v62 = vld [vmem:[#allocation13 + $0xbe0] sm:$0xff] }
 0x502   :  { %v2960_v1 = vmul.f32 %v2959_v46, %v9403_v0  ;;  %4944 = vmatmul.f32.gmra.mxu3 %v9394_v29  ;;  %v6707_v17 = vclamps-f32 %v2871_v12, 1.0  ;;  %v2358_v6 = vmul.f32 %v2357_v34, %v9463_v40  ;;  %v2434_v24 = vmul.f32 %v9589_v21, %v9589_v21  ;;  %vm9614_vm10 = vmor %vm2902_vm8, %vm2903_vm9 }
 0x503   :  { %v9604_v9 = vadd.f32 %v1804_v44, %v10641_v38  ;;  %v2923_v47 = vadd.f32 0.18741608, %v2922_v27  ;;  %6980 = vrcp.f32 %v9586_v39  ;;  %v2396_v7 = vmul.f32 2.1237322e-06, %v9493_v13 }
 0x504   :  { %v4286_v26 = vunpack.c.l.bf16 %v3496_v3  ;;  %v9608_v18 = vpop.eup %6978  ;;  %v9618_v46 = vadd.f32 1.0, %v2375_v8  ;;  %v2413_v12 = vmul.f32 %v2412_v2, %v9493_v13  ;;  %v9621_v34 = vmin.f32 %v2434_v24, 16.0 }
 0x505   :  { %v9624_v42 = vmul.f32 0.70710677, %v9604_v9  ;;  %v2905_v27 = vsel %vm9614_vm10, %v9524_v45, %v2901_v28  ;;  %v2909_v44 = vor.u32 1.1754944e-38, %v2908_v52  ;;  %v2961_v3 = vadd.f32 0.05243302, %v2960_v1 }
 0x506   :  { %4952 = vmatpush.msra.mxu0 %v4286_v26  ;;  %v4350_v59 = vunpack.c.l.bf16 %v3528_v51  ;;  %v2359_v38 = vadd.f32 0.0036580483, %v2358_v6  ;;  %v2447_v5 = vmul.f32 3.8918573e-05, %v9621_v34  ;;  %v4426_v2 = vunpack.c.l.bf16 %v3566_v37  ;;  %v1738_v37 = vpop.f32.mrf.mxu0 }
 0x507   :  { %v2474_v8 = vmul.f32 %v9624_v42, %v9624_v42  ;;  %v3178_v24 = vadd.f32 1.0, %v6707_v17  ;;  %vm2907_vm11 = vcmp.eq.f32.partialorder %v2906_v43, 8.507059e+37  ;;  %v2938_v22 = vmul.f32 %v9608_v18, %v9560_v57 }
 0x508   :  { %v2397_v29 = vadd.f32 0.00028619796, %v2396_v7  ;;  %4975 = vmatpush.msra.mxu1 %v4350_v59  ;;  %v2910_v45 = vsel %vm2907_vm11, %v2909_v44, %v2905_v27  ;;  %v2924_v28 = vmul.f32 %v2923_v47, %v9358_v61  ;;  %6982 = vrcp.f32 %v9618_v46  ;;  %4995 = vmatpush.msra.mxu2 %v4426_v2 }
 0x509   :  { %v2414_v52 = vadd.f32 0.4994258, %v2413_v12  ;;  %v9636_v1 = vpop.eup %6980  ;;  %v9639_v6 = vmul.f32 %v3164_v48, %v9379_v19  ;;  %v9642_v43 = vmul.f32 %v3165_v25, %v9397_v11  ;;  %v2448_v17 = vadd.f32 0.001143296, %v2447_v5  ;;  %v3494_v12 = vld [vmem:[#allocation13 + $0x8a0] sm:$0xff] }
 0x50a   :  { %v9644_v51 = vmin.f32 %v2474_v8, 16.0  ;;  %v2962_v7 = vmul.f32 %v2961_v3, %v9403_v0  ;;  %v9648_v26 = vmul.f32 0.5, %v9426_v20  ;;  %v2360_v61 = vmul.f32 %v2359_v38, %v9463_v40 }
 0x50b   :  { %v4490_v47 = vunpack.c.l.bf16 %v3598_v62  ;;  %v9652_v27 = vmul.f32 %v3178_v24, %v9400_v54  ;;  %v2911_v19 = vmul.f32 %v2910_v45, %v9583_v36  ;;  %v2939_v11 = vsub.f32 1.0, %v2938_v22  ;;  %v1761_v22 = vpop.f32.mrf.mxu1 }
 0x50c   :  { %v2398_v5 = vmul.f32 %v2397_v29, %v9493_v13  ;;  %v2925_v48 = vadd.f32 1.1283791, %v2924_v28  ;;  %v2946_v25 = vand.u32 2147483647, %v9560_v57  ;;  %v2978_v20 = vmul.f32 %v9636_v1, %v9586_v39 }
 0x50d   :  { %v2415_v44 = vmul.f32 %v2414_v52, %v9493_v13  ;;  %5018 = vmatpush.msra.mxu3 %v4490_v47  ;;  %v2449_v38 = vmul.f32 %v2448_v17, %v9621_v34  ;;  %v2487_v3 = vmul.f32 3.8918573e-05, %v9644_v51  ;;  %v10781_v54 = vperm.slane %v8893_v41, 4 }
 0x50e   :  { %v4282_v36 = vunpack.c.l.bf16 %v3494_v12  ;;  %v9666_v29 = vpop.eup %6982  ;;  %v2948_v8 = vand.u32 2147483648, %v9560_v57  ;;  %v2963_v2 = vadd.f32 0.18741608, %v2962_v7  ;;  %v2361_v24 = vadd.f32 0.05243302, %v2360_v61 }
 0x50f   :  { %v9664_v59 = vadd.f32 %v1738_v37, %v10781_v54  ;;  %v9670_v62 = vmul.f32 0.5, %v9434_v56  ;;  %v6708_v45 = vclamps-f32 %v2911_v19, 1.0  ;;  %v2940_v28 = vmul.f32 %v9608_v18, %v2939_v11  ;;  %v3526_v11 = vld [vmem:[#allocation13 + $0x9a0] sm:$0xff] }
 0x510   :  { %vm2942_vm12 = vweird.f32 %v9560_v57  ;;  %v2399_v52 = vadd.f32 0.0036580483, %v2398_v5  ;;  %4953 = vmatpush.msra.mxu0 %v4282_v36  ;;  %v2979_v17 = vsub.f32 1.0, %v2978_v20  ;;  %v9674_v47 = vadd.f32 1.0, %v2415_v44 }
 0x511   :  { %v2436_v37 = vmul.f32 2.1237322e-06, %v9621_v34  ;;  %v10782_v12 = vperm.slane %v8893_v41, 5  ;;  %v2378_v56 = vmul.f32 %v9666_v29, %v9618_v46  ;;  %v2450_v7 = vadd.f32 0.014752088, %v2449_v38 }
 0x512   :  { %v2488_v61 = vadd.f32 0.001143296, %v2487_v3  ;;  %v9684_v19 = vmul.f32 0.70710677, %v9664_v59  ;;  %vm9686_vm13 = vcmp.eq.f32.partialorder %v2946_v25, 8.507059e+37  ;;  %v2949_v5 = vor.u32 1.1754944e-38, %v2948_v8 }
 0x513   :  { %v9679_v54 = vadd.f32 %v1761_v22, %v10782_v12  ;;  %v2964_v20 = vmul.f32 %v2963_v2, %v9403_v0  ;;  %v2362_v44 = vmul.f32 %v2361_v24, %v9463_v40  ;;  %v9692_v41 = vadd.f32 1.0, %v6708_v45 }
 0x514   :  { %v2941_v22 = vadd.f32 %v9608_v18, %v2940_v28  ;;  %vm2943_vm14 = vweird.f32 %v9608_v18  ;;  %v2994_v38 = vmul.f32 %v9684_v19, %v9684_v19  ;;  %v2980_v3 = vmul.f32 %v9636_v1, %v2979_v17 }
 0x515   :  { %v2400_v25 = vmul.f32 %v2399_v52, %v9493_v13  ;;  %v2437_v36 = vadd.f32 0.00028619796, %v2436_v37  ;;  %v9701_v8 = vmul.f32 0.70710677, %v9679_v54  ;;  %v2379_v0 = vsub.f32 1.0, %v2378_v56  ;;  %vm9709_vm15 = vmor %vm2942_vm12, %vm2943_vm14 }
 0x516   :  { %6984 = vrcp.f32 %v9674_v47  ;;  %v2451_v2 = vmul.f32 %v2450_v7, %v9621_v34  ;;  %v2489_v24 = vmul.f32 %v2488_v61, %v9644_v51  ;;  %v2926_v45 = vmul.f32 %v2925_v48, %v9345_v60 }
 0x517   :  { %v2965_v52 = vadd.f32 1.1283791, %v2964_v20  ;;  %v2986_v17 = vand.u32 2147483647, %v9586_v39  ;;  %v2363_v37 = vadd.f32 0.18741608, %v2362_v44  ;;  %v2945_v12 = vsel %vm9709_vm15, %v9608_v18, %v2941_v22 }
 0x518   :  { %v2988_v56 = vand.u32 2147483648, %v9586_v39  ;;  %v9718_v7 = vmin.f32 %v2994_v38, 16.0  ;;  %v3034_v60 = vmul.f32 %v9701_v8, %v9701_v8  ;;  %v2981_v57 = vadd.f32 %v9636_v1, %v2980_v3  ;;  %v3564_v38 = vld [vmem:[#allocation13 + $0xad0] sm:$0xff] }
 0x519   :  { %vm2983_vm2 = vweird.f32 %v9636_v1  ;;  %v2401_v48 = vadd.f32 0.05243302, %v2400_v25  ;;  %v2438_v61 = vmul.f32 %v2437_v36, %v9621_v34  ;;  %v2380_v20 = vmul.f32 %v9666_v29, %v2379_v0 }
 0x51a   :  { %v2452_v44 = vadd.f32 0.112945676, %v2451_v2  ;;  %v2476_v28 = vmul.f32 2.1237322e-06, %v9644_v51  ;;  %v2490_v18 = vadd.f32 0.014752088, %v2489_v24  ;;  %v2966_v22 = vmul.f32 %v2965_v52, %v9376_v53 }
 0x51b   :  { %vm2982_vm3 = vweird.f32 %v9586_v39  ;;  %vm9729_vm4 = vcmp.eq.f32.partialorder %v2986_v17, 8.507059e+37  ;;  %v2364_v3 = vmul.f32 %v2363_v37, %v9463_v40  ;;  %v2950_v25 = vsel %vm9686_vm13, %v2949_v5, %v2945_v12 }
 0x51c   :  { %v9734_v4 = vpop.eup %6984  ;;  %vm9738_vm5 = vmor %vm2982_vm3, %vm2983_vm2  ;;  %v2989_v0 = vor.u32 1.1754944e-38, %v2988_v56  ;;  %v3007_v53 = vmul.f32 3.8918573e-05, %v9718_v7  ;;  %v9743_v2 = vmin.f32 %v3034_v60, 16.0  ;;  %vm2383_vm0 = vweird.f32 %v9666_v29 }
 0x51d   :  { %v2985_v39 = vsel %vm9738_vm5, %v9636_v1, %v2981_v57  ;;  %v2402_v40 = vmul.f32 %v2401_v48, %v9493_v13  ;;  %v2439_v24 = vadd.f32 0.0036580483, %v2438_v61  ;;  %v2381_v5 = vadd.f32 %v9666_v29, %v2380_v20 }
 0x51e   :  { %v2453_v52 = vmul.f32 %v2452_v44, %v9621_v34  ;;  %v2477_v17 = vadd.f32 0.00028619796, %v2476_v28  ;;  %v2491_v37 = vmul.f32 %v2490_v18, %v9644_v51  ;;  %v2365_v12 = vadd.f32 1.1283791, %v2364_v3 }
 0x51f   :  { %vm2382_vm1 = vweird.f32 %v9618_v46  ;;  %v2388_v56 = vand.u32 2147483648, %v9618_v46  ;;  %v2418_v1 = vmul.f32 %v9734_v4, %v9674_v47  ;;  %v2386_v60 = vand.u32 2147483647, %v9618_v46 }
 0x520   :  { %v3008_v57 = vadd.f32 0.001143296, %v3007_v53  ;;  %v3047_v48 = vmul.f32 3.8918573e-05, %v9743_v2  ;;  %v4346_v61 = vunpack.c.l.bf16 %v3526_v11  ;;  %v9759_v20 = vmul.f32 %v2950_v25, %v2926_v45  ;;  %vm9765_vm6 = vmor %vm2382_vm1, %vm2383_vm0 }
 0x521   :  { %v2990_v44 = vsel %vm9729_vm4, %v2989_v0, %v2985_v39  ;;  %v2403_v18 = vadd.f32 0.18741608, %v2402_v40  ;;  %v2440_v3 = vmul.f32 %v2439_v24, %v9621_v34  ;;  %v2385_v46 = vsel %vm9765_vm6, %v9666_v29, %v2381_v5  ;;  %v3596_v0 = vld [vmem:[#allocation13 + $0xbd0] sm:$0xff] }
 0x522   :  { %v2454_v36 = vadd.f32 0.4994258, %v2453_v52  ;;  %v2478_v45 = vmul.f32 %v2477_v17, %v9644_v51  ;;  %v2492_v25 = vadd.f32 0.112945676, %v2491_v37  ;;  %4976 = vmatpush.msra.mxu1 %v4346_v61  ;;  %v2366_v53 = vmul.f32 %v2365_v12, %v9445_v32  ;;  %v3524_v5 = vld [vmem:[#allocation13 + $0x990] sm:$0xff]  ;;  %v3562_v52 = vld [vmem:[#allocation13 + $0xac0] sm:$0xff] }
 0x523   :  { %v2389_v39 = vor.u32 1.1754944e-38, %v2388_v56  ;;  %v2419_v11 = vsub.f32 1.0, %v2418_v1  ;;  %v3048_v16 = vadd.f32 0.001143296, %v3047_v48  ;;  %v9775_v40 = vmul.f32 %v2990_v44, %v2966_v22  ;;  %v3594_v1 = vld [vmem:[#allocation13 + $0xbc0] sm:$0xff] }
 0x524   :  { %vm2387_vm7 = vcmp.eq.f32.partialorder %v2386_v60, 8.507059e+37  ;;  %v2996_v24 = vmul.f32 2.1237322e-06, %v9718_v7  ;;  %v3009_v29 = vmul.f32 %v3008_v57, %v9718_v7  ;;  %v2441_v37 = vadd.f32 0.05243302, %v2440_v3  ;;  %v3490_v44 = vld [vmem:[#allocation13 + $0x880] sm:$0xff] }
 0x525   :  { %v2390_v17 = vsel %vm2387_vm7, %v2389_v39, %v2385_v46  ;;  %v4422_v61 = vunpack.c.l.bf16 %v3564_v38  ;;  %v4486_v28 = vunpack.c.l.bf16 %v3596_v0  ;;  %v2455_v23 = vmul.f32 %v2454_v36, %v9621_v34 }
 0x526   :  { %v2479_v32 = vadd.f32 0.0036580483, %v2478_v45  ;;  %v2493_v12 = vmul.f32 %v2492_v25, %v9644_v51  ;;  %v4278_v56 = vunpack.c.l.bf16 %v3492_v15  ;;  %v2420_v22 = vmul.f32 %v9734_v4, %v2419_v11  ;;  %v3522_v45 = vld [vmem:[#allocation13 + $0x980] sm:$0xff] }
 0x527   :  { %v3049_v60 = vmul.f32 %v3048_v16, %v9743_v2  ;;  %4996 = vmatpush.msra.mxu2 %v4422_v61  ;;  %5019 = vmatpush.msra.mxu3 %v4486_v28  ;;  %v4342_v57 = vunpack.c.l.bf16 %v3524_v5  ;;  %v4418_v48 = vunpack.c.l.bf16 %v3562_v52  ;;  %v6709_v3 = vclamps-f32 %v9759_v20, 1.0  ;;  %v3560_v52 = vld [vmem:[#allocation13 + $0xab0] sm:$0xff] }
 0x528   :  { %v2404_v46 = vmul.f32 %v2403_v18, %v9493_v13  ;;  %v2997_v38 = vadd.f32 0.00028619796, %v2996_v24  ;;  %v3010_v36 = vadd.f32 0.014752088, %v3009_v29  ;;  %4954 = vmatpush.msra.mxu0 %v4278_v56  ;;  %v6710_v15 = vclamps-f32 %v9775_v40, 1.0 }
 0x529   :  { %v2391_v25 = vmul.f32 %v2390_v17, %v2366_v53  ;;  %v2442_v0 = vmul.f32 %v2441_v37, %v9621_v34  ;;  %4977 = vmatpush.msra.mxu1 %v4342_v57  ;;  %4997 = vmatpush.msra.mxu2 %v4418_v48  ;;  %v4482_v16 = vunpack.c.l.bf16 %v3594_v1  ;;  %v9787_v39 = vadd.f32 1.0, %v2455_v23  ;;  %v3592_v53 = vld [vmem:[#allocation13 + $0xbb0] sm:$0xff]  ;;  %v1784_v17 = vpop.f32.mrf.mxu2 }
 0x52a   :  { %v2480_v11 = vmul.f32 %v2479_v32, %v9644_v51  ;;  %v2494_v5 = vadd.f32 0.4994258, %v2493_v12  ;;  %v4274_v20 = vunpack.c.l.bf16 %v3490_v44  ;;  %v2421_v13 = vadd.f32 %v9734_v4, %v2420_v22 }
 0x52b   :  { %vm2423_vm8 = vweird.f32 %v9734_v4  ;;  %v3050_v18 = vadd.f32 0.014752088, %v3049_v60  ;;  %5020 = vmatpush.msra.mxu3 %v4482_v16  ;;  %v4338_v40 = vunpack.c.l.bf16 %v3522_v45  ;;  %vm2422_vm9 = vweird.f32 %v9674_v47 }
 0x52c   :  { %v2428_v24 = vand.u32 2147483648, %v9674_v47  ;;  %v2998_v23 = vmul.f32 %v2997_v38, %v9718_v7  ;;  %v3011_v29 = vmul.f32 %v3010_v36, %v9718_v7  ;;  %4955 = vmatpush.msra.mxu0 %v4274_v20  ;;  %v6695_v37 = vclamps-f32 %v2391_v25, 1.0  ;;  %vm9799_vm10 = vmor %vm2422_vm9, %vm2423_vm8 }
 0x52d   :  { %v2426_v61 = vand.u32 2147483647, %v9674_v47  ;;  %v2443_v28 = vadd.f32 0.18741608, %v2442_v0  ;;  %4978 = vmatpush.msra.mxu1 %v4338_v40  ;;  %v4414_v32 = vunpack.c.l.bf16 %v3560_v52  ;;  %6986 = vrcp.f32 %v9787_v39  ;;  %v3520_v40 = vld [vmem:[#allocation13 + $0x970] sm:$0xff] }
 0x52e   :  { %v2481_v56 = vadd.f32 0.05243302, %v2480_v11  ;;  %v2495_v1 = vmul.f32 %v2494_v5, %v9644_v51  ;;  %v4478_v22 = vunpack.c.l.bf16 %v3592_v53  ;;  %v2425_v60 = vsel %vm9799_vm10, %v9734_v4, %v2421_v13  ;;  %v1807_v11 = vpop.f32.mrf.mxu3  ;;  %v3488_v5 = vld [vmem:[#allocation13 + $0x870] sm:$0xff]  ;;  %v3558_v53 = vld [vmem:[#allocation13 + $0xaa0] sm:$0xff] }
 0x52f   :  { %v3036_v47 = vmul.f32 2.1237322e-06, %v9743_v2  ;;  %v3051_v57 = vmul.f32 %v3050_v18, %v9743_v2  ;;  %4998 = vmatpush.msra.mxu2 %v4414_v32  ;;  %v10795_v48 = vperm.slane %v9563_v33, 6  ;;  %v9816_v38 = vmul.f32 %v9692_v41, %v9420_v55  ;;  %v3590_v55 = vld [vmem:[#allocation13 + $0xba0] sm:$0xff] }
 0x530   :  { %v2429_v36 = vor.u32 1.1754944e-38, %v2428_v24  ;;  %v2999_v45 = vadd.f32 0.0036580483, %v2998_v23  ;;  %v3012_v25 = vadd.f32 0.112945676, %v3011_v29  ;;  %5021 = vmatpush.msra.mxu3 %v4478_v22  ;;  %v3180_v0 = vadd.f32 1.0, %v6709_v3 }
 0x531   :  { %v9812_v44 = vadd.f32 %v1784_v17, %v10795_v48  ;;  %v3181_v16 = vadd.f32 1.0, %v6710_v15  ;;  %v2405_v4 = vadd.f32 1.1283791, %v2404_v46  ;;  %vm2427_vm11 = vcmp.eq.f32.partialorder %v2426_v61, 8.507059e+37 }
 0x532   :  { %v3166_v20 = vadd.f32 1.0, %v6695_v37  ;;  %v2430_v52 = vsel %vm2427_vm11, %v2429_v36, %v2425_v60  ;;  %v2444_v13 = vmul.f32 %v2443_v28, %v9621_v34  ;;  %v9819_v18 = vadd.f32 1.0, %v2495_v1 }
 0x533   :  { %10796 = vst [vmem:[#allocation37_spill] sm:$0xff] %v9812_v44  ;;  %v2482_v41 = vmul.f32 %v2481_v56, %v9644_v51  ;;  %v3037_v24 = vadd.f32 0.00028619796, %v3036_v47  ;;  %v3052_v23 = vadd.f32 0.112945676, %v3051_v57  ;;  %v9825_v46 = vpop.eup %6986  ;;  %v3000_v15 = vmul.f32 %v2999_v45, %v9718_v7  ;;  %v3556_v45 = vld [vmem:[#allocation13 + $0xa90] sm:$0xff] }
 0x534   :  { %v9823_v3 = vmul.f32 0.70710677, %v9812_v44  ;;  %v3013_v29 = vmul.f32 %v3012_v25, %v9718_v7  ;;  %v10797_v34 = vperm.slane %v9563_v33, 7  ;;  %v4270_v37 = vunpack.c.l.bf16 %v3488_v5  ;;  %v3486_v33 = vld [vmem:[#allocation13 + $0x860] sm:$0xff]  ;;  %v3588_v25 = vld [vmem:[#allocation13 + $0xb90] sm:$0xff] }
 0x535   :  { %v4334_v28 = vunpack.c.l.bf16 %v3520_v40  ;;  %v4410_v32 = vunpack.c.l.bf16 %v3558_v53  ;;  %v4474_v12 = vunpack.c.l.bf16 %v3590_v55  ;;  %v9836_v56 = vmul.f32 %v3180_v0, %v9536_v63  ;;  %v3518_v63 = vld [vmem:[#allocation13 + $0x960] sm:$0xff] }
 0x536   :  { %v9831_v17 = vadd.f32 %v1807_v11, %v10797_v34  ;;  %v3074_v61 = vmul.f32 %v9823_v3, %v9823_v3  ;;  %v9839_v1 = vmul.f32 %v3181_v16, %v9570_v58  ;;  %v2406_v22 = vmul.f32 %v2405_v4, %v9460_v50  ;;  %4956 = vmatpush.msra.mxu0 %v4270_v37  ;;  %v3484_v16 = vld [vmem:[#allocation13 + $0x850] sm:$0xff]  ;;  %v3554_v11 = vld [vmem:[#allocation13 + $0xa80] sm:$0xff] }
 0x537   :  { %v2445_v60 = vadd.f32 1.1283791, %v2444_v13  ;;  %v2458_v47 = vmul.f32 %v9825_v46, %v9787_v39  ;;  %v2483_v57 = vadd.f32 0.18741608, %v2482_v41  ;;  %v3053_v48 = vmul.f32 %v3052_v23, %v9743_v2  ;;  %4979 = vmatpush.msra.mxu1 %v4334_v28  ;;  %4999 = vmatpush.msra.mxu2 %v4410_v32  ;;  %v3516_v4 = vld [vmem:[#allocation13 + $0x950] sm:$0xff]  ;;  %v3482_v32 = vld [vmem:[#allocation13 + $0x840] sm:$0xff] }
 0x538   :  { %10798 = vst [vmem:[#allocation40_spill] sm:$0xff] %v9831_v17  ;;  %v9845_v36 = vmin.f32 %v3074_v61, 16.0  ;;  %v9848_v58 = vmul.f32 %v3166_v20, %v9648_v26  ;;  %v9850_v50 = vmul.f32 %v2430_v52, %v2406_v22  ;;  %6988 = vrcp.f32 %v9819_v18  ;;  %5022 = vmatpush.msra.mxu3 %v4474_v12  ;;  %v3586_v61 = vld [vmem:[#allocation13 + $0xb80] sm:$0xff] }
 0x539   :  { %v9854_v0 = vmul.f32 0.70710677, %v9831_v17  ;;  %v3001_v5 = vadd.f32 0.05243302, %v3000_v15  ;;  %v3014_v13 = vadd.f32 0.4994258, %v3013_v29  ;;  %v3038_v40 = vmul.f32 %v3037_v24, %v9743_v2 }
 0x53a   :  { %v3087_v53 = vmul.f32 3.8918573e-05, %v9845_v36  ;;  %v4266_v20 = vunpack.c.l.bf16 %v3486_v33  ;;  %v4330_v52 = vunpack.c.l.bf16 %v3518_v63  ;;  %v4406_v55 = vunpack.c.l.bf16 %v3556_v45 }
 0x53b   :  { %v3114_v26 = vmul.f32 %v9854_v0, %v9854_v0  ;;  %v2459_v41 = vsub.f32 1.0, %v2458_v47  ;;  %v3054_v23 = vadd.f32 0.4994258, %v3053_v48  ;;  %v4470_v37 = vunpack.c.l.bf16 %v3588_v25 }
 0x53c   :  { %v3088_v34 = vadd.f32 0.001143296, %v3087_v53  ;;  %4957 = vmatpush.msra.mxu0 %v4266_v20  ;;  %4980 = vmatpush.msra.mxu1 %v4330_v52  ;;  %v4262_v15 = vunpack.c.l.bf16 %v3484_v16  ;;  %v4326_v29 = vunpack.c.l.bf16 %v3516_v4  ;;  %v4402_v24 = vunpack.c.l.bf16 %v3554_v11  ;;  %v3584_v20 = vld [vmem:[#allocation13 + $0xb70] sm:$0xff] }
 0x53d   :  { %v9860_v28 = vmin.f32 %v3114_v26, 16.0  ;;  %v6696_v12 = vclamps-f32 %v9850_v50, 1.0  ;;  %v9864_v22 = vmul.f32 %v2445_v60, %v9589_v21  ;;  %v3002_v33 = vmul.f32 %v3001_v5, %v9718_v7  ;;  %5000 = vmatpush.msra.mxu2 %v4406_v55  ;;  %5023 = vmatpush.msra.mxu3 %v4470_v37  ;;  %v3514_v21 = vld [vmem:[#allocation13 + $0x940] sm:$0xff]  ;;  %v3552_v5 = vld [vmem:[#allocation13 + $0xa70] sm:$0xff] }
 0x53e   :  { %v3039_v47 = vadd.f32 0.0036580483, %v3038_v40  ;;  %v9867_v48 = vpop.eup %6988  ;;  %vm2462_vm12 = vweird.f32 %v9787_v39  ;;  %v3015_v63 = vmul.f32 %v3014_v13, %v9718_v7  ;;  %v3089_v45 = vmul.f32 %v3088_v34, %v9845_v36  ;;  %4958 = vmatpush.msra.mxu0 %v4262_v15  ;;  %4981 = vmatpush.msra.mxu1 %v4326_v29  ;;  %v3512_v15 = vld [vmem:[#allocation13 + $0x930] sm:$0xff] }
 0x53f   :  { %v3127_v25 = vmul.f32 3.8918573e-05, %v9860_v28  ;;  %v4466_v50 = vunpack.c.l.bf16 %v3586_v61  ;;  %v2466_v60 = vand.u32 2147483647, %v9787_v39  ;;  %v2484_v16 = vmul.f32 %v2483_v57, %v9644_v51  ;;  %5001 = vmatpush.msra.mxu2 %v4402_v24  ;;  %v3480_v57 = vld [vmem:[#allocation13 + $0x830] sm:$0xff] }
 0x540   :  { %v3055_v4 = vmul.f32 %v3054_v23, %v9743_v2  ;;  %v4258_v11 = vunpack.c.l.bf16 %v3482_v32  ;;  %v2460_v40 = vmul.f32 %v9825_v46, %v2459_v41  ;;  %v2468_v13 = vand.u32 2147483648, %v9787_v39 }
 0x541   :  { %v3090_v53 = vadd.f32 0.014752088, %v3089_v45  ;;  %v3128_v26 = vadd.f32 0.001143296, %v3127_v25  ;;  %5024 = vmatpush.msra.mxu3 %v4466_v50  ;;  %v2498_v52 = vmul.f32 %v9867_v48, %v9819_v18  ;;  %v3003_v55 = vadd.f32 0.18741608, %v3002_v33 }
 0x542   :  { %v3040_v34 = vmul.f32 %v3039_v47, %v9743_v2  ;;  %4959 = vmatpush.msra.mxu0 %v4258_v11  ;;  %v4322_v51 = vunpack.c.l.bf16 %v3514_v21  ;;  %v9881_v23 = vadd.f32 1.0, %v3015_v63  ;;  %v4398_v61 = vunpack.c.l.bf16 %v3552_v5  ;;  %v3550_v25 = vld [vmem:[#allocation13 + $0xa60] sm:$0xff] }
 0x543   :  { %v3091_v37 = vmul.f32 %v3090_v53, %v9845_v36  ;;  %v3129_v41 = vmul.f32 %v3128_v26, %v9860_v28  ;;  %v9885_v29 = vadd.f32 1.0, %v6696_v12  ;;  %v2485_v24 = vadd.f32 1.1283791, %v2484_v16  ;;  %v3478_v53 = vld [vmem:[#allocation13 + $0x820] sm:$0xff] }
 0x544   :  { %v9887_v32 = vadd.f32 1.0, %v3055_v4  ;;  %4982 = vmatpush.msra.mxu1 %v4322_v51  ;;  %v4462_v33 = vunpack.c.l.bf16 %v3584_v20  ;;  %v2461_v47 = vadd.f32 %v9825_v46, %v2460_v40  ;;  %vm2463_vm13 = vweird.f32 %v9825_v46  ;;  %5002 = vmatpush.msra.mxu2 %v4398_v61  ;;  %v3582_v4 = vld [vmem:[#allocation13 + $0xb60] sm:$0xff] }
 0x545   :  { %v3130_v45 = vadd.f32 0.014752088, %v3129_v41  ;;  %v4254_v63 = vunpack.c.l.bf16 %v3480_v57  ;;  %vm9891_vm14 = vcmp.eq.f32.partialorder %v2466_v60, 8.507059e+37  ;;  %v3041_v21 = vadd.f32 0.05243302, %v3040_v34  ;;  %v3510_v26 = vld [vmem:[#allocation13 + $0x920] sm:$0xff]  ;;  %vm9902_vm15 = vmor %vm2462_vm12, %vm2463_vm13 }
 0x546   :  { %v3092_v12 = vadd.f32 0.112945676, %v3091_v37  ;;  %5025 = vmatpush.msra.mxu3 %v4462_v33  ;;  %v4318_v16 = vunpack.c.l.bf16 %v3512_v15  ;;  %v2499_v11 = vsub.f32 1.0, %v2498_v52  ;;  %v3004_v5 = vmul.f32 %v3003_v55, %v9718_v7  ;;  %v3548_v55 = vld [vmem:[#allocation13 + $0xa50] sm:$0xff]  ;;  %v3506_v60 = vld [vmem:[#allocation13 + $0x900] sm:$0xff] }
 0x547   :  { %6990 = vrcp.f32 %v9881_v23  ;;  %v3131_v40 = vmul.f32 %v3130_v45, %v9860_v28  ;;  %4960 = vmatpush.msra.mxu0 %v4254_v63  ;;  %v2469_v20 = vor.u32 1.1754944e-38, %v2468_v13  ;;  %v9907_v52 = vmul.f32 %v2485_v24, %v9624_v42  ;;  %v3580_v37 = vld [vmem:[#allocation13 + $0xb50] sm:$0xff]  ;;  %v3546_v63 = vld [vmem:[#allocation13 + $0xa40] sm:$0xff] }
 0x548   :  { %6992 = vrcp.f32 %v9887_v32  ;;  %4983 = vmatpush.msra.mxu1 %v4318_v16  ;;  %v4394_v7 = vunpack.c.l.bf16 %v3550_v25  ;;  %v2465_v34 = vsel %vm9902_vm15, %v9825_v46, %v2461_v47  ;;  %v2508_v51 = vand.u32 2147483648, %v9819_v18  ;;  %v3476_v41 = vld [vmem:[#allocation13 + $0x810] sm:$0xff]  ;;  %v3578_v25 = vld [vmem:[#allocation13 + $0xb40] sm:$0xff] }
 0x549   :  { %v3132_v39 = vadd.f32 0.112945676, %v3131_v40  ;;  %v4458_v57 = vunpack.c.l.bf16 %v3582_v4  ;;  %vm2502_vm2 = vweird.f32 %v9819_v18  ;;  %v2506_v42 = vand.u32 2147483647, %v9819_v18  ;;  %v3508_v24 = vld [vmem:[#allocation13 + $0x910] sm:$0xff] }
 0x54a   :  { %v3093_v13 = vmul.f32 %v3092_v12, %v9845_v36  ;;  %5003 = vmatpush.msra.mxu2 %v4394_v7  ;;  %v4250_v61 = vunpack.c.l.bf16 %v3478_v53  ;;  %v4314_v15 = vunpack.c.l.bf16 %v3510_v26  ;;  %v2500_v33 = vmul.f32 %v9867_v48, %v2499_v11  ;;  %v3474_v26 = vld [vmem:[#allocation13 + $0x800] sm:$0xff] }
 0x54b   :  { %v3005_v45 = vadd.f32 1.1283791, %v3004_v5  ;;  %v3042_v46 = vmul.f32 %v3041_v21, %v9743_v2  ;;  %5026 = vmatpush.msra.mxu3 %v4458_v57  ;;  %v4390_v47 = vunpack.c.l.bf16 %v3548_v55  ;;  %v2470_v16 = vsel %vm9891_vm14, %v2469_v20, %v2465_v34  ;;  %v3576_v57 = vld [vmem:[#allocation13 + $0xb30] sm:$0xff] }
 0x54c   :  { %v3133_v4 = vmul.f32 %v3132_v39, %v9860_v28  ;;  %4961 = vmatpush.msra.mxu0 %v4250_v61  ;;  %4984 = vmatpush.msra.mxu1 %v4314_v15  ;;  %v4454_v12 = vunpack.c.l.bf16 %v3580_v37  ;;  %v4246_v40 = vunpack.c.l.bf16 %v3476_v41  ;;  %vm2503_vm3 = vweird.f32 %v9867_v48  ;;  %v3544_v39 = vld [vmem:[#allocation13 + $0xa30] sm:$0xff] }
 0x54d   :  { %v9922_v53 = vpop.eup %6990  ;;  %v9925_v11 = vor.u32 1.1754944e-38, %v2508_v51  ;;  %v3076_v21 = vmul.f32 2.1237322e-06, %v9845_v36  ;;  %5004 = vmatpush.msra.mxu2 %v4390_v47  ;;  %v4310_v5 = vunpack.c.l.bf16 %v3508_v24  ;;  %v3094_v20 = vadd.f32 0.4994258, %v3093_v13  ;;  %v3632_v13 = vld [vmem:[#allocation13 + $0xcf0] sm:$0xff]  ;;  %vm9957_vm5 = vmor %vm2502_vm2, %vm2503_vm3 }
 0x54e   :  { %v9928_v50 = vpop.eup %6992  ;;  %v3116_v7 = vmul.f32 2.1237322e-06, %v9860_v28  ;;  %5027 = vmatpush.msra.mxu3 %v4454_v12  ;;  %4962 = vmatpush.msra.mxu0 %v4246_v40  ;;  %v4386_v55 = vunpack.c.l.bf16 %v3546_v63  ;;  %v4450_v34 = vunpack.c.l.bf16 %v3578_v25  ;;  %v9932_v51 = vmul.f32 %v2470_v16, %v9864_v22  ;;  %v3664_v15 = vld [vmem:[#allocation13 + $0xdf0] sm:$0xff]  ;;  %v3542_v24 = vld [vmem:[#allocation13 + $0xa20] sm:$0xff] }
 0x54f   :  { %v9935_v37 = vadd.f32 %v9867_v48, %v2500_v33  ;;  %v9938_v41 = vmul.f32 %v3005_v45, %v9684_v19  ;;  %v3043_v61 = vadd.f32 0.18741608, %v3042_v46  ;;  %4985 = vmatpush.msra.mxu1 %v4310_v5  ;;  %v9942_v47 = vmul.f32 %v9922_v53, %v9881_v23  ;;  %v3574_v16 = vld [vmem:[#allocation13 + $0xb20] sm:$0xff] }
 0x550   :  { %v3134_v63 = vadd.f32 0.4994258, %v3133_v4  ;;  %5005 = vmatpush.msra.mxu2 %v4386_v55  ;;  %5028 = vmatpush.msra.mxu3 %v4450_v34  ;;  %v4242_v22 = vunpack.c.l.bf16 %v3474_v26  ;;  %v4306_v25 = vunpack.c.l.bf16 %v3506_v60  ;;  %v3630_v33 = vld [vmem:[#allocation13 + $0xce0] sm:$0xff]  ;;  %vm9944_vm4 = vcmp.eq.f32.partialorder %v2506_v42, 8.507059e+37  ;;  %v3540_v34 = vld [vmem:[#allocation13 + $0xa10] sm:$0xff] }
 0x551   :  { %v3662_v12 = vld [vmem:[#allocation13 + $0xde0] sm:$0xff]  ;;  %v9950_v45 = vmul.f32 %v9928_v50, %v9887_v32  ;;  %v3077_v46 = vadd.f32 0.00028619796, %v3076_v21  ;;  %v4382_v40 = vunpack.c.l.bf16 %v3544_v39  ;;  %v4446_v5 = vunpack.c.l.bf16 %v3576_v57  ;;  %v3628_v42 = vld [vmem:[#allocation13 + $0xcd0] sm:$0xff] }
 0x552   :  { %v3095_v4 = vmul.f32 %v3094_v20, %v9845_v36  ;;  %v3117_v55 = vadd.f32 0.00028619796, %v3116_v7  ;;  %4963 = vmatpush.msra.mxu0 %v4242_v22  ;;  %4986 = vmatpush.msra.mxu1 %v4306_v25  ;;  %v4558_v26 = vunpack.c.l.bf16 %v3632_v13  ;;  %v4622_v60 = vunpack.c.l.bf16 %v3664_v15  ;;  %v3660_v57 = vld [vmem:[#allocation13 + $0xdd0] sm:$0xff]  ;;  %v3538_v13 = vld [vmem:[#allocation13 + $0xa00] sm:$0xff] }
 0x553   :  { %5006 = vmatpush.msra.mxu2 %v4382_v40  ;;  %5029 = vmatpush.msra.mxu3 %v4446_v5  ;;  %v4378_v21 = vunpack.c.l.bf16 %v3542_v24  ;;  %v4442_v20 = vunpack.c.l.bf16 %v3574_v16  ;;  %v4554_v7 = vunpack.c.l.bf16 %v3630_v33  ;;  %v4618_v39 = vunpack.c.l.bf16 %v3662_v12  ;;  %v3570_v24 = vld [vmem:[#allocation13 + $0xb00] sm:$0xff] }
 0x554   :  { %v2505_v22 = vsel %vm9957_vm5, %v9867_v48, %v9935_v37  ;;  %v9967_v18 = vmul.f32 %v3043_v61, %v9743_v2  ;;  %v3135_v25 = vmul.f32 %v3134_v63, %v9860_v28  ;;  %5040 = vmatpush.msrb.mxu0 %v4558_v26  ;;  %5063 = vmatpush.msrb.mxu1 %v4622_v60  ;;  %v3626_v16 = vld [vmem:[#allocation13 + $0xcc0] sm:$0xff]  ;;  %v3019_v12 = vsub.f32 1.0, %v9942_v47  ;;  %v3624_v48 = vld [vmem:[#allocation13 + $0xcb0] sm:$0xff] }
 0x555   :  { %v3658_v33 = vld [vmem:[#allocation13 + $0xdc0] sm:$0xff]  ;;  %5007 = vmatpush.msra.mxu2 %v4378_v21  ;;  %5030 = vmatpush.msra.mxu3 %v4442_v20  ;;  %v4374_v40 = vunpack.c.l.bf16 %v3540_v34  ;;  %v4438_v5 = vunpack.c.l.bf16 %v3572_v14  ;;  %v4550_v15 = vunpack.c.l.bf16 %v3628_v42  ;;  %v3059_v2 = vsub.f32 1.0, %v9950_v45  ;;  %v3656_v26 = vld [vmem:[#allocation13 + $0xdb0] sm:$0xff] }
 0x556   :  { %v3078_v37 = vmul.f32 %v3077_v46, %v9845_v36  ;;  %v3118_v61 = vmul.f32 %v3117_v55, %v9860_v28  ;;  %5041 = vmatpush.msrb.mxu0 %v4554_v7  ;;  %5064 = vmatpush.msrb.mxu1 %v4618_v39  ;;  %v4614_v63 = vunpack.c.l.bf16 %v3660_v57  ;;  %v3694_v60 = vld [vmem:[#allocation13 + $0xee0] sm:$0xff]  ;;  %v9974_v21 = vadd.f32 1.0, %v3095_v4 }
 0x557   :  { %v3726_v47 = vld [vmem:[#allocation13 + $0xfe0] sm:$0xff]  ;;  %5008 = vmatpush.msra.mxu2 %v4374_v40  ;;  %5031 = vmatpush.msra.mxu3 %v4438_v5  ;;  %v4370_v14 = vunpack.c.l.bf16 %v3538_v13  ;;  %v4434_v34 = vunpack.c.l.bf16 %v3570_v24  ;;  %v4546_v42 = vunpack.c.l.bf16 %v3626_v16  ;;  %v9976_v20 = vadd.f32 1.0, %v3135_v25  ;;  %v3692_v40 = vld [vmem:[#allocation13 + $0xed0] sm:$0xff] }
 0x558   :  { %5042 = vmatpush.msrb.mxu0 %v4550_v15  ;;  %5065 = vmatpush.msrb.mxu1 %v4614_v63  ;;  %v4610_v45 = vunpack.c.l.bf16 %v3658_v33  ;;  %v4686_v46 = vunpack.c.l.bf16 %v3696_v49  ;;  %v4750_v55 = vunpack.c.l.bf16 %v3728_v10  ;;  %v3622_v7 = vld [vmem:[#allocation13 + $0xca0] sm:$0xff]  ;;  %v4542_v57 = vunpack.c.l.bf16 %v3624_v48  ;;  %v3724_v5 = vld [vmem:[#allocation13 + $0xfd0] sm:$0xff] }
 0x559   :  { %v3654_v39 = vld [vmem:[#allocation13 + $0xda0] sm:$0xff]  ;;  %5009 = vmatpush.msra.mxu2 %v4370_v14  ;;  %5032 = vmatpush.msra.mxu3 %v4434_v34  ;;  %v4606_v17 = vunpack.c.l.bf16 %v3656_v26  ;;  %v4682_v4 = vunpack.c.l.bf16 %v3694_v60  ;;  %v4746_v44 = vunpack.c.l.bf16 %v3726_v47  ;;  %v2510_v13 = vsel %vm9944_vm4, %v9925_v11, %v2505_v22  ;;  %v3620_v24 = vld [vmem:[#allocation13 + $0xc90] sm:$0xff] }
 0x55a   :  { %v3020_v15 = vmul.f32 %v9922_v53, %v3019_v12  ;;  %v3026_v25 = vand.u32 2147483647, %v9881_v23  ;;  %v3079_v49 = vadd.f32 0.0036580483, %v3078_v37  ;;  %5043 = vmatpush.msrb.mxu0 %v4546_v42  ;;  %5066 = vmatpush.msrb.mxu1 %v4610_v45  ;;  %v3652_v16 = vld [vmem:[#allocation13 + $0xd90] sm:$0xff]  ;;  %6994 = vrcp.f32 %v9974_v21  ;;  %v3690_v63 = vld [vmem:[#allocation13 + $0xec0] sm:$0xff] }
 0x55b   :  { %v3119_v33 = vadd.f32 0.0036580483, %v3118_v61  ;;  %5086 = vmatpush.msrb.mxu2 %v4686_v46  ;;  %5109 = vmatpush.msrb.mxu3 %v4750_v55  ;;  %v4538_v10 = vunpack.c.l.bf16 %v3622_v7  ;;  %v4602_v48 = vunpack.c.l.bf16 %v3654_v39  ;;  %v3722_v26 = vld [vmem:[#allocation13 + $0xfc0] sm:$0xff]  ;;  %v3060_v11 = vmul.f32 %v9928_v50, %v3059_v2  ;;  %v3688_v34 = vld [vmem:[#allocation13 + $0xeb0] sm:$0xff] }
 0x55c   :  { %6996 = vrcp.f32 %v9976_v20  ;;  %5044 = vmatpush.msrb.mxu0 %v4542_v57  ;;  %5067 = vmatpush.msrb.mxu1 %v4606_v17  ;;  %v4678_v19 = vunpack.c.l.bf16 %v3692_v40  ;;  %v4742_v22 = vunpack.c.l.bf16 %v3724_v5  ;;  %v3618_v12 = vld [vmem:[#allocation13 + $0xc80] sm:$0xff]  ;;  %v9987_v60 = vmul.f32 %v2510_v13, %v9907_v52  ;;  %v3720_v42 = vld [vmem:[#allocation13 + $0xfb0] sm:$0xff] }
 0x55d   :  { %v3650_v37 = vld [vmem:[#allocation13 + $0xd80] sm:$0xff]  ;;  %v3028_v61 = vand.u32 2147483648, %v9881_v23  ;;  %5087 = vmatpush.msrb.mxu2 %v4682_v4  ;;  %5110 = vmatpush.msrb.mxu3 %v4746_v44  ;;  %v4534_v47 = vunpack.c.l.bf16 %v3620_v24  ;;  %v4598_v14 = vunpack.c.l.bf16 %v3652_v16  ;;  %vm3023_vm0 = vweird.f32 %v9922_v53  ;;  %v3616_v7 = vld [vmem:[#allocation13 + $0xc70] sm:$0xff] }
 0x55e   :  { %v3080_v2 = vmul.f32 %v3079_v49, %v9845_v36  ;;  %4964 = vmatmul.f32.vlgmr.msra.gmra.mxu0 %v9417_v35  ;;  %4987 = vmatmul.f32.vlgmr.msra.gmra.mxu1 %v9422_v30  ;;  %v4674_v17 = vunpack.c.l.bf16 %v3690_v63  ;;  %v4738_v45 = vunpack.c.l.bf16 %v3722_v26  ;;  %v9995_v52 = vadd.f32 %v9922_v53, %v3020_v15  ;;  %v3648_v39 = vld [vmem:[#allocation13 + $0xd70] sm:$0xff]  ;;  %v3686_v5 = vld [vmem:[#allocation13 + $0xea0] sm:$0xff] }
 0x55f   :  { %v3120_v46 = vmul.f32 %v3119_v33, %v9860_v28  ;;  %5045 = vmatpush.msrb.mxu0 %v4538_v10  ;;  %5068 = vmatpush.msrb.mxu1 %v4602_v48  ;;  %v4530_v44 = vunpack.c.l.bf16 %v3618_v12  ;;  %v4594_v55 = vunpack.c.l.bf16 %v3650_v37  ;;  %v9999_v57 = vadd.f32 %v9928_v50, %v3060_v11  ;;  %v3718_v13 = vld [vmem:[#allocation13 + $0xfa0] sm:$0xff]  ;;  %v3684_v37 = vld [vmem:[#allocation13 + $0xe90] sm:$0xff] }
 0x560   :  { %vm3063_vm1 = vweird.f32 %v9928_v50  ;;  %5088 = vmatpush.msrb.mxu2 %v4678_v19  ;;  %5111 = vmatpush.msrb.mxu3 %v4742_v22  ;;  %v4670_v4 = vunpack.c.l.bf16 %v3688_v34  ;;  %v4734_v40 = vunpack.c.l.bf16 %v3720_v42  ;;  %v10002_v15 = vpop.eup %6994  ;;  %vm3022_vm6 = vweird.f32 %v9881_v23  ;;  %v3614_v48 = vld [vmem:[#allocation13 + $0xc60] sm:$0xff]  ;;  %v3712_v33 = vld [vmem:[#allocation13 + $0xf70] sm:$0xff] }
 0x561   :  { %vm10005_vm7 = vcmp.eq.f32.partialorder %v3026_v25, 8.507059e+37  ;;  %v10010_v24 = vadd.f32 1.1283791, %v9967_v18  ;;  %vm3062_vm8 = vweird.f32 %v9887_v32  ;;  %5046 = vmatpush.msrb.mxu0 %v4534_v47  ;;  %5069 = vmatpush.msrb.mxu1 %v4598_v14  ;;  %vm10017_vm9 = vmor %vm3022_vm6, %vm3023_vm0  ;;  %v3068_v23 = vand.u32 2147483648, %v9887_v32  ;;  %v3646_v63 = vld [vmem:[#allocation13 + $0xd60] sm:$0xff]  ;;  %v3716_v47 = vld [vmem:[#allocation13 + $0xf90] sm:$0xff] }
 0x562   :  { %v10013_v16 = vpop.eup %6996  ;;  %v3081_v25 = vadd.f32 0.05243302, %v3080_v2  ;;  %5089 = vmatpush.msrb.mxu2 %v4674_v17  ;;  %5112 = vmatpush.msrb.mxu3 %v4738_v45  ;;  %v4526_v10 = vunpack.c.l.bf16 %v3616_v7  ;;  %v4590_v18 = vunpack.c.l.bf16 %v3648_v39  ;;  %vm10024_vm10 = vmor %vm3062_vm8, %vm3063_vm1  ;;  %v3066_v11 = vand.u32 2147483647, %v9887_v32  ;;  %v3612_v2 = vld [vmem:[#allocation13 + $0xc50] sm:$0xff]  ;;  %v3610_v39 = vld [vmem:[#allocation13 + $0xc40] sm:$0xff] }
 0x563   :  { %v3121_v19 = vadd.f32 0.05243302, %v3120_v46  ;;  %5047 = vmatpush.msrb.mxu0 %v4530_v44  ;;  %5070 = vmatpush.msrb.mxu1 %v4594_v55  ;;  %v4666_v22 = vunpack.c.l.bf16 %v3686_v5  ;;  %v4730_v12 = vunpack.c.l.bf16 %v3718_v13  ;;  %v6698_v14 = vclamps-f32 %v9987_v60, 1.0  ;;  %v3644_v17 = vld [vmem:[#allocation13 + $0xd50] sm:$0xff] }
 0x564   :  { %v3025_v34 = vsel %vm10017_vm9, %v9922_v53, %v9995_v52  ;;  %v3029_v42 = vor.u32 1.1754944e-38, %v3028_v61  ;;  %v3065_v32 = vsel %vm10024_vm10, %v9928_v50, %v9999_v57  ;;  %5090 = vmatpush.msrb.mxu2 %v4670_v4  ;;  %5113 = vmatpush.msrb.mxu3 %v4734_v40  ;;  %v10040_v45 = vmul.f32 %v10002_v15, %v9974_v21  ;;  %v3682_v52 = vld [vmem:[#allocation13 + $0xe80] sm:$0xff]  ;;  %v3680_v13 = vld [vmem:[#allocation13 + $0xe70] sm:$0xff] }
 0x565   :  { %v10044_v60 = vmul.f32 %v10013_v16, %v9976_v20  ;;  %5010 = vmatmul.f32.vlgmr.msra.gmra.mxu2 %v9639_v6  ;;  %5033 = vmatmul.f32.vlgmr.msra.gmra.mxu3 %v9642_v43  ;;  %v4522_v53 = vunpack.c.l.bf16 %v3614_v48  ;;  %v4586_v61 = vunpack.c.l.bf16 %v3646_v63  ;;  %v3714_v50 = vld [vmem:[#allocation13 + $0xf80] sm:$0xff]  ;;  %v3069_v46 = vor.u32 1.1754944e-38, %v3068_v23 }
 0x566   :  { %v3082_v44 = vmul.f32 %v3081_v25, %v9845_v36  ;;  %5048 = vmatpush.msrb.mxu0 %v4526_v10  ;;  %5071 = vmatpush.msrb.mxu1 %v4590_v18  ;;  %v4662_v55 = vunpack.c.l.bf16 %v3684_v37  ;;  %v4726_v7 = vunpack.c.l.bf16 %v3716_v47  ;;  %v3642_v57 = vld [vmem:[#allocation13 + $0xd40] sm:$0xff]  ;;  %vm3067_vm11 = vcmp.eq.f32.partialorder %v3066_v11, 8.507059e+37 }
 0x567   :  { %v3122_v4 = vmul.f32 %v3121_v19, %v9860_v28  ;;  %5091 = vmatpush.msrb.mxu2 %v4666_v22  ;;  %5114 = vmatpush.msrb.mxu3 %v4730_v12  ;;  %v4518_v40 = vunpack.c.l.bf16 %v3612_v2  ;;  %v4582_v5 = vunpack.c.l.bf16 %v3644_v17  ;;  %v3030_v23 = vsel %vm10005_vm7, %v3029_v42, %v3025_v34  ;;  %v3608_v19 = vld [vmem:[#allocation13 + $0xc30] sm:$0xff]  ;;  %v3678_v34 = vld [vmem:[#allocation13 + $0xe60] sm:$0xff] }
 0x568   :  { %v3070_v48 = vsel %vm3067_vm11, %v3069_v46, %v3065_v32  ;;  %4967 = vmatmul.f32.gmra.mxu0 %v9652_v27  ;;  %4990 = vmatmul.f32.gmra.mxu1 %v9816_v38  ;;  %v4658_v25 = vunpack.c.l.bf16 %v3682_v52  ;;  %v4722_v10 = vunpack.c.l.bf16 %v3714_v50  ;;  %v3099_v18 = vsub.f32 1.0, %v10040_v45  ;;  %v3640_v22 = vld [vmem:[#allocation13 + $0xd30] sm:$0xff]  ;;  %v3710_v42 = vld [vmem:[#allocation13 + $0xf60] sm:$0xff] }
 0x569   :  { %v3139_v63 = vsub.f32 1.0, %v10044_v60  ;;  %5049 = vmatpush.msrb.mxu0 %v4522_v53  ;;  %5072 = vmatpush.msrb.mxu1 %v4586_v61  ;;  %v4514_v26 = vunpack.c.l.bf16 %v3610_v39  ;;  %v4578_v11 = vunpack.c.l.bf16 %v3642_v57  ;;  %v3046_v49 = vmul.f32 %v10010_v24, %v9701_v8  ;;  %v3606_v8 = vld [vmem:[#allocation13 + $0xc20] sm:$0xff]  ;;  %v3676_v52 = vld [vmem:[#allocation13 + $0xe50] sm:$0xff] }
 0x56a   :  { %v3083_v12 = vadd.f32 0.18741608, %v3082_v44  ;;  %5092 = vmatpush.msrb.mxu2 %v4662_v55  ;;  %5115 = vmatpush.msrb.mxu3 %v4726_v7  ;;  %v4654_v37 = vunpack.c.l.bf16 %v3680_v13  ;;  %v4718_v47 = vunpack.c.l.bf16 %v3712_v33  ;;  %v10060_v32 = vmul.f32 %v9885_v29, %v9670_v62  ;;  %v3638_v24 = vld [vmem:[#allocation13 + $0xd20] sm:$0xff]  ;;  %v3604_v55 = vld [vmem:[#allocation13 + $0xc10] sm:$0xff] }
 0x56b   :  { %v10814_v2 = vclamps-f32 %v9932_v51, 1.0  ;;  %v10066_v45 = vadd.f32 1.0, %v6698_v14  ;;  %v3123_v60 = vadd.f32 0.18741608, %v3122_v4  ;;  %5050 = vmatpush.msrb.mxu0 %v4518_v40  ;;  %5073 = vmatpush.msrb.mxu1 %v4582_v5  ;;  %v10069_v53 = vmul.f32 %v3030_v23, %v9938_v41  ;;  %v3708_v51 = vld [vmem:[#allocation13 + $0xf50] sm:$0xff]  ;;  %v3674_v4 = vld [vmem:[#allocation13 + $0xe40] sm:$0xff] }
 0x56c   :  { %10813 = vst [vmem:[#allocation41_spill] sm:$0xff] %v10060_v32  ;;  %v10071_v61 = vmul.f32 %v3070_v48, %v3046_v49  ;;  %5093 = vmatpush.msrb.mxu2 %v4658_v25  ;;  %5116 = vmatpush.msrb.mxu3 %v4722_v10  ;;  %v4510_v62 = vunpack.c.l.bf16 %v3608_v19  ;;  %v4574_v29 = vunpack.c.l.bf16 %v3640_v22  ;;  %v3100_v50 = vmul.f32 %v10002_v15, %v3099_v18  ;;  %v3636_v7 = vld [vmem:[#allocation13 + $0xd10] sm:$0xff]  ;;  %v3706_v40 = vld [vmem:[#allocation13 + $0xf40] sm:$0xff] }
 0x56d   :  { %v10064_v17 = vadd.f32 1.0, %v10814_v2  ;;  %v3140_v14 = vmul.f32 %v10013_v16, %v3139_v63  ;;  %5051 = vmatpush.msrb.mxu0 %v4514_v26  ;;  %5074 = vmatpush.msrb.mxu1 %v4578_v11  ;;  %v4650_v46 = vunpack.c.l.bf16 %v3678_v34  ;;  %v4714_v44 = vunpack.c.l.bf16 %v3710_v42  ;;  %v3602_v48 = vld [vmem:[#allocation13 + $0xc00] sm:$0xff]  ;;  %v3672_v18 = vld [vmem:[#allocation13 + $0xe30] sm:$0xff] }
 0x56e   :  { %v3084_v41 = vmul.f32 %v3083_v12, %v9845_v36  ;;  %vm3102_vm12 = vweird.f32 %v9974_v21  ;;  %5094 = vmatpush.msrb.mxu2 %v4654_v37  ;;  %5117 = vmatpush.msrb.mxu3 %v4718_v47  ;;  %v4506_v39 = vunpack.c.l.bf16 %v3606_v8  ;;  %v4570_v57 = vunpack.c.l.bf16 %v3638_v24  ;;  %v3634_v36 = vld [vmem:[#allocation13 + $0xd00] sm:$0xff]  ;;  %v3704_v63 = vld [vmem:[#allocation13 + $0xf30] sm:$0xff] }
 0x56f   :  { %v3106_v5 = vand.u32 2147483647, %v9974_v21  ;;  %v3124_v13 = vmul.f32 %v3123_v60, %v9860_v28  ;;  %5013 = vmatmul.f32.gmra.mxu2 %v9836_v56  ;;  %5036 = vmatmul.f32.gmra.mxu3 %v9839_v1  ;;  %v4646_v33 = vunpack.c.l.bf16 %v3676_v52  ;;  %v4710_v23 = vunpack.c.l.bf16 %v3708_v51  ;;  %v3670_v60 = vld [vmem:[#allocation13 + $0xe20] sm:$0xff] }
 0x570   :  { %vm3103_vm13 = vweird.f32 %v10002_v15  ;;  %vm3143_vm14 = vweird.f32 %v10013_v16  ;;  %5052 = vmatpush.msrb.mxu0 %v4510_v62  ;;  %5075 = vmatpush.msrb.mxu1 %v4574_v29  ;;  %v4502_v25 = vunpack.c.l.bf16 %v3604_v55  ;;  %v4566_v10 = vunpack.c.l.bf16 %v3636_v7  ;;  %v3702_v8 = vld [vmem:[#allocation13 + $0xf20] sm:$0xff] }
 0x571   :  { %v3101_v28 = vadd.f32 %v10002_v15, %v3100_v50  ;;  %v3141_v26 = vadd.f32 %v10013_v16, %v3140_v14  ;;  %5095 = vmatpush.msrb.mxu2 %v4650_v46  ;;  %5118 = vmatpush.msrb.mxu3 %v4714_v44  ;;  %v4642_v11 = vunpack.c.l.bf16 %v3674_v4  ;;  %v4706_v19 = vunpack.c.l.bf16 %v3706_v40  ;;  %vm10091_vm15 = vmor %vm3102_vm12, %vm3103_vm13  ;;  %v7016_v50 = vld [vmem:[#allocation13 + $0x1f0] sm:$0xff]  ;;  %v3666_v40 = vld [vmem:[#allocation13 + $0xe00] sm:$0xff] }
 0x572   :  { %v3108_v22 = vand.u32 2147483648, %v9974_v21  ;;  %v3148_v49 = vand.u32 2147483648, %v9976_v20  ;;  %5053 = vmatpush.msrb.mxu0 %v4506_v39  ;;  %5076 = vmatpush.msrb.mxu1 %v4570_v57  ;;  %v4498_v12 = vunpack.c.l.bf16 %v3602_v48  ;;  %v4562_v37 = vunpack.c.l.bf16 %v3634_v36  ;;  %v3668_v46 = vld [vmem:[#allocation13 + $0xe10] sm:$0xff]  ;;  %v7018_v57 = vld [vmem:[#allocation13 + $0x1e0] sm:$0xff] }
 0x573   :  { %vm3142_vm2 = vweird.f32 %v9976_v20  ;;  %v3146_v34 = vand.u32 2147483647, %v9976_v20  ;;  %5096 = vmatpush.msrb.mxu2 %v4646_v33  ;;  %5119 = vmatpush.msrb.mxu3 %v4710_v23  ;;  %v4638_v42 = vunpack.c.l.bf16 %v3672_v18  ;;  %v4702_v2 = vunpack.c.l.bf16 %v3704_v63  ;;  %v3700_v44 = vld [vmem:[#allocation13 + $0xf10] sm:$0xff] }
 0x574   :  { %v6711_v24 = vclamps-f32 %v10069_v53, 1.0  ;;  %v6712_v62 = vclamps-f32 %v10071_v61, 1.0  ;;  %v3085_v29 = vadd.f32 1.1283791, %v3084_v41  ;;  %v3125_v21 = vadd.f32 1.1283791, %v3124_v13  ;;  %vm10101_vm3 = vmor %vm3142_vm2, %vm3143_vm14  ;;  %5054 = vmatpush.msrb.mxu0 %v4502_v25  ;;  %5077 = vmatpush.msrb.mxu1 %v4566_v10 }
 0x575   :  { %v3105_v20 = vsel %vm10091_vm15, %v10002_v15, %v3101_v28  ;;  %v3145_v53 = vsel %vm10101_vm3, %v10013_v16, %v3141_v26  ;;  %5097 = vmatpush.msrb.mxu2 %v4642_v11  ;;  %5120 = vmatpush.msrb.mxu3 %v4706_v19  ;;  %v7015_v61 = vld [vmem:[#allocation13 + $0xf0] sm:$0xff]  ;;  %v3855_v14 = vunpack.c.h.bf16 %v7016_v50  ;;  %v3109_v55 = vor.u32 1.1754944e-38, %v3108_v22  ;;  %v7017_v15 = vld [vmem:[#allocation13 + $0xe0] sm:$0xff] }
 0x576   :  { %v3791_v51 = vunpack.c.h.bf16 %v7015_v61  ;;  %v3149_v7 = vor.u32 1.1754944e-38, %v3148_v49  ;;  %5055 = vmatpush.msrb.mxu0 %v4498_v12  ;;  %5078 = vmatpush.msrb.mxu1 %v4562_v37  ;;  %v4634_v41 = vunpack.c.l.bf16 %v3670_v60  ;;  %v4698_v39 = vunpack.c.l.bf16 %v3702_v8  ;;  %v3698_v13 = vld [vmem:[#allocation13 + $0xf00] sm:$0xff]  ;;  %v7019_v10 = vld [vmem:[#allocation13 + $0xd0] sm:$0xff] }
 0x577   :  { %vm3107_vm4 = vcmp.eq.f32.partialorder %v3106_v5, 8.507059e+37  ;;  %vm3147_vm5 = vcmp.eq.f32.partialorder %v3146_v34, 8.507059e+37  ;;  %5098 = vmatpush.msrb.mxu2 %v4638_v42  ;;  %5121 = vmatpush.msrb.mxu3 %v4702_v2  ;;  %v3787_v16 = vunpack.c.h.bf16 %v7017_v15  ;;  %v3851_v4 = vunpack.c.h.bf16 %v7018_v57  ;;  %v7020_v63 = vld [vmem:[#allocation13 + $0x1d0] sm:$0xff]  ;;  %v7021_v37 = vld [vmem:[#allocation13 + $0xc0] sm:$0xff] }
 0x578   :  { %v3110_v33 = vsel %vm3107_vm4, %v3109_v55, %v3105_v20  ;;  %v3150_v23 = vsel %vm3147_vm5, %v3149_v7, %v3145_v53  ;;  %5056 = vmatmul.f32.vlgmr.msrb.gmra.mxu0 %v9848_v58  ;;  %5079 = vmatmul.f32.vlgmr.msrb.gmra.mxu1 %v10060_v32  ;;  %v4630_v48 = vunpack.c.l.bf16 %v3668_v46  ;;  %v4694_v36 = vunpack.c.l.bf16 %v3700_v44  ;;  %v7022_v34 = vld [vmem:[#allocation13 + $0x1c0] sm:$0xff]  ;;  %v7024_v8 = vld [vmem:[#allocation13 + $0x3f0] sm:$0xff] }
 0x579   :  { %v3086_v25 = vmul.f32 %v3085_v29, %v9823_v3  ;;  %v3126_v5 = vmul.f32 %v3125_v21, %v9854_v0  ;;  %5132 = vmatpush.msra.mxu0 %v3791_v51  ;;  %5155 = vmatpush.msra.mxu1 %v3855_v14  ;;  %v3783_v18 = vunpack.c.h.bf16 %v7019_v10  ;;  %v3847_v28 = vunpack.c.h.bf16 %v7020_v63  ;;  %v7026_v20 = vld [vmem:[#allocation13 + $0x1b0] sm:$0xff]  ;;  %v7028_v50 = vld [vmem:[#allocation13 + $0x3e0] sm:$0xff] }
 0x57a   :  { %5099 = vmatpush.msrb.mxu2 %v4634_v41  ;;  %5122 = vmatpush.msrb.mxu3 %v4698_v39  ;;  %v4626_v26 = vunpack.c.l.bf16 %v3666_v40  ;;  %v4690_v11 = vunpack.c.l.bf16 %v3698_v13  ;;  %v1824_v19 = vmul.f32 0.5, %v9575_v31  ;;  %v1825_v22 = vmul.f32 0.5, %v9604_v9  ;;  %v7023_v31 = vld [vmem:[#allocation13 + $0x2f0] sm:$0xff]  ;;  %v7029_v46 = vld [vmem:[#allocation13 + $0xa0] sm:$0xff] }
 0x57b   :  { %v3111_v49 = vmul.f32 %v3110_v33, %v3086_v25  ;;  %v3151_v12 = vmul.f32 %v3150_v23, %v3126_v5  ;;  %5133 = vmatpush.msra.mxu0 %v3787_v16  ;;  %5156 = vmatpush.msra.mxu1 %v3851_v4  ;;  %v3182_v3 = vadd.f32 1.0, %v6711_v24  ;;  %v3183_v0 = vadd.f32 1.0, %v6712_v62  ;;  %v7030_v55 = vld [vmem:[#allocation13 + $0x1a0] sm:$0xff]  ;;  %v7031_v41 = vld [vmem:[#allocation13 + $0x2d0] sm:$0xff] }
 0x57c   :  { %5100 = vmatpush.msrb.mxu2 %v4630_v48  ;;  %5123 = vmatpush.msrb.mxu3 %v4694_v36  ;;  %v3779_v47 = vunpack.c.h.bf16 %v7021_v37  ;;  %v3843_v42 = vunpack.c.h.bf16 %v7022_v34  ;;  %v10118_v2 = vmul.f32 %v10064_v17, %v1824_v19  ;;  %v10121_v60 = vmul.f32 %v10066_v45, %v1825_v22  ;;  %v7025_v17 = vld [vmem:[#allocation13 + $0xb0] sm:$0xff]  ;;  %v7035_v48 = vld [vmem:[#allocation13 + $0x2c0] sm:$0xff] }
 0x57d   :  { %5134 = vmatpush.msra.mxu0 %v3783_v18  ;;  %5157 = vmatpush.msra.mxu1 %v3847_v28  ;;  %v3919_v9 = vunpack.c.h.bf16 %v7023_v31  ;;  %v3983_v29 = vunpack.c.h.bf16 %v7024_v8  ;;  %v1838_v24 = vmul.f32 0.5, %v9664_v59  ;;  %v1839_v62 = vmul.f32 0.5, %v9679_v54  ;;  %v7027_v59 = vld [vmem:[#allocation13 + $0x2e0] sm:$0xff]  ;;  %v7032_v15 = vld [vmem:[#allocation13 + $0x3d0] sm:$0xff] }
 0x57e   :  { %10819 = vst [vmem:[#allocation42_spill] sm:$0xff] %v10118_v2  ;;  %5101 = vmatpush.msrb.mxu2 %v4626_v26  ;;  %5124 = vmatpush.msrb.mxu3 %v4690_v11  ;;  %v6713_v21 = vclamps-f32 %v3111_v49, 1.0  ;;  %v6714_v52 = vclamps-f32 %v3151_v12, 1.0  ;;  %v3775_v45 = vunpack.c.h.bf16 %v7025_v17  ;;  %v3839_v53 = vunpack.c.h.bf16 %v7026_v20  ;;  %v7033_v40 = vld [vmem:[#allocation13 + $0x90] sm:$0xff]  ;;  %v7036_v25 = vld [vmem:[#allocation13 + $0x3c0] sm:$0xff] }
 0x57f   :  { %10820 = vst [vmem:[#allocation43_spill] sm:$0xff] %v10121_v60  ;;  %5102 = vmatmul.f32.vlgmr.msrb.gmra.mxu2 %v10118_v2  ;;  %5125 = vmatmul.f32.vlgmr.msrb.gmra.mxu3 %v10121_v60  ;;  %v10127_v61 = vmul.f32 %v3182_v3, %v1838_v24  ;;  %v10129_v51 = vmul.f32 %v3183_v0, %v1839_v62  ;;  %v3915_v54 = vunpack.c.h.bf16 %v7027_v59  ;;  %v3979_v14 = vunpack.c.h.bf16 %v7028_v50  ;;  %v7034_v33 = vld [vmem:[#allocation13 + $0x190] sm:$0xff]  ;;  %v7037_v26 = vld [vmem:[#allocation13 + $0x80] sm:$0xff] }
 0x580   :  { %5135 = vmatpush.msra.mxu0 %v3779_v47  ;;  %5158 = vmatpush.msra.mxu1 %v3843_v42  ;;  %v3771_v44 = vunpack.c.h.bf16 %v7029_v46  ;;  %v3835_v7 = vunpack.c.h.bf16 %v7030_v55  ;;  %v3911_v39 = vunpack.c.h.bf16 %v7031_v41  ;;  %v3975_v16 = vunpack.c.h.bf16 %v7032_v15  ;;  %v10823_v10 = vld [vmem:[#allocation37_spill] sm:$0xff]  ;;  %v10824_v63 = vld [vmem:[#allocation40_spill] sm:$0xff]  ;;  %v7038_v19 = vld [vmem:[#allocation13 + $0x180] sm:$0xff] }
 0x581   :  { %10821 = vst [vmem:[#allocation44_spill] sm:$0xff] %v10127_v61  ;;  %5178 = vmatpush.msra.mxu2 %v3919_v9  ;;  %5201 = vmatpush.msra.mxu3 %v3983_v29  ;;  %v3184_v57 = vadd.f32 1.0, %v6713_v21  ;;  %v3185_v4 = vadd.f32 1.0, %v6714_v52  ;;  %v3767_v13 = vunpack.c.h.bf16 %v7033_v40  ;;  %v3831_v23 = vunpack.c.h.bf16 %v7034_v33  ;;  %v7039_v3 = vld [vmem:[#allocation13 + $0x2b0] sm:$0xff]  ;;  %v7043_v8 = vld [vmem:[#allocation13 + $0x2a0] sm:$0xff] }
 0x582   :  { %10822 = vst [vmem:[#allocation45_spill] sm:$0xff] %v10129_v51  ;;  %5059 = vmatmul.f32.gmra.mxu0 %v10127_v61  ;;  %5082 = vmatmul.f32.gmra.mxu1 %v10129_v51  ;;  %v3907_v36 = vunpack.c.h.bf16 %v7035_v48  ;;  %v3971_v5 = vunpack.c.h.bf16 %v7036_v25  ;;  %v1840_v18 = vmul.f32 0.5, %v10823_v10  ;;  %v1841_v28 = vmul.f32 0.5, %v10824_v63  ;;  %v7040_v37 = vld [vmem:[#allocation13 + $0x3b0] sm:$0xff]  ;;  %v7044_v24 = vld [vmem:[#allocation13 + $0x3a0] sm:$0xff] }
 0x583   :  { %5136 = vmatpush.msra.mxu0 %v3775_v45  ;;  %5159 = vmatpush.msra.mxu1 %v3839_v53  ;;  %v3763_v11 = vunpack.c.h.bf16 %v7037_v26  ;;  %v3827_v22 = vunpack.c.h.bf16 %v7038_v19  ;;  %v3903_v0 = vunpack.c.h.bf16 %v7039_v3  ;;  %v3967_v47 = vunpack.c.h.bf16 %v7040_v37  ;;  %v7041_v34 = vld [vmem:[#allocation13 + $0x70] sm:$0xff]  ;;  %v7045_v21 = vld [vmem:[#allocation13 + $0x60] sm:$0xff] }
 0x584   :  { %5179 = vmatpush.msra.mxu2 %v3915_v54  ;;  %5202 = vmatpush.msra.mxu3 %v3979_v14  ;;  %v10135_v49 = vmul.f32 %v3184_v57, %v1840_v18  ;;  %v10137_v12 = vmul.f32 %v3185_v4, %v1841_v28  ;;  %v3759_v42 = vunpack.c.h.bf16 %v7041_v34  ;;  %v7042_v31 = vld [vmem:[#allocation13 + $0x170] sm:$0xff]  ;;  %v3899_v29 = vunpack.c.h.bf16 %v7043_v8  ;;  %v7046_v17 = vld [vmem:[#allocation13 + $0x160] sm:$0xff] }
 0x585   :  { %5137 = vmatpush.msra.mxu0 %v3771_v44  ;;  %5160 = vmatpush.msra.mxu1 %v3835_v7  ;;  %v3823_v9 = vunpack.c.h.bf16 %v7042_v31  ;;  %v3963_v62 = vunpack.c.h.bf16 %v7044_v24  ;;  %v3755_v52 = vunpack.c.h.bf16 %v7045_v21  ;;  %v3819_v45 = vunpack.c.h.bf16 %v7046_v17  ;;  %v7047_v20 = vld [vmem:[#allocation13 + $0x290] sm:$0xff]  ;;  %v7051_v55 = vld [vmem:[#allocation13 + $0x280] sm:$0xff] }
 0x586   :  { %5180 = vmatpush.msra.mxu2 %v3911_v39  ;;  %5203 = vmatpush.msra.mxu3 %v3975_v16  ;;  %10825 = vst [vmem:[#allocation37_spill] sm:$0xff] %v10135_v49  ;;  %v3895_v53 = vunpack.c.h.bf16 %v7047_v20  ;;  %v7048_v59 = vld [vmem:[#allocation13 + $0x390] sm:$0xff]  ;;  %v3891_v7 = vunpack.c.h.bf16 %v7051_v55  ;;  %v7052_v41 = vld [vmem:[#allocation13 + $0x380] sm:$0xff] }
 0x587   :  { %10826 = vst [vmem:[#allocation40_spill] sm:$0xff] %v10137_v12  ;;  %5138 = vmatpush.msra.mxu0 %v3767_v13  ;;  %5161 = vmatpush.msra.mxu1 %v3831_v23  ;;  %v3959_v54 = vunpack.c.h.bf16 %v7048_v59  ;;  %v7049_v50 = vld [vmem:[#allocation13 + $0x50] sm:$0xff]  ;;  %v3955_v39 = vunpack.c.h.bf16 %v7052_v41  ;;  %v7053_v15 = vld [vmem:[#allocation13 + $0x40] sm:$0xff] }
 0x588   :  { %5181 = vmatpush.msra.mxu2 %v3907_v36  ;;  %5204 = vmatpush.msra.mxu3 %v3971_v5  ;;  %v3751_v14 = vunpack.c.h.bf16 %v7049_v50  ;;  %v7050_v46 = vld [vmem:[#allocation13 + $0x150] sm:$0xff]  ;;  %v3747_v16 = vunpack.c.h.bf16 %v7053_v15  ;;  %v7054_v57 = vld [vmem:[#allocation13 + $0x140] sm:$0xff] }
 0x589   :  { %5105 = vmatmul.f32.gmra.mxu2 %v10135_v49  ;;  %5128 = vmatmul.f32.gmra.mxu3 %v10137_v12  ;;  %v3815_v44 = vunpack.c.h.bf16 %v7050_v46  ;;  %v3811_v4 = vunpack.c.h.bf16 %v7054_v57  ;;  %v7055_v40 = vld [vmem:[#allocation13 + $0x270] sm:$0xff]  ;;  %v7059_v10 = vld [vmem:[#allocation13 + $0x260] sm:$0xff] }
 0x58a   :  { %5139 = vmatpush.msra.mxu0 %v3763_v11  ;;  %5162 = vmatpush.msra.mxu1 %v3827_v22  ;;  %v3887_v13 = vunpack.c.h.bf16 %v7055_v40  ;;  %v7056_v33 = vld [vmem:[#allocation13 + $0x370] sm:$0xff]  ;;  %v3883_v18 = vunpack.c.h.bf16 %v7059_v10  ;;  %v7060_v63 = vld [vmem:[#allocation13 + $0x360] sm:$0xff] }
 0x58b   :  { %5182 = vmatpush.msra.mxu2 %v3903_v0  ;;  %5205 = vmatpush.msra.mxu3 %v3967_v47  ;;  %v3951_v23 = vunpack.c.h.bf16 %v7056_v33  ;;  %v7057_v48 = vld [vmem:[#allocation13 + $0x30] sm:$0xff]  ;;  %v3947_v28 = vunpack.c.h.bf16 %v7060_v63  ;;  %v7061_v26 = vld [vmem:[#allocation13 + $0x20] sm:$0xff] }
 0x58c   :  { %5140 = vmatpush.msra.mxu0 %v3759_v42  ;;  %5163 = vmatpush.msra.mxu1 %v3823_v9  ;;  %v3743_v36 = vunpack.c.h.bf16 %v7057_v48  ;;  %v7058_v25 = vld [vmem:[#allocation13 + $0x130] sm:$0xff]  ;;  %v3739_v11 = vunpack.c.h.bf16 %v7061_v26  ;;  %v7062_v19 = vld [vmem:[#allocation13 + $0x120] sm:$0xff] }
 0x58d   :  { %5183 = vmatpush.msra.mxu2 %v3899_v29  ;;  %5206 = vmatpush.msra.mxu3 %v3963_v62  ;;  %v3807_v5 = vunpack.c.h.bf16 %v7058_v25  ;;  %v3803_v22 = vunpack.c.h.bf16 %v7062_v19  ;;  %v7063_v3 = vld [vmem:[#allocation13 + $0x250] sm:$0xff]  ;;  %v7067_v8 = vld [vmem:[#allocation13 + $0x240] sm:$0xff] }
 0x58e   :  { %5141 = vmatpush.msra.mxu0 %v3755_v52  ;;  %5164 = vmatpush.msra.mxu1 %v3819_v45  ;;  %v3879_v0 = vunpack.c.h.bf16 %v7063_v3  ;;  %v7064_v37 = vld [vmem:[#allocation13 + $0x350] sm:$0xff]  ;;  %v3875_v29 = vunpack.c.h.bf16 %v7067_v8  ;;  %v7068_v24 = vld [vmem:[#allocation13 + $0x340] sm:$0xff] }
 0x58f   :  { %5184 = vmatpush.msra.mxu2 %v3895_v53  ;;  %5207 = vmatpush.msra.mxu3 %v3959_v54  ;;  %v3943_v47 = vunpack.c.h.bf16 %v7064_v37  ;;  %v7065_v34 = vld [vmem:[#allocation13 + $0x10] sm:$0xff]  ;;  %v3939_v62 = vunpack.c.h.bf16 %v7068_v24  ;;  %v7069_v21 = vld [vmem:[#allocation13] sm:$0xff] }
 0x590   :  { %5142 = vmatpush.msra.mxu0 %v3751_v14  ;;  %5165 = vmatpush.msra.mxu1 %v3815_v44  ;;  %v3735_v42 = vunpack.c.h.bf16 %v7065_v34  ;;  %v7066_v31 = vld [vmem:[#allocation13 + $0x110] sm:$0xff]  ;;  %v3731_v52 = vunpack.c.h.bf16 %v7069_v21  ;;  %v7070_v17 = vld [vmem:[#allocation13 + $0x100] sm:$0xff] }
 0x591   :  { %5185 = vmatpush.msra.mxu2 %v3891_v7  ;;  %5208 = vmatpush.msra.mxu3 %v3955_v39  ;;  %v3799_v9 = vunpack.c.h.bf16 %v7066_v31  ;;  %v3795_v45 = vunpack.c.h.bf16 %v7070_v17  ;;  %v7071_v20 = vld [vmem:[#allocation13 + $0x230] sm:$0xff]  ;;  %v7075_v55 = vld [vmem:[#allocation13 + $0x220] sm:$0xff] }
 0x592   :  { %5143 = vmatpush.msra.mxu0 %v3747_v16  ;;  %5166 = vmatpush.msra.mxu1 %v3811_v4  ;;  %v3871_v53 = vunpack.c.h.bf16 %v7071_v20  ;;  %v7072_v59 = vld [vmem:[#allocation13 + $0x330] sm:$0xff]  ;;  %v3867_v7 = vunpack.c.h.bf16 %v7075_v55  ;;  %v7076_v41 = vld [vmem:[#allocation13 + $0x320] sm:$0xff] }
 0x593   :  { %5186 = vmatpush.msra.mxu2 %v3887_v13  ;;  %5209 = vmatpush.msra.mxu3 %v3951_v23  ;;  %v3935_v54 = vunpack.c.h.bf16 %v7072_v59  ;;  %v7073_v50 = vld [vmem:[#allocation13 + $0x4f0] sm:$0xff]  ;;  %v3931_v39 = vunpack.c.h.bf16 %v7076_v41  ;;  %v7077_v15 = vld [vmem:[#allocation13 + $0x4e0] sm:$0xff] }
 0x594   :  { %5144 = vmatpush.msra.mxu0 %v3743_v36  ;;  %5167 = vmatpush.msra.mxu1 %v3807_v5  ;;  %v4047_v14 = vunpack.c.h.bf16 %v7073_v50  ;;  %v7074_v46 = vld [vmem:[#allocation13 + $0x5f0] sm:$0xff]  ;;  %v4043_v16 = vunpack.c.h.bf16 %v7077_v15  ;;  %v7078_v57 = vld [vmem:[#allocation13 + $0x5e0] sm:$0xff] }
 0x595   :  { %5187 = vmatpush.msra.mxu2 %v3883_v18  ;;  %5210 = vmatpush.msra.mxu3 %v3947_v28  ;;  %v4111_v44 = vunpack.c.h.bf16 %v7074_v46  ;;  %v4107_v4 = vunpack.c.h.bf16 %v7078_v57  ;;  %v10827_v40 = vld [vmem:[#allocation23_spill] sm:$0xff]  ;;  %v10828_v13 = vld [vmem:[#allocation24_spill] sm:$0xff]  ;;  %v10829_v31 = vld [vmem:[#allocation26_spill] sm:$0xff] }
 0x596   :  { %5145 = vmatpush.msra.mxu0 %v3739_v11  ;;  %5168 = vmatpush.msra.mxu1 %v3803_v22  ;;  %v7079_v33 = vld [vmem:[#allocation13 + $0x210] sm:$0xff]  ;;  %v7083_v63 = vld [vmem:[#allocation13 + $0x200] sm:$0xff] }
 0x597   :  { %5188 = vmatpush.msra.mxu2 %v3879_v0  ;;  %5211 = vmatpush.msra.mxu3 %v3943_v47  ;;  %v3863_v23 = vunpack.c.h.bf16 %v7079_v33  ;;  %v7080_v48 = vld [vmem:[#allocation13 + $0x310] sm:$0xff]  ;;  %v3859_v28 = vunpack.c.h.bf16 %v7083_v63  ;;  %v7084_v26 = vld [vmem:[#allocation13 + $0x300] sm:$0xff] }
 0x598   :  { %5146 = vmatpush.msra.mxu0 %v3735_v42  ;;  %5169 = vmatpush.msra.mxu1 %v3799_v9  ;;  %v3927_v36 = vunpack.c.h.bf16 %v7080_v48  ;;  %v7081_v25 = vld [vmem:[#allocation13 + $0x4d0] sm:$0xff]  ;;  %v3923_v11 = vunpack.c.h.bf16 %v7084_v26  ;;  %v7085_v19 = vld [vmem:[#allocation13 + $0x4c0] sm:$0xff] }
 0x599   :  { %5189 = vmatpush.msra.mxu2 %v3875_v29  ;;  %5212 = vmatpush.msra.mxu3 %v3939_v62  ;;  %v4039_v5 = vunpack.c.h.bf16 %v7081_v25  ;;  %v7082_v10 = vld [vmem:[#allocation13 + $0x5d0] sm:$0xff]  ;;  %v4035_v22 = vunpack.c.h.bf16 %v7085_v19  ;;  %v7086_v3 = vld [vmem:[#allocation13 + $0x5c0] sm:$0xff] }
 0x59a   :  { %5147 = vmatpush.msra.mxu0 %v3731_v52  ;;  %5170 = vmatpush.msra.mxu1 %v3795_v45  ;;  %v4103_v18 = vunpack.c.h.bf16 %v7082_v10  ;;  %v4099_v0 = vunpack.c.h.bf16 %v7086_v3  ;;  %v7087_v37 = vld [vmem:[#allocation13 + $0x6f0] sm:$0xff]  ;;  %v7091_v21 = vld [vmem:[#allocation13 + $0x6e0] sm:$0xff] }
 0x59b   :  { %5190 = vmatpush.msra.mxu2 %v3871_v53  ;;  %5213 = vmatpush.msra.mxu3 %v3935_v54  ;;  %v4175_v47 = vunpack.c.h.bf16 %v7087_v37  ;;  %v7088_v34 = vld [vmem:[#allocation13 + $0x7f0] sm:$0xff]  ;;  %v4171_v52 = vunpack.c.h.bf16 %v7091_v21  ;;  %v7092_v17 = vld [vmem:[#allocation13 + $0x7e0] sm:$0xff] }
 0x59c   :  { %5148 = vmatmul.f32.vlgmr.msra.gmra.mxu0 %v10827_v40  ;;  %5171 = vmatmul.f32.vlgmr.msra.gmra.mxu1 %v10828_v13  ;;  %v4239_v42 = vunpack.c.h.bf16 %v7088_v34  ;;  %v10830_v9 = vld [vmem:[#allocation28_spill] sm:$0xff]  ;;  %v4235_v45 = vunpack.c.h.bf16 %v7092_v17  ;;  %v7093_v20 = vld [vmem:[#allocation13 + $0x4a0] sm:$0xff]  ;;  %v10831_v50 = vld [vmem:[#allocation25_spill] sm:$0xff] }
 0x59d   :  { %5224 = vmatpush.msrb.mxu0 %v4047_v14  ;;  %5247 = vmatpush.msrb.mxu1 %v4111_v44  ;;  %v7089_v8 = vld [vmem:[#allocation13 + $0x4b0] sm:$0xff]  ;;  %v4027_v53 = vunpack.c.h.bf16 %v7093_v20  ;;  %v7094_v59 = vld [vmem:[#allocation13 + $0x5a0] sm:$0xff] }
 0x59e   :  { %5191 = vmatpush.msra.mxu2 %v3867_v7  ;;  %5214 = vmatpush.msra.mxu3 %v3931_v39  ;;  %v4031_v29 = vunpack.c.h.bf16 %v7089_v8  ;;  %v7090_v24 = vld [vmem:[#allocation13 + $0x5b0] sm:$0xff]  ;;  %v4091_v54 = vunpack.c.h.bf16 %v7094_v59  ;;  %v10832_v14 = vld [vmem:[#allocation27_spill] sm:$0xff] }
 0x59f   :  { %5225 = vmatpush.msrb.mxu0 %v4043_v16  ;;  %5248 = vmatpush.msrb.mxu1 %v4107_v4  ;;  %v4095_v62 = vunpack.c.h.bf16 %v7090_v24  ;;  %v7095_v46 = vld [vmem:[#allocation13 + $0x6d0] sm:$0xff]  ;;  %v7099_v57 = vld [vmem:[#allocation13 + $0x6c0] sm:$0xff] }
 0x5a0   :  { %5192 = vmatpush.msra.mxu2 %v3863_v23  ;;  %5215 = vmatpush.msra.mxu3 %v3927_v36  ;;  %v4167_v44 = vunpack.c.h.bf16 %v7095_v46  ;;  %v7096_v55 = vld [vmem:[#allocation13 + $0x7d0] sm:$0xff]  ;;  %v4163_v4 = vunpack.c.h.bf16 %v7099_v57  ;;  %v7100_v33 = vld [vmem:[#allocation13 + $0x7c0] sm:$0xff] }
 0x5a1   :  { %5226 = vmatpush.msrb.mxu0 %v4039_v5  ;;  %5249 = vmatpush.msrb.mxu1 %v4103_v18  ;;  %v4231_v7 = vunpack.c.h.bf16 %v7096_v55  ;;  %v7097_v41 = vld [vmem:[#allocation13 + $0x490] sm:$0xff]  ;;  %v4227_v23 = vunpack.c.h.bf16 %v7100_v33  ;;  %v7101_v48 = vld [vmem:[#allocation13 + $0x480] sm:$0xff] }
 0x5a2   :  { %5193 = vmatpush.msra.mxu2 %v3859_v28  ;;  %5216 = vmatpush.msra.mxu3 %v3923_v11  ;;  %v4023_v39 = vunpack.c.h.bf16 %v7097_v41  ;;  %v7098_v15 = vld [vmem:[#allocation13 + $0x590] sm:$0xff]  ;;  %v4019_v36 = vunpack.c.h.bf16 %v7101_v48  ;;  %v7102_v25 = vld [vmem:[#allocation13 + $0x580] sm:$0xff] }
 0x5a3   :  { %5194 = vmatmul.f32.vlgmr.msra.gmra.mxu2 %v10829_v31  ;;  %5217 = vmatmul.f32.vlgmr.msra.gmra.mxu3 %v10830_v9  ;;  %v4087_v16 = vunpack.c.h.bf16 %v7098_v15  ;;  %v4083_v5 = vunpack.c.h.bf16 %v7102_v25  ;;  %v7103_v10 = vld [vmem:[#allocation13 + $0x6b0] sm:$0xff]  ;;  %v7107_v37 = vld [vmem:[#allocation13 + $0x6a0] sm:$0xff] }
 0x5a4   :  { %5227 = vmatpush.msrb.mxu0 %v4035_v22  ;;  %5250 = vmatpush.msrb.mxu1 %v4099_v0  ;;  %v4159_v18 = vunpack.c.h.bf16 %v7103_v10  ;;  %v7104_v63 = vld [vmem:[#allocation13 + $0x7b0] sm:$0xff]  ;;  %v10834_v0 = vld [vmem:[#allocation30_spill] sm:$0xff] }
 0x5a5   :  { %5270 = vmatpush.msrb.mxu2 %v4175_v47  ;;  %5293 = vmatpush.msrb.mxu3 %v4239_v42  ;;  %v4223_v28 = vunpack.c.h.bf16 %v7104_v63  ;;  %v7105_v26 = vld [vmem:[#allocation13 + $0x470] sm:$0xff]  ;;  %v4155_v47 = vunpack.c.h.bf16 %v7107_v37  ;;  %v7108_v34 = vld [vmem:[#allocation13 + $0x7a0] sm:$0xff] }
 0x5a6   :  { %5151 = vmatmul.f32.gmra.mxu0 %v10831_v50  ;;  %5174 = vmatmul.f32.gmra.mxu1 %v10832_v14  ;;  %v4015_v11 = vunpack.c.h.bf16 %v7105_v26  ;;  %v7106_v19 = vld [vmem:[#allocation13 + $0x570] sm:$0xff]  ;;  %v4219_v42 = vunpack.c.h.bf16 %v7108_v34  ;;  %v7109_v8 = vld [vmem:[#allocation13 + $0x460] sm:$0xff] }
 0x5a7   :  { %5228 = vmatpush.msrb.mxu0 %v4031_v29  ;;  %5251 = vmatpush.msrb.mxu1 %v4095_v62  ;;  %v4079_v22 = vunpack.c.h.bf16 %v7106_v19  ;;  %v10833_v3 = vld [vmem:[#allocation29_spill] sm:$0xff]  ;;  %v4011_v29 = vunpack.c.h.bf16 %v7109_v8  ;;  %v7110_v24 = vld [vmem:[#allocation13 + $0x560] sm:$0xff] }
 0x5a8   :  { %5271 = vmatpush.msrb.mxu2 %v4171_v52  ;;  %5294 = vmatpush.msrb.mxu3 %v4235_v45  ;;  %v4075_v62 = vunpack.c.h.bf16 %v7110_v24  ;;  %v7111_v21 = vld [vmem:[#allocation13 + $0x690] sm:$0xff]  ;;  %v7115_v46 = vld [vmem:[#allocation13 + $0x680] sm:$0xff] }
 0x5a9   :  { %5229 = vmatpush.msrb.mxu0 %v4027_v53  ;;  %5252 = vmatpush.msrb.mxu1 %v4091_v54  ;;  %v4151_v52 = vunpack.c.h.bf16 %v7111_v21  ;;  %v7112_v17 = vld [vmem:[#allocation13 + $0x790] sm:$0xff]  ;;  %v7116_v55 = vld [vmem:[#allocation13 + $0x780] sm:$0xff] }
 0x5aa   :  { %5272 = vmatpush.msrb.mxu2 %v4167_v44  ;;  %5295 = vmatpush.msrb.mxu3 %v4231_v7  ;;  %v4215_v45 = vunpack.c.h.bf16 %v7112_v17  ;;  %v7113_v20 = vld [vmem:[#allocation13 + $0x450] sm:$0xff]  ;;  %v4147_v44 = vunpack.c.h.bf16 %v7115_v46  ;;  %v4211_v7 = vunpack.c.h.bf16 %v7116_v55  ;;  %v7117_v41 = vld [vmem:[#allocation13 + $0x440] sm:$0xff] }
 0x5ab   :  { %5230 = vmatpush.msrb.mxu0 %v4023_v39  ;;  %5253 = vmatpush.msrb.mxu1 %v4087_v16  ;;  %v4007_v53 = vunpack.c.h.bf16 %v7113_v20  ;;  %v7114_v59 = vld [vmem:[#allocation13 + $0x550] sm:$0xff]  ;;  %v4003_v39 = vunpack.c.h.bf16 %v7117_v41  ;;  %v7118_v15 = vld [vmem:[#allocation13 + $0x540] sm:$0xff] }
 0x5ac   :  { %5273 = vmatpush.msrb.mxu2 %v4163_v4  ;;  %5296 = vmatpush.msrb.mxu3 %v4227_v23  ;;  %v4071_v54 = vunpack.c.h.bf16 %v7114_v59  ;;  %v4067_v16 = vunpack.c.h.bf16 %v7118_v15  ;;  %v7119_v57 = vld [vmem:[#allocation13 + $0x670] sm:$0xff]  ;;  %v7123_v10 = vld [vmem:[#allocation13 + $0x660] sm:$0xff] }
 0x5ad   :  { %5197 = vmatmul.f32.gmra.mxu2 %v10833_v3  ;;  %5220 = vmatmul.f32.gmra.mxu3 %v10834_v0  ;;  %v4143_v4 = vunpack.c.h.bf16 %v7119_v57  ;;  %v7120_v33 = vld [vmem:[#allocation13 + $0x770] sm:$0xff]  ;;  %v7124_v63 = vld [vmem:[#allocation13 + $0x760] sm:$0xff] }
 0x5ae   :  { %5231 = vmatpush.msrb.mxu0 %v4019_v36  ;;  %5254 = vmatpush.msrb.mxu1 %v4083_v5  ;;  %v4207_v23 = vunpack.c.h.bf16 %v7120_v33  ;;  %v7121_v48 = vld [vmem:[#allocation13 + $0x430] sm:$0xff]  ;;  %v7125_v26 = vld [vmem:[#allocation13 + $0x420] sm:$0xff] }
 0x5af   :  { %5274 = vmatpush.msrb.mxu2 %v4159_v18  ;;  %5297 = vmatpush.msrb.mxu3 %v4223_v28  ;;  %v3999_v36 = vunpack.c.h.bf16 %v7121_v48  ;;  %v7122_v25 = vld [vmem:[#allocation13 + $0x530] sm:$0xff]  ;;  %v4139_v18 = vunpack.c.h.bf16 %v7123_v10  ;;  %v4203_v28 = vunpack.c.h.bf16 %v7124_v63  ;;  %v7126_v19 = vld [vmem:[#allocation13 + $0x520] sm:$0xff] }
 0x5b0   :  { %5232 = vmatpush.msrb.mxu0 %v4015_v11  ;;  %5255 = vmatpush.msrb.mxu1 %v4079_v22  ;;  %v4063_v5 = vunpack.c.h.bf16 %v7122_v25  ;;  %v3995_v11 = vunpack.c.h.bf16 %v7125_v26  ;;  %v4059_v22 = vunpack.c.h.bf16 %v7126_v19  ;;  %v7127_v37 = vld [vmem:[#allocation13 + $0x650] sm:$0xff]  ;;  %v7131_v21 = vld [vmem:[#allocation13 + $0x640] sm:$0xff] }
 0x5b1   :  { %5275 = vmatpush.msrb.mxu2 %v4155_v47  ;;  %5298 = vmatpush.msrb.mxu3 %v4219_v42  ;;  %v4135_v47 = vunpack.c.h.bf16 %v7127_v37  ;;  %v7128_v34 = vld [vmem:[#allocation13 + $0x750] sm:$0xff]  ;;  %v7132_v17 = vld [vmem:[#allocation13 + $0x740] sm:$0xff] }
 0x5b2   :  { %5233 = vmatpush.msrb.mxu0 %v4011_v29  ;;  %5256 = vmatpush.msrb.mxu1 %v4075_v62  ;;  %v4199_v42 = vunpack.c.h.bf16 %v7128_v34  ;;  %v7129_v8 = vld [vmem:[#allocation13 + $0x410] sm:$0xff]  ;;  %v7133_v20 = vld [vmem:[#allocation13 + $0x400] sm:$0xff]  ;;  %v10151_v34 = vpop.f32.mrf.mxu0 }
 0x5b3   :  { %5276 = vmatpush.msrb.mxu2 %v4151_v52  ;;  %5299 = vmatpush.msrb.mxu3 %v4215_v45  ;;  %v3991_v29 = vunpack.c.h.bf16 %v7129_v8  ;;  %v7130_v24 = vld [vmem:[#allocation13 + $0x510] sm:$0xff]  ;;  %v4131_v52 = vunpack.c.h.bf16 %v7131_v21  ;;  %v4195_v45 = vunpack.c.h.bf16 %v7132_v17  ;;  %v7134_v59 = vld [vmem:[#allocation13 + $0x500] sm:$0xff] }
 0x5b4   :  { %5234 = vmatpush.msrb.mxu0 %v4007_v53  ;;  %5257 = vmatpush.msrb.mxu1 %v4071_v54  ;;  %v4055_v62 = vunpack.c.h.bf16 %v7130_v24  ;;  %v3987_v53 = vunpack.c.h.bf16 %v7133_v20  ;;  %v4051_v54 = vunpack.c.h.bf16 %v7134_v59  ;;  %v7135_v46 = vld [vmem:[#allocation13 + $0x630] sm:$0xff]  ;;  %v7139_v57 = vld [vmem:[#allocation13 + $0x620] sm:$0xff] }
 0x5b5   :  { %5277 = vmatpush.msrb.mxu2 %v4147_v44  ;;  %5300 = vmatpush.msrb.mxu3 %v4211_v7  ;;  %v4127_v44 = vunpack.c.h.bf16 %v7135_v46  ;;  %v7136_v55 = vld [vmem:[#allocation13 + $0x730] sm:$0xff]  ;;  %v7140_v33 = vld [vmem:[#allocation13 + $0x720] sm:$0xff] }
 0x5b6   :  { %5235 = vmatpush.msrb.mxu0 %v4003_v39  ;;  %5258 = vmatpush.msrb.mxu1 %v4067_v16  ;;  %v4191_v7 = vunpack.c.h.bf16 %v7136_v55  ;;  %v7137_v41 = vld [vmem:[#allocation13 + $0x8f0] sm:$0xff]  ;;  %v7141_v48 = vld [vmem:[#allocation13 + $0x8e0] sm:$0xff] }
 0x5b7   :  { %5278 = vmatpush.msrb.mxu2 %v4143_v4  ;;  %5301 = vmatpush.msrb.mxu3 %v4207_v23  ;;  %v4303_v39 = vunpack.c.h.bf16 %v7137_v41  ;;  %v7138_v15 = vld [vmem:[#allocation13 + $0x9f0] sm:$0xff]  ;;  %v4123_v4 = vunpack.c.h.bf16 %v7139_v57  ;;  %v4187_v23 = vunpack.c.h.bf16 %v7140_v33  ;;  %v7142_v25 = vld [vmem:[#allocation13 + $0x9e0] sm:$0xff] }
 0x5b8   :  { %5236 = vmatpush.msrb.mxu0 %v3999_v36  ;;  %5259 = vmatpush.msrb.mxu1 %v4063_v5  ;;  %v4367_v16 = vunpack.c.h.bf16 %v7138_v15  ;;  %v4299_v36 = vunpack.c.h.bf16 %v7141_v48  ;;  %v4363_v5 = vunpack.c.h.bf16 %v7142_v25  ;;  %v10835_v10 = vld [vmem:[#allocation31_spill] sm:$0xff]  ;;  %v7143_v63 = vld [vmem:[#allocation13 + $0x610] sm:$0xff]  ;;  %v10838_v46 = vld [vmem:[#allocation34_spill] sm:$0xff] }
 0x5b9   :  { %5279 = vmatpush.msrb.mxu2 %v4139_v18  ;;  %5302 = vmatpush.msrb.mxu3 %v4203_v28  ;;  %v10836_v18 = vld [vmem:[#allocation32_spill] sm:$0xff]  ;;  %v4119_v28 = vunpack.c.h.bf16 %v7143_v63  ;;  %v7155_v15 = vld [vmem:[#allocation13 + $0xae0] sm:$0xff] }
 0x5ba   :  { %5237 = vmatpush.msrb.mxu0 %v3995_v11  ;;  %5260 = vmatpush.msrb.mxu1 %v4059_v22  ;;  %v7144_v26 = vld [vmem:[#allocation13 + $0x710] sm:$0xff]  ;;  %v7156_v57 = vld [vmem:[#allocation13 + $0xbe0] sm:$0xff] }
 0x5bb   :  { %5280 = vmatpush.msrb.mxu2 %v4135_v47  ;;  %5303 = vmatpush.msrb.mxu3 %v4199_v42  ;;  %v4183_v11 = vunpack.c.h.bf16 %v7144_v26  ;;  %v7145_v19 = vld [vmem:[#allocation13 + $0x8d0] sm:$0xff]  ;;  %v7147_v42 = vld [vmem:[#allocation13 + $0x600] sm:$0xff] }
 0x5bc   :  { %5238 = vmatpush.msrb.mxu0 %v3991_v29  ;;  %5261 = vmatpush.msrb.mxu1 %v4055_v62  ;;  %v4295_v22 = vunpack.c.h.bf16 %v7145_v19  ;;  %v7146_v37 = vld [vmem:[#allocation13 + $0x9d0] sm:$0xff]  ;;  %v4115_v8 = vunpack.c.h.bf16 %v7147_v42  ;;  %v7148_v29 = vld [vmem:[#allocation13 + $0x700] sm:$0xff]  ;;  %v10159_v19 = vpop.f32.mrf.mxu2 }
 0x5bd   :  { %5281 = vmatpush.msrb.mxu2 %v4131_v52  ;;  %5304 = vmatpush.msrb.mxu3 %v4195_v45  ;;  %v4359_v47 = vunpack.c.h.bf16 %v7146_v37  ;;  %v4179_v24 = vunpack.c.h.bf16 %v7148_v29  ;;  %v7149_v62 = vld [vmem:[#allocation13 + $0x8c0] sm:$0xff]  ;;  %v7151_v45 = vld [vmem:[#allocation13 + $0xaf0] sm:$0xff] }
 0x5be   :  { %5239 = vmatpush.msrb.mxu0 %v3987_v53  ;;  %5262 = vmatpush.msrb.mxu1 %v4051_v54  ;;  %v4291_v21 = vunpack.c.h.bf16 %v7149_v62  ;;  %v7150_v52 = vld [vmem:[#allocation13 + $0x9c0] sm:$0xff]  ;;  %v4431_v20 = vunpack.c.h.bf16 %v7151_v45  ;;  %v7152_v53 = vld [vmem:[#allocation13 + $0xbf0] sm:$0xff] }
 0x5bf   :  { %5282 = vmatpush.msrb.mxu2 %v4127_v44  ;;  %5305 = vmatpush.msrb.mxu3 %v4191_v7  ;;  %v4355_v17 = vunpack.c.h.bf16 %v7150_v52  ;;  %v4495_v59 = vunpack.c.h.bf16 %v7152_v53  ;;  %v10837_v54 = vld [vmem:[#allocation33_spill] sm:$0xff]  ;;  %v7157_v33 = vld [vmem:[#allocation13 + $0x8a0] sm:$0xff]  ;;  %v10163_v52 = vpop.f32.mrf.mxu3 }
 0x5c0   :  { %5240 = vmatmul.f32.vlgmr.msrb.gmra.mxu0 %v10835_v10  ;;  %5263 = vmatmul.f32.vlgmr.msrb.gmra.mxu1 %v10836_v18  ;;  %v7153_v44 = vld [vmem:[#allocation13 + $0x8b0] sm:$0xff]  ;;  %v7158_v48 = vld [vmem:[#allocation13 + $0x9a0] sm:$0xff] }
 0x5c1   :  { %5316 = vmatpush.msra.mxu0 %v4303_v39  ;;  %5339 = vmatpush.msra.mxu1 %v4367_v16  ;;  %v4287_v55 = vunpack.c.h.bf16 %v7153_v44  ;;  %v7154_v7 = vld [vmem:[#allocation13 + $0x9b0] sm:$0xff]  ;;  %v10155_v39 = vpop.f32.mrf.mxu1  ;;  %v4427_v16 = vunpack.c.h.bf16 %v7155_v15  ;;  %v10839_v25 = vld [vmem:[#allocation35_spill] sm:$0xff] }
 0x5c2   :  { %5283 = vmatpush.msrb.mxu2 %v4123_v4  ;;  %5306 = vmatpush.msrb.mxu3 %v4187_v23  ;;  %v4351_v41 = vunpack.c.h.bf16 %v7154_v7  ;;  %v4491_v4 = vunpack.c.h.bf16 %v7156_v57  ;;  %v4283_v23 = vunpack.c.h.bf16 %v7157_v33  ;;  %v7159_v63 = vld [vmem:[#allocation13 + $0xad0] sm:$0xff]  ;;  %v7163_v29 = vld [vmem:[#allocation13 + $0xac0] sm:$0xff] }
 0x5c3   :  { %5317 = vmatpush.msra.mxu0 %v4299_v36  ;;  %5340 = vmatpush.msra.mxu1 %v4363_v5  ;;  %v4347_v36 = vunpack.c.h.bf16 %v7158_v48  ;;  %v10840_v5 = vld [vmem:[#allocation36_spill] sm:$0xff]  ;;  %v7164_v62 = vld [vmem:[#allocation13 + $0xbc0] sm:$0xff] }
 0x5c4   :  { %5284 = vmatpush.msrb.mxu2 %v4119_v28  ;;  %5307 = vmatpush.msrb.mxu3 %v4183_v11  ;;  %v4423_v28 = vunpack.c.h.bf16 %v7159_v63  ;;  %v7160_v26 = vld [vmem:[#allocation13 + $0xbd0] sm:$0xff]  ;;  %v10842_v48 = vld [vmem:[#allocation39_spill] sm:$0xff] }
 0x5c5   :  { %5318 = vmatpush.msra.mxu0 %v4295_v22  ;;  %5341 = vmatpush.msra.mxu1 %v4359_v47  ;;  %v4487_v11 = vunpack.c.h.bf16 %v7160_v26  ;;  %v10161_v22 = vpop.f32.mrf.mxu0  ;;  %v7161_v37 = vld [vmem:[#allocation13 + $0x890] sm:$0xff] }
 0x5c6   :  { %5285 = vmatpush.msrb.mxu2 %v4115_v8  ;;  %5308 = vmatpush.msrb.mxu3 %v4179_v24  ;;  %v4279_v47 = vunpack.c.h.bf16 %v7161_v37  ;;  %v7162_v42 = vld [vmem:[#allocation13 + $0x990] sm:$0xff]  ;;  %v4419_v24 = vunpack.c.h.bf16 %v7163_v29 }
 0x5c7   :  { %5286 = vmatmul.f32.vlgmr.msrb.gmra.mxu2 %v10837_v54  ;;  %5309 = vmatmul.f32.vlgmr.msrb.gmra.mxu3 %v10838_v46  ;;  %v4343_v8 = vunpack.c.h.bf16 %v7162_v42  ;;  %v7169_v15 = vld [vmem:[#allocation13 + $0x870] sm:$0xff] }
 0x5c8   :  { %5319 = vmatpush.msra.mxu0 %v4291_v21  ;;  %5342 = vmatpush.msra.mxu1 %v4355_v17  ;;  %v4483_v21 = vunpack.c.h.bf16 %v7164_v62  ;;  %v7165_v17 = vld [vmem:[#allocation13 + $0x880] sm:$0xff]  ;;  %v7170_v57 = vld [vmem:[#allocation13 + $0x970] sm:$0xff] }
 0x5c9   :  { %5362 = vmatpush.msra.mxu2 %v4431_v20  ;;  %5385 = vmatpush.msra.mxu3 %v4495_v59  ;;  %v4275_v45 = vunpack.c.h.bf16 %v7165_v17  ;;  %v7166_v20 = vld [vmem:[#allocation13 + $0x980] sm:$0xff]  ;;  %v7167_v59 = vld [vmem:[#allocation13 + $0xab0] sm:$0xff]  ;;  %v10167_v33 = vpop.f32.mrf.mxu1 }
 0x5ca   :  { %5243 = vmatmul.f32.gmra.mxu0 %v10839_v25  ;;  %5266 = vmatmul.f32.gmra.mxu1 %v10840_v5  ;;  %v4339_v53 = vunpack.c.h.bf16 %v7166_v20  ;;  %v4415_v44 = vunpack.c.h.bf16 %v7167_v59  ;;  %v7177_v20 = vld [vmem:[#allocation13 + $0x850] sm:$0xff] }
 0x5cb   :  { %5320 = vmatpush.msra.mxu0 %v4287_v55  ;;  %5343 = vmatpush.msra.mxu1 %v4351_v41  ;;  %v7168_v55 = vld [vmem:[#allocation13 + $0xbb0] sm:$0xff]  ;;  %v10165_v41 = vld [vmem:[#allocation14] sm:$0xf]  ;;  %v4263_v59 = vunpack.c.h.bf16 %v7177_v20 }
 0x5cc   :  { %5363 = vmatpush.msra.mxu2 %v4427_v16  ;;  %5386 = vmatpush.msra.mxu3 %v4491_v4  ;;  %v4479_v7 = vunpack.c.h.bf16 %v7168_v55  ;;  %v4271_v16 = vunpack.c.h.bf16 %v7169_v15  ;;  %v4335_v4 = vunpack.c.h.bf16 %v7170_v57  ;;  %v4756_v29 = vperm.slane %v10165_v41, 0  ;;  %v10176_v15 = vpop.f32.mrf.mxu3  ;;  %v7179_v57 = vld [vmem:[#allocation13 + $0xa80] sm:$0xff]  ;;  %v7185_v20 = vld [vmem:[#allocation13 + $0x830] sm:$0xff] }
 0x5cd   :  { %5321 = vmatpush.msra.mxu0 %v4283_v23  ;;  %5344 = vmatpush.msra.mxu1 %v4347_v36  ;;  %v10841_v23 = vld [vmem:[#allocation38_spill] sm:$0xff]  ;;  %v10174_v55 = vpop.f32.mrf.mxu0 }
 0x5ce   :  { %5364 = vmatpush.msra.mxu2 %v4423_v28  ;;  %5387 = vmatpush.msra.mxu3 %v4487_v11  ;;  %v7171_v36 = vld [vmem:[#allocation13 + $0xaa0] sm:$0xff] }
 0x5cf   :  { %5322 = vmatpush.msra.mxu0 %v4279_v47  ;;  %5345 = vmatpush.msra.mxu1 %v4343_v8  ;;  %v4411_v63 = vunpack.c.h.bf16 %v7171_v36  ;;  %v7172_v28 = vld [vmem:[#allocation13 + $0xba0] sm:$0xff]  ;;  %v10171_v8 = vpop.f32.mrf.mxu2  ;;  %v4403_v36 = vunpack.c.h.bf16 %v7179_v57 }
 0x5d0   :  { %5365 = vmatpush.msra.mxu2 %v4419_v24  ;;  %5388 = vmatpush.msra.mxu3 %v4483_v21  ;;  %v4475_v26 = vunpack.c.h.bf16 %v7172_v28  ;;  %v7173_v11 = vld [vmem:[#allocation13 + $0x860] sm:$0xff]  ;;  %v7175_v24 = vld [vmem:[#allocation13 + $0xa90] sm:$0xff] }
 0x5d1   :  { %5289 = vmatmul.f32.gmra.mxu2 %v10841_v23  ;;  %5312 = vmatmul.f32.gmra.mxu3 %v10842_v48  ;;  %v4267_v37 = vunpack.c.h.bf16 %v7173_v11  ;;  %v7174_v47 = vld [vmem:[#allocation13 + $0x960] sm:$0xff]  ;;  %v4407_v62 = vunpack.c.h.bf16 %v7175_v24  ;;  %v7176_v21 = vld [vmem:[#allocation13 + $0xb90] sm:$0xff] }
 0x5d2   :  { %5323 = vmatpush.msra.mxu0 %v4275_v45  ;;  %5346 = vmatpush.msra.mxu1 %v4339_v53  ;;  %v4331_v42 = vunpack.c.h.bf16 %v7174_v47  ;;  %v4471_v17 = vunpack.c.h.bf16 %v7176_v21  ;;  %v7178_v45 = vld [vmem:[#allocation13 + $0x950] sm:$0xff]  ;;  %v7181_v28 = vld [vmem:[#allocation13 + $0x840] sm:$0xff]  ;;  %v4782_v47 = vadd.f32 %v10151_v34, %v4756_v29  ;;  %v10181_v34 = vpop.f32.mrf.mxu1 }
 0x5d3   :  { %5366 = vmatpush.msra.mxu2 %v4415_v44  ;;  %5389 = vmatpush.msra.mxu3 %v4479_v7  ;;  %v4327_v53 = vunpack.c.h.bf16 %v7178_v45  ;;  %v7180_v44 = vld [vmem:[#allocation13 + $0xb80] sm:$0xff]  ;;  %v4259_v11 = vunpack.c.h.bf16 %v7181_v28  ;;  %v7183_v24 = vld [vmem:[#allocation13 + $0xa70] sm:$0xff]  ;;  %v4255_v45 = vunpack.c.h.bf16 %v7185_v20 }
 0x5d4   :  { %5324 = vmatpush.msra.mxu0 %v4271_v16  ;;  %5347 = vmatpush.msra.mxu1 %v4335_v4  ;;  %v4467_v7 = vunpack.c.h.bf16 %v7180_v44  ;;  %v7182_v16 = vld [vmem:[#allocation13 + $0x940] sm:$0xff]  ;;  %v4399_v21 = vunpack.c.h.bf16 %v7183_v24 }
 0x5d5   :  { %5367 = vmatpush.msra.mxu2 %v4411_v63  ;;  %5390 = vmatpush.msra.mxu3 %v4475_v26  ;;  %v4323_v4 = vunpack.c.h.bf16 %v7182_v16  ;;  %v7184_v63 = vld [vmem:[#allocation13 + $0xb70] sm:$0xff]  ;;  %v7187_v57 = vld [vmem:[#allocation13 + $0xa60] sm:$0xff] }
 0x5d6   :  { %5325 = vmatpush.msra.mxu0 %v4267_v37  ;;  %5348 = vmatpush.msra.mxu1 %v4331_v42  ;;  %v4463_v26 = vunpack.c.h.bf16 %v7184_v63  ;;  %v7186_v37 = vld [vmem:[#allocation13 + $0x930] sm:$0xff]  ;;  %v4395_v44 = vunpack.c.h.bf16 %v7187_v57  ;;  %v7188_v28 = vld [vmem:[#allocation13 + $0xb60] sm:$0xff] }
 0x5d7   :  { %5368 = vmatpush.msra.mxu2 %v4407_v62  ;;  %5391 = vmatpush.msra.mxu3 %v4471_v17  ;;  %v4319_v42 = vunpack.c.h.bf16 %v7186_v37  ;;  %v4459_v16 = vunpack.c.h.bf16 %v7188_v28  ;;  %v7189_v62 = vld [vmem:[#allocation13 + $0x820] sm:$0xff]  ;;  %v7193_v37 = vld [vmem:[#allocation13 + $0x810] sm:$0xff]  ;;  %v10184_v28 = vpop.f32.mrf.mxu2 }
 0x5d8   :  { %5326 = vmatpush.msra.mxu0 %v4263_v59  ;;  %5349 = vmatpush.msra.mxu1 %v4327_v53  ;;  %v4251_v17 = vunpack.c.h.bf16 %v7189_v62  ;;  %v7190_v24 = vld [vmem:[#allocation13 + $0x920] sm:$0xff]  ;;  %v4805_v59 = vadd.f32 %v10155_v39, %v4782_v47  ;;  %v7191_v53 = vld [vmem:[#allocation13 + $0xa50] sm:$0xff]  ;;  %v4247_v57 = vunpack.c.h.bf16 %v7193_v37  ;;  %v10189_v37 = vpop.f32.mrf.mxu3 }
 0x5d9   :  { %5369 = vmatpush.msra.mxu2 %v4403_v36  ;;  %5392 = vmatpush.msra.mxu3 %v4467_v7  ;;  %v4315_v63 = vunpack.c.h.bf16 %v7190_v24  ;;  %v4391_v20 = vunpack.c.h.bf16 %v7191_v53  ;;  %v7192_v36 = vld [vmem:[#allocation13 + $0xb50] sm:$0xff]  ;;  %v7195_v24 = vld [vmem:[#allocation13 + $0xa40] sm:$0xff] }
 0x5da   :  { %5327 = vmatpush.msra.mxu0 %v4259_v11  ;;  %5350 = vmatpush.msra.mxu1 %v4323_v4  ;;  %v4455_v7 = vunpack.c.h.bf16 %v7192_v36  ;;  %v7194_v11 = vld [vmem:[#allocation13 + $0x910] sm:$0xff]  ;;  %v4828_v62 = vadd.f32 %v10159_v19, %v4805_v59  ;;  %v4387_v39 = vunpack.c.h.bf16 %v7195_v24  ;;  %v7196_v47 = vld [vmem:[#allocation13 + $0xb40] sm:$0xff]  ;;  %v10187_v36 = vpop.f32.mrf.mxu0  ;;  %v4785_v19 = vadd.f32 %v10161_v22, %v4756_v29 }
 0x5db   :  { %5370 = vmatpush.msra.mxu2 %v4399_v21  ;;  %5393 = vmatpush.msra.mxu3 %v4463_v26  ;;  %v4311_v4 = vunpack.c.h.bf16 %v7194_v11  ;;  %v4451_v21 = vunpack.c.h.bf16 %v7196_v47  ;;  %v7197_v26 = vld [vmem:[#allocation13 + $0x800] sm:$0xff]  ;;  %v7200_v59 = vld [vmem:[#allocation13 + $0xb30] sm:$0xff] }
 0x5dc   :  { %5328 = vmatpush.msra.mxu0 %v4255_v45  ;;  %5351 = vmatpush.msra.mxu1 %v4319_v42  ;;  %v4243_v53 = vunpack.c.h.bf16 %v7197_v26  ;;  %v7198_v45 = vld [vmem:[#allocation13 + $0x900] sm:$0xff]  ;;  %v4447_v11 = vunpack.c.h.bf16 %v7200_v59  ;;  %v7202_v47 = vld [vmem:[#allocation13 + $0xdf0] sm:$0xff] }
 0x5dd   :  { %5371 = vmatpush.msra.mxu2 %v4395_v44  ;;  %5394 = vmatpush.msra.mxu3 %v4459_v16  ;;  %v4307_v42 = vunpack.c.h.bf16 %v7198_v45  ;;  %v7199_v44 = vld [vmem:[#allocation13 + $0xa30] sm:$0xff]  ;;  %v4623_v26 = vunpack.c.h.bf16 %v7202_v47  ;;  %v7203_v41 = vld [vmem:[#allocation13 + $0xa20] sm:$0xff] }
 0x5de   :  { %5329 = vmatpush.msra.mxu0 %v4251_v17  ;;  %5352 = vmatpush.msra.mxu1 %v4315_v63  ;;  %v4383_v16 = vunpack.c.h.bf16 %v7199_v44  ;;  %v4851_v17 = vadd.f32 %v10163_v52, %v4828_v62  ;;  %v7201_v63 = vld [vmem:[#allocation13 + $0xcf0] sm:$0xff]  ;;  %v4379_v22 = vunpack.c.h.bf16 %v7203_v41  ;;  %v7204_v29 = vld [vmem:[#allocation13 + $0xb20] sm:$0xff] }
 0x5df   :  { %5372 = vmatpush.msra.mxu2 %v4391_v20  ;;  %5395 = vmatpush.msra.mxu3 %v4455_v7  ;;  %v4559_v24 = vunpack.c.h.bf16 %v7201_v63  ;;  %v4443_v20 = vunpack.c.h.bf16 %v7204_v29  ;;  %v4808_v7 = vadd.f32 %v10167_v33, %v4785_v19  ;;  %v7212_v63 = vld [vmem:[#allocation13 + $0xb00] sm:$0xff]  ;;  %v10202_v41 = vpop.f32.mrf.mxu2 }
 0x5e0   :  { %5330 = vmatpush.msra.mxu0 %v4247_v57  ;;  %5353 = vmatpush.msra.mxu1 %v4311_v4  ;;  %v4874_v45 = vadd.f32 %v10174_v55, %v4851_v17  ;;  %v7205_v57 = vld [vmem:[#allocation13 + $0xce0] sm:$0xff]  ;;  %v7209_v55 = vld [vmem:[#allocation13 + $0xcd0] sm:$0xff]  ;;  %v4435_v47 = vunpack.c.h.bf16 %v7212_v63 }
 0x5e1   :  { %5373 = vmatpush.msra.mxu2 %v4387_v39  ;;  %5396 = vmatpush.msra.mxu3 %v4451_v21  ;;  %v4555_v52 = vunpack.c.h.bf16 %v7205_v57  ;;  %v7206_v4 = vld [vmem:[#allocation13 + $0xde0] sm:$0xff]  ;;  %v10199_v39 = vpop.f32.mrf.mxu1  ;;  %v7207_v21 = vld [vmem:[#allocation13 + $0xa10] sm:$0xff]  ;;  %v4831_v33 = vadd.f32 %v10171_v8, %v4808_v7  ;;  %v4551_v19 = vunpack.c.h.bf16 %v7209_v55 }
 0x5e2   :  { %5331 = vmatpush.msra.mxu0 %v4243_v53  ;;  %5354 = vmatpush.msra.mxu1 %v4307_v42  ;;  %v4619_v62 = vunpack.c.h.bf16 %v7206_v4  ;;  %v4375_v53 = vunpack.c.h.bf16 %v7207_v21  ;;  %v7208_v42 = vld [vmem:[#allocation13 + $0xb10] sm:$0xff]  ;;  %v4897_v29 = vadd.f32 %v10181_v34, %v4874_v45  ;;  %v7213_v8 = vld [vmem:[#allocation13 + $0xcc0] sm:$0xff]  ;;  %v4965_v57 = vpop.f32.mrf.mxu0  ;;  %v10205_v4 = vpop.f32.mrf.mxu3 }
 0x5e3   :  { %5374 = vmatpush.msra.mxu2 %v4383_v16  ;;  %5397 = vmatpush.msra.mxu3 %v4447_v11  ;;  %v4439_v44 = vunpack.c.h.bf16 %v7208_v42  ;;  %v7210_v16 = vld [vmem:[#allocation13 + $0xdd0] sm:$0xff]  ;;  %v7211_v11 = vld [vmem:[#allocation13 + $0xa00] sm:$0xff] }
 0x5e4   :  { %5332 = vmatmul.f32.vlgmr.msra.gmra.mxu0 %v9417_v35  ;;  %5355 = vmatmul.f32.vlgmr.msra.gmra.mxu1 %v9422_v30  ;;  %v4615_v59 = vunpack.c.h.bf16 %v7210_v16  ;;  %v4371_v17 = vunpack.c.h.bf16 %v7211_v11  ;;  %v7215_v21 = vld [vmem:[#allocation13 + $0xef0] sm:$0xff]  ;;  %v7220_v55 = vld [vmem:[#allocation13 + $0xfe0] sm:$0xff] }
 0x5e5   :  { %5408 = vmatpush.msrb.mxu0 %v4559_v24  ;;  %5431 = vmatpush.msrb.mxu1 %v4623_v26  ;;  %v4547_v24 = vunpack.c.h.bf16 %v7213_v8  ;;  %v7214_v26 = vld [vmem:[#allocation13 + $0xdc0] sm:$0xff]  ;;  %v4687_v42 = vunpack.c.h.bf16 %v7215_v21  ;;  %v7216_v34 = vld [vmem:[#allocation13 + $0xff0] sm:$0xff] }
 0x5e6   :  { %5375 = vmatpush.msra.mxu2 %v4379_v22  ;;  %5398 = vmatpush.msra.mxu3 %v4443_v20  ;;  %v4611_v7 = vunpack.c.h.bf16 %v7214_v26  ;;  %v4854_v22 = vadd.f32 %v10176_v15, %v4831_v33  ;;  %v4920_v20 = vadd.f32 %v10184_v28, %v4897_v29  ;;  %v4751_v45 = vunpack.c.h.bf16 %v7216_v34  ;;  %v7219_v15 = vld [vmem:[#allocation13 + $0xee0] sm:$0xff]  ;;  %v7223_v29 = vld [vmem:[#allocation13 + $0xed0] sm:$0xff] }
 0x5e7   :  { %5409 = vmatpush.msrb.mxu0 %v4555_v52  ;;  %5432 = vmatpush.msrb.mxu1 %v4619_v62  ;;  %v7217_v52 = vld [vmem:[#allocation13 + $0xcb0] sm:$0xff]  ;;  %v4683_v33 = vunpack.c.h.bf16 %v7219_v15  ;;  %v4747_v28 = vunpack.c.h.bf16 %v7220_v55  ;;  %v4679_v8 = vunpack.c.h.bf16 %v7223_v29  ;;  %v7230_v15 = vld [vmem:[#allocation13 + $0xd80] sm:$0xff] }
 0x5e8   :  { %5376 = vmatpush.msra.mxu2 %v4375_v53  ;;  %5399 = vmatpush.msra.mxu3 %v4439_v44  ;;  %v4543_v62 = vunpack.c.h.bf16 %v7217_v52  ;;  %v7218_v53 = vld [vmem:[#allocation13 + $0xdb0] sm:$0xff]  ;;  %v4943_v16 = vadd.f32 %v10189_v37, %v4920_v20  ;;  %v7227_v20 = vld [vmem:[#allocation13 + $0xec0] sm:$0xff]  ;;  %v4595_v55 = vunpack.c.h.bf16 %v7230_v15 }
 0x5e9   :  { %5410 = vmatpush.msrb.mxu0 %v4551_v19  ;;  %5433 = vmatpush.msrb.mxu1 %v4615_v59  ;;  %v4607_v44 = vunpack.c.h.bf16 %v7218_v53  ;;  %v4877_v19 = vadd.f32 %v10187_v36, %v4854_v22  ;;  %v7221_v59 = vld [vmem:[#allocation13 + $0xca0] sm:$0xff]  ;;  %v7225_v36 = vld [vmem:[#allocation13 + $0xc90] sm:$0xff]  ;;  %v4675_v21 = vunpack.c.h.bf16 %v7227_v20 }
 0x5ea   :  { %5377 = vmatpush.msra.mxu2 %v4371_v17  ;;  %5400 = vmatpush.msra.mxu3 %v4435_v47  ;;  %v4539_v11 = vunpack.c.h.bf16 %v7221_v59  ;;  %v7222_v17 = vld [vmem:[#allocation13 + $0xda0] sm:$0xff]  ;;  %v4988_v47 = vpop.f32.mrf.mxu1  ;;  %v7226_v37 = vld [vmem:[#allocation13 + $0xd90] sm:$0xff]  ;;  %v4966_v53 = vadd.f32 %v4965_v57, %v4943_v16  ;;  %v4968_v59 = vpop.f32.mrf.mxu0 }
 0x5eb   :  { %5378 = vmatmul.f32.vlgmr.msra.gmra.mxu2 %v9639_v6  ;;  %5401 = vmatmul.f32.vlgmr.msra.gmra.mxu3 %v9642_v43  ;;  %v4603_v63 = vunpack.c.h.bf16 %v7222_v17  ;;  %v4599_v22 = vunpack.c.h.bf16 %v7226_v37  ;;  %v4900_v52 = vadd.f32 %v10199_v39, %v4877_v19  ;;  %v5034_v17 = vpop.f32.mrf.mxu3  ;;  %v7233_v39 = vld [vmem:[#allocation13 + $0xc70] sm:$0xff] }
 0x5ec   :  { %5411 = vmatpush.msrb.mxu0 %v4547_v24  ;;  %5434 = vmatpush.msrb.mxu1 %v4611_v7  ;;  %v7224_v24 = vld [vmem:[#allocation13 + $0xfd0] sm:$0xff]  ;;  %v4535_v7 = vunpack.c.h.bf16 %v7225_v36  ;;  %v4527_v57 = vunpack.c.h.bf16 %v7233_v39 }
 0x5ed   :  { %5454 = vmatpush.msrb.mxu2 %v4687_v42  ;;  %5477 = vmatpush.msrb.mxu3 %v4751_v45  ;;  %v4743_v26 = vunpack.c.h.bf16 %v7224_v24  ;;  %v7228_v42 = vld [vmem:[#allocation13 + $0xfc0] sm:$0xff]  ;;  %v5011_v45 = vpop.f32.mrf.mxu2  ;;  %v7232_v24 = vld [vmem:[#allocation13 + $0xfb0] sm:$0xff] }
 0x5ee   :  { %5335 = vmatmul.f32.gmra.mxu0 %v9652_v27  ;;  %5358 = vmatmul.f32.gmra.mxu1 %v9816_v38  ;;  %v4739_v34 = vunpack.c.h.bf16 %v7228_v42  ;;  %v4735_v36 = vunpack.c.h.bf16 %v7232_v24  ;;  %v7234_v19 = vld [vmem:[#allocation13 + $0xd70] sm:$0xff]  ;;  %v7243_v24 = vld [vmem:[#allocation13 + $0xe80] sm:$0xff] }
 0x5ef   :  { %5412 = vmatpush.msrb.mxu0 %v4543_v62  ;;  %5435 = vmatpush.msrb.mxu1 %v4607_v44  ;;  %v7229_v62 = vld [vmem:[#allocation13 + $0xc80] sm:$0xff]  ;;  %v4591_v16 = vunpack.c.h.bf16 %v7234_v19  ;;  %v7239_v42 = vld [vmem:[#allocation13 + $0xe90] sm:$0xff]  ;;  %v4659_v39 = vunpack.c.h.bf16 %v7243_v24 }
 0x5f0   :  { %5455 = vmatpush.msrb.mxu2 %v4683_v33  ;;  %5478 = vmatpush.msrb.mxu3 %v4747_v28  ;;  %v4531_v44 = vunpack.c.h.bf16 %v7229_v62  ;;  %v4923_v33 = vadd.f32 %v10202_v41, %v4900_v52  ;;  %v7231_v28 = vld [vmem:[#allocation13 + $0xeb0] sm:$0xff]  ;;  %v7237_v41 = vld [vmem:[#allocation13 + $0xc60] sm:$0xff] }
 0x5f1   :  { %5413 = vmatpush.msrb.mxu0 %v4539_v11  ;;  %5436 = vmatpush.msrb.mxu1 %v4603_v63  ;;  %v4671_v29 = vunpack.c.h.bf16 %v7231_v28  ;;  %v4989_v11 = vadd.f32 %v4988_v47, %v4966_v53  ;;  %v7235_v63 = vld [vmem:[#allocation13 + $0xea0] sm:$0xff]  ;;  %v4523_v37 = vunpack.c.h.bf16 %v7237_v41  ;;  %v4663_v47 = vunpack.c.h.bf16 %v7239_v42  ;;  %v7241_v15 = vld [vmem:[#allocation13 + $0xc50] sm:$0xff] }
 0x5f2   :  { %5456 = vmatpush.msrb.mxu2 %v4679_v8  ;;  %5479 = vmatpush.msrb.mxu3 %v4743_v26  ;;  %v4667_v8 = vunpack.c.h.bf16 %v7235_v63  ;;  %v7236_v26 = vld [vmem:[#allocation13 + $0xfa0] sm:$0xff]  ;;  %v4991_v62 = vpop.f32.mrf.mxu1  ;;  %v4519_v28 = vunpack.c.h.bf16 %v7241_v15 }
 0x5f3   :  { %5414 = vmatpush.msrb.mxu0 %v4535_v7  ;;  %5437 = vmatpush.msrb.mxu1 %v4599_v22  ;;  %v4731_v7 = vunpack.c.h.bf16 %v7236_v26  ;;  %v7238_v22 = vld [vmem:[#allocation13 + $0xd60] sm:$0xff]  ;;  %v5012_v53 = vadd.f32 %v5011_v45, %v4989_v11  ;;  %v7247_v26 = vld [vmem:[#allocation13 + $0xe70] sm:$0xff] }
 0x5f4   :  { %5457 = vmatpush.msrb.mxu2 %v4675_v21  ;;  %5480 = vmatpush.msrb.mxu3 %v4739_v34  ;;  %v4587_v20 = vunpack.c.h.bf16 %v7238_v22  ;;  %v4946_v21 = vadd.f32 %v10205_v4, %v4923_v33  ;;  %v7240_v34 = vld [vmem:[#allocation13 + $0xf90] sm:$0xff]  ;;  %v7244_v19 = vld [vmem:[#allocation13 + $0xf80] sm:$0xff]  ;;  %v4655_v41 = vunpack.c.h.bf16 %v7247_v26 }
 0x5f5   :  { %5381 = vmatmul.f32.gmra.mxu2 %v9836_v56  ;;  %5404 = vmatmul.f32.gmra.mxu3 %v9839_v1  ;;  %v4727_v52 = vunpack.c.h.bf16 %v7240_v34  ;;  %v4723_v4 = vunpack.c.h.bf16 %v7244_v19  ;;  %v7245_v33 = vld [vmem:[#allocation13 + $0xc40] sm:$0xff]  ;;  %v5014_v45 = vpop.f32.mrf.mxu2  ;;  %v5035_v11 = vadd.f32 %v5034_v17, %v5012_v53  ;;  %v7249_v22 = vld [vmem:[#allocation13 + $0xc30] sm:$0xff]  ;;  %v5037_v34 = vpop.f32.mrf.mxu3 }
 0x5f6   :  { %5415 = vmatpush.msrb.mxu0 %v4531_v44  ;;  %5438 = vmatpush.msrb.mxu1 %v4595_v55  ;;  %v7242_v44 = vld [vmem:[#allocation13 + $0xd50] sm:$0xff]  ;;  %v4511_v42 = vunpack.c.h.bf16 %v7249_v22  ;;  %v7251_v15 = vld [vmem:[#allocation13 + $0xe60] sm:$0xff] }
 0x5f7   :  { %5458 = vmatpush.msrb.mxu2 %v4671_v29  ;;  %5481 = vmatpush.msrb.mxu3 %v4735_v36  ;;  %v4583_v55 = vunpack.c.h.bf16 %v7242_v44  ;;  %v4515_v29 = vunpack.c.h.bf16 %v7245_v33  ;;  %v7246_v36 = vld [vmem:[#allocation13 + $0xd40] sm:$0xff]  ;;  %v4651_v44 = vunpack.c.h.bf16 %v7251_v15  ;;  %v7256_v33 = vld [vmem:[#allocation13 + $0xf50] sm:$0xff]  ;;  %v3281_v15 = vld [vmem:[#allocation13 + $0x1f8] sm:$0xff] }
 0x5f8   :  { %5416 = vmatpush.msrb.mxu0 %v4527_v57  ;;  %5439 = vmatpush.msrb.mxu1 %v4591_v16  ;;  %v4579_v63 = vunpack.c.h.bf16 %v7246_v36  ;;  %v5057_v57 = vpop.f32.mrf.mxu0  ;;  %v4969_v16 = vadd.f32 %v4968_v59, %v4946_v21  ;;  %v7252_v24 = vld [vmem:[#allocation13 + $0xf60] sm:$0xff]  ;;  %v4711_v36 = vunpack.c.h.bf16 %v7256_v33  ;;  %v7258_v26 = vld [vmem:[#allocation13 + $0xd10] sm:$0xff] }
 0x5f9   :  { %5459 = vmatpush.msrb.mxu2 %v4667_v8  ;;  %5482 = vmatpush.msrb.mxu3 %v4731_v7  ;;  %v7248_v8 = vld [vmem:[#allocation13 + $0xf70] sm:$0xff]  ;;  %v4715_v59 = vunpack.c.h.bf16 %v7252_v24  ;;  %v5058_v21 = vadd.f32 %v5057_v57, %v5035_v11  ;;  %v7253_v17 = vld [vmem:[#allocation13 + $0xc20] sm:$0xff] }
 0x5fa   :  { %5417 = vmatpush.msrb.mxu0 %v4523_v37  ;;  %5440 = vmatpush.msrb.mxu1 %v4587_v20  ;;  %v4719_v7 = vunpack.c.h.bf16 %v7248_v8  ;;  %v7250_v37 = vld [vmem:[#allocation13 + $0xd30] sm:$0xff]  ;;  %v4567_v8 = vunpack.c.h.bf16 %v7258_v26  ;;  %v5080_v57 = vpop.f32.mrf.mxu1  ;;  %v7260_v11 = vld [vmem:[#allocation13 + $0xf40] sm:$0xff] }
 0x5fb   :  { %5460 = vmatpush.msrb.mxu2 %v4663_v47  ;;  %5483 = vmatpush.msrb.mxu3 %v4727_v52  ;;  %v4575_v20 = vunpack.c.h.bf16 %v7250_v37  ;;  %v4507_v47 = vunpack.c.h.bf16 %v7253_v17  ;;  %v7254_v52 = vld [vmem:[#allocation13 + $0xd20] sm:$0xff]  ;;  %v4707_v22 = vunpack.c.h.bf16 %v7260_v11  ;;  %v7263_v17 = vld [vmem:[#allocation13 + $0xe30] sm:$0xff]  ;;  %v3245_v11 = vld [vmem:[#allocation13 + $0xd8] sm:$0xff] }
 0x5fc   :  { %5418 = vmatpush.msrb.mxu0 %v4519_v28  ;;  %5441 = vmatpush.msrb.mxu1 %v4583_v55  ;;  %v4571_v53 = vunpack.c.h.bf16 %v7254_v52  ;;  %v4992_v28 = vadd.f32 %v4991_v62, %v4969_v16  ;;  %v7255_v55 = vld [vmem:[#allocation13 + $0xe50] sm:$0xff]  ;;  %v5081_v16 = vadd.f32 %v5080_v57, %v5058_v21  ;;  %v7262_v37 = vld [vmem:[#allocation13 + $0xd00] sm:$0xff]  ;;  %v3279_v21 = vld [vmem:[#allocation13 + $0x1e8] sm:$0xff] }
 0x5fd   :  { %5461 = vmatpush.msrb.mxu2 %v4659_v39  ;;  %5484 = vmatpush.msrb.mxu3 %v4723_v4  ;;  %v4647_v19 = vunpack.c.h.bf16 %v7255_v55  ;;  %v7257_v39 = vld [vmem:[#allocation13 + $0xc10] sm:$0xff]  ;;  %v7266_v57 = vld [vmem:[#allocation13 + $0xf20] sm:$0xff] }
 0x5fe   :  { %5419 = vmatpush.msrb.mxu0 %v4515_v29  ;;  %5442 = vmatpush.msrb.mxu1 %v4579_v63  ;;  %v4503_v4 = vunpack.c.h.bf16 %v7257_v39  ;;  %v7259_v29 = vld [vmem:[#allocation13 + $0xe40] sm:$0xff]  ;;  %v5015_v62 = vadd.f32 %v5014_v45, %v4992_v28  ;;  %v3247_v45 = vld [vmem:[#allocation13 + $0xe8] sm:$0xff]  ;;  %v3856_v39 = vunpack.c.l.bf16 %v3281_v15 }
 0x5ff   :  { %5462 = vmatpush.msrb.mxu2 %v4655_v41  ;;  %5485 = vmatpush.msrb.mxu3 %v4719_v7  ;;  %v4643_v63 = vunpack.c.h.bf16 %v7259_v29  ;;  %v7261_v41 = vld [vmem:[#allocation13 + $0xc00] sm:$0xff]  ;;  %v4699_v29 = vunpack.c.h.bf16 %v7266_v57  ;;  %v3275_v15 = vld [vmem:[#allocation13 + $0x1c8] sm:$0xff]  ;;  %v3273_v57 = vld [vmem:[#allocation13 + $0x1b8] sm:$0xff] }
 0x600   :  { %5420 = vmatpush.msrb.mxu0 %v4511_v42  ;;  %5443 = vmatpush.msrb.mxu1 %v4575_v20  ;;  %v4499_v7 = vunpack.c.h.bf16 %v7261_v41  ;;  %v4563_v42 = vunpack.c.h.bf16 %v7262_v37  ;;  %v3249_v20 = vld [vmem:[#allocation13 + $0xf8] sm:$0xff]  ;;  %v5038_v28 = vadd.f32 %v5037_v34, %v5015_v62  ;;  %v7267_v34 = vld [vmem:[#allocation13 + $0xe10] sm:$0xff]  ;;  %v3784_v37 = vunpack.c.l.bf16 %v3245_v11 }
 0x601   :  { %5463 = vmatpush.msrb.mxu2 %v4651_v44  ;;  %5486 = vmatpush.msrb.mxu3 %v4715_v59  ;;  %v4639_v44 = vunpack.c.h.bf16 %v7263_v17  ;;  %v7264_v59 = vld [vmem:[#allocation13 + $0xf30] sm:$0xff]  ;;  %v3792_v33 = vunpack.c.l.bf16 %v3249_v20  ;;  %v3243_v20 = vld [vmem:[#allocation13 + $0xc8] sm:$0xff] }
 0x602   :  { %5421 = vmatpush.msrb.mxu0 %v4507_v47  ;;  %5444 = vmatpush.msrb.mxu1 %v4571_v53  ;;  %v5103_v24 = vpop.f32.mrf.mxu2  ;;  %v4703_v52 = vunpack.c.h.bf16 %v7264_v59  ;;  %v5060_v47 = vpop.f32.mrf.mxu0  ;;  %v7268_v62 = vld [vmem:[#allocation13 + $0xf10] sm:$0xff] }
 0x603   :  { %5464 = vmatpush.msrb.mxu2 %v4647_v19  ;;  %5487 = vmatpush.msrb.mxu3 %v4711_v36  ;;  %v5104_v55 = vadd.f32 %v5103_v24, %v5081_v16  ;;  %v5126_v53 = vpop.f32.mrf.mxu3  ;;  %v7265_v19 = vld [vmem:[#allocation13 + $0xe20] sm:$0xff]  ;;  %v3852_v16 = vunpack.c.l.bf16 %v3279_v21  ;;  %v5061_v41 = vadd.f32 %v5060_v47, %v5038_v28  ;;  %v3313_v24 = vld [vmem:[#allocation13 + $0x2f8] sm:$0xff]  ;;  %v5083_v21 = vpop.f32.mrf.mxu1 }
 0x604   :  { %5422 = vmatpush.msrb.mxu0 %v4503_v4  ;;  %5445 = vmatpush.msrb.mxu1 %v4567_v8  ;;  %v4635_v36 = vunpack.c.h.bf16 %v7265_v19  ;;  %v3277_v4 = vld [vmem:[#allocation13 + $0x1d8] sm:$0xff]  ;;  %v3788_v8 = vunpack.c.l.bf16 %v3247_v45  ;;  %v3920_v19 = vunpack.c.l.bf16 %v3313_v24 }
 0x605   :  { %5465 = vmatpush.msrb.mxu2 %v4643_v63  ;;  %5488 = vmatpush.msrb.mxu3 %v4707_v22  ;;  %v10220_v26 = vadd.f32 %v5126_v53, %v5104_v55  ;;  %v4631_v22 = vunpack.c.h.bf16 %v7267_v34  ;;  %v3345_v45 = vld [vmem:[#allocation13 + $0x3f8] sm:$0xff]  ;;  %v5084_v53 = vadd.f32 %v5083_v21, %v5061_v41  ;;  %v3239_v34 = vld [vmem:[#allocation13 + $0xa8] sm:$0xff] }
 0x606   :  { %5423 = vmatpush.msrb.mxu0 %v4499_v7  ;;  %5446 = vmatpush.msrb.mxu1 %v4563_v42  ;;  %v4695_v7 = vunpack.c.h.bf16 %v7268_v62  ;;  %v3848_v42 = vunpack.c.l.bf16 %v3277_v4  ;;  %v3241_v47 = vld [vmem:[#allocation13 + $0xb8] sm:$0xff]  ;;  %v3984_v11 = vunpack.c.l.bf16 %v3345_v45  ;;  %v3343_v4 = vld [vmem:[#allocation13 + $0x3e8] sm:$0xff] }
 0x607   :  { %5466 = vmatpush.msrb.mxu2 %v4639_v44  ;;  %5489 = vmatpush.msrb.mxu3 %v4703_v52  ;;  %v10223_v63 = vmul.f32 0.70710677, %v10220_v26  ;;  %v7269_v44 = vld [vmem:[#allocation13 + $0xe00] sm:$0xff]  ;;  %v3271_v62 = vld [vmem:[#allocation13 + $0x1a8] sm:$0xff]  ;;  %v3269_v45 = vld [vmem:[#allocation13 + $0x198] sm:$0xff] }
 0x608   :  { %5424 = vmatmul.f32.vlgmr.msrb.gmra.mxu0 %v9848_v58  ;;  %5447 = vmatmul.f32.vlgmr.msrb.gmra.mxu1 %v10060_v32  ;;  %v4627_v59 = vunpack.c.h.bf16 %v7269_v44  ;;  %v7270_v52 = vld [vmem:[#allocation13 + $0xf00] sm:$0xff]  ;;  %v3836_v21 = vunpack.c.l.bf16 %v3271_v62  ;;  %v3405_v32 = vld [vmem:[#allocation13 + $0x5d8] sm:$0xff] }
 0x609   :  { %5500 = vmatpush.msra.mxu0 %v3792_v33  ;;  %5523 = vmatpush.msra.mxu1 %v3856_v39  ;;  %v6252_v17 = vmul.f32 %v10223_v63, %v10223_v63  ;;  %v4691_v55 = vunpack.c.h.bf16 %v7270_v52  ;;  %v3780_v33 = vunpack.c.l.bf16 %v3243_v20  ;;  %v3844_v39 = vunpack.c.l.bf16 %v3275_v15  ;;  %v3237_v15 = vld [vmem:[#allocation13 + $0x98] sm:$0xff] }
 0x60a   :  { %5467 = vmatpush.msrb.mxu2 %v4635_v36  ;;  %5490 = vmatpush.msrb.mxu3 %v4699_v29  ;;  %v3311_v36 = vld [vmem:[#allocation13 + $0x2e8] sm:$0xff] }
 0x60b   :  { %5501 = vmatpush.msra.mxu0 %v3788_v8  ;;  %5524 = vmatpush.msra.mxu1 %v3852_v16  ;;  %v10229_v28 = vmin.f32 %v6252_v17, 16.0  ;;  %v3916_v52 = vunpack.c.l.bf16 %v3311_v36  ;;  %v3768_v36 = vunpack.c.l.bf16 %v3237_v15 }
 0x60c   :  { %5468 = vmatpush.msrb.mxu2 %v4631_v22  ;;  %5491 = vmatpush.msrb.mxu3 %v4695_v7  ;;  %v5106_v29 = vpop.f32.mrf.mxu2  ;;  %v3776_v22 = vunpack.c.l.bf16 %v3241_v47  ;;  %v3309_v7 = vld [vmem:[#allocation13 + $0x2d8] sm:$0xff]  ;;  %v5129_v20 = vpop.f32.mrf.mxu3  ;;  %v3307_v47 = vld [vmem:[#allocation13 + $0x2c8] sm:$0xff] }
 0x60d   :  { %5502 = vmatpush.msra.mxu0 %v3784_v37  ;;  %5525 = vmatpush.msra.mxu1 %v3848_v42  ;;  %v6254_v8 = vmul.f32 2.1237322e-06, %v10229_v28  ;;  %v6265_v16 = vmul.f32 3.8918573e-05, %v10229_v28  ;;  %v5107_v41 = vadd.f32 %v5106_v29, %v5084_v53  ;;  %v3840_v37 = vunpack.c.l.bf16 %v3273_v57  ;;  %v3341_v42 = vld [vmem:[#allocation13 + $0x3d8] sm:$0xff]  ;;  %v3339_v53 = vld [vmem:[#allocation13 + $0x3c8] sm:$0xff] }
 0x60e   :  { %5469 = vmatpush.msrb.mxu2 %v4627_v59  ;;  %5492 = vmatpush.msrb.mxu3 %v4691_v55  ;;  %v3980_v59 = vunpack.c.l.bf16 %v3343_v4  ;;  %v3772_v55 = vunpack.c.l.bf16 %v3239_v34  ;;  %v3235_v4 = vld [vmem:[#allocation13 + $0x88] sm:$0xff] }
 0x60f   :  { %5470 = vmatmul.f32.vlgmr.msrb.gmra.mxu2 %v10118_v2  ;;  %5493 = vmatmul.f32.vlgmr.msrb.gmra.mxu3 %v10121_v60  ;;  %v6255_v24 = vadd.f32 0.00028619796, %v6254_v8  ;;  %v6266_v17 = vadd.f32 0.001143296, %v6265_v16  ;;  %v10235_v44 = vadd.f32 %v5129_v20, %v5107_v41  ;;  %v3267_v16 = vld [vmem:[#allocation13 + $0x188] sm:$0xff]  ;;  %v3305_v41 = vld [vmem:[#allocation13 + $0x2b8] sm:$0xff]  ;;  %v3908_v20 = vunpack.c.l.bf16 %v3307_v47 }
 0x610   :  { %5503 = vmatpush.msra.mxu0 %v3780_v33  ;;  %5526 = vmatpush.msra.mxu1 %v3844_v39  ;;  %v3912_v33 = vunpack.c.l.bf16 %v3309_v7  ;;  %v3976_v39 = vunpack.c.l.bf16 %v3341_v42  ;;  %v3233_v42 = vld [vmem:[#allocation13 + $0x78] sm:$0xff]  ;;  %v3764_v15 = vunpack.c.l.bf16 %v3235_v4  ;;  %v3263_v47 = vld [vmem:[#allocation13 + $0x168] sm:$0xff] }
 0x611   :  { %5546 = vmatpush.msra.mxu2 %v3920_v19  ;;  %5569 = vmatpush.msra.mxu3 %v3984_v11  ;;  %v6256_v29 = vmul.f32 %v6255_v24, %v10229_v28  ;;  %v6267_v57 = vmul.f32 %v6266_v17, %v10229_v28  ;;  %v10240_v8 = vmul.f32 0.70710677, %v10235_v44  ;;  %v3832_v19 = vunpack.c.l.bf16 %v3269_v45  ;;  %v3337_v17 = vld [vmem:[#allocation13 + $0x3b8] sm:$0xff]  ;;  %v3227_v60 = vld [vmem:[#allocation13 + $0x48] sm:$0xff] }
 0x612   :  { %5427 = vmatmul.f32.gmra.mxu0 %v10127_v61  ;;  %5450 = vmatmul.f32.gmra.mxu1 %v10129_v51  ;;  %v3972_v24 = vunpack.c.l.bf16 %v3339_v53  ;;  %v3828_v45 = vunpack.c.l.bf16 %v3267_v16  ;;  %v3335_v51 = vld [vmem:[#allocation13 + $0x3a8] sm:$0xff]  ;;  %v3301_v53 = vld [vmem:[#allocation13 + $0x298] sm:$0xff] }
 0x613   :  { %5504 = vmatpush.msra.mxu0 %v3776_v22  ;;  %5527 = vmatpush.msra.mxu1 %v3840_v37  ;;  %v6257_v11 = vadd.f32 0.0036580483, %v6256_v29  ;;  %v6268_v34 = vadd.f32 0.014752088, %v6267_v57  ;;  %v6412_v62 = vmul.f32 %v10240_v8, %v10240_v8  ;;  %v3265_v22 = vld [vmem:[#allocation13 + $0x178] sm:$0xff]  ;;  %v3904_v29 = vunpack.c.l.bf16 %v3305_v41  ;;  %v3303_v57 = vld [vmem:[#allocation13 + $0x2a8] sm:$0xff] }
 0x614   :  { %5547 = vmatpush.msra.mxu2 %v3916_v52  ;;  %5570 = vmatpush.msra.mxu3 %v3980_v59  ;;  %v3231_v52 = vld [vmem:[#allocation13 + $0x68] sm:$0xff]  ;;  %v3333_v4 = vld [vmem:[#allocation13 + $0x398] sm:$0xff] }
 0x615   :  { %5505 = vmatpush.msra.mxu0 %v3772_v55  ;;  %5528 = vmatpush.msra.mxu1 %v3836_v21  ;;  %v6269_v7 = vmul.f32 %v6268_v34, %v10229_v28  ;;  %v10247_v37 = vmin.f32 %v6412_v62, 16.0  ;;  %v6258_v59 = vmul.f32 %v6257_v11, %v10229_v28  ;;  %v3968_v21 = vunpack.c.l.bf16 %v3337_v17  ;;  %v3229_v11 = vld [vmem:[#allocation13 + $0x58] sm:$0xff] }
 0x616   :  { %5548 = vmatpush.msra.mxu2 %v3912_v33  ;;  %5571 = vmatpush.msra.mxu3 %v3976_v39  ;;  %v3760_v33 = vunpack.c.l.bf16 %v3233_v42  ;;  %v3824_v39 = vunpack.c.l.bf16 %v3265_v22  ;;  %v3261_v62 = vld [vmem:[#allocation13 + $0x158] sm:$0xff]  ;;  %v3299_v42 = vld [vmem:[#allocation13 + $0x288] sm:$0xff] }
 0x617   :  { %5506 = vmatpush.msra.mxu0 %v3768_v36  ;;  %5529 = vmatpush.msra.mxu1 %v3832_v19  ;;  %v6270_v55 = vadd.f32 0.112945676, %v6269_v7  ;;  %v6414_v34 = vmul.f32 2.1237322e-06, %v10247_v37  ;;  %v6425_v16 = vmul.f32 3.8918573e-05, %v10247_v37  ;;  %v3900_v36 = vunpack.c.l.bf16 %v3303_v57 }
 0x618   :  { %5549 = vmatpush.msra.mxu2 %v3908_v20  ;;  %5572 = vmatpush.msra.mxu3 %v3972_v24  ;;  %v3964_v19 = vunpack.c.l.bf16 %v3335_v51  ;;  %v3756_v20 = vunpack.c.l.bf16 %v3231_v52  ;;  %v3820_v24 = vunpack.c.l.bf16 %v3263_v47  ;;  %v3896_v7 = vunpack.c.l.bf16 %v3301_v53  ;;  %v3331_v22 = vld [vmem:[#allocation13 + $0x388] sm:$0xff]  ;;  %v3329_v47 = vld [vmem:[#allocation13 + $0x378] sm:$0xff] }
 0x619   :  { %v6271_v41 = vmul.f32 %v6270_v55, %v10229_v28  ;;  %5473 = vmatmul.f32.gmra.mxu2 %v10135_v49  ;;  %5496 = vmatmul.f32.gmra.mxu3 %v10137_v12  ;;  %v6415_v17 = vadd.f32 0.00028619796, %v6414_v34  ;;  %v6426_v61 = vadd.f32 0.001143296, %v6425_v16  ;;  %v6259_v2 = vadd.f32 0.05243302, %v6258_v59 }
 0x61a   :  { %5507 = vmatpush.msra.mxu0 %v3764_v15  ;;  %5530 = vmatpush.msra.mxu1 %v3828_v45  ;;  %v3960_v49 = vunpack.c.l.bf16 %v3333_v4  ;;  %v3259_v51 = vld [vmem:[#allocation13 + $0x148] sm:$0xff]  ;;  %v3297_v12 = vld [vmem:[#allocation13 + $0x278] sm:$0xff]  ;;  %v3752_v15 = vunpack.c.l.bf16 %v3229_v11  ;;  %v3816_v45 = vunpack.c.l.bf16 %v3261_v62  ;;  %v3892_v59 = vunpack.c.l.bf16 %v3299_v42 }
 0x61b   :  { %v6272_v55 = vadd.f32 0.4994258, %v6271_v41  ;;  %5550 = vmatpush.msra.mxu2 %v3904_v29  ;;  %5573 = vmatpush.msra.mxu3 %v3968_v21  ;;  %v6416_v57 = vmul.f32 %v6415_v17, %v10247_v37  ;;  %v6427_v52 = vmul.f32 %v6426_v61, %v10247_v37  ;;  %v3956_v34 = vunpack.c.l.bf16 %v3331_v22  ;;  %v3225_v29 = vld [vmem:[#allocation13 + $0x38] sm:$0xff]  ;;  %v3327_v11 = vld [vmem:[#allocation13 + $0x368] sm:$0xff] }
 0x61c   :  { %5508 = vmatpush.msra.mxu0 %v3760_v33  ;;  %5531 = vmatpush.msra.mxu1 %v3824_v39  ;;  %v3257_v21 = vld [vmem:[#allocation13 + $0x138] sm:$0xff]  ;;  %v3748_v16 = vunpack.c.l.bf16 %v3227_v60  ;;  %v3812_v41 = vunpack.c.l.bf16 %v3259_v51  ;;  %v3888_v33 = vunpack.c.l.bf16 %v3297_v12  ;;  %v3295_v39 = vld [vmem:[#allocation13 + $0x268] sm:$0xff]  ;;  %v6260_v62 = vmul.f32 %v6259_v2, %v10229_v28 }
 0x61d   :  { %v6273_v53 = vmul.f32 %v6272_v55, %v10229_v28  ;;  %5551 = vmatpush.msra.mxu2 %v3900_v36  ;;  %5574 = vmatpush.msra.mxu3 %v3964_v19  ;;  %v6428_v4 = vadd.f32 0.014752088, %v6427_v52  ;;  %v6417_v36 = vadd.f32 0.0036580483, %v6416_v57  ;;  %v3952_v19 = vunpack.c.l.bf16 %v3329_v47  ;;  %v3223_v17 = vld [vmem:[#allocation13 + $0x28] sm:$0xff]  ;;  %v3293_v22 = vld [vmem:[#allocation13 + $0x258] sm:$0xff] }
 0x61e   :  { %5509 = vmatpush.msra.mxu0 %v3756_v20  ;;  %5532 = vmatpush.msra.mxu1 %v3820_v24  ;;  %v3255_v42 = vld [vmem:[#allocation13 + $0x128] sm:$0xff]  ;;  %v3744_v24 = vunpack.c.l.bf16 %v3225_v29  ;;  %v3808_v60 = vunpack.c.l.bf16 %v3257_v21  ;;  %v3325_v12 = vld [vmem:[#allocation13 + $0x358] sm:$0xff]  ;;  %v3884_v2 = vunpack.c.l.bf16 %v3295_v39  ;;  %v3948_v55 = vunpack.c.l.bf16 %v3327_v11 }
 0x61f   :  { %v10259_v61 = vadd.f32 1.0, %v6273_v53  ;;  %5552 = vmatpush.msra.mxu2 %v3896_v7  ;;  %5575 = vmatpush.msra.mxu3 %v3960_v49  ;;  %v6429_v20 = vmul.f32 %v6428_v4, %v10247_v37  ;;  %v3221_v7 = vld [vmem:[#allocation13 + $0x18] sm:$0xff]  ;;  %v3740_v51 = vunpack.c.l.bf16 %v3223_v17  ;;  %v3323_v52 = vld [vmem:[#allocation13 + $0x348] sm:$0xff]  ;;  %v6261_v47 = vadd.f32 0.18741608, %v6260_v62 }
 0x620   :  { %5510 = vmatpush.msra.mxu0 %v3752_v15  ;;  %5533 = vmatpush.msra.mxu1 %v3816_v45  ;;  %v3253_v49 = vld [vmem:[#allocation13 + $0x118] sm:$0xff]  ;;  %v3804_v15 = vunpack.c.l.bf16 %v3255_v42  ;;  %v3291_v45 = vld [vmem:[#allocation13 + $0x248] sm:$0xff]  ;;  %v6418_v53 = vmul.f32 %v6417_v36, %v10247_v37  ;;  %v3880_v29 = vunpack.c.l.bf16 %v3293_v22  ;;  %v3944_v21 = vunpack.c.l.bf16 %v3325_v12 }
 0x621   :  { %6998 = vrcp.f32 %v10259_v61  ;;  %5553 = vmatpush.msra.mxu2 %v3892_v59  ;;  %5576 = vmatpush.msra.mxu3 %v3956_v34  ;;  %v6430_v57 = vadd.f32 0.112945676, %v6429_v20  ;;  %v3219_v59 = vld [vmem:[#allocation13 + $0x8] sm:$0xff]  ;;  %v3736_v39 = vunpack.c.l.bf16 %v3221_v7  ;;  %v3321_v11 = vld [vmem:[#allocation13 + $0x338] sm:$0xff]  ;;  %v3876_v17 = vunpack.c.l.bf16 %v3291_v45 }
 0x622   :  { %5511 = vmatpush.msra.mxu0 %v3748_v16  ;;  %5534 = vmatpush.msra.mxu1 %v3812_v41  ;;  %v3251_v34 = vld [vmem:[#allocation13 + $0x108] sm:$0xff]  ;;  %v3800_v16 = vunpack.c.l.bf16 %v3253_v49  ;;  %v3289_v41 = vld [vmem:[#allocation13 + $0x238] sm:$0xff]  ;;  %v3940_v62 = vunpack.c.l.bf16 %v3323_v52  ;;  %v6419_v7 = vadd.f32 0.05243302, %v6418_v53  ;;  %vm6280_vm1 = vweird.f32 %v10259_v61 }
 0x623   :  { %5554 = vmatpush.msra.mxu2 %v3888_v33  ;;  %5577 = vmatpush.msra.mxu3 %v3952_v19  ;;  %v6431_v4 = vmul.f32 %v6430_v57, %v10247_v37  ;;  %v3377_v42 = vld [vmem:[#allocation13 + $0x4f8] sm:$0xff]  ;;  %v3732_v19 = vunpack.c.l.bf16 %v3219_v59  ;;  %v3796_v20 = vunpack.c.l.bf16 %v3251_v34  ;;  %v3287_v22 = vld [vmem:[#allocation13 + $0x228] sm:$0xff] }
 0x624   :  { %5512 = vmatpush.msra.mxu0 %v3744_v24  ;;  %5535 = vmatpush.msra.mxu1 %v3808_v60  ;;  %v3409_v36 = vld [vmem:[#allocation13 + $0x5f8] sm:$0xff]  ;;  %v3319_v12 = vld [vmem:[#allocation13 + $0x328] sm:$0xff]  ;;  %v6262_v60 = vmul.f32 %v6261_v47, %v10229_v28  ;;  %v4048_v52 = vunpack.c.l.bf16 %v3377_v42  ;;  %v3868_v28 = vunpack.c.l.bf16 %v3287_v22 }
 0x625   :  { %5555 = vmatpush.msra.mxu2 %v3884_v2  ;;  %5578 = vmatpush.msra.mxu3 %v3948_v55  ;;  %v6432_v33 = vadd.f32 0.4994258, %v6431_v4  ;;  %v3375_v57 = vld [vmem:[#allocation13 + $0x4e8] sm:$0xff]  ;;  %v3872_v2 = vunpack.c.l.bf16 %v3289_v41  ;;  %v3936_v55 = vunpack.c.l.bf16 %v3321_v11  ;;  %v3285_v45 = vld [vmem:[#allocation13 + $0x218] sm:$0xff]  ;;  %v4112_v34 = vunpack.c.l.bf16 %v3409_v36 }
 0x626   :  { %5513 = vmatpush.msra.mxu0 %v3740_v51  ;;  %5536 = vmatpush.msra.mxu1 %v3804_v15  ;;  %v3407_v49 = vld [vmem:[#allocation13 + $0x5e8] sm:$0xff]  ;;  %v3317_v59 = vld [vmem:[#allocation13 + $0x318] sm:$0xff]  ;;  %v3932_v47 = vunpack.c.l.bf16 %v3319_v12  ;;  %v4044_v53 = vunpack.c.l.bf16 %v3375_v57  ;;  %v3864_v41 = vunpack.c.l.bf16 %v3285_v45  ;;  %v4104_v12 = vunpack.c.l.bf16 %v3405_v32 }
 0x627   :  { %v10265_v24 = vpop.eup %6998  ;;  %5556 = vmatpush.msra.mxu2 %v3880_v29  ;;  %5579 = vmatpush.msra.mxu3 %v3944_v21  ;;  %v6433_v15 = vmul.f32 %v6432_v33, %v10247_v37  ;;  %v4108_v4 = vunpack.c.l.bf16 %v3407_v49  ;;  %v3373_v11 = vld [vmem:[#allocation13 + $0x4d8] sm:$0xff]  ;;  %v6263_v33 = vadd.f32 1.1283791, %v6262_v60  ;;  %v3315_v42 = vld [vmem:[#allocation13 + $0x308] sm:$0xff] }
 0x628   :  { %v6276_v51 = vmul.f32 %v10265_v24, %v10259_v61  ;;  %5514 = vmatpush.msra.mxu0 %v3736_v39  ;;  %5537 = vmatpush.msra.mxu1 %v3800_v16  ;;  %v6286_v39 = vand.u32 2147483648, %v10259_v61  ;;  %v6420_v16 = vmul.f32 %v6419_v7, %v10247_v37  ;;  %vm6281_vm0 = vweird.f32 %v10265_v24  ;;  %v3403_v57 = vld [vmem:[#allocation13 + $0x5c8] sm:$0xff]  ;;  %v3473_v49 = vld [vmem:[#allocation13 + $0x7f8] sm:$0xff] }
 0x629   :  { %5557 = vmatpush.msra.mxu2 %v3876_v17  ;;  %5580 = vmatpush.msra.mxu3 %v3940_v62  ;;  %v10271_v21 = vadd.f32 1.0, %v6433_v15  ;;  %v3928_v17 = vunpack.c.l.bf16 %v3317_v59  ;;  %v3283_v62 = vld [vmem:[#allocation13 + $0x208] sm:$0xff]  ;;  %v4040_v22 = vunpack.c.l.bf16 %v3373_v11  ;;  %vm6282_vm6 = vmor %vm6280_vm1, %vm6281_vm0  ;;  %v6264_v32 = vmul.f32 %v6263_v33, %v10223_v63  ;;  %v3369_v59 = vld [vmem:[#allocation13 + $0x4b8] sm:$0xff] }
 0x62a   :  { %v6277_v29 = vsub.f32 1.0, %v6276_v51  ;;  %5515 = vmatpush.msra.mxu0 %v3732_v19  ;;  %5538 = vmatpush.msra.mxu1 %v3796_v20  ;;  %v6284_v19 = vand.u32 2147483647, %v10259_v61  ;;  %v3371_v20 = vld [vmem:[#allocation13 + $0x4c8] sm:$0xff]  ;;  %v3860_v7 = vunpack.c.l.bf16 %v3283_v62  ;;  %v6287_v45 = vor.u32 1.1754944e-38, %v6286_v39 }
 0x62b   :  { %5558 = vmatpush.msra.mxu2 %v3872_v2  ;;  %5581 = vmatpush.msra.mxu3 %v3936_v55  ;;  %7000 = vrcp.f32 %v10271_v21  ;;  %v3924_v2 = vunpack.c.l.bf16 %v3315_v42  ;;  %v3441_v55 = vld [vmem:[#allocation13 + $0x6f8] sm:$0xff]  ;;  %v6421_v51 = vadd.f32 0.18741608, %v6420_v16  ;;  %v4036_v15 = vunpack.c.l.bf16 %v3371_v20  ;;  %v3439_v11 = vld [vmem:[#allocation13 + $0x6e8] sm:$0xff] }
 0x62c   :  { %v6278_v36 = vmul.f32 %v10265_v24, %v6277_v29  ;;  %5516 = vmatmul.f32.vlgmr.msra.gmra.mxu0 %v10827_v40  ;;  %5539 = vmatmul.f32.vlgmr.msra.gmra.mxu1 %v10828_v13  ;;  %vm6285_vm7 = vcmp.eq.f32.partialorder %v6284_v19, 8.507059e+37  ;;  %v4100_v61 = vunpack.c.l.bf16 %v3403_v57  ;;  %v4240_v29 = vunpack.c.l.bf16 %v3473_v49  ;;  %v3471_v39 = vld [vmem:[#allocation13 + $0x7e8] sm:$0xff]  ;;  %v3469_v16 = vld [vmem:[#allocation13 + $0x7d8] sm:$0xff] }
 0x62d   :  { %5592 = vmatpush.msrb.mxu0 %v4048_v52  ;;  %5615 = vmatpush.msrb.mxu1 %v4112_v34  ;;  %v3401_v34 = vld [vmem:[#allocation13 + $0x5b8] sm:$0xff]  ;;  %v6236_v63 = vmul.f32 0.5, %v10220_v26  ;;  %v4032_v42 = vunpack.c.l.bf16 %v3369_v59  ;;  %v3467_v49 = vld [vmem:[#allocation13 + $0x7c8] sm:$0xff]  ;;  %vm6440_vm9 = vweird.f32 %v10271_v21 }
 0x62e   :  { %v6279_v60 = vadd.f32 %v10265_v24, %v6278_v36  ;;  %5559 = vmatpush.msra.mxu2 %v3868_v28  ;;  %5582 = vmatpush.msra.mxu3 %v3932_v47  ;;  %v4176_v47 = vunpack.c.l.bf16 %v3441_v55  ;;  %v4096_v36 = vunpack.c.l.bf16 %v3401_v34  ;;  %v3365_v19 = vld [vmem:[#allocation13 + $0x498] sm:$0xff]  ;;  %v3435_v55 = vld [vmem:[#allocation13 + $0x6c8] sm:$0xff]  ;;  %v6444_v34 = vand.u32 2147483647, %v10271_v21 }
 0x62f   :  { %5593 = vmatpush.msrb.mxu0 %v4044_v53  ;;  %5616 = vmatpush.msrb.mxu1 %v4108_v4  ;;  %v3367_v53 = vld [vmem:[#allocation13 + $0x4a8] sm:$0xff]  ;;  %v3397_v20 = vld [vmem:[#allocation13 + $0x598] sm:$0xff] }
 0x630   :  { %v6283_v52 = vsel %vm6282_vm6, %v10265_v24, %v6279_v60  ;;  %5560 = vmatpush.msra.mxu2 %v3864_v41  ;;  %5583 = vmatpush.msra.mxu3 %v3928_v17  ;;  %v3399_v24 = vld [vmem:[#allocation13 + $0x5a8] sm:$0xff]  ;;  %v3437_v41 = vld [vmem:[#allocation13 + $0x6d8] sm:$0xff]  ;;  %v6422_v17 = vmul.f32 %v6421_v51, %v10247_v37  ;;  %v4028_v57 = vunpack.c.l.bf16 %v3367_v53  ;;  %v6446_v51 = vand.u32 2147483648, %v10271_v21 }
 0x631   :  { %v6288_v28 = vsel %vm6285_vm7, %v6287_v45, %v6283_v52  ;;  %5594 = vmatpush.msrb.mxu0 %v4040_v22  ;;  %5617 = vmatpush.msrb.mxu1 %v4104_v12  ;;  %v10287_v4 = vpop.eup %7000  ;;  %v4172_v22 = vunpack.c.l.bf16 %v3439_v11  ;;  %v4236_v12 = vunpack.c.l.bf16 %v3471_v39  ;;  %v4092_v37 = vunpack.c.l.bf16 %v3399_v24  ;;  %v3363_v52 = vld [vmem:[#allocation13 + $0x488] sm:$0xff]  ;;  %v3465_v53 = vld [vmem:[#allocation13 + $0x7b8] sm:$0xff] }
 0x632   :  { %v6289_v33 = vmul.f32 %v6288_v28, %v6264_v32  ;;  %5561 = vmatpush.msra.mxu2 %v3860_v7  ;;  %5584 = vmatpush.msra.mxu3 %v3924_v2  ;;  %v6436_v62 = vmul.f32 %v10287_v4, %v10271_v21  ;;  %v4168_v7 = vunpack.c.l.bf16 %v3437_v41  ;;  %v4232_v2 = vunpack.c.l.bf16 %v3469_v16  ;;  %v3395_v28 = vld [vmem:[#allocation13 + $0x588] sm:$0xff]  ;;  %v3361_v24 = vld [vmem:[#allocation13 + $0x478] sm:$0xff] }
 0x633   :  { %5562 = vmatmul.f32.vlgmr.msra.gmra.mxu2 %v10829_v31  ;;  %5585 = vmatmul.f32.vlgmr.msra.gmra.mxu3 %v10830_v9  ;;  %v4088_v32 = vunpack.c.l.bf16 %v3397_v20  ;;  %vm6441_vm8 = vweird.f32 %v10287_v4  ;;  %v4164_v11 = vunpack.c.l.bf16 %v3435_v55  ;;  %v4228_v39 = vunpack.c.l.bf16 %v3467_v49  ;;  %v3393_v41 = vld [vmem:[#allocation13 + $0x578] sm:$0xff] }
 0x634   :  { %v6715_v26 = vclamps-f32 %v6289_v33, 1.0  ;;  %5595 = vmatpush.msrb.mxu0 %v4036_v15  ;;  %5618 = vmatpush.msrb.mxu1 %v4100_v61  ;;  %v6437_v60 = vsub.f32 1.0, %v6436_v62  ;;  %v4024_v15 = vunpack.c.l.bf16 %v3365_v19  ;;  %v6423_v61 = vadd.f32 1.1283791, %v6422_v17  ;;  %vm10305_vm10 = vmor %vm6440_vm9, %vm6441_vm8  ;;  %v3463_v19 = vld [vmem:[#allocation13 + $0x7a8] sm:$0xff]  ;;  %v3357_v49 = vld [vmem:[#allocation13 + $0x458] sm:$0xff] }
 0x635   :  { %5638 = vmatpush.msrb.mxu2 %v4176_v47  ;;  %5661 = vmatpush.msrb.mxu3 %v4240_v29  ;;  %v3433_v47 = vld [vmem:[#allocation13 + $0x6b8] sm:$0xff]  ;;  %v4020_v17 = vunpack.c.l.bf16 %v3363_v52  ;;  %v4084_v62 = vunpack.c.l.bf16 %v3395_v28  ;;  %vm6445_vm11 = vcmp.eq.f32.partialorder %v6444_v34, 8.507059e+37  ;;  %v3459_v52 = vld [vmem:[#allocation13 + $0x788] sm:$0xff] }
 0x636   :  { %v6572_v45 = vadd.f32 1.0, %v6715_v26  ;;  %5519 = vmatmul.f32.gmra.mxu0 %v10831_v50  ;;  %5542 = vmatmul.f32.gmra.mxu1 %v10832_v14  ;;  %v6438_v59 = vmul.f32 %v10287_v4, %v6437_v60  ;;  %v6424_v21 = vmul.f32 %v6423_v61, %v10240_v8  ;;  %v4224_v26 = vunpack.c.l.bf16 %v3465_v53  ;;  %v3355_v28 = vld [vmem:[#allocation13 + $0x448] sm:$0xff]  ;;  %v3457_v53 = vld [vmem:[#allocation13 + $0x778] sm:$0xff] }
 0x637   :  { %5596 = vmatpush.msrb.mxu0 %v4032_v42  ;;  %5619 = vmatpush.msrb.mxu1 %v4096_v36  ;;  %v4160_v42 = vunpack.c.l.bf16 %v3433_v47  ;;  %v3431_v36 = vld [vmem:[#allocation13 + $0x6a8] sm:$0xff]  ;;  %v4016_v60 = vunpack.c.l.bf16 %v3361_v24  ;;  %v4212_v16 = vunpack.c.l.bf16 %v3459_v52 }
 0x638   :  { %v6580_v29 = vmul.f32 %v6572_v45, %v6236_v63  ;;  %5639 = vmatpush.msrb.mxu2 %v4172_v22  ;;  %5662 = vmatpush.msrb.mxu3 %v4236_v12  ;;  %v6439_v33 = vadd.f32 %v10287_v4, %v6438_v59  ;;  %v6447_v63 = vor.u32 1.1754944e-38, %v6446_v51  ;;  %v3359_v22 = vld [vmem:[#allocation13 + $0x468] sm:$0xff]  ;;  %v4156_v8 = vunpack.c.l.bf16 %v3431_v36  ;;  %v3389_v45 = vld [vmem:[#allocation13 + $0x558] sm:$0xff] }
 0x639   :  { %5597 = vmatpush.msrb.mxu0 %v4028_v57  ;;  %5620 = vmatpush.msrb.mxu1 %v4092_v37  ;;  %v3391_v12 = vld [vmem:[#allocation13 + $0x568] sm:$0xff]  ;;  %v4080_v37 = vunpack.c.l.bf16 %v3393_v41  ;;  %v4012_v51 = vunpack.c.l.bf16 %v3359_v22 }
 0x63a   :  { %6588 = vst [vmem:[#allocation16] sm:$0xff] %v6580_v29  ;;  %5640 = vmatpush.msrb.mxu2 %v4168_v7  ;;  %5663 = vmatpush.msrb.mxu3 %v4232_v2  ;;  %v6443_v20 = vsel %vm10305_vm10, %v10287_v4, %v6439_v33  ;;  %v3429_v7 = vld [vmem:[#allocation13 + $0x698] sm:$0xff]  ;;  %v4220_v4 = vunpack.c.l.bf16 %v3463_v19  ;;  %v3387_v47 = vld [vmem:[#allocation13 + $0x548] sm:$0xff]  ;;  %v4008_v29 = vunpack.c.l.bf16 %v3357_v49  ;;  %v6240_v33 = vmul.f32 0.5, %v10235_v44 }
 0x63b   :  { %5598 = vmatpush.msrb.mxu0 %v4024_v15  ;;  %5621 = vmatpush.msrb.mxu1 %v4088_v32  ;;  %v6448_v57 = vsel %vm6445_vm11, %v6447_v63, %v6443_v20  ;;  %v3461_v2 = vld [vmem:[#allocation13 + $0x798] sm:$0xff]  ;;  %v4076_v15 = vunpack.c.l.bf16 %v3391_v12  ;;  %v3427_v32 = vld [vmem:[#allocation13 + $0x688] sm:$0xff]  ;;  %v4152_v59 = vunpack.c.l.bf16 %v3429_v7 }
 0x63c   :  { %5641 = vmatpush.msrb.mxu2 %v4164_v11  ;;  %5664 = vmatpush.msrb.mxu3 %v4228_v39  ;;  %v6449_v55 = vmul.f32 %v6448_v57, %v6424_v21  ;;  %v4216_v34 = vunpack.c.l.bf16 %v3461_v2  ;;  %v4072_v11 = vunpack.c.l.bf16 %v3389_v45  ;;  %v3425_v39 = vld [vmem:[#allocation13 + $0x678] sm:$0xff]  ;;  %v4148_v41 = vunpack.c.l.bf16 %v3427_v32  ;;  %v3423_v36 = vld [vmem:[#allocation13 + $0x668] sm:$0xff] }
 0x63d   :  { %5565 = vmatmul.f32.gmra.mxu2 %v10833_v3  ;;  %5588 = vmatmul.f32.gmra.mxu3 %v10834_v0  ;;  %v3353_v63 = vld [vmem:[#allocation13 + $0x438] sm:$0xff]  ;;  %v3455_v19 = vld [vmem:[#allocation13 + $0x768] sm:$0xff]  ;;  %v4144_v20 = vunpack.c.l.bf16 %v3425_v39  ;;  %v4140_v7 = vunpack.c.l.bf16 %v3423_v36 }
 0x63e   :  { %5599 = vmatpush.msrb.mxu0 %v4020_v17  ;;  %5622 = vmatpush.msrb.mxu1 %v4084_v62  ;;  %v6719_v61 = vclamps-f32 %v6449_v55, 1.0  ;;  %v3385_v17 = vld [vmem:[#allocation13 + $0x538] sm:$0xff]  ;;  %v4004_v62 = vunpack.c.l.bf16 %v3355_v28  ;;  %v3351_v22 = vld [vmem:[#allocation13 + $0x428] sm:$0xff]  ;;  %v4000_v12 = vunpack.c.l.bf16 %v3353_v63  ;;  %v4204_v2 = vunpack.c.l.bf16 %v3455_v19 }
 0x63f   :  { %5642 = vmatpush.msrb.mxu2 %v4160_v42  ;;  %5665 = vmatpush.msrb.mxu3 %v4224_v26  ;;  %v4068_v42 = vunpack.c.l.bf16 %v3387_v47  ;;  %v4208_v26 = vunpack.c.l.bf16 %v3457_v53  ;;  %v3383_v44 = vld [vmem:[#allocation13 + $0x528] sm:$0xff]  ;;  %v4064_v57 = vunpack.c.l.bf16 %v3385_v17  ;;  %v3349_v55 = vld [vmem:[#allocation13 + $0x418] sm:$0xff] }
 0x640   :  { %5600 = vmatpush.msrb.mxu0 %v4016_v60  ;;  %5623 = vmatpush.msrb.mxu1 %v4080_v37  ;;  %v6576_v24 = vadd.f32 1.0, %v6719_v61  ;;  %v3421_v60 = vld [vmem:[#allocation13 + $0x658] sm:$0xff]  ;;  %v4060_v49 = vunpack.c.l.bf16 %v3383_v44  ;;  %v3419_v45 = vld [vmem:[#allocation13 + $0x648] sm:$0xff] }
 0x641   :  { %5643 = vmatpush.msrb.mxu2 %v4156_v8  ;;  %5666 = vmatpush.msrb.mxu3 %v4220_v4  ;;  %v3453_v37 = vld [vmem:[#allocation13 + $0x758] sm:$0xff]  ;;  %v3996_v4 = vunpack.c.l.bf16 %v3351_v22  ;;  %v3347_v52 = vld [vmem:[#allocation13 + $0x408] sm:$0xff] }
 0x642   :  { %5601 = vmatpush.msrb.mxu0 %v4012_v51  ;;  %5624 = vmatpush.msrb.mxu1 %v4076_v15  ;;  %v6584_v21 = vmul.f32 %v6576_v24, %v6240_v33  ;;  %v3381_v8 = vld [vmem:[#allocation13 + $0x518] sm:$0xff]  ;;  %v3451_v51 = vld [vmem:[#allocation13 + $0x748] sm:$0xff]  ;;  %v4136_v15 = vunpack.c.l.bf16 %v3421_v60  ;;  %v4200_v32 = vunpack.c.l.bf16 %v3453_v37  ;;  %v3988_v39 = vunpack.c.l.bf16 %v3347_v52 }
 0x643   :  { %5644 = vmatpush.msrb.mxu2 %v4152_v59  ;;  %5667 = vmatpush.msrb.mxu3 %v4216_v34  ;;  %v3379_v61 = vld [vmem:[#allocation13 + $0x508] sm:$0xff]  ;;  %v3992_v59 = vunpack.c.l.bf16 %v3349_v55  ;;  %v4056_v34 = vunpack.c.l.bf16 %v3381_v8  ;;  %v3417_v28 = vld [vmem:[#allocation13 + $0x638] sm:$0xff] }
 0x644   :  { %5602 = vmatpush.msrb.mxu0 %v4008_v29  ;;  %5625 = vmatpush.msrb.mxu1 %v4072_v11  ;;  %6592 = vst [vmem:[#allocation16 + $0x20] sm:$0xff] %v6584_v21  ;;  %v3449_v47 = vld [vmem:[#allocation13 + $0x738] sm:$0xff]  ;;  %v4132_v29 = vunpack.c.l.bf16 %v3419_v45  ;;  %v4196_v11 = vunpack.c.l.bf16 %v3451_v51  ;;  %v4052_v53 = vunpack.c.l.bf16 %v3379_v61  ;;  %v3415_v63 = vld [vmem:[#allocation13 + $0x628] sm:$0xff]  ;;  %v10318_v61 = vpop.f32.mrf.mxu0 }
 0x645   :  { %5645 = vmatpush.msrb.mxu2 %v4148_v41  ;;  %5668 = vmatpush.msrb.mxu3 %v4212_v16  ;;  %v3505_v33 = vld [vmem:[#allocation13 + $0x8f8] sm:$0xff]  ;;  %v4128_v41 = vunpack.c.l.bf16 %v3417_v28  ;;  %v4192_v16 = vunpack.c.l.bf16 %v3449_v47  ;;  %v3447_v17 = vld [vmem:[#allocation13 + $0x728] sm:$0xff] }
 0x646   :  { %5603 = vmatpush.msrb.mxu0 %v4004_v62  ;;  %5626 = vmatpush.msrb.mxu1 %v4068_v42  ;;  %v3537_v24 = vld [vmem:[#allocation13 + $0x9f8] sm:$0xff]  ;;  %v3503_v62 = vld [vmem:[#allocation13 + $0x8e8] sm:$0xff]  ;;  %v4304_v36 = vunpack.c.l.bf16 %v3505_v33  ;;  %v4188_v22 = vunpack.c.l.bf16 %v3447_v17 }
 0x647   :  { %5646 = vmatpush.msrb.mxu2 %v4144_v20  ;;  %5669 = vmatpush.msrb.mxu3 %v4208_v26  ;;  %v3535_v42 = vld [vmem:[#allocation13 + $0x9e8] sm:$0xff]  ;;  %v4368_v19 = vunpack.c.l.bf16 %v3537_v24  ;;  %v3413_v21 = vld [vmem:[#allocation13 + $0x618] sm:$0xff]  ;;  %v4124_v26 = vunpack.c.l.bf16 %v3415_v63 }
 0x648   :  { %5604 = vmatpush.msrb.mxu0 %v4000_v12  ;;  %5627 = vmatpush.msrb.mxu1 %v4064_v57  ;;  %v3445_v20 = vld [vmem:[#allocation13 + $0x718] sm:$0xff]  ;;  %v4300_v57 = vunpack.c.l.bf16 %v3503_v62  ;;  %v4364_v60 = vunpack.c.l.bf16 %v3535_v42  ;;  %v3411_v37 = vld [vmem:[#allocation13 + $0x608] sm:$0xff] }
 0x649   :  { %5647 = vmatpush.msrb.mxu2 %v4140_v7  ;;  %5670 = vmatpush.msrb.mxu3 %v4204_v2  ;;  %v3501_v44 = vld [vmem:[#allocation13 + $0x8d8] sm:$0xff]  ;;  %v3443_v7 = vld [vmem:[#allocation13 + $0x708] sm:$0xff]  ;;  %v4120_v2 = vunpack.c.l.bf16 %v3413_v21  ;;  %v4184_v55 = vunpack.c.l.bf16 %v3445_v20  ;;  %v4116_v51 = vunpack.c.l.bf16 %v3411_v37 }
 0x64a   :  { %5605 = vmatpush.msrb.mxu0 %v3996_v4  ;;  %5628 = vmatpush.msrb.mxu1 %v4060_v49  ;;  %v3533_v12 = vld [vmem:[#allocation13 + $0x9d8] sm:$0xff]  ;;  %v4296_v8 = vunpack.c.l.bf16 %v3501_v44  ;;  %v3499_v49 = vld [vmem:[#allocation13 + $0x8c8] sm:$0xff]  ;;  %v10322_v44 = vpop.f32.mrf.mxu1 }
 0x64b   :  { %5648 = vmatpush.msrb.mxu2 %v4136_v15  ;;  %5671 = vmatpush.msrb.mxu3 %v4200_v32  ;;  %v4360_v4 = vunpack.c.l.bf16 %v3533_v12  ;;  %v3531_v45 = vld [vmem:[#allocation13 + $0x9c8] sm:$0xff]  ;;  %v4180_v15 = vunpack.c.l.bf16 %v3443_v7  ;;  %v3569_v32 = vld [vmem:[#allocation13 + $0xaf8] sm:$0xff] }
 0x64c   :  { %5606 = vmatpush.msrb.mxu0 %v3992_v59  ;;  %5629 = vmatpush.msrb.mxu1 %v4056_v34  ;;  %v3601_v52 = vld [vmem:[#allocation13 + $0xbf8] sm:$0xff]  ;;  %v4292_v59 = vunpack.c.l.bf16 %v3499_v49  ;;  %v4356_v34 = vunpack.c.l.bf16 %v3531_v45  ;;  %v3495_v33 = vld [vmem:[#allocation13 + $0x8a8] sm:$0xff] }
 0x64d   :  { %5649 = vmatpush.msrb.mxu2 %v4132_v29  ;;  %5672 = vmatpush.msrb.mxu3 %v4196_v11  ;;  %v3497_v28 = vld [vmem:[#allocation13 + $0x8b8] sm:$0xff]  ;;  %v4432_v29 = vunpack.c.l.bf16 %v3569_v32  ;;  %v4496_v11 = vunpack.c.l.bf16 %v3601_v52  ;;  %v3527_v24 = vld [vmem:[#allocation13 + $0x9a8] sm:$0xff]  ;;  %v4284_v21 = vunpack.c.l.bf16 %v3495_v33  ;;  %v10328_v32 = vpop.f32.mrf.mxu0  ;;  %v10330_v52 = vpop.f32.mrf.mxu3 }
 0x64e   :  { %5607 = vmatpush.msrb.mxu0 %v3988_v39  ;;  %5630 = vmatpush.msrb.mxu1 %v4052_v53  ;;  %v3529_v47 = vld [vmem:[#allocation13 + $0x9b8] sm:$0xff]  ;;  %v3567_v39 = vld [vmem:[#allocation13 + $0xae8] sm:$0xff]  ;;  %v4348_v20 = vunpack.c.l.bf16 %v3527_v24 }
 0x64f   :  { %5650 = vmatpush.msrb.mxu2 %v4128_v41  ;;  %5673 = vmatpush.msrb.mxu3 %v4192_v16  ;;  %v3599_v53 = vld [vmem:[#allocation13 + $0xbe8] sm:$0xff]  ;;  %v4288_v41 = vunpack.c.l.bf16 %v3497_v28  ;;  %v4352_v16 = vunpack.c.l.bf16 %v3529_v47  ;;  %v3565_v63 = vld [vmem:[#allocation13 + $0xad8] sm:$0xff]  ;;  %v4428_v62 = vunpack.c.l.bf16 %v3567_v39 }
 0x650   :  { %5608 = vmatmul.f32.vlgmr.msrb.gmra.mxu0 %v10835_v10  ;;  %5631 = vmatmul.f32.vlgmr.msrb.gmra.mxu1 %v10836_v18  ;;  %v3597_v17 = vld [vmem:[#allocation13 + $0xbd8] sm:$0xff]  ;;  %v4492_v42 = vunpack.c.l.bf16 %v3599_v53  ;;  %v4424_v12 = vunpack.c.l.bf16 %v3565_v63  ;;  %v3491_v7 = vld [vmem:[#allocation13 + $0x888] sm:$0xff] }
 0x651   :  { %5684 = vmatpush.msra.mxu0 %v4304_v36  ;;  %5707 = vmatpush.msra.mxu1 %v4368_v19  ;;  %v3493_v36 = vld [vmem:[#allocation13 + $0x898] sm:$0xff]  ;;  %v3559_v28 = vld [vmem:[#allocation13 + $0xaa8] sm:$0xff] }
 0x652   :  { %5651 = vmatpush.msrb.mxu2 %v4124_v26  ;;  %5674 = vmatpush.msrb.mxu3 %v4188_v22  ;;  %v3525_v19 = vld [vmem:[#allocation13 + $0x998] sm:$0xff]  ;;  %v3563_v26 = vld [vmem:[#allocation13 + $0xac8] sm:$0xff]  ;;  %v4412_v63 = vunpack.c.l.bf16 %v3559_v28 }
 0x653   :  { %5685 = vmatpush.msra.mxu0 %v4300_v57  ;;  %5708 = vmatpush.msra.mxu1 %v4364_v60  ;;  %v3595_v22 = vld [vmem:[#allocation13 + $0xbc8] sm:$0xff]  ;;  %v4488_v57 = vunpack.c.l.bf16 %v3597_v17  ;;  %v4280_v60 = vunpack.c.l.bf16 %v3493_v36  ;;  %v4344_v37 = vunpack.c.l.bf16 %v3525_v19  ;;  %v3561_v49 = vld [vmem:[#allocation13 + $0xab8] sm:$0xff] }
 0x654   :  { %5652 = vmatpush.msrb.mxu2 %v4120_v2  ;;  %5675 = vmatpush.msrb.mxu3 %v4184_v55  ;;  %v3523_v2 = vld [vmem:[#allocation13 + $0x988] sm:$0xff]  ;;  %v10326_v55 = vpop.f32.mrf.mxu2  ;;  %v3593_v45 = vld [vmem:[#allocation13 + $0xbb8] sm:$0xff] }
 0x655   :  { %5686 = vmatpush.msra.mxu0 %v4296_v8  ;;  %5709 = vmatpush.msra.mxu1 %v4360_v4  ;;  %v4420_v8 = vunpack.c.l.bf16 %v3563_v26  ;;  %v4484_v4 = vunpack.c.l.bf16 %v3595_v22  ;;  %v3591_v47 = vld [vmem:[#allocation13 + $0xba8] sm:$0xff]  ;;  %v10341_v28 = vpop.f32.mrf.mxu0 }
 0x656   :  { %5653 = vmatpush.msrb.mxu2 %v4116_v51  ;;  %5676 = vmatpush.msrb.mxu3 %v4180_v15  ;;  %v3489_v51 = vld [vmem:[#allocation13 + $0x878] sm:$0xff]  ;;  %v3487_v39 = vld [vmem:[#allocation13 + $0x868] sm:$0xff]  ;;  %v4476_v17 = vunpack.c.l.bf16 %v3591_v47 }
 0x657   :  { %5654 = vmatmul.f32.vlgmr.msrb.gmra.mxu2 %v10837_v54  ;;  %5677 = vmatmul.f32.vlgmr.msrb.gmra.mxu3 %v10838_v46  ;;  %v3521_v15 = vld [vmem:[#allocation13 + $0x978] sm:$0xff]  ;;  %v3519_v53 = vld [vmem:[#allocation13 + $0x968] sm:$0xff]  ;;  %v4272_v33 = vunpack.c.l.bf16 %v3489_v51  ;;  %v4268_v36 = vunpack.c.l.bf16 %v3487_v39 }
 0x658   :  { %5687 = vmatpush.msra.mxu0 %v4292_v59  ;;  %5710 = vmatpush.msra.mxu1 %v4356_v34  ;;  %v4276_v59 = vunpack.c.l.bf16 %v3491_v7  ;;  %v4340_v34 = vunpack.c.l.bf16 %v3523_v2  ;;  %v4336_v24 = vunpack.c.l.bf16 %v3521_v15  ;;  %v4332_v19 = vunpack.c.l.bf16 %v3519_v53  ;;  %v3553_v2 = vld [vmem:[#allocation13 + $0xa78] sm:$0xff]  ;;  %v3583_v39 = vld [vmem:[#allocation13 + $0xb68] sm:$0xff] }
 0x659   :  { %5730 = vmatpush.msra.mxu2 %v4432_v29  ;;  %5753 = vmatpush.msra.mxu3 %v4496_v11  ;;  %v4416_v29 = vunpack.c.l.bf16 %v3561_v49  ;;  %v4480_v11 = vunpack.c.l.bf16 %v3593_v45  ;;  %v3481_v15 = vld [vmem:[#allocation13 + $0x838] sm:$0xff]  ;;  %v4400_v53 = vunpack.c.l.bf16 %v3553_v2 }
 0x65a   :  { %5611 = vmatmul.f32.gmra.mxu0 %v10839_v25  ;;  %5634 = vmatmul.f32.gmra.mxu1 %v10840_v5 }
 0x65b   :  { %5688 = vmatpush.msra.mxu0 %v4288_v41  ;;  %5711 = vmatpush.msra.mxu1 %v4352_v16  ;;  %v3557_v41 = vld [vmem:[#allocation13 + $0xa98] sm:$0xff] }
 0x65c   :  { %5731 = vmatpush.msra.mxu2 %v4428_v62  ;;  %5754 = vmatpush.msra.mxu3 %v4492_v42  ;;  %v3589_v16 = vld [vmem:[#allocation13 + $0xb98] sm:$0xff]  ;;  %v4408_v26 = vunpack.c.l.bf16 %v3557_v41  ;;  %v3511_v41 = vld [vmem:[#allocation13 + $0x928] sm:$0xff] }
 0x65d   :  { %5689 = vmatpush.msra.mxu0 %v4284_v21  ;;  %5712 = vmatpush.msra.mxu1 %v4348_v20  ;;  %v3485_v62 = vld [vmem:[#allocation13 + $0x858] sm:$0xff]  ;;  %v3555_v21 = vld [vmem:[#allocation13 + $0xa88] sm:$0xff]  ;;  %v4472_v22 = vunpack.c.l.bf16 %v3589_v16  ;;  %v10343_v16 = vpop.f32.mrf.mxu3 }
 0x65e   :  { %5732 = vmatpush.msra.mxu2 %v4424_v12  ;;  %5755 = vmatpush.msra.mxu3 %v4488_v57  ;;  %v3517_v42 = vld [vmem:[#allocation13 + $0x958] sm:$0xff]  ;;  %v3587_v20 = vld [vmem:[#allocation13 + $0xb88] sm:$0xff]  ;;  %v4404_v45 = vunpack.c.l.bf16 %v3555_v21  ;;  %v4460_v21 = vunpack.c.l.bf16 %v3583_v39 }
 0x65f   :  { %5690 = vmatpush.msra.mxu0 %v4280_v60  ;;  %5713 = vmatpush.msra.mxu1 %v4344_v37  ;;  %v3483_v12 = vld [vmem:[#allocation13 + $0x848] sm:$0xff]  ;;  %v10334_v60 = vpop.f32.mrf.mxu1  ;;  %v4264_v37 = vunpack.c.l.bf16 %v3485_v62  ;;  %v4328_v7 = vunpack.c.l.bf16 %v3517_v42  ;;  %v4468_v51 = vunpack.c.l.bf16 %v3587_v20  ;;  %v3549_v62 = vld [vmem:[#allocation13 + $0xa58] sm:$0xff] }
 0x660   :  { %5733 = vmatpush.msra.mxu2 %v4420_v8  ;;  %5756 = vmatpush.msra.mxu3 %v4484_v4  ;;  %v3515_v57 = vld [vmem:[#allocation13 + $0x948] sm:$0xff]  ;;  %v3585_v8 = vld [vmem:[#allocation13 + $0xb78] sm:$0xff]  ;;  %v10336_v4 = vld [vmem:[#allocation14] sm:$0xf]  ;;  %v4260_v47 = vunpack.c.l.bf16 %v3483_v12  ;;  %v4316_v12 = vunpack.c.l.bf16 %v3511_v41 }
 0x661   :  { %5657 = vmatmul.f32.gmra.mxu2 %v10841_v23  ;;  %5680 = vmatmul.f32.gmra.mxu3 %v10842_v48  ;;  %v4757_v49 = vperm.slane %v10336_v4, 1  ;;  %v3581_v42 = vld [vmem:[#allocation13 + $0xb58] sm:$0xff] }
 0x662   :  { %5691 = vmatpush.msra.mxu0 %v4276_v59  ;;  %5714 = vmatpush.msra.mxu1 %v4340_v34  ;;  %v3513_v59 = vld [vmem:[#allocation13 + $0x938] sm:$0xff]  ;;  %v10339_v34 = vpop.f32.mrf.mxu2  ;;  %v4456_v2 = vunpack.c.l.bf16 %v3581_v42 }
 0x663   :  { %5734 = vmatpush.msra.mxu2 %v4416_v29  ;;  %5757 = vmatpush.msra.mxu3 %v4480_v11  ;;  %v4324_v29 = vunpack.c.l.bf16 %v3515_v57  ;;  %v3551_v11 = vld [vmem:[#allocation13 + $0xa68] sm:$0xff]  ;;  %v3477_v20 = vld [vmem:[#allocation13 + $0x818] sm:$0xff] }
 0x664   :  { %5692 = vmatpush.msra.mxu0 %v4272_v33  ;;  %5715 = vmatpush.msra.mxu1 %v4336_v24  ;;  %v4464_v33 = vunpack.c.l.bf16 %v3585_v8  ;;  %v3479_v24 = vld [vmem:[#allocation13 + $0x828] sm:$0xff]  ;;  %v3633_v41 = vld [vmem:[#allocation13 + $0xcf8] sm:$0xff] }
 0x665   :  { %5735 = vmatpush.msra.mxu2 %v4412_v63  ;;  %5758 = vmatpush.msra.mxu3 %v4476_v17  ;;  %v4256_v63 = vunpack.c.l.bf16 %v3481_v15  ;;  %v4320_v17 = vunpack.c.l.bf16 %v3513_v59  ;;  %v3547_v57 = vld [vmem:[#allocation13 + $0xa48] sm:$0xff] }
 0x666   :  { %5693 = vmatpush.msra.mxu0 %v4268_v36  ;;  %5716 = vmatpush.msra.mxu1 %v4332_v19  ;;  %v5150_v36 = vadd.f32 %v10318_v61, %v4757_v49  ;;  %v4396_v19 = vunpack.c.l.bf16 %v3551_v11  ;;  %v3475_v8 = vld [vmem:[#allocation13 + $0x808] sm:$0xff]  ;;  %v4248_v61 = vunpack.c.l.bf16 %v3477_v20  ;;  %v3577_v11 = vld [vmem:[#allocation13 + $0xb38] sm:$0xff] }
 0x667   :  { %5736 = vmatpush.msra.mxu2 %v4408_v26  ;;  %5759 = vmatpush.msra.mxu3 %v4472_v22  ;;  %v3509_v26 = vld [vmem:[#allocation13 + $0x918] sm:$0xff]  ;;  %v4252_v22 = vunpack.c.l.bf16 %v3479_v24  ;;  %v3507_v15 = vld [vmem:[#allocation13 + $0x908] sm:$0xff]  ;;  %v10348_v59 = vpop.f32.mrf.mxu1  ;;  %v4448_v42 = vunpack.c.l.bf16 %v3577_v11 }
 0x668   :  { %5694 = vmatpush.msra.mxu0 %v4264_v37  ;;  %5717 = vmatpush.msra.mxu1 %v4328_v7  ;;  %v3579_v37 = vld [vmem:[#allocation13 + $0xb48] sm:$0xff]  ;;  %v4392_v7 = vunpack.c.l.bf16 %v3549_v62  ;;  %v4308_v24 = vunpack.c.l.bf16 %v3507_v15  ;;  %v3665_v62 = vld [vmem:[#allocation13 + $0xdf8] sm:$0xff]  ;;  %v5153_v15 = vadd.f32 %v10328_v32, %v4757_v49 }
 0x669   :  { %5737 = vmatpush.msra.mxu2 %v4404_v45  ;;  %5760 = vmatpush.msra.mxu3 %v4468_v51  ;;  %v4312_v45 = vunpack.c.l.bf16 %v3509_v26  ;;  %v3545_v51 = vld [vmem:[#allocation13 + $0xa38] sm:$0xff]  ;;  %v4452_v39 = vunpack.c.l.bf16 %v3579_v37  ;;  %v3543_v20 = vld [vmem:[#allocation13 + $0xa28] sm:$0xff] }
 0x66a   :  { %5695 = vmatpush.msra.mxu0 %v4260_v47  ;;  %5718 = vmatpush.msra.mxu1 %v4324_v29  ;;  %v5173_v47 = vadd.f32 %v10322_v44, %v5150_v36  ;;  %v4388_v29 = vunpack.c.l.bf16 %v3547_v57  ;;  %v3575_v44 = vld [vmem:[#allocation13 + $0xb28] sm:$0xff]  ;;  %v10354_v36 = vpop.f32.mrf.mxu0  ;;  %v3541_v57 = vld [vmem:[#allocation13 + $0xa18] sm:$0xff]  ;;  %v4380_v37 = vunpack.c.l.bf16 %v3543_v20 }
 0x66b   :  { %5738 = vmatpush.msra.mxu2 %v4400_v53  ;;  %5761 = vmatpush.msra.mxu3 %v4464_v33  ;;  %v10351_v53 = vpop.f32.mrf.mxu2  ;;  %v4244_v33 = vunpack.c.l.bf16 %v3475_v8  ;;  %v3663_v26 = vld [vmem:[#allocation13 + $0xde8] sm:$0xff]  ;;  %v3661_v8 = vld [vmem:[#allocation13 + $0xdd8] sm:$0xff] }
 0x66c   :  { %5696 = vmatpush.msra.mxu0 %v4256_v63  ;;  %5719 = vmatpush.msra.mxu1 %v4320_v17  ;;  %v5196_v63 = vadd.f32 %v10326_v55, %v5173_v47  ;;  %v4384_v17 = vunpack.c.l.bf16 %v3545_v51  ;;  %v3573_v55 = vld [vmem:[#allocation13 + $0xb18] sm:$0xff]  ;;  %v4620_v51 = vunpack.c.l.bf16 %v3663_v26  ;;  %v3539_v11 = vld [vmem:[#allocation13 + $0xa08] sm:$0xff]  ;;  %v4616_v32 = vunpack.c.l.bf16 %v3661_v8 }
 0x66d   :  { %5739 = vmatpush.msra.mxu2 %v4396_v19  ;;  %5762 = vmatpush.msra.mxu3 %v4460_v21  ;;  %v10356_v19 = vpop.f32.mrf.mxu3  ;;  %v3631_v21 = vld [vmem:[#allocation13 + $0xce8] sm:$0xff]  ;;  %v3625_v26 = vld [vmem:[#allocation13 + $0xcb8] sm:$0xff] }
 0x66e   :  { %5697 = vmatpush.msra.mxu0 %v4252_v22  ;;  %5720 = vmatpush.msra.mxu1 %v4316_v12  ;;  %v4560_v22 = vunpack.c.l.bf16 %v3633_v41  ;;  %v4624_v12 = vunpack.c.l.bf16 %v3665_v62  ;;  %v3571_v47 = vld [vmem:[#allocation13 + $0xb08] sm:$0xff]  ;;  %v4372_v41 = vunpack.c.l.bf16 %v3539_v11 }
 0x66f   :  { %5740 = vmatpush.msra.mxu2 %v4392_v7  ;;  %5763 = vmatpush.msra.mxu3 %v4456_v2  ;;  %v4444_v7 = vunpack.c.l.bf16 %v3575_v44  ;;  %v3629_v2 = vld [vmem:[#allocation13 + $0xcd8] sm:$0xff]  ;;  %v3627_v49 = vld [vmem:[#allocation13 + $0xcc8] sm:$0xff]  ;;  %v4436_v62 = vunpack.c.l.bf16 %v3571_v47 }
 0x670   :  { %5698 = vmatpush.msra.mxu0 %v4248_v61  ;;  %5721 = vmatpush.msra.mxu1 %v4312_v45  ;;  %v5219_v61 = vadd.f32 %v10330_v52, %v5196_v63  ;;  %v4556_v45 = vunpack.c.l.bf16 %v3631_v21  ;;  %v4552_v4 = vunpack.c.l.bf16 %v3629_v2  ;;  %v3659_v52 = vld [vmem:[#allocation13 + $0xdc8] sm:$0xff]  ;;  %v3697_v63 = vld [vmem:[#allocation13 + $0xef8] sm:$0xff]  ;;  %v4548_v44 = vunpack.c.l.bf16 %v3627_v49 }
 0x671   :  { %5741 = vmatpush.msra.mxu2 %v4388_v29  ;;  %5764 = vmatpush.msra.mxu3 %v4452_v39  ;;  %v4376_v29 = vunpack.c.l.bf16 %v3541_v57  ;;  %v4440_v39 = vunpack.c.l.bf16 %v3573_v55  ;;  %v4612_v21 = vunpack.c.l.bf16 %v3659_v52  ;;  %v4688_v55 = vunpack.c.l.bf16 %v3697_v63  ;;  %v3623_v8 = vld [vmem:[#allocation13 + $0xca8] sm:$0xff] }
 0x672   :  { %5699 = vmatpush.msra.mxu0 %v4244_v33  ;;  %5722 = vmatpush.msra.mxu1 %v4308_v24  ;;  %v5242_v33 = vadd.f32 %v10341_v28, %v5219_v61  ;;  %v10365_v24 = vpop.f32.mrf.mxu1  ;;  %v5333_v28 = vpop.f32.mrf.mxu0  ;;  %v3723_v49 = vld [vmem:[#allocation13 + $0xfc8] sm:$0xff] }
 0x673   :  { %5742 = vmatpush.msra.mxu2 %v4384_v17  ;;  %5765 = vmatpush.msra.mxu3 %v4448_v42  ;;  %v3729_v17 = vld [vmem:[#allocation13 + $0xff8] sm:$0xff]  ;;  %v5176_v42 = vadd.f32 %v10334_v60, %v5153_v15  ;;  %v10368_v20 = vpop.f32.mrf.mxu2  ;;  %v3695_v60 = vld [vmem:[#allocation13 + $0xee8] sm:$0xff] }
 0x674   :  { %5700 = vmatmul.f32.vlgmr.msra.gmra.mxu0 %v9417_v35  ;;  %5723 = vmatmul.f32.vlgmr.msra.gmra.mxu1 %v9422_v30  ;;  %v5265_v57 = vadd.f32 %v10348_v59, %v5242_v33  ;;  %v3655_v15 = vld [vmem:[#allocation13 + $0xda8] sm:$0xff]  ;;  %v4684_v11 = vunpack.c.l.bf16 %v3695_v60  ;;  %v3617_v60 = vld [vmem:[#allocation13 + $0xc78] sm:$0xff] }
 0x675   :  { %5776 = vmatpush.msrb.mxu0 %v4560_v22  ;;  %5799 = vmatpush.msrb.mxu1 %v4624_v12  ;;  %v3657_v22 = vld [vmem:[#allocation13 + $0xdb8] sm:$0xff]  ;;  %v5199_v12 = vadd.f32 %v10339_v34, %v5176_v42  ;;  %v10372_v2 = vpop.f32.mrf.mxu3  ;;  %v4544_v34 = vunpack.c.l.bf16 %v3625_v26 }
 0x676   :  { %5743 = vmatpush.msra.mxu2 %v4380_v37  ;;  %5766 = vmatpush.msra.mxu3 %v4444_v7  ;;  %v4752_v37 = vunpack.c.l.bf16 %v3729_v17  ;;  %v3727_v7 = vld [vmem:[#allocation13 + $0xfe8] sm:$0xff]  ;;  %v5288_v61 = vadd.f32 %v10351_v53, %v5265_v57  ;;  %v4608_v59 = vunpack.c.l.bf16 %v3657_v22  ;;  %v4604_v53 = vunpack.c.l.bf16 %v3655_v15  ;;  %v3689_v57 = vld [vmem:[#allocation13 + $0xeb8] sm:$0xff] }
 0x677   :  { %5777 = vmatpush.msrb.mxu0 %v4556_v45  ;;  %5800 = vmatpush.msrb.mxu1 %v4620_v51  ;;  %v3693_v45 = vld [vmem:[#allocation13 + $0xed8] sm:$0xff]  ;;  %v4748_v47 = vunpack.c.l.bf16 %v3727_v7  ;;  %v5222_v33 = vadd.f32 %v10343_v16, %v5199_v12  ;;  %v4740_v22 = vunpack.c.l.bf16 %v3723_v49 }
 0x678   :  { %5744 = vmatpush.msra.mxu2 %v4376_v29  ;;  %5767 = vmatpush.msra.mxu3 %v4440_v39  ;;  %v3725_v51 = vld [vmem:[#allocation13 + $0xfd8] sm:$0xff]  ;;  %v5311_v17 = vadd.f32 %v10356_v19, %v5288_v61  ;;  %v3687_v61 = vld [vmem:[#allocation13 + $0xea8] sm:$0xff] }
 0x679   :  { %5778 = vmatpush.msrb.mxu0 %v4552_v4  ;;  %5801 = vmatpush.msrb.mxu1 %v4616_v32  ;;  %v3621_v29 = vld [vmem:[#allocation13 + $0xc98] sm:$0xff]  ;;  %v4540_v4 = vunpack.c.l.bf16 %v3623_v8  ;;  %v3691_v32 = vld [vmem:[#allocation13 + $0xec8] sm:$0xff]  ;;  %v5245_v63 = vadd.f32 %v10354_v36, %v5222_v33 }
 0x67a   :  { %5745 = vmatpush.msra.mxu2 %v4372_v41  ;;  %5768 = vmatpush.msra.mxu3 %v4436_v62  ;;  %v3653_v39 = vld [vmem:[#allocation13 + $0xd98] sm:$0xff]  ;;  %v5356_v52 = vpop.f32.mrf.mxu1  ;;  %v4680_v41 = vunpack.c.l.bf16 %v3693_v45  ;;  %v4744_v62 = vunpack.c.l.bf16 %v3725_v51  ;;  %v4536_v16 = vunpack.c.l.bf16 %v3621_v29  ;;  %v4676_v26 = vunpack.c.l.bf16 %v3691_v32  ;;  %v10382_v7 = vpop.f32.mrf.mxu0 }
 0x67b   :  { %5746 = vmatmul.f32.vlgmr.msra.gmra.mxu2 %v9639_v6  ;;  %5769 = vmatmul.f32.vlgmr.msra.gmra.mxu3 %v9642_v43  ;;  %v4600_v42 = vunpack.c.l.bf16 %v3653_v39  ;;  %v5379_v12 = vpop.f32.mrf.mxu2  ;;  %v3649_v36 = vld [vmem:[#allocation13 + $0xd78] sm:$0xff]  ;;  %v4672_v45 = vunpack.c.l.bf16 %v3689_v57 }
 0x67c   :  { %5779 = vmatpush.msrb.mxu0 %v4548_v44  ;;  %5802 = vmatpush.msrb.mxu1 %v4612_v21  ;;  %v3619_v44 = vld [vmem:[#allocation13 + $0xc88] sm:$0xff]  ;;  %v4592_v29 = vunpack.c.l.bf16 %v3649_v36  ;;  %v3685_v39 = vld [vmem:[#allocation13 + $0xe98] sm:$0xff] }
 0x67d   :  { %5822 = vmatpush.msrb.mxu2 %v4688_v55  ;;  %5845 = vmatpush.msrb.mxu3 %v4752_v37  ;;  %v3651_v21 = vld [vmem:[#allocation13 + $0xd88] sm:$0xff]  ;;  %v3721_v55 = vld [vmem:[#allocation13 + $0xfb8] sm:$0xff]  ;;  %v5334_v37 = vadd.f32 %v5333_v28, %v5311_v17  ;;  %v5402_v19 = vpop.f32.mrf.mxu3  ;;  %v4532_v8 = vunpack.c.l.bf16 %v3619_v44  ;;  %v4664_v44 = vunpack.c.l.bf16 %v3685_v39 }
 0x67e   :  { %5703 = vmatmul.f32.gmra.mxu0 %v9652_v27  ;;  %5726 = vmatmul.f32.gmra.mxu1 %v9816_v38  ;;  %v4596_v15 = vunpack.c.l.bf16 %v3651_v21  ;;  %v4736_v51 = vunpack.c.l.bf16 %v3721_v55  ;;  %v3615_v28 = vld [vmem:[#allocation13 + $0xc68] sm:$0xff]  ;;  %v3717_v33 = vld [vmem:[#allocation13 + $0xf98] sm:$0xff] }
 0x67f   :  { %5780 = vmatpush.msrb.mxu0 %v4544_v34  ;;  %5803 = vmatpush.msrb.mxu1 %v4608_v59  ;;  %v3719_v34 = vld [vmem:[#allocation13 + $0xfa8] sm:$0xff]  ;;  %v5268_v59 = vadd.f32 %v10365_v24, %v5245_v63  ;;  %v4668_v24 = vunpack.c.l.bf16 %v3687_v61  ;;  %v3613_v49 = vld [vmem:[#allocation13 + $0xc58] sm:$0xff] }
 0x680   :  { %5823 = vmatpush.msrb.mxu2 %v4684_v11  ;;  %5846 = vmatpush.msrb.mxu3 %v4748_v47  ;;  %v3647_v11 = vld [vmem:[#allocation13 + $0xd68] sm:$0xff]  ;;  %v4528_v47 = vunpack.c.l.bf16 %v3617_v60  ;;  %v4732_v32 = vunpack.c.l.bf16 %v3719_v34  ;;  %v3681_v55 = vld [vmem:[#allocation13 + $0xe78] sm:$0xff] }
 0x681   :  { %5781 = vmatpush.msrb.mxu0 %v4540_v4  ;;  %5804 = vmatpush.msrb.mxu1 %v4604_v53  ;;  %v5291_v4 = vadd.f32 %v10368_v20, %v5268_v59  ;;  %v5357_v53 = vadd.f32 %v5356_v52, %v5334_v37  ;;  %v4588_v63 = vunpack.c.l.bf16 %v3647_v11  ;;  %v3683_v17 = vld [vmem:[#allocation13 + $0xe88] sm:$0xff]  ;;  %v4728_v20 = vunpack.c.l.bf16 %v3717_v33  ;;  %v3713_v37 = vld [vmem:[#allocation13 + $0xf78] sm:$0xff] }
 0x682   :  { %5824 = vmatpush.msrb.mxu2 %v4680_v41  ;;  %5847 = vmatpush.msrb.mxu3 %v4744_v62  ;;  %v3645_v41 = vld [vmem:[#allocation13 + $0xd58] sm:$0xff]  ;;  %v4524_v62 = vunpack.c.l.bf16 %v3615_v28  ;;  %v3611_v52 = vld [vmem:[#allocation13 + $0xc48] sm:$0xff]  ;;  %v4660_v36 = vunpack.c.l.bf16 %v3683_v17 }
 0x683   :  { %5782 = vmatpush.msrb.mxu0 %v4536_v16  ;;  %5805 = vmatpush.msrb.mxu1 %v4600_v42  ;;  %v3715_v16 = vld [vmem:[#allocation13 + $0xf88] sm:$0xff]  ;;  %v5380_v42 = vadd.f32 %v5379_v12, %v5357_v53  ;;  %v4584_v57 = vunpack.c.l.bf16 %v3645_v41  ;;  %v5314_v60 = vadd.f32 %v10372_v2, %v5291_v4  ;;  %v3609_v12 = vld [vmem:[#allocation13 + $0xc38] sm:$0xff]  ;;  %v5382_v61 = vpop.f32.mrf.mxu2  ;;  %v4516_v34 = vunpack.c.l.bf16 %v3611_v52 }
 0x684   :  { %5825 = vmatpush.msrb.mxu2 %v4676_v26  ;;  %5848 = vmatpush.msrb.mxu3 %v4740_v22  ;;  %v3643_v21 = vld [vmem:[#allocation13 + $0xd48] sm:$0xff]  ;;  %v5359_v26 = vpop.f32.mrf.mxu1  ;;  %v4520_v22 = vunpack.c.l.bf16 %v3613_v49  ;;  %v4656_v2 = vunpack.c.l.bf16 %v3681_v55  ;;  %v4512_v53 = vunpack.c.l.bf16 %v3609_v12  ;;  %v3709_v49 = vld [vmem:[#allocation13 + $0xf58] sm:$0xff] }
 0x685   :  { %5749 = vmatmul.f32.gmra.mxu2 %v9836_v56  ;;  %5772 = vmatmul.f32.gmra.mxu3 %v9839_v1  ;;  %v4580_v59 = vunpack.c.l.bf16 %v3643_v21  ;;  %v5425_v28 = vpop.f32.mrf.mxu0  ;;  %v5337_v11 = vadd.f32 %v10382_v7, %v5314_v60  ;;  %v3607_v39 = vld [vmem:[#allocation13 + $0xc28] sm:$0xff]  ;;  %v5405_v4 = vpop.f32.mrf.mxu3  ;;  %v3637_v7 = vld [vmem:[#allocation13 + $0xd18] sm:$0xff]  ;;  %v4712_v21 = vunpack.c.l.bf16 %v3709_v49 }
 0x686   :  { %5783 = vmatpush.msrb.mxu0 %v4532_v8  ;;  %5806 = vmatpush.msrb.mxu1 %v4596_v15  ;;  %v4724_v8 = vunpack.c.l.bf16 %v3715_v16  ;;  %v3641_v15 = vld [vmem:[#allocation13 + $0xd38] sm:$0xff]  ;;  %v3639_v33 = vld [vmem:[#allocation13 + $0xd28] sm:$0xff]  ;;  %v4508_v17 = vunpack.c.l.bf16 %v3607_v39 }
 0x687   :  { %5826 = vmatpush.msrb.mxu2 %v4672_v45  ;;  %5849 = vmatpush.msrb.mxu3 %v4736_v51  ;;  %v3679_v45 = vld [vmem:[#allocation13 + $0xe68] sm:$0xff]  ;;  %v4572_v16 = vunpack.c.l.bf16 %v3639_v33  ;;  %v3673_v60 = vld [vmem:[#allocation13 + $0xe38] sm:$0xff] }
 0x688   :  { %5784 = vmatpush.msrb.mxu0 %v4528_v47  ;;  %5807 = vmatpush.msrb.mxu1 %v4592_v29  ;;  %v3711_v51 = vld [vmem:[#allocation13 + $0xf68] sm:$0xff]  ;;  %v5403_v47 = vadd.f32 %v5402_v19, %v5380_v42  ;;  %v4720_v29 = vunpack.c.l.bf16 %v3713_v37  ;;  %v4652_v41 = vunpack.c.l.bf16 %v3679_v45  ;;  %v4568_v37 = vunpack.c.l.bf16 %v3637_v7 }
 0x689   :  { %5827 = vmatpush.msrb.mxu2 %v4668_v24  ;;  %5850 = vmatpush.msrb.mxu3 %v4732_v32  ;;  %v4576_v24 = vunpack.c.l.bf16 %v3641_v15  ;;  %v3677_v32 = vld [vmem:[#allocation13 + $0xe58] sm:$0xff]  ;;  %v3675_v42 = vld [vmem:[#allocation13 + $0xe48] sm:$0xff] }
 0x68a   :  { %5785 = vmatpush.msrb.mxu0 %v4524_v62  ;;  %5808 = vmatpush.msrb.mxu1 %v4588_v63  ;;  %v4716_v62 = vunpack.c.l.bf16 %v3711_v51  ;;  %v3605_v63 = vld [vmem:[#allocation13 + $0xc18] sm:$0xff]  ;;  %v5426_v19 = vadd.f32 %v5425_v28, %v5403_v47  ;;  %v4648_v52 = vunpack.c.l.bf16 %v3677_v32  ;;  %v4644_v15 = vunpack.c.l.bf16 %v3675_v42  ;;  %v3671_v47 = vld [vmem:[#allocation13 + $0xe28] sm:$0xff] }
 0x68b   :  { %5828 = vmatpush.msrb.mxu2 %v4664_v44  ;;  %5851 = vmatpush.msrb.mxu3 %v4728_v20  ;;  %v3707_v44 = vld [vmem:[#allocation13 + $0xf48] sm:$0xff]  ;;  %v5360_v20 = vadd.f32 %v5359_v26, %v5337_v11  ;;  %v4504_v55 = vunpack.c.l.bf16 %v3605_v63  ;;  %v4640_v28 = vunpack.c.l.bf16 %v3673_v60  ;;  %v7273_v32 = vld [vmem:[#allocation13 + $0x1f8] sm:$0xff]  ;;  %v4636_v7 = vunpack.c.l.bf16 %v3671_v47 }
 0x68c   :  { %5786 = vmatpush.msrb.mxu0 %v4520_v22  ;;  %5809 = vmatpush.msrb.mxu1 %v4584_v57  ;;  %v3603_v22 = vld [vmem:[#allocation13 + $0xc08] sm:$0xff]  ;;  %v3857_v49 = vunpack.c.h.bf16 %v7273_v32 }
 0x68d   :  { %5829 = vmatpush.msrb.mxu2 %v4660_v36  ;;  %5852 = vmatpush.msrb.mxu3 %v4724_v8  ;;  %v3635_v57 = vld [vmem:[#allocation13 + $0xd08] sm:$0xff]  ;;  %v3705_v36 = vld [vmem:[#allocation13 + $0xf38] sm:$0xff]  ;;  %v5448_v8 = vpop.f32.mrf.mxu1  ;;  %v5383_v12 = vadd.f32 %v5382_v61, %v5360_v20  ;;  %v4500_v26 = vunpack.c.l.bf16 %v3603_v22 }
 0x68e   :  { %5787 = vmatpush.msrb.mxu0 %v4516_v34  ;;  %5810 = vmatpush.msrb.mxu1 %v4580_v59  ;;  %v4708_v34 = vunpack.c.l.bf16 %v3707_v44  ;;  %v5449_v59 = vadd.f32 %v5448_v8, %v5426_v19  ;;  %v4564_v45 = vunpack.c.l.bf16 %v3635_v57  ;;  %v4704_v11 = vunpack.c.l.bf16 %v3705_v36  ;;  %v7275_v42 = vld [vmem:[#allocation13 + $0x1e8] sm:$0xff]  ;;  %v10845_v22 = vld [vmem:[#allocation41_spill] sm:$0xff] }
 0x68f   :  { %5830 = vmatpush.msrb.mxu2 %v4656_v2  ;;  %5853 = vmatpush.msrb.mxu3 %v4720_v29  ;;  %v3703_v2 = vld [vmem:[#allocation13 + $0xf28] sm:$0xff]  ;;  %v5428_v61 = vpop.f32.mrf.mxu0  ;;  %v5406_v33 = vadd.f32 %v5405_v4, %v5383_v12  ;;  %v3853_v4 = vunpack.c.h.bf16 %v7275_v42  ;;  %v7277_v36 = vld [vmem:[#allocation13 + $0x1d8] sm:$0xff] }
 0x690   :  { %5788 = vmatpush.msrb.mxu0 %v4512_v53  ;;  %5811 = vmatpush.msrb.mxu1 %v4576_v24  ;;  %v7272_v53 = vld [vmem:[#allocation13 + $0xf8] sm:$0xff]  ;;  %v4700_v19 = vunpack.c.l.bf16 %v3703_v2  ;;  %v3667_v44 = vld [vmem:[#allocation13 + $0xe08] sm:$0xff]  ;;  %v3849_v8 = vunpack.c.h.bf16 %v7277_v36 }
 0x691   :  { %5831 = vmatpush.msrb.mxu2 %v4652_v41  ;;  %5854 = vmatpush.msrb.mxu3 %v4716_v62  ;;  %v3793_v24 = vunpack.c.h.bf16 %v7272_v53  ;;  %v3669_v41 = vld [vmem:[#allocation13 + $0xe18] sm:$0xff]  ;;  %v3699_v20 = vld [vmem:[#allocation13 + $0xf08] sm:$0xff] }
 0x692   :  { %5789 = vmatpush.msrb.mxu0 %v4508_v17  ;;  %5812 = vmatpush.msrb.mxu1 %v4572_v16  ;;  %v5471_v51 = vpop.f32.mrf.mxu2  ;;  %v5494_v39 = vpop.f32.mrf.mxu3  ;;  %v3701_v62 = vld [vmem:[#allocation13 + $0xf18] sm:$0xff]  ;;  %v7274_v17 = vld [vmem:[#allocation13 + $0xe8] sm:$0xff]  ;;  %v4632_v57 = vunpack.c.l.bf16 %v3669_v41 }
 0x693   :  { %5832 = vmatpush.msrb.mxu2 %v4648_v52  ;;  %5855 = vmatpush.msrb.mxu3 %v4712_v21  ;;  %v5472_v29 = vadd.f32 %v5471_v51, %v5449_v59  ;;  %v3789_v16 = vunpack.c.h.bf16 %v7274_v17  ;;  %v5429_v52 = vadd.f32 %v5428_v61, %v5406_v33  ;;  %v7278_v51 = vld [vmem:[#allocation13 + $0xc8] sm:$0xff]  ;;  %v7280_v2 = vld [vmem:[#allocation13 + $0x2f8] sm:$0xff] }
 0x694   :  { %5790 = vmatpush.msrb.mxu0 %v4504_v55  ;;  %5813 = vmatpush.msrb.mxu1 %v4568_v37  ;;  %v4696_v55 = vunpack.c.l.bf16 %v3701_v62  ;;  %v7276_v37 = vld [vmem:[#allocation13 + $0xd8] sm:$0xff]  ;;  %v7287_v36 = vld [vmem:[#allocation13 + $0x1a8] sm:$0xff] }
 0x695   :  { %5833 = vmatpush.msrb.mxu2 %v4644_v15  ;;  %5856 = vmatpush.msrb.mxu3 %v4708_v34  ;;  %v10390_v63 = vadd.f32 %v5494_v39, %v5472_v29  ;;  %v3785_v60 = vunpack.c.h.bf16 %v7276_v37  ;;  %v4628_v15 = vunpack.c.l.bf16 %v3667_v44  ;;  %v4692_v34 = vunpack.c.l.bf16 %v3699_v20  ;;  %v5451_v59 = vpop.f32.mrf.mxu1  ;;  %v7281_v39 = vld [vmem:[#allocation13 + $0x3f8] sm:$0xff]  ;;  %v7284_v20 = vld [vmem:[#allocation13 + $0x2e8] sm:$0xff] }
 0x696   :  { %5791 = vmatpush.msrb.mxu0 %v4500_v26  ;;  %5814 = vmatpush.msrb.mxu1 %v4564_v45  ;;  %v5452_v26 = vadd.f32 %v5451_v59, %v5429_v52  ;;  %v3921_v29 = vunpack.c.h.bf16 %v7280_v2  ;;  %v3985_v33 = vunpack.c.h.bf16 %v7281_v39  ;;  %v7283_v17 = vld [vmem:[#allocation13 + $0x1b8] sm:$0xff]  ;;  %v3917_v52 = vunpack.c.h.bf16 %v7284_v20  ;;  %v7286_v37 = vld [vmem:[#allocation13 + $0xa8] sm:$0xff] }
 0x697   :  { %5834 = vmatpush.msrb.mxu2 %v4640_v28  ;;  %5857 = vmatpush.msrb.mxu3 %v4704_v11  ;;  %v10393_v21 = vmul.f32 0.70710677, %v10390_v63  ;;  %v3781_v28 = vunpack.c.h.bf16 %v7278_v51  ;;  %v7279_v11 = vld [vmem:[#allocation13 + $0x1c8] sm:$0xff]  ;;  %v7288_v51 = vld [vmem:[#allocation13 + $0x2d8] sm:$0xff] }
 0x698   :  { %5792 = vmatmul.f32.vlgmr.msrb.gmra.mxu0 %v9848_v58  ;;  %5815 = vmatmul.f32.vlgmr.msrb.gmra.mxu1 %v10845_v22  ;;  %v3845_v47 = vunpack.c.h.bf16 %v7279_v11  ;;  %v10848_v59 = vld [vmem:[#allocation44_spill] sm:$0xff]  ;;  %v7289_v11 = vld [vmem:[#allocation13 + $0x3d8] sm:$0xff] }
 0x699   :  { %5868 = vmatpush.msra.mxu0 %v3793_v24  ;;  %5891 = vmatpush.msra.mxu1 %v3857_v49  ;;  %v6292_v12 = vmul.f32 %v10393_v21, %v10393_v21  ;;  %v7282_v49 = vld [vmem:[#allocation13 + $0xb8] sm:$0xff]  ;;  %v7295_v20 = vld [vmem:[#allocation13 + $0x188] sm:$0xff] }
 0x69a   :  { %5835 = vmatpush.msrb.mxu2 %v4636_v7  ;;  %5858 = vmatpush.msrb.mxu3 %v4700_v19  ;;  %v3777_v41 = vunpack.c.h.bf16 %v7282_v49  ;;  %v10846_v7 = vld [vmem:[#allocation42_spill] sm:$0xff]  ;;  %v10847_v19 = vld [vmem:[#allocation43_spill] sm:$0xff] }
 0x69b   :  { %5869 = vmatpush.msra.mxu0 %v3789_v16  ;;  %5892 = vmatpush.msra.mxu1 %v3853_v4  ;;  %v10399_v45 = vmin.f32 %v6292_v12, 16.0  ;;  %v3841_v16 = vunpack.c.h.bf16 %v7283_v17  ;;  %v7290_v2 = vld [vmem:[#allocation13 + $0x98] sm:$0xff] }
 0x69c   :  { %5836 = vmatpush.msrb.mxu2 %v4632_v57  ;;  %5859 = vmatpush.msrb.mxu3 %v4696_v55  ;;  %v5474_v61 = vpop.f32.mrf.mxu2  ;;  %v5497_v62 = vpop.f32.mrf.mxu3  ;;  %v7285_v57 = vld [vmem:[#allocation13 + $0x3e8] sm:$0xff] }
 0x69d   :  { %5870 = vmatpush.msra.mxu0 %v3785_v60  ;;  %5893 = vmatpush.msra.mxu1 %v3849_v8  ;;  %v6294_v53 = vmul.f32 2.1237322e-06, %v10399_v45  ;;  %v6305_v24 = vmul.f32 3.8918573e-05, %v10399_v45  ;;  %v5475_v32 = vadd.f32 %v5474_v61, %v5452_v26  ;;  %v3981_v55 = vunpack.c.h.bf16 %v7285_v57  ;;  %v10849_v26 = vld [vmem:[#allocation45_spill] sm:$0xff] }
 0x69e   :  { %5837 = vmatpush.msrb.mxu2 %v4628_v15  ;;  %5860 = vmatpush.msrb.mxu3 %v4692_v34  ;;  %v3773_v60 = vunpack.c.h.bf16 %v7286_v37  ;;  %v3837_v8 = vunpack.c.h.bf16 %v7287_v36  ;;  %v7291_v61 = vld [vmem:[#allocation13 + $0x198] sm:$0xff]  ;;  %v3829_v57 = vunpack.c.h.bf16 %v7295_v20 }
 0x69f   :  { %5838 = vmatmul.f32.vlgmr.msrb.gmra.mxu2 %v10846_v7  ;;  %5861 = vmatmul.f32.vlgmr.msrb.gmra.mxu3 %v10847_v19  ;;  %v6295_v42 = vadd.f32 0.00028619796, %v6294_v53  ;;  %v6306_v4 = vadd.f32 0.001143296, %v6305_v24  ;;  %v10405_v44 = vadd.f32 %v5497_v62, %v5475_v32  ;;  %v3833_v39 = vunpack.c.h.bf16 %v7291_v61  ;;  %v7292_v32 = vld [vmem:[#allocation13 + $0x2c8] sm:$0xff]  ;;  %v7296_v37 = vld [vmem:[#allocation13 + $0x2b8] sm:$0xff] }
 0x6a0   :  { %5871 = vmatpush.msra.mxu0 %v3781_v28  ;;  %5894 = vmatpush.msra.mxu1 %v3845_v47  ;;  %v3913_v28 = vunpack.c.h.bf16 %v7288_v51  ;;  %v3977_v47 = vunpack.c.h.bf16 %v7289_v11  ;;  %v3909_v49 = vunpack.c.h.bf16 %v7292_v32  ;;  %v7293_v62 = vld [vmem:[#allocation13 + $0x3c8] sm:$0xff]  ;;  %v3905_v36 = vunpack.c.h.bf16 %v7296_v37  ;;  %v10850_v61 = vld [vmem:[#allocation37_spill] sm:$0xff] }
 0x6a1   :  { %5914 = vmatpush.msra.mxu2 %v3921_v29  ;;  %5937 = vmatpush.msra.mxu3 %v3985_v33  ;;  %v6296_v12 = vmul.f32 %v6295_v42, %v10399_v45  ;;  %v6307_v15 = vmul.f32 %v6306_v4, %v10399_v45  ;;  %v10410_v34 = vmul.f32 0.70710677, %v10405_v44  ;;  %v3769_v29 = vunpack.c.h.bf16 %v7290_v2 }
 0x6a2   :  { %5795 = vmatmul.f32.gmra.mxu0 %v10848_v59  ;;  %5818 = vmatmul.f32.gmra.mxu1 %v10849_v26  ;;  %v3973_v17 = vunpack.c.h.bf16 %v7293_v62 }
 0x6a3   :  { %5872 = vmatpush.msra.mxu0 %v3777_v41  ;;  %5895 = vmatpush.msra.mxu1 %v3841_v16  ;;  %v6297_v33 = vadd.f32 0.0036580483, %v6296_v12  ;;  %v6308_v53 = vadd.f32 0.014752088, %v6307_v15  ;;  %v6452_v24 = vmul.f32 %v10410_v34, %v10410_v34  ;;  %v7294_v41 = vld [vmem:[#allocation13 + $0x88] sm:$0xff]  ;;  %v7297_v12 = vld [vmem:[#allocation13 + $0x3b8] sm:$0xff] }
 0x6a4   :  { %5915 = vmatpush.msra.mxu2 %v3917_v52  ;;  %5938 = vmatpush.msra.mxu3 %v3981_v55  ;;  %v3765_v16 = vunpack.c.h.bf16 %v7294_v41  ;;  %v7298_v15 = vld [vmem:[#allocation13 + $0x78] sm:$0xff] }
 0x6a5   :  { %5873 = vmatpush.msra.mxu0 %v3773_v60  ;;  %5896 = vmatpush.msra.mxu1 %v3837_v8  ;;  %v6309_v42 = vmul.f32 %v6308_v53, %v10399_v45  ;;  %v10417_v4 = vmin.f32 %v6452_v24, 16.0  ;;  %v6298_v52 = vmul.f32 %v6297_v33, %v10399_v45  ;;  %v3969_v60 = vunpack.c.h.bf16 %v7297_v12  ;;  %v7301_v53 = vld [vmem:[#allocation13 + $0x3a8] sm:$0xff]  ;;  %v7304_v41 = vld [vmem:[#allocation13 + $0x298] sm:$0xff] }
 0x6a6   :  { %5916 = vmatpush.msra.mxu2 %v3913_v28  ;;  %5939 = vmatpush.msra.mxu3 %v3977_v47  ;;  %v3761_v51 = vunpack.c.h.bf16 %v7298_v15  ;;  %v7299_v28 = vld [vmem:[#allocation13 + $0x178] sm:$0xff]  ;;  %v3965_v24 = vunpack.c.h.bf16 %v7301_v53  ;;  %v3897_v20 = vunpack.c.h.bf16 %v7304_v41 }
 0x6a7   :  { %5874 = vmatpush.msra.mxu0 %v3769_v29  ;;  %5897 = vmatpush.msra.mxu1 %v3833_v39  ;;  %v6310_v55 = vadd.f32 0.112945676, %v6309_v42  ;;  %v6454_v8 = vmul.f32 2.1237322e-06, %v10417_v4  ;;  %v3825_v11 = vunpack.c.h.bf16 %v7299_v28  ;;  %v6465_v47 = vmul.f32 3.8918573e-05, %v10417_v4 }
 0x6a8   :  { %5917 = vmatpush.msra.mxu2 %v3909_v49  ;;  %5940 = vmatpush.msra.mxu3 %v3973_v17  ;;  %v10851_v29 = vld [vmem:[#allocation40_spill] sm:$0xff]  ;;  %v6299_v12 = vadd.f32 0.05243302, %v6298_v52  ;;  %v7305_v15 = vld [vmem:[#allocation13 + $0x398] sm:$0xff] }
 0x6a9   :  { %v6311_v2 = vmul.f32 %v6310_v55, %v10399_v45  ;;  %5841 = vmatmul.f32.gmra.mxu2 %v10850_v61  ;;  %5864 = vmatmul.f32.gmra.mxu3 %v10851_v29  ;;  %v7300_v39 = vld [vmem:[#allocation13 + $0x2a8] sm:$0xff]  ;;  %v6455_v32 = vadd.f32 0.00028619796, %v6454_v8  ;;  %v6466_v37 = vadd.f32 0.001143296, %v6465_v47  ;;  %v3961_v28 = vunpack.c.h.bf16 %v7305_v15  ;;  %v7306_v8 = vld [vmem:[#allocation13 + $0x58] sm:$0xff] }
 0x6aa   :  { %v3901_v33 = vunpack.c.h.bf16 %v7300_v39  ;;  %5875 = vmatpush.msra.mxu0 %v3765_v16  ;;  %5898 = vmatpush.msra.mxu1 %v3829_v57  ;;  %v7302_v49 = vld [vmem:[#allocation13 + $0x68] sm:$0xff]  ;;  %v3753_v16 = vunpack.c.h.bf16 %v7306_v8  ;;  %v7307_v57 = vld [vmem:[#allocation13 + $0x158] sm:$0xff] }
 0x6ab   :  { %v3757_v62 = vunpack.c.h.bf16 %v7302_v49  ;;  %v7303_v17 = vld [vmem:[#allocation13 + $0x168] sm:$0xff]  ;;  %v6312_v55 = vadd.f32 0.4994258, %v6311_v2  ;;  %5918 = vmatpush.msra.mxu2 %v3905_v36  ;;  %5941 = vmatpush.msra.mxu3 %v3969_v60  ;;  %v6456_v39 = vmul.f32 %v6455_v32, %v10417_v4  ;;  %v3817_v53 = vunpack.c.h.bf16 %v7307_v57  ;;  %v7312_v15 = vld [vmem:[#allocation13 + $0x278] sm:$0xff] }
 0x6ac   :  { %v3821_v42 = vunpack.c.h.bf16 %v7303_v17  ;;  %5876 = vmatpush.msra.mxu0 %v3761_v51  ;;  %5899 = vmatpush.msra.mxu1 %v3825_v11  ;;  %v6467_v49 = vmul.f32 %v6466_v37, %v10417_v4  ;;  %v7308_v52 = vld [vmem:[#allocation13 + $0x288] sm:$0xff]  ;;  %v3889_v8 = vunpack.c.h.bf16 %v7312_v15  ;;  %v6300_v57 = vmul.f32 %v6299_v12, %v10399_v45 }
 0x6ad   :  { %v6313_v17 = vmul.f32 %v6312_v55, %v10399_v45  ;;  %5919 = vmatpush.msra.mxu2 %v3901_v33  ;;  %5942 = vmatpush.msra.mxu3 %v3965_v24  ;;  %v3893_v47 = vunpack.c.h.bf16 %v7308_v52  ;;  %v7309_v36 = vld [vmem:[#allocation13 + $0x388] sm:$0xff]  ;;  %v6457_v33 = vadd.f32 0.0036580483, %v6456_v39  ;;  %v7313_v24 = vld [vmem:[#allocation13 + $0x378] sm:$0xff] }
 0x6ae   :  { %v3957_v60 = vunpack.c.h.bf16 %v7309_v36  ;;  %5877 = vmatpush.msra.mxu0 %v3757_v62  ;;  %5900 = vmatpush.msra.mxu1 %v3821_v42  ;;  %v6468_v2 = vadd.f32 0.014752088, %v6467_v49  ;;  %v7310_v32 = vld [vmem:[#allocation13 + $0x48] sm:$0xff]  ;;  %v3953_v55 = vunpack.c.h.bf16 %v7313_v24  ;;  %v7314_v42 = vld [vmem:[#allocation13 + $0x38] sm:$0xff] }
 0x6af   :  { %v3749_v51 = vunpack.c.h.bf16 %v7310_v32  ;;  %v7311_v11 = vld [vmem:[#allocation13 + $0x148] sm:$0xff]  ;;  %v10429_v37 = vadd.f32 1.0, %v6313_v17  ;;  %5920 = vmatpush.msra.mxu2 %v3897_v20  ;;  %5943 = vmatpush.msra.mxu3 %v3961_v28  ;;  %v3745_v49 = vunpack.c.h.bf16 %v7314_v42  ;;  %v7315_v52 = vld [vmem:[#allocation13 + $0x138] sm:$0xff]  ;;  %v6458_v15 = vmul.f32 %v6457_v33, %v10417_v4 }
 0x6b0   :  { %v3813_v41 = vunpack.c.h.bf16 %v7311_v11  ;;  %5878 = vmatpush.msra.mxu0 %v3753_v16  ;;  %5901 = vmatpush.msra.mxu1 %v3817_v53  ;;  %v6469_v62 = vmul.f32 %v6468_v2, %v10417_v4  ;;  %v3809_v36 = vunpack.c.h.bf16 %v7315_v52  ;;  %v7316_v12 = vld [vmem:[#allocation13 + $0x268] sm:$0xff]  ;;  %v6301_v2 = vadd.f32 0.18741608, %v6300_v57  ;;  %v7320_v24 = vld [vmem:[#allocation13 + $0x258] sm:$0xff] }
 0x6b1   :  { %7002 = vrcp.f32 %v10429_v37  ;;  %5921 = vmatpush.msra.mxu2 %v3893_v47  ;;  %5944 = vmatpush.msra.mxu3 %v3957_v60  ;;  %v3885_v17 = vunpack.c.h.bf16 %v7316_v12  ;;  %v7317_v32 = vld [vmem:[#allocation13 + $0x368] sm:$0xff]  ;;  %v3881_v42 = vunpack.c.h.bf16 %v7320_v24  ;;  %v7321_v47 = vld [vmem:[#allocation13 + $0x358] sm:$0xff]  ;;  %vm6320_vm13 = vweird.f32 %v10429_v37 }
 0x6b2   :  { %v3949_v20 = vunpack.c.h.bf16 %v7317_v32  ;;  %v6470_v28 = vadd.f32 0.112945676, %v6469_v62  ;;  %5879 = vmatpush.msra.mxu0 %v3749_v51  ;;  %5902 = vmatpush.msra.mxu1 %v3813_v41  ;;  %v7318_v39 = vld [vmem:[#allocation13 + $0x28] sm:$0xff]  ;;  %v3945_v60 = vunpack.c.h.bf16 %v7321_v47  ;;  %v7322_v62 = vld [vmem:[#allocation13 + $0x18] sm:$0xff] }
 0x6b3   :  { %v3741_v16 = vunpack.c.h.bf16 %v7318_v39  ;;  %v7319_v53 = vld [vmem:[#allocation13 + $0x128] sm:$0xff]  ;;  %5922 = vmatpush.msra.mxu2 %v3889_v8  ;;  %5945 = vmatpush.msra.mxu3 %v3953_v55  ;;  %v3737_v51 = vunpack.c.h.bf16 %v7322_v62  ;;  %v7323_v41 = vld [vmem:[#allocation13 + $0x118] sm:$0xff] }
 0x6b4   :  { %v3805_v11 = vunpack.c.h.bf16 %v7319_v53  ;;  %v6471_v52 = vmul.f32 %v6470_v28, %v10417_v4  ;;  %5880 = vmatpush.msra.mxu0 %v3745_v49  ;;  %5903 = vmatpush.msra.mxu1 %v3809_v36  ;;  %v3801_v12 = vunpack.c.h.bf16 %v7323_v41  ;;  %v7324_v32 = vld [vmem:[#allocation13 + $0x248] sm:$0xff]  ;;  %v6302_v49 = vmul.f32 %v6301_v2, %v10399_v45  ;;  %v7329_v62 = vld [vmem:[#allocation13 + $0x338] sm:$0xff] }
 0x6b5   :  { %5923 = vmatpush.msra.mxu2 %v3885_v17  ;;  %5946 = vmatpush.msra.mxu3 %v3949_v20  ;;  %v3877_v57 = vunpack.c.h.bf16 %v7324_v32  ;;  %v7325_v39 = vld [vmem:[#allocation13 + $0x348] sm:$0xff]  ;;  %v6459_v36 = vadd.f32 0.05243302, %v6458_v15  ;;  %v7328_v17 = vld [vmem:[#allocation13 + $0x238] sm:$0xff]  ;;  %v3937_v41 = vunpack.c.h.bf16 %v7329_v62 }
 0x6b6   :  { %v3941_v33 = vunpack.c.h.bf16 %v7325_v39  ;;  %v6472_v8 = vadd.f32 0.4994258, %v6471_v52  ;;  %5881 = vmatpush.msra.mxu0 %v3741_v16  ;;  %5904 = vmatpush.msra.mxu1 %v3805_v11  ;;  %v7326_v55 = vld [vmem:[#allocation13 + $0x8] sm:$0xff]  ;;  %v3873_v20 = vunpack.c.h.bf16 %v7328_v17  ;;  %v7330_v11 = vld [vmem:[#allocation13 + $0x4f8] sm:$0xff] }
 0x6b7   :  { %v3733_v53 = vunpack.c.h.bf16 %v7326_v55  ;;  %v7327_v24 = vld [vmem:[#allocation13 + $0x108] sm:$0xff]  ;;  %v10435_v28 = vpop.eup %7002  ;;  %5924 = vmatpush.msra.mxu2 %v3881_v42  ;;  %5947 = vmatpush.msra.mxu3 %v3945_v60  ;;  %v4049_v32 = vunpack.c.h.bf16 %v7330_v11  ;;  %v7331_v39 = vld [vmem:[#allocation13 + $0x5f8] sm:$0xff]  ;;  %v6303_v11 = vadd.f32 1.1283791, %v6302_v49 }
 0x6b8   :  { %v3797_v47 = vunpack.c.h.bf16 %v7327_v24  ;;  %v6316_v52 = vmul.f32 %v10435_v28, %v10429_v37  ;;  %v6473_v16 = vmul.f32 %v6472_v8, %v10417_v4  ;;  %5882 = vmatpush.msra.mxu0 %v3737_v51  ;;  %5905 = vmatpush.msra.mxu1 %v3801_v12  ;;  %v4113_v45 = vunpack.c.h.bf16 %v7331_v39  ;;  %v7332_v2 = vld [vmem:[#allocation13 + $0x228] sm:$0xff]  ;;  %v7336_v12 = vld [vmem:[#allocation13 + $0x218] sm:$0xff] }
 0x6b9   :  { %5925 = vmatpush.msra.mxu2 %v3877_v57  ;;  %5948 = vmatpush.msra.mxu3 %v3941_v33  ;;  %v3869_v15 = vunpack.c.h.bf16 %v7332_v2  ;;  %v7333_v42 = vld [vmem:[#allocation13 + $0x328] sm:$0xff]  ;;  %v3865_v29 = vunpack.c.h.bf16 %v7336_v12  ;;  %v6326_v57 = vand.u32 2147483648, %v10429_v37  ;;  %v6460_v33 = vmul.f32 %v6459_v36, %v10417_v4  ;;  %v7337_v39 = vld [vmem:[#allocation13 + $0x318] sm:$0xff] }
 0x6ba   :  { %v3933_v60 = vunpack.c.h.bf16 %v7333_v42  ;;  %v7334_v55 = vld [vmem:[#allocation13 + $0x4e8] sm:$0xff]  ;;  %v6317_v17 = vsub.f32 1.0, %v6316_v52  ;;  %v10441_v62 = vadd.f32 1.0, %v6473_v16  ;;  %5883 = vmatpush.msra.mxu0 %v3733_v53  ;;  %5906 = vmatpush.msra.mxu1 %v3797_v47  ;;  %v3929_v2 = vunpack.c.h.bf16 %v7337_v39  ;;  %v7338_v47 = vld [vmem:[#allocation13 + $0x4d8] sm:$0xff] }
 0x6bb   :  { %v4045_v24 = vunpack.c.h.bf16 %v7334_v55  ;;  %v7335_v8 = vld [vmem:[#allocation13 + $0x5e8] sm:$0xff]  ;;  %5926 = vmatpush.msra.mxu2 %v3873_v20  ;;  %5949 = vmatpush.msra.mxu3 %v3937_v41  ;;  %vm6321_vm12 = vweird.f32 %v10435_v28  ;;  %v6324_v53 = vand.u32 2147483647, %v10429_v37  ;;  %v4041_v49 = vunpack.c.h.bf16 %v7338_v47  ;;  %v7339_v36 = vld [vmem:[#allocation13 + $0x5d8] sm:$0xff] }
 0x6bc   :  { %v4109_v51 = vunpack.c.h.bf16 %v7335_v8  ;;  %v6318_v42 = vmul.f32 %v10435_v28, %v6317_v17  ;;  %7004 = vrcp.f32 %v10441_v62  ;;  %5884 = vmatmul.f32.vlgmr.msra.gmra.mxu0 %v10827_v40  ;;  %5907 = vmatmul.f32.vlgmr.msra.gmra.mxu1 %v10828_v13  ;;  %v4105_v20 = vunpack.c.h.bf16 %v7339_v36  ;;  %v7340_v52 = vld [vmem:[#allocation13 + $0x208] sm:$0xff]  ;;  %vm6322_vm14 = vmor %vm6320_vm13, %vm6321_vm12  ;;  %v7344_v39 = vld [vmem:[#allocation13 + $0x6f8] sm:$0xff] }
 0x6bd   :  { %5960 = vmatpush.msrb.mxu0 %v4049_v32  ;;  %5983 = vmatpush.msrb.mxu1 %v4113_v45  ;;  %v3861_v16 = vunpack.c.h.bf16 %v7340_v52  ;;  %v7341_v55 = vld [vmem:[#allocation13 + $0x308] sm:$0xff]  ;;  %v6327_v40 = vor.u32 1.1754944e-38, %v6326_v57  ;;  %v6461_v13 = vadd.f32 0.18741608, %v6460_v33  ;;  %v6304_v8 = vmul.f32 %v6303_v11, %v10393_v21  ;;  %v7345_v57 = vld [vmem:[#allocation13 + $0x7f8] sm:$0xff] }
 0x6be   :  { %v6319_v41 = vadd.f32 %v10435_v28, %v6318_v42  ;;  %5927 = vmatpush.msra.mxu2 %v3869_v15  ;;  %5950 = vmatpush.msra.mxu3 %v3933_v60  ;;  %v3925_v17 = vunpack.c.h.bf16 %v7341_v55  ;;  %v7342_v32 = vld [vmem:[#allocation13 + $0x4c8] sm:$0xff]  ;;  %vm6325_vm15 = vcmp.eq.f32.partialorder %v6324_v53, 8.507059e+37  ;;  %v4177_v42 = vunpack.c.h.bf16 %v7344_v39 }
 0x6bf   :  { %5961 = vmatpush.msrb.mxu0 %v4045_v24  ;;  %5984 = vmatpush.msrb.mxu1 %v4109_v51  ;;  %v4037_v45 = vunpack.c.h.bf16 %v7342_v32  ;;  %v7343_v37 = vld [vmem:[#allocation13 + $0x5c8] sm:$0xff]  ;;  %v4241_v33 = vunpack.c.h.bf16 %v7345_v57  ;;  %v6237_v51 = vmul.f32 0.5, %v10390_v63  ;;  %v6462_v21 = vmul.f32 %v6461_v13, %v10417_v4 }
 0x6c0   :  { %v6323_v12 = vsel %vm6322_vm14, %v10435_v28, %v6319_v41  ;;  %5928 = vmatpush.msra.mxu2 %v3865_v29  ;;  %5951 = vmatpush.msra.mxu3 %v3929_v2  ;;  %v4101_v15 = vunpack.c.h.bf16 %v7343_v37  ;;  %v7346_v28 = vld [vmem:[#allocation13 + $0x4b8] sm:$0xff]  ;;  %v7348_v63 = vld [vmem:[#allocation13 + $0x6e8] sm:$0xff]  ;;  %vm6480_vm3 = vweird.f32 %v10441_v62 }
 0x6c1   :  { %v6328_v60 = vsel %vm6325_vm15, %v6327_v40, %v6323_v12  ;;  %5962 = vmatpush.msrb.mxu0 %v4041_v49  ;;  %5985 = vmatpush.msrb.mxu1 %v4105_v20  ;;  %v4033_v11 = vunpack.c.h.bf16 %v7346_v28  ;;  %v7347_v2 = vld [vmem:[#allocation13 + $0x5b8] sm:$0xff]  ;;  %v4173_v36 = vunpack.c.h.bf16 %v7348_v63  ;;  %v7349_v20 = vld [vmem:[#allocation13 + $0x7e8] sm:$0xff] }
 0x6c2   :  { %v10457_v24 = vpop.eup %7004  ;;  %v6329_v47 = vmul.f32 %v6328_v60, %v6304_v8  ;;  %5929 = vmatpush.msra.mxu2 %v3861_v16  ;;  %5952 = vmatpush.msra.mxu3 %v3925_v17  ;;  %v4097_v53 = vunpack.c.h.bf16 %v7347_v2  ;;  %v4237_v41 = vunpack.c.h.bf16 %v7349_v20  ;;  %v7350_v52 = vld [vmem:[#allocation13 + $0x4a8] sm:$0xff]  ;;  %v7352_v17 = vld [vmem:[#allocation13 + $0x6d8] sm:$0xff]  ;;  %v6486_v8 = vand.u32 2147483648, %v10441_v62 }
 0x6c3   :  { %v6476_v29 = vmul.f32 %v10457_v24, %v10441_v62  ;;  %5930 = vmatmul.f32.vlgmr.msra.gmra.mxu2 %v10829_v31  ;;  %5953 = vmatmul.f32.vlgmr.msra.gmra.mxu3 %v10830_v9  ;;  %v4029_v4 = vunpack.c.h.bf16 %v7350_v52  ;;  %v7351_v55 = vld [vmem:[#allocation13 + $0x5a8] sm:$0xff]  ;;  %v4169_v9 = vunpack.c.h.bf16 %v7352_v17  ;;  %v7353_v40 = vld [vmem:[#allocation13 + $0x7d8] sm:$0xff]  ;;  %v6463_v60 = vadd.f32 1.1283791, %v6462_v21 }
 0x6c4   :  { %v6716_v49 = vclamps-f32 %v6329_v47, 1.0  ;;  %5963 = vmatpush.msrb.mxu0 %v4037_v45  ;;  %5986 = vmatpush.msrb.mxu1 %v4101_v15  ;;  %v4093_v31 = vunpack.c.h.bf16 %v7351_v55  ;;  %v4233_v13 = vunpack.c.h.bf16 %v7353_v40  ;;  %v7354_v45 = vld [vmem:[#allocation13 + $0x498] sm:$0xff]  ;;  %vm6481_vm2 = vweird.f32 %v10457_v24  ;;  %v7357_v47 = vld [vmem:[#allocation13 + $0x7c8] sm:$0xff] }
 0x6c5   :  { %v6477_v16 = vsub.f32 1.0, %v6476_v29  ;;  %6006 = vmatpush.msrb.mxu2 %v4177_v42  ;;  %6029 = vmatpush.msrb.mxu3 %v4241_v33  ;;  %v4025_v12 = vunpack.c.h.bf16 %v7354_v45  ;;  %v7355_v37 = vld [vmem:[#allocation13 + $0x598] sm:$0xff]  ;;  %v6484_v42 = vand.u32 2147483647, %v10441_v62  ;;  %v7356_v33 = vld [vmem:[#allocation13 + $0x6c8] sm:$0xff]  ;;  %vm10475_vm4 = vmor %vm6480_vm3, %vm6481_vm2  ;;  %v6464_v62 = vmul.f32 %v6463_v60, %v10410_v34 }
 0x6c6   :  { %v6573_v32 = vadd.f32 1.0, %v6716_v49  ;;  %5887 = vmatmul.f32.gmra.mxu0 %v10831_v50  ;;  %5910 = vmatmul.f32.gmra.mxu1 %v10832_v14  ;;  %v4089_v15 = vunpack.c.h.bf16 %v7355_v37  ;;  %v4165_v50 = vunpack.c.h.bf16 %v7356_v33  ;;  %v4229_v14 = vunpack.c.h.bf16 %v7357_v47  ;;  %v7358_v28 = vld [vmem:[#allocation13 + $0x488] sm:$0xff]  ;;  %v7360_v49 = vld [vmem:[#allocation13 + $0x6b8] sm:$0xff] }
 0x6c7   :  { %v6478_v39 = vmul.f32 %v10457_v24, %v6477_v16  ;;  %5964 = vmatpush.msrb.mxu0 %v4033_v11  ;;  %5987 = vmatpush.msrb.mxu1 %v4097_v53  ;;  %v4021_v11 = vunpack.c.h.bf16 %v7358_v28  ;;  %v7359_v2 = vld [vmem:[#allocation13 + $0x588] sm:$0xff]  ;;  %v4161_v63 = vunpack.c.h.bf16 %v7360_v49  ;;  %vm6485_vm5 = vcmp.eq.f32.partialorder %v6484_v42, 8.507059e+37  ;;  %v7361_v20 = vld [vmem:[#allocation13 + $0x7b8] sm:$0xff] }
 0x6c8   :  { %v6581_v57 = vmul.f32 %v6573_v32, %v6237_v51  ;;  %6007 = vmatpush.msrb.mxu2 %v4173_v36  ;;  %6030 = vmatpush.msrb.mxu3 %v4237_v41  ;;  %v6487_v51 = vor.u32 1.1754944e-38, %v6486_v8  ;;  %v4085_v53 = vunpack.c.h.bf16 %v7359_v2  ;;  %v4225_v41 = vunpack.c.h.bf16 %v7361_v20  ;;  %v7363_v55 = vld [vmem:[#allocation13 + $0x578] sm:$0xff]  ;;  %v7364_v34 = vld [vmem:[#allocation13 + $0x6a8] sm:$0xff] }
 0x6c9   :  { %v6479_v29 = vadd.f32 %v10457_v24, %v6478_v39  ;;  %5965 = vmatpush.msrb.mxu0 %v4029_v4  ;;  %5988 = vmatpush.msrb.mxu1 %v4093_v31  ;;  %v7362_v4 = vld [vmem:[#allocation13 + $0x478] sm:$0xff]  ;;  %v4081_v31 = vunpack.c.h.bf16 %v7363_v55  ;;  %v7367_v8 = vld [vmem:[#allocation13 + $0x568] sm:$0xff]  ;;  %v6241_v33 = vmul.f32 0.5, %v10405_v44 }
 0x6ca   :  { %6589 = vst [vmem:[#allocation16 + $0x8] sm:$0xff] %v6581_v57  ;;  %6008 = vmatpush.msrb.mxu2 %v4169_v9  ;;  %6031 = vmatpush.msrb.mxu3 %v4233_v13  ;;  %v4017_v16 = vunpack.c.h.bf16 %v7362_v4  ;;  %v4157_v9 = vunpack.c.h.bf16 %v7364_v34  ;;  %v7366_v13 = vld [vmem:[#allocation13 + $0x468] sm:$0xff]  ;;  %v4077_v45 = vunpack.c.h.bf16 %v7367_v8  ;;  %v7368_v37 = vld [vmem:[#allocation13 + $0x698] sm:$0xff] }
 0x6cb   :  { %v6483_v36 = vsel %vm10475_vm4, %v10457_v24, %v6479_v29  ;;  %5966 = vmatpush.msrb.mxu0 %v4025_v12  ;;  %5989 = vmatpush.msrb.mxu1 %v4089_v15  ;;  %v7365_v24 = vld [vmem:[#allocation13 + $0x7a8] sm:$0xff]  ;;  %v4013_v32 = vunpack.c.h.bf16 %v7366_v13  ;;  %v4153_v15 = vunpack.c.h.bf16 %v7368_v37  ;;  %v7369_v60 = vld [vmem:[#allocation13 + $0x798] sm:$0xff] }
 0x6cc   :  { %v6488_v52 = vsel %vm6485_vm5, %v6487_v51, %v6483_v36  ;;  %6009 = vmatpush.msrb.mxu2 %v4165_v50  ;;  %6032 = vmatpush.msrb.mxu3 %v4229_v14  ;;  %v4221_v40 = vunpack.c.h.bf16 %v7365_v24  ;;  %v4217_v39 = vunpack.c.h.bf16 %v7369_v60  ;;  %v7371_v42 = vld [vmem:[#allocation13 + $0x558] sm:$0xff]  ;;  %v7372_v47 = vld [vmem:[#allocation13 + $0x688] sm:$0xff] }
 0x6cd   :  { %v6489_v17 = vmul.f32 %v6488_v52, %v6464_v62  ;;  %5933 = vmatmul.f32.gmra.mxu2 %v10833_v3  ;;  %5956 = vmatmul.f32.gmra.mxu3 %v10834_v0  ;;  %v7370_v3 = vld [vmem:[#allocation13 + $0x458] sm:$0xff]  ;;  %v4073_v57 = vunpack.c.h.bf16 %v7371_v42  ;;  %v4149_v14 = vunpack.c.h.bf16 %v7372_v47  ;;  %v7373_v29 = vld [vmem:[#allocation13 + $0x788] sm:$0xff] }
 0x6ce   :  { %5967 = vmatpush.msrb.mxu0 %v4021_v11  ;;  %5990 = vmatpush.msrb.mxu1 %v4085_v53  ;;  %v4009_v0 = vunpack.c.h.bf16 %v7370_v3  ;;  %v4213_v21 = vunpack.c.h.bf16 %v7373_v29  ;;  %v7374_v51 = vld [vmem:[#allocation13 + $0x448] sm:$0xff]  ;;  %v7376_v49 = vld [vmem:[#allocation13 + $0x678] sm:$0xff] }
 0x6cf   :  { %v6720_v12 = vclamps-f32 %v6489_v17, 1.0  ;;  %6010 = vmatpush.msrb.mxu2 %v4161_v63  ;;  %6033 = vmatpush.msrb.mxu3 %v4225_v41  ;;  %v4005_v28 = vunpack.c.h.bf16 %v7374_v51  ;;  %v7375_v11 = vld [vmem:[#allocation13 + $0x548] sm:$0xff]  ;;  %v4145_v63 = vunpack.c.h.bf16 %v7376_v49  ;;  %v7377_v62 = vld [vmem:[#allocation13 + $0x778] sm:$0xff] }
 0x6d0   :  { %5968 = vmatpush.msrb.mxu0 %v4017_v16  ;;  %5991 = vmatpush.msrb.mxu1 %v4081_v31  ;;  %v4069_v2 = vunpack.c.h.bf16 %v7375_v11  ;;  %v4209_v44 = vunpack.c.h.bf16 %v7377_v62  ;;  %v7378_v36 = vld [vmem:[#allocation13 + $0x438] sm:$0xff]  ;;  %v7380_v4 = vld [vmem:[#allocation13 + $0x668] sm:$0xff] }
 0x6d1   :  { %v6577_v50 = vadd.f32 1.0, %v6720_v12  ;;  %6011 = vmatpush.msrb.mxu2 %v4157_v9  ;;  %6034 = vmatpush.msrb.mxu3 %v4221_v40  ;;  %v4001_v20 = vunpack.c.h.bf16 %v7378_v36  ;;  %v7379_v41 = vld [vmem:[#allocation13 + $0x538] sm:$0xff]  ;;  %v4141_v16 = vunpack.c.h.bf16 %v7380_v4  ;;  %v7381_v55 = vld [vmem:[#allocation13 + $0x768] sm:$0xff] }
 0x6d2   :  { %5969 = vmatpush.msrb.mxu0 %v4013_v32  ;;  %5992 = vmatpush.msrb.mxu1 %v4077_v45  ;;  %v4065_v52 = vunpack.c.h.bf16 %v7379_v41  ;;  %v4205_v31 = vunpack.c.h.bf16 %v7381_v55  ;;  %v7382_v17 = vld [vmem:[#allocation13 + $0x428] sm:$0xff]  ;;  %v7384_v40 = vld [vmem:[#allocation13 + $0x658] sm:$0xff] }
 0x6d3   :  { %v6585_v53 = vmul.f32 %v6577_v50, %v6241_v33  ;;  %6012 = vmatpush.msrb.mxu2 %v4153_v15  ;;  %6035 = vmatpush.msrb.mxu3 %v4217_v39  ;;  %v3997_v34 = vunpack.c.h.bf16 %v7382_v17  ;;  %v7383_v9 = vld [vmem:[#allocation13 + $0x528] sm:$0xff]  ;;  %v4137_v13 = vunpack.c.h.bf16 %v7384_v40  ;;  %v7385_v32 = vld [vmem:[#allocation13 + $0x758] sm:$0xff] }
 0x6d4   :  { %5970 = vmatpush.msrb.mxu0 %v4009_v0  ;;  %5993 = vmatpush.msrb.mxu1 %v4073_v57  ;;  %v4061_v24 = vunpack.c.h.bf16 %v7383_v9  ;;  %v4201_v8 = vunpack.c.h.bf16 %v7385_v32  ;;  %v7386_v45 = vld [vmem:[#allocation13 + $0x418] sm:$0xff]  ;;  %v7388_v60 = vld [vmem:[#allocation13 + $0x648] sm:$0xff] }
 0x6d5   :  { %6593 = vst [vmem:[#allocation16 + $0x28] sm:$0xff] %v6585_v53  ;;  %6013 = vmatpush.msrb.mxu2 %v4149_v14  ;;  %6036 = vmatpush.msrb.mxu3 %v4213_v21  ;;  %v3993_v12 = vunpack.c.h.bf16 %v7386_v45  ;;  %v7387_v37 = vld [vmem:[#allocation13 + $0x518] sm:$0xff]  ;;  %v4133_v39 = vunpack.c.h.bf16 %v7388_v60  ;;  %v7389_v3 = vld [vmem:[#allocation13 + $0x748] sm:$0xff] }
 0x6d6   :  { %5971 = vmatpush.msrb.mxu0 %v4005_v28  ;;  %5994 = vmatpush.msrb.mxu1 %v4069_v2  ;;  %v4057_v15 = vunpack.c.h.bf16 %v7387_v37  ;;  %v4197_v0 = vunpack.c.h.bf16 %v7389_v3  ;;  %v7390_v42 = vld [vmem:[#allocation13 + $0x408] sm:$0xff]  ;;  %v7392_v47 = vld [vmem:[#allocation13 + $0x638] sm:$0xff] }
 0x6d7   :  { %6014 = vmatpush.msrb.mxu2 %v4145_v63  ;;  %6037 = vmatpush.msrb.mxu3 %v4209_v44  ;;  %v3989_v57 = vunpack.c.h.bf16 %v7390_v42  ;;  %v7391_v33 = vld [vmem:[#allocation13 + $0x508] sm:$0xff]  ;;  %v4129_v14 = vunpack.c.h.bf16 %v7392_v47  ;;  %v7393_v29 = vld [vmem:[#allocation13 + $0x738] sm:$0xff] }
 0x6d8   :  { %5972 = vmatpush.msrb.mxu0 %v4001_v20  ;;  %5995 = vmatpush.msrb.mxu1 %v4065_v52  ;;  %v4053_v50 = vunpack.c.h.bf16 %v7391_v33  ;;  %v4193_v21 = vunpack.c.h.bf16 %v7393_v29  ;;  %v7394_v51 = vld [vmem:[#allocation13 + $0x8f8] sm:$0xff]  ;;  %v7396_v53 = vld [vmem:[#allocation13 + $0x628] sm:$0xff] }
 0x6d9   :  { %6015 = vmatpush.msrb.mxu2 %v4141_v16  ;;  %6038 = vmatpush.msrb.mxu3 %v4205_v31  ;;  %v4305_v28 = vunpack.c.h.bf16 %v7394_v51  ;;  %v7395_v11 = vld [vmem:[#allocation13 + $0x9f8] sm:$0xff]  ;;  %v4125_v49 = vunpack.c.h.bf16 %v7396_v53  ;;  %v7397_v63 = vld [vmem:[#allocation13 + $0x728] sm:$0xff] }
 0x6da   :  { %5973 = vmatpush.msrb.mxu0 %v3997_v34  ;;  %5996 = vmatpush.msrb.mxu1 %v4061_v24  ;;  %v4369_v2 = vunpack.c.h.bf16 %v7395_v11  ;;  %v4189_v62 = vunpack.c.h.bf16 %v7397_v63  ;;  %v7398_v44 = vld [vmem:[#allocation13 + $0x8e8] sm:$0xff]  ;;  %v7400_v52 = vld [vmem:[#allocation13 + $0x618] sm:$0xff]  ;;  %v10492_v11 = vpop.f32.mrf.mxu1 }
 0x6db   :  { %6016 = vmatpush.msrb.mxu2 %v4137_v13  ;;  %6039 = vmatpush.msrb.mxu3 %v4201_v8  ;;  %v4301_v36 = vunpack.c.h.bf16 %v7398_v44  ;;  %v7399_v20 = vld [vmem:[#allocation13 + $0x9e8] sm:$0xff]  ;;  %v4121_v4 = vunpack.c.h.bf16 %v7400_v52  ;;  %v7401_v16 = vld [vmem:[#allocation13 + $0x718] sm:$0xff] }
 0x6dc   :  { %5974 = vmatpush.msrb.mxu0 %v3993_v12  ;;  %5997 = vmatpush.msrb.mxu1 %v4057_v15  ;;  %v4365_v41 = vunpack.c.h.bf16 %v7399_v20  ;;  %v4185_v55 = vunpack.c.h.bf16 %v7401_v16  ;;  %v7402_v31 = vld [vmem:[#allocation13 + $0x8d8] sm:$0xff]  ;;  %v7404_v24 = vld [vmem:[#allocation13 + $0x608] sm:$0xff] }
 0x6dd   :  { %6017 = vmatpush.msrb.mxu2 %v4133_v39  ;;  %6040 = vmatpush.msrb.mxu3 %v4197_v0  ;;  %v4297_v17 = vunpack.c.h.bf16 %v7402_v31  ;;  %v7403_v34 = vld [vmem:[#allocation13 + $0x9d8] sm:$0xff]  ;;  %v4117_v40 = vunpack.c.h.bf16 %v7404_v24  ;;  %v7405_v13 = vld [vmem:[#allocation13 + $0x708] sm:$0xff] }
 0x6de   :  { %5975 = vmatpush.msrb.mxu0 %v3989_v57  ;;  %5998 = vmatpush.msrb.mxu1 %v4053_v50  ;;  %v4361_v9 = vunpack.c.h.bf16 %v7403_v34  ;;  %v4181_v32 = vunpack.c.h.bf16 %v7405_v13  ;;  %v7407_v45 = vld [vmem:[#allocation13 + $0x9c8] sm:$0xff]  ;;  %v7408_v37 = vld [vmem:[#allocation13 + $0xaf8] sm:$0xff] }
 0x6df   :  { %6018 = vmatpush.msrb.mxu2 %v4129_v14  ;;  %6041 = vmatpush.msrb.mxu3 %v4193_v21  ;;  %v4357_v12 = vunpack.c.h.bf16 %v7407_v45  ;;  %v4433_v15 = vunpack.c.h.bf16 %v7408_v37  ;;  %v7409_v60 = vld [vmem:[#allocation13 + $0xbf8] sm:$0xff]  ;;  %v7412_v33 = vld [vmem:[#allocation13 + $0xae8] sm:$0xff] }
 0x6e0   :  { %5976 = vmatmul.f32.vlgmr.msrb.gmra.mxu0 %v10835_v10  ;;  %5999 = vmatmul.f32.vlgmr.msrb.gmra.mxu1 %v10836_v18  ;;  %v10488_v10 = vpop.f32.mrf.mxu0  ;;  %v7406_v18 = vld [vmem:[#allocation13 + $0x8c8] sm:$0xff]  ;;  %v4497_v39 = vunpack.c.h.bf16 %v7409_v60  ;;  %v7410_v3 = vld [vmem:[#allocation13 + $0x8b8] sm:$0xff]  ;;  %v4429_v50 = vunpack.c.h.bf16 %v7412_v33 }
 0x6e1   :  { %6052 = vmatpush.msra.mxu0 %v4305_v28  ;;  %6075 = vmatpush.msra.mxu1 %v4369_v2  ;;  %v4293_v8 = vunpack.c.h.bf16 %v7406_v18  ;;  %v4289_v0 = vunpack.c.h.bf16 %v7410_v3  ;;  %v7411_v42 = vld [vmem:[#allocation13 + $0x9b8] sm:$0xff]  ;;  %v7413_v47 = vld [vmem:[#allocation13 + $0xbe8] sm:$0xff] }
 0x6e2   :  { %6019 = vmatpush.msrb.mxu2 %v4125_v49  ;;  %6042 = vmatpush.msrb.mxu3 %v4189_v62  ;;  %v4353_v57 = vunpack.c.h.bf16 %v7411_v42  ;;  %v4493_v14 = vunpack.c.h.bf16 %v7413_v47  ;;  %v7414_v29 = vld [vmem:[#allocation13 + $0x8a8] sm:$0xff]  ;;  %v7417_v2 = vld [vmem:[#allocation13 + $0xbd8] sm:$0xff]  ;;  %v10504_v47 = vpop.f32.mrf.mxu1 }
 0x6e3   :  { %6053 = vmatpush.msra.mxu0 %v4301_v36  ;;  %6076 = vmatpush.msra.mxu1 %v4365_v41  ;;  %v4285_v21 = vunpack.c.h.bf16 %v7414_v29  ;;  %v7415_v51 = vld [vmem:[#allocation13 + $0x9a8] sm:$0xff]  ;;  %v4489_v53 = vunpack.c.h.bf16 %v7417_v2  ;;  %v7418_v49 = vld [vmem:[#allocation13 + $0x898] sm:$0xff]  ;;  %v10496_v36 = vpop.f32.mrf.mxu2 }
 0x6e4   :  { %6020 = vmatpush.msrb.mxu2 %v4121_v4  ;;  %6043 = vmatpush.msrb.mxu3 %v4185_v55  ;;  %v4349_v28 = vunpack.c.h.bf16 %v7415_v51  ;;  %v4281_v63 = vunpack.c.h.bf16 %v7418_v49  ;;  %v7419_v62 = vld [vmem:[#allocation13 + $0x998] sm:$0xff]  ;;  %v7420_v20 = vld [vmem:[#allocation13 + $0xac8] sm:$0xff]  ;;  %v10500_v4 = vpop.f32.mrf.mxu3 }
 0x6e5   :  { %6054 = vmatpush.msra.mxu0 %v4297_v17  ;;  %6077 = vmatpush.msra.mxu1 %v4361_v9  ;;  %v4345_v44 = vunpack.c.h.bf16 %v7419_v62  ;;  %v4421_v41 = vunpack.c.h.bf16 %v7420_v20  ;;  %v7421_v52 = vld [vmem:[#allocation13 + $0xbc8] sm:$0xff]  ;;  %v7424_v34 = vld [vmem:[#allocation13 + $0xab8] sm:$0xff] }
 0x6e6   :  { %6021 = vmatpush.msrb.mxu2 %v4117_v40  ;;  %6044 = vmatpush.msrb.mxu3 %v4181_v32  ;;  %v7422_v16 = vld [vmem:[#allocation13 + $0x888] sm:$0xff]  ;;  %v4417_v9 = vunpack.c.h.bf16 %v7424_v34  ;;  %v7425_v24 = vld [vmem:[#allocation13 + $0xbb8] sm:$0xff] }
 0x6e7   :  { %6022 = vmatmul.f32.vlgmr.msrb.gmra.mxu2 %v10837_v54  ;;  %6045 = vmatmul.f32.vlgmr.msrb.gmra.mxu3 %v10838_v46  ;;  %v7416_v54 = vld [vmem:[#allocation13 + $0xad8] sm:$0xff]  ;;  %v4277_v55 = vunpack.c.h.bf16 %v7422_v16  ;;  %v7423_v31 = vld [vmem:[#allocation13 + $0x988] sm:$0xff]  ;;  %v4481_v40 = vunpack.c.h.bf16 %v7425_v24 }
 0x6e8   :  { %6055 = vmatpush.msra.mxu0 %v4293_v8  ;;  %6078 = vmatpush.msra.mxu1 %v4357_v12  ;;  %v4425_v46 = vunpack.c.h.bf16 %v7416_v54  ;;  %v4341_v17 = vunpack.c.h.bf16 %v7423_v31  ;;  %v7426_v13 = vld [vmem:[#allocation13 + $0x878] sm:$0xff]  ;;  %v7428_v45 = vld [vmem:[#allocation13 + $0xaa8] sm:$0xff] }
 0x6e9   :  { %6098 = vmatpush.msra.mxu2 %v4433_v15  ;;  %6121 = vmatpush.msra.mxu3 %v4497_v39  ;;  %v4273_v32 = vunpack.c.h.bf16 %v7426_v13  ;;  %v7427_v18 = vld [vmem:[#allocation13 + $0x978] sm:$0xff]  ;;  %v4413_v12 = vunpack.c.h.bf16 %v7428_v45  ;;  %v7429_v37 = vld [vmem:[#allocation13 + $0xba8] sm:$0xff] }
 0x6ea   :  { %5979 = vmatmul.f32.gmra.mxu0 %v10839_v25  ;;  %6002 = vmatmul.f32.gmra.mxu1 %v10840_v5  ;;  %v4485_v25 = vunpack.c.h.bf16 %v7421_v52  ;;  %v10498_v5 = vpop.f32.mrf.mxu0  ;;  %v4337_v8 = vunpack.c.h.bf16 %v7427_v18  ;;  %v4477_v15 = vunpack.c.h.bf16 %v7429_v37  ;;  %v7430_v60 = vld [vmem:[#allocation13 + $0x868] sm:$0xff]  ;;  %v7432_v42 = vld [vmem:[#allocation13 + $0xa98] sm:$0xff] }
 0x6eb   :  { %6056 = vmatpush.msra.mxu0 %v4289_v0  ;;  %6079 = vmatpush.msra.mxu1 %v4353_v57  ;;  %v4269_v39 = vunpack.c.h.bf16 %v7430_v60  ;;  %v7431_v3 = vld [vmem:[#allocation13 + $0x968] sm:$0xff]  ;;  %v4409_v57 = vunpack.c.h.bf16 %v7432_v42  ;;  %v7433_v33 = vld [vmem:[#allocation13 + $0xb98] sm:$0xff] }
 0x6ec   :  { %6099 = vmatpush.msra.mxu2 %v4429_v50  ;;  %6122 = vmatpush.msra.mxu3 %v4493_v14  ;;  %v4333_v0 = vunpack.c.h.bf16 %v7431_v3  ;;  %v4473_v50 = vunpack.c.h.bf16 %v7433_v33  ;;  %v7435_v14 = vld [vmem:[#allocation13 + $0x958] sm:$0xff] }
 0x6ed   :  { %6057 = vmatpush.msra.mxu0 %v4285_v21  ;;  %6080 = vmatpush.msra.mxu1 %v4349_v28  ;;  %v4329_v29 = vunpack.c.h.bf16 %v7435_v14  ;;  %v10506_v21 = vld [vmem:[#allocation14] sm:$0xf]  ;;  %v7437_v28 = vld [vmem:[#allocation13 + $0xa88] sm:$0xff]  ;;  %v7443_v31 = vld [vmem:[#allocation13 + $0x838] sm:$0xff] }
 0x6ee   :  { %6100 = vmatpush.msra.mxu2 %v4425_v46  ;;  %6123 = vmatpush.msra.mxu3 %v4489_v53  ;;  %v4758_v51 = vperm.slane %v10506_v21, 2  ;;  %v4405_v54 = vunpack.c.h.bf16 %v7437_v28  ;;  %v7438_v46 = vld [vmem:[#allocation13 + $0xb88] sm:$0xff]  ;;  %v10509_v53 = vpop.f32.mrf.mxu2  ;;  %v7444_v34 = vld [vmem:[#allocation13 + $0x938] sm:$0xff] }
 0x6ef   :  { %6058 = vmatpush.msra.mxu0 %v4281_v63  ;;  %6081 = vmatpush.msra.mxu1 %v4345_v44  ;;  %v4469_v2 = vunpack.c.h.bf16 %v7438_v46  ;;  %v7439_v63 = vld [vmem:[#allocation13 + $0x848] sm:$0xff] }
 0x6f0   :  { %6101 = vmatpush.msra.mxu2 %v4421_v41  ;;  %6124 = vmatpush.msra.mxu3 %v4485_v25  ;;  %v4261_v62 = vunpack.c.h.bf16 %v7439_v63  ;;  %v7440_v44 = vld [vmem:[#allocation13 + $0x948] sm:$0xff]  ;;  %v7441_v41 = vld [vmem:[#allocation13 + $0xa78] sm:$0xff]  ;;  %v5518_v24 = vadd.f32 %v10488_v10, %v4758_v51 }
 0x6f1   :  { %6025 = vmatmul.f32.gmra.mxu2 %v10841_v23  ;;  %6048 = vmatmul.f32.gmra.mxu3 %v10842_v48  ;;  %v7434_v23 = vld [vmem:[#allocation13 + $0x858] sm:$0xff]  ;;  %v4325_v20 = vunpack.c.h.bf16 %v7440_v44  ;;  %v4401_v52 = vunpack.c.h.bf16 %v7441_v41  ;;  %v7454_v14 = vld [vmem:[#allocation13 + $0xb48] sm:$0xff] }
 0x6f2   :  { %6059 = vmatpush.msra.mxu0 %v4277_v55  ;;  %6082 = vmatpush.msra.mxu1 %v4341_v17  ;;  %v4265_v48 = vunpack.c.h.bf16 %v7434_v23  ;;  %v10511_v49 = vpop.f32.mrf.mxu0  ;;  %v7442_v25 = vld [vmem:[#allocation13 + $0xb78] sm:$0xff]  ;;  %v10513_v55 = vpop.f32.mrf.mxu3  ;;  %v4257_v17 = vunpack.c.h.bf16 %v7443_v31  ;;  %v7453_v23 = vld [vmem:[#allocation13 + $0xa48] sm:$0xff] }
 0x6f3   :  { %6102 = vmatpush.msra.mxu2 %v4417_v9  ;;  %6125 = vmatpush.msra.mxu3 %v4481_v40  ;;  %v4465_v16 = vunpack.c.h.bf16 %v7442_v25  ;;  %v4321_v9 = vunpack.c.h.bf16 %v7444_v34  ;;  %v7445_v40 = vld [vmem:[#allocation13 + $0xa68] sm:$0xff]  ;;  %v7451_v10 = vld [vmem:[#allocation13 + $0x818] sm:$0xff] }
 0x6f4   :  { %6060 = vmatpush.msra.mxu0 %v4273_v32  ;;  %6083 = vmatpush.msra.mxu1 %v4337_v8  ;;  %v4397_v13 = vunpack.c.h.bf16 %v7445_v40  ;;  %v7446_v32 = vld [vmem:[#allocation13 + $0xb68] sm:$0xff]  ;;  %v4249_v42 = vunpack.c.h.bf16 %v7451_v10  ;;  %v7457_v44 = vld [vmem:[#allocation13 + $0xa38] sm:$0xff] }
 0x6f5   :  { %6103 = vmatpush.msra.mxu2 %v4413_v12  ;;  %6126 = vmatpush.msra.mxu3 %v4477_v15  ;;  %v4461_v18 = vunpack.c.h.bf16 %v7446_v32  ;;  %v7447_v8 = vld [vmem:[#allocation13 + $0x828] sm:$0xff]  ;;  %v7449_v15 = vld [vmem:[#allocation13 + $0xa58] sm:$0xff] }
 0x6f6   :  { %6061 = vmatpush.msra.mxu0 %v4269_v39  ;;  %6084 = vmatpush.msra.mxu1 %v4333_v0  ;;  %v4253_v45 = vunpack.c.h.bf16 %v7447_v8  ;;  %v7448_v12 = vld [vmem:[#allocation13 + $0x928] sm:$0xff]  ;;  %v4393_v60 = vunpack.c.h.bf16 %v7449_v15  ;;  %v7450_v39 = vld [vmem:[#allocation13 + $0xb58] sm:$0xff]  ;;  %v10518_v0 = vpop.f32.mrf.mxu1  ;;  %v10521_v28 = vpop.f32.mrf.mxu2 }
 0x6f7   :  { %6104 = vmatpush.msra.mxu2 %v4409_v57  ;;  %6127 = vmatpush.msra.mxu3 %v4473_v50  ;;  %v4317_v37 = vunpack.c.h.bf16 %v7448_v12  ;;  %v4457_v3 = vunpack.c.h.bf16 %v7450_v39  ;;  %v7452_v57 = vld [vmem:[#allocation13 + $0x918] sm:$0xff]  ;;  %v5541_v50 = vadd.f32 %v10492_v11, %v5518_v24  ;;  %v4385_v11 = vunpack.c.h.bf16 %v7457_v44  ;;  %v7462_v24 = vld [vmem:[#allocation13 + $0xb28] sm:$0xff] }
 0x6f8   :  { %6062 = vmatpush.msra.mxu0 %v4265_v48  ;;  %6085 = vmatpush.msra.mxu1 %v4329_v29  ;;  %v4313_v33 = vunpack.c.h.bf16 %v7452_v57  ;;  %v4389_v48 = vunpack.c.h.bf16 %v7453_v23  ;;  %v4453_v29 = vunpack.c.h.bf16 %v7454_v14  ;;  %v4445_v40 = vunpack.c.h.bf16 %v7462_v24  ;;  %v7469_v57 = vld [vmem:[#allocation13 + $0xa08] sm:$0xff] }
 0x6f9   :  { %6105 = vmatpush.msra.mxu2 %v4405_v54  ;;  %6128 = vmatpush.msra.mxu3 %v4469_v2  ;;  %v7455_v54 = vld [vmem:[#allocation13 + $0x808] sm:$0xff] }
 0x6fa   :  { %6063 = vmatpush.msra.mxu0 %v4261_v62  ;;  %6086 = vmatpush.msra.mxu1 %v4325_v20  ;;  %v4245_v46 = vunpack.c.h.bf16 %v7455_v54  ;;  %v7456_v2 = vld [vmem:[#allocation13 + $0x908] sm:$0xff]  ;;  %v5564_v62 = vadd.f32 %v10496_v36, %v5541_v50  ;;  %v7458_v20 = vld [vmem:[#allocation13 + $0xb38] sm:$0xff]  ;;  %v10526_v25 = vpop.f32.mrf.mxu3 }
 0x6fb   :  { %6106 = vmatpush.msra.mxu2 %v4401_v52  ;;  %6129 = vmatpush.msra.mxu3 %v4465_v16  ;;  %v4309_v63 = vunpack.c.h.bf16 %v7456_v2  ;;  %v4449_v41 = vunpack.c.h.bf16 %v7458_v20  ;;  %v10524_v52 = vpop.f32.mrf.mxu0  ;;  %v7459_v16 = vld [vmem:[#allocation13 + $0xcf8] sm:$0xff]  ;;  %v7461_v36 = vld [vmem:[#allocation13 + $0xa28] sm:$0xff] }
 0x6fc   :  { %6064 = vmatpush.msra.mxu0 %v4257_v17  ;;  %6087 = vmatpush.msra.mxu1 %v4321_v9  ;;  %v4561_v31 = vunpack.c.h.bf16 %v7459_v16  ;;  %v7460_v17 = vld [vmem:[#allocation13 + $0xdf8] sm:$0xff]  ;;  %v4381_v9 = vunpack.c.h.bf16 %v7461_v36  ;;  %v5587_v32 = vadd.f32 %v10500_v4, %v5564_v62  ;;  %v7479_v24 = vld [vmem:[#allocation13 + $0xca8] sm:$0xff] }
 0x6fd   :  { %6107 = vmatpush.msra.mxu2 %v4397_v13  ;;  %6130 = vmatpush.msra.mxu3 %v4461_v18  ;;  %v4625_v34 = vunpack.c.h.bf16 %v7460_v17  ;;  %v5521_v13 = vadd.f32 %v10498_v5, %v4758_v51  ;;  %v7463_v18 = vld [vmem:[#allocation13 + $0xce8] sm:$0xff]  ;;  %v7467_v5 = vld [vmem:[#allocation13 + $0xcd8] sm:$0xff] }
 0x6fe   :  { %6065 = vmatpush.msra.mxu0 %v4253_v45  ;;  %6088 = vmatpush.msra.mxu1 %v4317_v37  ;;  %v4557_v8 = vunpack.c.h.bf16 %v7463_v18  ;;  %v7464_v45 = vld [vmem:[#allocation13 + $0xde8] sm:$0xff]  ;;  %v7465_v37 = vld [vmem:[#allocation13 + $0xa18] sm:$0xff]  ;;  %v4553_v4 = vunpack.c.h.bf16 %v7467_v5  ;;  %v10538_v23 = vpop.f32.mrf.mxu2 }
 0x6ff   :  { %6108 = vmatpush.msra.mxu2 %v4393_v60  ;;  %6131 = vmatpush.msra.mxu3 %v4457_v3  ;;  %v4621_v12 = vunpack.c.h.bf16 %v7464_v45  ;;  %v4377_v15 = vunpack.c.h.bf16 %v7465_v37  ;;  %v7466_v60 = vld [vmem:[#allocation13 + $0xb18] sm:$0xff]  ;;  %v5610_v3 = vadd.f32 %v10511_v49, %v5587_v32  ;;  %v5544_v50 = vadd.f32 %v10504_v47, %v5521_v13 }
 0x700   :  { %6066 = vmatpush.msra.mxu0 %v4249_v42  ;;  %6089 = vmatpush.msra.mxu1 %v4313_v33  ;;  %v4441_v39 = vunpack.c.h.bf16 %v7466_v60  ;;  %v7468_v51 = vld [vmem:[#allocation13 + $0xdd8] sm:$0xff]  ;;  %v10535_v42 = vpop.f32.mrf.mxu1  ;;  %v7470_v33 = vld [vmem:[#allocation13 + $0xb08] sm:$0xff] }
 0x701   :  { %6109 = vmatpush.msra.mxu2 %v4389_v48  ;;  %6132 = vmatpush.msra.mxu3 %v4453_v29  ;;  %v4617_v10 = vunpack.c.h.bf16 %v7468_v51  ;;  %v7471_v48 = vld [vmem:[#allocation13 + $0xcc8] sm:$0xff]  ;;  %v5633_v2 = vadd.f32 %v10518_v0, %v5610_v3  ;;  %v7474_v47 = vld [vmem:[#allocation13 + $0xff8] sm:$0xff] }
 0x702   :  { %6067 = vmatpush.msra.mxu0 %v4245_v46  ;;  %6090 = vmatpush.msra.mxu1 %v4309_v63  ;;  %v4549_v14 = vunpack.c.h.bf16 %v7471_v48  ;;  %v7472_v29 = vld [vmem:[#allocation13 + $0xdc8] sm:$0xff]  ;;  %v5567_v46 = vadd.f32 %v10509_v53, %v5544_v50  ;;  %v7473_v63 = vld [vmem:[#allocation13 + $0xef8] sm:$0xff]  ;;  %v4753_v44 = vunpack.c.h.bf16 %v7474_v47 }
 0x703   :  { %6110 = vmatpush.msra.mxu2 %v4385_v11  ;;  %6133 = vmatpush.msra.mxu3 %v4449_v41  ;;  %v5701_v49 = vpop.f32.mrf.mxu0  ;;  %v4613_v54 = vunpack.c.h.bf16 %v7472_v29  ;;  %v4689_v62 = vunpack.c.h.bf16 %v7473_v63  ;;  %v10542_v11 = vpop.f32.mrf.mxu3  ;;  %v5656_v20 = vadd.f32 %v10521_v28, %v5633_v2  ;;  %v7475_v41 = vld [vmem:[#allocation13 + $0xcb8] sm:$0xff]  ;;  %v4541_v28 = vunpack.c.h.bf16 %v7479_v24  ;;  %v7486_v3 = vld [vmem:[#allocation13 + $0xfc8] sm:$0xff] }
 0x704   :  { %6068 = vmatmul.f32.vlgmr.msra.gmra.mxu0 %v9417_v35  ;;  %6091 = vmatmul.f32.vlgmr.msra.gmra.mxu1 %v9422_v30  ;;  %v4373_v35 = vunpack.c.h.bf16 %v7469_v57  ;;  %v4437_v30 = vunpack.c.h.bf16 %v7470_v33  ;;  %v4545_v53 = vunpack.c.h.bf16 %v7475_v41  ;;  %v7476_v16 = vld [vmem:[#allocation13 + $0xdb8] sm:$0xff]  ;;  %v7488_v57 = vld [vmem:[#allocation13 + $0xd88] sm:$0xff] }
 0x705   :  { %6144 = vmatpush.msrb.mxu0 %v4561_v31  ;;  %6167 = vmatpush.msrb.mxu1 %v4625_v34  ;;  %v4609_v0 = vunpack.c.h.bf16 %v7476_v16  ;;  %v7477_v31 = vld [vmem:[#allocation13 + $0xee8] sm:$0xff]  ;;  %v7482_v18 = vld [vmem:[#allocation13 + $0xfd8] sm:$0xff] }
 0x706   :  { %6111 = vmatpush.msra.mxu2 %v4381_v9  ;;  %6134 = vmatpush.msra.mxu3 %v4445_v40  ;;  %v4685_v17 = vunpack.c.h.bf16 %v7477_v31  ;;  %v7478_v34 = vld [vmem:[#allocation13 + $0xfe8] sm:$0xff]  ;;  %v5590_v9 = vadd.f32 %v10513_v55, %v5567_v46  ;;  %v7483_v55 = vld [vmem:[#allocation13 + $0xc98] sm:$0xff]  ;;  %v5747_v5 = vpop.f32.mrf.mxu2 }
 0x707   :  { %6145 = vmatpush.msrb.mxu0 %v4557_v8  ;;  %6168 = vmatpush.msrb.mxu1 %v4621_v12  ;;  %v4749_v36 = vunpack.c.h.bf16 %v7478_v34  ;;  %v7480_v40 = vld [vmem:[#allocation13 + $0xda8] sm:$0xff]  ;;  %v4745_v8 = vunpack.c.h.bf16 %v7482_v18  ;;  %v5679_v12 = vadd.f32 %v10526_v25, %v5656_v20  ;;  %v4537_v37 = vunpack.c.h.bf16 %v7483_v55  ;;  %v7490_v48 = vld [vmem:[#allocation13 + $0xfb8] sm:$0xff] }
 0x708   :  { %6112 = vmatpush.msra.mxu2 %v4377_v15  ;;  %6135 = vmatpush.msra.mxu3 %v4441_v39  ;;  %v5724_v13 = vpop.f32.mrf.mxu1  ;;  %v5613_v45 = vadd.f32 %v10524_v52, %v5590_v9  ;;  %v7484_v15 = vld [vmem:[#allocation13 + $0xd98] sm:$0xff]  ;;  %v7485_v39 = vld [vmem:[#allocation13 + $0xec8] sm:$0xff] }
 0x709   :  { %6146 = vmatpush.msrb.mxu0 %v4553_v4  ;;  %6169 = vmatpush.msrb.mxu1 %v4617_v10  ;;  %v4601_v60 = vunpack.c.h.bf16 %v7484_v15  ;;  %v5702_v4 = vadd.f32 %v5701_v49, %v5679_v12  ;;  %v7487_v25 = vld [vmem:[#allocation13 + $0xc88] sm:$0xff]  ;;  %v7491_v49 = vld [vmem:[#allocation13 + $0xc78] sm:$0xff] }
 0x70a   :  { %6113 = vmatpush.msra.mxu2 %v4373_v35  ;;  %6136 = vmatpush.msra.mxu3 %v4437_v30  ;;  %v4533_v10 = vunpack.c.h.bf16 %v7487_v25  ;;  %v4597_v35 = vunpack.c.h.bf16 %v7488_v57  ;;  %v5636_v33 = vadd.f32 %v10535_v42, %v5613_v45  ;;  %v7489_v30 = vld [vmem:[#allocation13 + $0xeb8] sm:$0xff]  ;;  %v4529_v29 = vunpack.c.h.bf16 %v7491_v49  ;;  %v7493_v42 = vld [vmem:[#allocation13 + $0xea8] sm:$0xff] }
 0x70b   :  { %6114 = vmatmul.f32.vlgmr.msra.gmra.mxu2 %v9639_v6  ;;  %6137 = vmatmul.f32.vlgmr.msra.gmra.mxu3 %v9642_v43  ;;  %v4605_v6 = vunpack.c.h.bf16 %v7480_v40  ;;  %v7481_v43 = vld [vmem:[#allocation13 + $0xed8] sm:$0xff]  ;;  %v10552_v51 = vpop.f32.mrf.mxu0  ;;  %v5770_v52 = vpop.f32.mrf.mxu3  ;;  %v4673_v50 = vunpack.c.h.bf16 %v7489_v30  ;;  %v5725_v63 = vadd.f32 %v5724_v13, %v5702_v4  ;;  %v7494_v47 = vld [vmem:[#allocation13 + $0xfa8] sm:$0xff] }
 0x70c   :  { %6147 = vmatpush.msrb.mxu0 %v4549_v14  ;;  %6170 = vmatpush.msrb.mxu1 %v4613_v54  ;;  %v4681_v32 = vunpack.c.h.bf16 %v7481_v43  ;;  %v4737_v14 = vunpack.c.h.bf16 %v7490_v48  ;;  %v7492_v54 = vld [vmem:[#allocation13 + $0xd78] sm:$0xff]  ;;  %v5659_v2 = vadd.f32 %v10538_v23, %v5636_v33  ;;  %v7495_v20 = vld [vmem:[#allocation13 + $0xc68] sm:$0xff] }
 0x70d   :  { %6190 = vmatpush.msrb.mxu2 %v4689_v62  ;;  %6213 = vmatpush.msrb.mxu3 %v4753_v44  ;;  %v4593_v46 = vunpack.c.h.bf16 %v7492_v54  ;;  %v4669_v62 = vunpack.c.h.bf16 %v7493_v42  ;;  %v4733_v44 = vunpack.c.h.bf16 %v7494_v47  ;;  %v4525_v41 = vunpack.c.h.bf16 %v7495_v20  ;;  %v7497_v31 = vld [vmem:[#allocation13 + $0xe98] sm:$0xff]  ;;  %v7501_v40 = vld [vmem:[#allocation13 + $0xe88] sm:$0xff] }
 0x70e   :  { %6071 = vmatmul.f32.gmra.mxu0 %v9652_v27  ;;  %6094 = vmatmul.f32.gmra.mxu1 %v9816_v38  ;;  %v4677_v27 = vunpack.c.h.bf16 %v7485_v39  ;;  %v4741_v38 = vunpack.c.h.bf16 %v7486_v3  ;;  %v4665_v23 = vunpack.c.h.bf16 %v7497_v31  ;;  %v7500_v9 = vld [vmem:[#allocation13 + $0xd58] sm:$0xff]  ;;  %v7502_v13 = vld [vmem:[#allocation13 + $0xf88] sm:$0xff] }
 0x70f   :  { %6148 = vmatpush.msrb.mxu0 %v4545_v53  ;;  %6171 = vmatpush.msrb.mxu1 %v4609_v0  ;;  %v7496_v53 = vld [vmem:[#allocation13 + $0xd68] sm:$0xff]  ;;  %v5748_v0 = vadd.f32 %v5747_v5, %v5725_v63  ;;  %v4585_v24 = vunpack.c.h.bf16 %v7500_v9  ;;  %v4725_v43 = vunpack.c.h.bf16 %v7502_v13  ;;  %v7506_v39 = vld [vmem:[#allocation13 + $0xf78] sm:$0xff] }
 0x710   :  { %6191 = vmatpush.msrb.mxu2 %v4685_v17  ;;  %6214 = vmatpush.msrb.mxu3 %v4749_v36  ;;  %v4589_v16 = vunpack.c.h.bf16 %v7496_v53  ;;  %v7498_v17 = vld [vmem:[#allocation13 + $0xf98] sm:$0xff]  ;;  %v7503_v18 = vld [vmem:[#allocation13 + $0xc48] sm:$0xff] }
 0x711   :  { %6149 = vmatpush.msrb.mxu0 %v4541_v28  ;;  %6172 = vmatpush.msrb.mxu1 %v4605_v6  ;;  %v4729_v34 = vunpack.c.h.bf16 %v7498_v17  ;;  %v5682_v28 = vadd.f32 %v10542_v11, %v5659_v2  ;;  %v4661_v6 = vunpack.c.h.bf16 %v7501_v40  ;;  %v7504_v45 = vld [vmem:[#allocation13 + $0xd48] sm:$0xff]  ;;  %v5771_v15 = vadd.f32 %v5770_v52, %v5748_v0  ;;  %v7505_v11 = vld [vmem:[#allocation13 + $0xe78] sm:$0xff] }
 0x712   :  { %6192 = vmatpush.msrb.mxu2 %v4681_v32  ;;  %6215 = vmatpush.msrb.mxu3 %v4745_v8  ;;  %v5750_v32 = vpop.f32.mrf.mxu2  ;;  %v4517_v8 = vunpack.c.h.bf16 %v7503_v18  ;;  %v4581_v12 = vunpack.c.h.bf16 %v7504_v45  ;;  %v7508_v4 = vld [vmem:[#allocation13 + $0xd38] sm:$0xff]  ;;  %v7511_v33 = vld [vmem:[#allocation13 + $0xc28] sm:$0xff] }
 0x713   :  { %6150 = vmatpush.msrb.mxu0 %v4537_v37  ;;  %6173 = vmatpush.msrb.mxu1 %v4601_v60  ;;  %v5705_v37 = vadd.f32 %v10552_v51, %v5682_v28  ;;  %v4657_v60 = vunpack.c.h.bf16 %v7505_v11  ;;  %v5773_v3 = vpop.f32.mrf.mxu3  ;;  %v4577_v25 = vunpack.c.h.bf16 %v7508_v4  ;;  %v4509_v30 = vunpack.c.h.bf16 %v7511_v33  ;;  %v7513_v49 = vld [vmem:[#allocation13 + $0xe58] sm:$0xff]  ;;  %v7517_v20 = vld [vmem:[#allocation13 + $0xe48] sm:$0xff] }
 0x714   :  { %6193 = vmatpush.msrb.mxu2 %v4677_v27  ;;  %6216 = vmatpush.msrb.mxu3 %v4741_v38  ;;  %v4721_v27 = vunpack.c.h.bf16 %v7506_v39  ;;  %v7507_v38 = vld [vmem:[#allocation13 + $0xc38] sm:$0xff]  ;;  %v7518_v53 = vld [vmem:[#allocation13 + $0xf48] sm:$0xff] }
 0x715   :  { %6117 = vmatmul.f32.gmra.mxu2 %v9836_v56  ;;  %6140 = vmatmul.f32.gmra.mxu3 %v9839_v1  ;;  %v5727_v56 = vpop.f32.mrf.mxu1  ;;  %v7499_v1 = vld [vmem:[#allocation13 + $0xc58] sm:$0xff]  ;;  %v5793_v55 = vpop.f32.mrf.mxu0  ;;  %v4513_v5 = vunpack.c.h.bf16 %v7507_v38  ;;  %v7519_v31 = vld [vmem:[#allocation13 + $0xc08] sm:$0xff] }
 0x716   :  { %6151 = vmatpush.msrb.mxu0 %v4533_v10  ;;  %6174 = vmatpush.msrb.mxu1 %v4597_v35  ;;  %v4521_v36 = vunpack.c.h.bf16 %v7499_v1  ;;  %v7509_v10 = vld [vmem:[#allocation13 + $0xe68] sm:$0xff]  ;;  %v5794_v52 = vadd.f32 %v5793_v55, %v5771_v15  ;;  %v7514_v54 = vld [vmem:[#allocation13 + $0xf58] sm:$0xff] }
 0x717   :  { %6194 = vmatpush.msrb.mxu2 %v4673_v50  ;;  %6217 = vmatpush.msrb.mxu3 %v4737_v14  ;;  %v4653_v57 = vunpack.c.h.bf16 %v7509_v10  ;;  %v7510_v35 = vld [vmem:[#allocation13 + $0xf68] sm:$0xff]  ;;  %v5728_v14 = vadd.f32 %v5727_v56, %v5705_v37  ;;  %v7515_v2 = vld [vmem:[#allocation13 + $0xc18] sm:$0xff] }
 0x718   :  { %6152 = vmatpush.msrb.mxu0 %v4529_v29  ;;  %6175 = vmatpush.msrb.mxu1 %v4593_v46  ;;  %v4717_v51 = vunpack.c.h.bf16 %v7510_v35  ;;  %v7512_v50 = vld [vmem:[#allocation13 + $0xd28] sm:$0xff]  ;;  %v4649_v29 = vunpack.c.h.bf16 %v7513_v49  ;;  %v4713_v46 = vunpack.c.h.bf16 %v7514_v54  ;;  %v4505_v63 = vunpack.c.h.bf16 %v7515_v2  ;;  %v7516_v42 = vld [vmem:[#allocation13 + $0xd18] sm:$0xff] }
 0x719   :  { %6195 = vmatpush.msrb.mxu2 %v4669_v62  ;;  %6218 = vmatpush.msrb.mxu3 %v4733_v44  ;;  %v4573_v48 = vunpack.c.h.bf16 %v7512_v50  ;;  %v4569_v62 = vunpack.c.h.bf16 %v7516_v42  ;;  %v5751_v44 = vadd.f32 %v5750_v32, %v5728_v14  ;;  %v7520_v17 = vld [vmem:[#allocation13 + $0xd08] sm:$0xff]  ;;  %v7521_v1 = vld [vmem:[#allocation13 + $0xe38] sm:$0xff] }
 0x71a   :  { %6153 = vmatpush.msrb.mxu0 %v4525_v41  ;;  %6176 = vmatpush.msrb.mxu1 %v4589_v16  ;;  %v4645_v41 = vunpack.c.h.bf16 %v7517_v20  ;;  %v4709_v16 = vunpack.c.h.bf16 %v7518_v53  ;;  %v7522_v9 = vld [vmem:[#allocation13 + $0xf38] sm:$0xff]  ;;  %v7524_v18 = vld [vmem:[#allocation13 + $0xf28] sm:$0xff] }
 0x71b   :  { %6196 = vmatpush.msrb.mxu2 %v4665_v23  ;;  %6219 = vmatpush.msrb.mxu3 %v4729_v34  ;;  %v4501_v23 = vunpack.c.h.bf16 %v7519_v31  ;;  %v4565_v34 = vunpack.c.h.bf16 %v7520_v17  ;;  %v5774_v13 = vadd.f32 %v5773_v3, %v5751_v44  ;;  %v7526_v37 = vld [vmem:[#allocation13 + $0xf18] sm:$0xff]  ;;  %v7527_v39 = vld [vmem:[#allocation13 + $0xe08] sm:$0xff] }
 0x71c   :  { %6154 = vmatpush.msrb.mxu0 %v4521_v36  ;;  %6177 = vmatpush.msrb.mxu1 %v4585_v24  ;;  %v4641_v36 = vunpack.c.h.bf16 %v7521_v1  ;;  %v4705_v24 = vunpack.c.h.bf16 %v7522_v9  ;;  %v4697_v15 = vunpack.c.h.bf16 %v7526_v37  ;;  %v7528_v3 = vld [vmem:[#allocation13 + $0xf08] sm:$0xff] }
 0x71d   :  { %6197 = vmatpush.msrb.mxu2 %v4661_v6  ;;  %6220 = vmatpush.msrb.mxu3 %v4725_v43  ;;  %v5816_v47 = vpop.f32.mrf.mxu1  ;;  %v7523_v43 = vld [vmem:[#allocation13 + $0xe28] sm:$0xff]  ;;  %v4693_v38 = vunpack.c.h.bf16 %v7528_v3 }
 0x71e   :  { %6155 = vmatpush.msrb.mxu0 %v4517_v8  ;;  %6178 = vmatpush.msrb.mxu1 %v4581_v12  ;;  %v5817_v0 = vadd.f32 %v5816_v47, %v5794_v52  ;;  %v4637_v32 = vunpack.c.h.bf16 %v7523_v43  ;;  %v4701_v8 = vunpack.c.h.bf16 %v7524_v18  ;;  %v7525_v12 = vld [vmem:[#allocation13 + $0xe18] sm:$0xff] }
 0x71f   :  { %6198 = vmatpush.msrb.mxu2 %v4657_v60  ;;  %6221 = vmatpush.msrb.mxu3 %v4721_v27  ;;  %v5796_v40 = vpop.f32.mrf.mxu0  ;;  %v4633_v55 = vunpack.c.h.bf16 %v7525_v12  ;;  %v4629_v27 = vunpack.c.h.bf16 %v7527_v39 }
 0x720   :  { %6156 = vmatpush.msrb.mxu0 %v4513_v5  ;;  %6179 = vmatpush.msrb.mxu1 %v4577_v25  ;;  %v5797_v11 = vadd.f32 %v5796_v40, %v5774_v13 }
 0x721   :  { %6199 = vmatpush.msrb.mxu2 %v4653_v57  ;;  %6222 = vmatpush.msrb.mxu3 %v4717_v51 }
 0x722   :  { %6157 = vmatpush.msrb.mxu0 %v4509_v30  ;;  %6180 = vmatpush.msrb.mxu1 %v4573_v48  ;;  %v5839_v56 = vpop.f32.mrf.mxu2  ;;  %v5862_v6 = vpop.f32.mrf.mxu3 }
 0x723   :  { %6200 = vmatpush.msrb.mxu2 %v4649_v29  ;;  %6223 = vmatpush.msrb.mxu3 %v4713_v46  ;;  %v5840_v28 = vadd.f32 %v5839_v56, %v5817_v0  ;;  %v10854_v46 = vld [vmem:[#allocation40_spill] sm:$0xff] }
 0x724   :  { %6158 = vmatpush.msrb.mxu0 %v4505_v63  ;;  %6181 = vmatpush.msrb.mxu1 %v4569_v62 }
 0x725   :  { %6201 = vmatpush.msrb.mxu2 %v4645_v41  ;;  %6224 = vmatpush.msrb.mxu3 %v4709_v16  ;;  %v10560_v45 = vadd.f32 %v5862_v6, %v5840_v28  ;;  %v5819_v4 = vpop.f32.mrf.mxu1 }
 0x726   :  { %6159 = vmatpush.msrb.mxu0 %v4501_v23  ;;  %6182 = vmatpush.msrb.mxu1 %v4565_v34  ;;  %v5820_v25 = vadd.f32 %v5819_v4, %v5797_v11 }
 0x727   :  { %6202 = vmatpush.msrb.mxu2 %v4641_v36  ;;  %6225 = vmatpush.msrb.mxu3 %v4705_v24  ;;  %v10563_v60 = vmul.f32 0.70710677, %v10560_v45 }
 0x728   :  { %6160 = vmatmul.f32.vlgmr.msrb.gmra.mxu0 %v9848_v58  ;;  %6183 = vmatmul.f32.vlgmr.msrb.gmra.mxu1 %v10845_v22 }
 0x729   :  { %6203 = vmatpush.msrb.mxu2 %v4637_v32  ;;  %6226 = vmatpush.msrb.mxu3 %v4701_v8  ;;  %v6332_v5 = vmul.f32 %v10563_v60, %v10563_v60 }
 0x72b   :  { %6204 = vmatpush.msrb.mxu2 %v4633_v55  ;;  %6227 = vmatpush.msrb.mxu3 %v4697_v15  ;;  %v6333_v10 = vmin.f32 %v6332_v5, 16.0 }
 0x72c   :  { %v5842_v57 = vpop.f32.mrf.mxu2  ;;  %v5865_v51 = vpop.f32.mrf.mxu3 }
 0x72d   :  { %6205 = vmatpush.msrb.mxu2 %v4629_v27  ;;  %6228 = vmatpush.msrb.mxu3 %v4693_v38  ;;  %v6334_v58 = vmul.f32 2.1237322e-06, %v6333_v10  ;;  %v6345_v35 = vmul.f32 3.8918573e-05, %v6333_v10  ;;  %v5843_v22 = vadd.f32 %v5842_v57, %v5820_v25 }
 0x72e   :  { %6206 = vmatmul.f32.vlgmr.msrb.gmra.mxu2 %v10846_v7  ;;  %6229 = vmatmul.f32.vlgmr.msrb.gmra.mxu3 %v10847_v19 }
 0x72f   :  { %v6335_v52 = vadd.f32 0.00028619796, %v6334_v58  ;;  %v6346_v33 = vadd.f32 0.001143296, %v6345_v35  ;;  %v10571_v30 = vadd.f32 %v5865_v51, %v5843_v22  ;;  %v6238_v35 = vmul.f32 0.5, %v10560_v45 }
 0x730   :  { %6163 = vmatmul.f32.gmra.mxu0 %v10848_v59  ;;  %6186 = vmatmul.f32.gmra.mxu1 %v10849_v26 }
 0x731   :  { %v6336_v50 = vmul.f32 %v6335_v52, %v6333_v10  ;;  %v6347_v48 = vmul.f32 %v6346_v33, %v6333_v10  ;;  %v10576_v14 = vmul.f32 0.70710677, %v10571_v30  ;;  %v6242_v45 = vmul.f32 0.5, %v10571_v30 }
 0x733   :  { %v6337_v49 = vadd.f32 0.0036580483, %v6336_v50  ;;  %v6348_v29 = vadd.f32 0.014752088, %v6347_v48  ;;  %v6492_v7 = vmul.f32 %v10576_v14, %v10576_v14 }
 0x735   :  { %v6349_v19 = vmul.f32 %v6348_v29, %v6333_v10  ;;  %v6493_v54 = vmin.f32 %v6492_v7, 16.0  ;;  %v6338_v2 = vmul.f32 %v6337_v49, %v6333_v10 }
 0x736   :  { %6209 = vmatmul.f32.gmra.mxu2 %v10850_v61  ;;  %6232 = vmatmul.f32.gmra.mxu3 %v10854_v46 }
 0x737   :  { %v6350_v59 = vadd.f32 0.112945676, %v6349_v19  ;;  %v6494_v63 = vmul.f32 2.1237322e-06, %v6493_v54  ;;  %v6505_v26 = vmul.f32 3.8918573e-05, %v6493_v54 }
 0x738   :  { %v6339_v44 = vadd.f32 0.05243302, %v6338_v2 }
 0x739   :  { %v6351_v42 = vmul.f32 %v6350_v59, %v6333_v10  ;;  %v6495_v62 = vadd.f32 0.00028619796, %v6494_v63  ;;  %v6506_v47 = vadd.f32 0.001143296, %v6505_v26  ;;  %v5885_v63 = vpop.f32.mrf.mxu0  ;;  %v5908_v26 = vpop.f32.mrf.mxu1 }
 0x73a   :  { %v6340_v31 = vmul.f32 %v6339_v44, %v6333_v10 }
 0x73b   :  { %v6352_v20 = vadd.f32 0.4994258, %v6351_v42  ;;  %v6496_v41 = vmul.f32 %v6495_v62, %v6493_v54  ;;  %v6507_v53 = vmul.f32 %v6506_v47, %v6493_v54 }
 0x73c   :  { %v6341_v56 = vadd.f32 0.18741608, %v6340_v31 }
 0x73d   :  { %v6353_v16 = vmul.f32 %v6352_v20, %v6333_v10  ;;  %v6508_v0 = vadd.f32 0.014752088, %v6507_v53  ;;  %v6497_v17 = vadd.f32 0.0036580483, %v6496_v41  ;;  %v4759_v41 = vperm.slane %v10506_v21, 3 }
 0x73e   :  { %v6342_v28 = vmul.f32 %v6341_v56, %v6333_v10 }
 0x73f   :  { %v6354_v23 = vadd.f32 1.0, %v6353_v16  ;;  %v6509_v34 = vmul.f32 %v6508_v0, %v6493_v54  ;;  %v6498_v1 = vmul.f32 %v6497_v17, %v6493_v54  ;;  %v5886_v16 = vadd.f32 %v5885_v63, %v4759_v41 }
 0x740   :  { %v6343_v18 = vadd.f32 1.1283791, %v6342_v28 }
 0x741   :  { %7006 = vrcp.f32 %v6354_v23  ;;  %v6510_v61 = vadd.f32 0.112945676, %v6509_v34  ;;  %v6499_v40 = vadd.f32 0.05243302, %v6498_v1  ;;  %v6366_v8 = vand.u32 2147483648, %v6354_v23 }
 0x742   :  { %v6364_v37 = vand.u32 2147483647, %v6354_v23  ;;  %vm6360_vm1 = vweird.f32 %v6354_v23  ;;  %v6344_v27 = vmul.f32 %v6343_v18, %v10563_v60  ;;  %v5909_v31 = vadd.f32 %v5908_v26, %v5886_v16 }
 0x743   :  { %v6511_v36 = vmul.f32 %v6510_v61, %v6493_v54  ;;  %v6500_v12 = vmul.f32 %v6499_v40, %v6493_v54  ;;  %v6367_v11 = vor.u32 1.1754944e-38, %v6366_v8  ;;  %v5888_v42 = vpop.f32.mrf.mxu0  ;;  %v5911_v44 = vpop.f32.mrf.mxu1 }
 0x744   :  { %vm6365_vm7 = vcmp.eq.f32.partialorder %v6364_v37, 8.507059e+37  ;;  %v5889_v61 = vadd.f32 %v5888_v42, %v4759_v41 }
 0x745   :  { %v6512_v9 = vadd.f32 0.4994258, %v6511_v36  ;;  %v6501_v39 = vadd.f32 0.18741608, %v6500_v12 }
 0x746   :  { %v5931_v62 = vpop.f32.mrf.mxu2  ;;  %v5954_v47 = vpop.f32.mrf.mxu3  ;;  %v5912_v36 = vadd.f32 %v5911_v44, %v5889_v61 }
 0x747   :  { %v7007_v24 = vpop.eup %7006  ;;  %v6513_v13 = vmul.f32 %v6512_v9, %v6493_v54  ;;  %v6502_v25 = vmul.f32 %v6501_v39, %v6493_v54  ;;  %v5932_v34 = vadd.f32 %v5931_v62, %v5909_v31 }
 0x748   :  { %v6356_v6 = vmul.f32 %v7007_v24, %v6354_v23  ;;  %vm6361_vm0 = vweird.f32 %v7007_v24 }
 0x749   :  { %v6514_v32 = vadd.f32 1.0, %v6513_v13  ;;  %vm6362_vm6 = vmor %vm6360_vm1, %vm6361_vm0  ;;  %v6503_v52 = vadd.f32 1.1283791, %v6502_v25  ;;  %v5955_v56 = vadd.f32 %v5954_v47, %v5932_v34 }
 0x74a   :  { %v6357_v43 = vsub.f32 1.0, %v6356_v6 }
 0x74b   :  { %7008 = vrcp.f32 %v6514_v32  ;;  %v6526_v51 = vand.u32 2147483648, %v6514_v32  ;;  %v6524_v50 = vand.u32 2147483647, %v6514_v32  ;;  %vm6520_vm9 = vweird.f32 %v6514_v32 }
 0x74c   :  { %v6358_v55 = vmul.f32 %v7007_v24, %v6357_v43  ;;  %v6504_v29 = vmul.f32 %v6503_v52, %v10576_v14 }
 0x74d   :  { %v6527_v60 = vor.u32 1.1754944e-38, %v6526_v51  ;;  %vm6525_vm11 = vcmp.eq.f32.partialorder %v6524_v50, 8.507059e+37 }
 0x74e   :  { %v6359_v15 = vadd.f32 %v7007_v24, %v6358_v55 }
 0x750   :  { %v6363_v3 = vsel %vm6362_vm6, %v7007_v24, %v6359_v15  ;;  %v5934_v14 = vpop.f32.mrf.mxu2  ;;  %v5957_v53 = vpop.f32.mrf.mxu3 }
 0x751   :  { %v6368_v38 = vsel %vm6365_vm7, %v6367_v11, %v6363_v3  ;;  %v7009_v5 = vpop.eup %7008  ;;  %v5935_v28 = vadd.f32 %v5934_v14, %v5912_v36 }
 0x752   :  { %v6369_v4 = vmul.f32 %v6368_v38, %v6344_v27  ;;  %v6516_v10 = vmul.f32 %v7009_v5, %v6514_v32  ;;  %vm6521_vm8 = vweird.f32 %v7009_v5 }
 0x753   :  { %vm6522_vm10 = vmor %vm6520_vm9, %vm6521_vm8  ;;  %v5958_v21 = vadd.f32 %v5957_v53, %v5935_v28 }
 0x754   :  { %v6717_v57 = vclamps-f32 %v6369_v4, 1.0  ;;  %v6517_v58 = vsub.f32 1.0, %v6516_v10 }
 0x756   :  { %v6574_v22 = vadd.f32 1.0, %v6717_v57  ;;  %v6518_v33 = vmul.f32 %v7009_v5, %v6517_v58 }
 0x758   :  { %v6582_v48 = vmul.f32 %v6574_v22, %v6238_v35  ;;  %v6519_v49 = vadd.f32 %v7009_v5, %v6518_v33 }
 0x75a   :  { %6590 = vst [vmem:[#allocation16 + $0x10] sm:$0xff] %v6582_v48  ;;  %v6523_v7 = vsel %vm6522_vm10, %v7009_v5, %v6519_v49 }
 0x75b   :  { %v6528_v19 = vsel %vm6525_vm11, %v6527_v60, %v6523_v7 }
 0x75c   :  { %v6529_v54 = vmul.f32 %v6528_v19, %v6504_v29 }
 0x75d   :  { %v5977_v20 = vpop.f32.mrf.mxu0  ;;  %v6000_v0 = vpop.f32.mrf.mxu1 }
 0x75e   :  { %v6721_v46 = vclamps-f32 %v6529_v54, 1.0  ;;  %v5978_v9 = vadd.f32 %v5977_v20, %v5955_v56 }
 0x760   :  { %v6578_v2 = vadd.f32 1.0, %v6721_v46  ;;  %v6001_v13 = vadd.f32 %v6000_v0, %v5978_v9 }
 0x762   :  { %v6586_v59 = vmul.f32 %v6578_v2, %v6242_v45 }
 0x764   :  { %6594 = vst [vmem:[#allocation16 + $0x30] sm:$0xff] %v6586_v59 }
 0x767   :  { %v5980_v23 = vpop.f32.mrf.mxu0  ;;  %v6003_v1 = vpop.f32.mrf.mxu1 }
 0x768   :  { %v5981_v18 = vadd.f32 %v5980_v23, %v5958_v21 }
 0x76a   :  { %v6023_v17 = vpop.f32.mrf.mxu2  ;;  %v6046_v30 = vpop.f32.mrf.mxu3  ;;  %v6004_v15 = vadd.f32 %v6003_v1, %v5981_v18 }
 0x76b   :  { %v6024_v43 = vadd.f32 %v6023_v17, %v6001_v13 }
 0x76d   :  { %v6047_v8 = vadd.f32 %v6046_v30, %v6024_v43 }
 0x774   :  { %v6026_v40 = vpop.f32.mrf.mxu2  ;;  %v6049_v6 = vpop.f32.mrf.mxu3 }
 0x775   :  { %v6027_v39 = vadd.f32 %v6026_v40, %v6004_v15 }
 0x777   :  { %v6050_v38 = vadd.f32 %v6049_v6, %v6027_v39 }
 0x781   :  { %v6069_v24 = vpop.f32.mrf.mxu0  ;;  %v6092_v32 = vpop.f32.mrf.mxu1 }
 0x782   :  { %v6070_v11 = vadd.f32 %v6069_v24, %v6047_v8 }
 0x784   :  { %v6093_v27 = vadd.f32 %v6092_v32, %v6070_v11 }
 0x78b   :  { %v6072_v12 = vpop.f32.mrf.mxu0  ;;  %v6095_v3 = vpop.f32.mrf.mxu1 }
 0x78c   :  { %v6073_v25 = vadd.f32 %v6072_v12, %v6050_v38 }
 0x78e   :  { %v6115_v55 = vpop.f32.mrf.mxu2  ;;  %v6138_v37 = vpop.f32.mrf.mxu3  ;;  %v6096_v35 = vadd.f32 %v6095_v3, %v6073_v25 }
 0x78f   :  { %v6116_v5 = vadd.f32 %v6115_v55, %v6093_v27 }
 0x791   :  { %v6139_v58 = vadd.f32 %v6138_v37, %v6116_v5 }
 0x798   :  { %v6118_v10 = vpop.f32.mrf.mxu2  ;;  %v6141_v57 = vpop.f32.mrf.mxu3 }
 0x799   :  { %v6119_v52 = vadd.f32 %v6118_v10, %v6096_v35 }
 0x79b   :  { %v6142_v60 = vadd.f32 %v6141_v57, %v6119_v52 }
 0x7a5   :  { %v6161_v4 = vpop.f32.mrf.mxu0  ;;  %v6184_v51 = vpop.f32.mrf.mxu1 }
 0x7a6   :  { %v6162_v22 = vadd.f32 %v6161_v4, %v6139_v58 }
 0x7a8   :  { %v6185_v33 = vadd.f32 %v6184_v51, %v6162_v22 }
 0x7ad   :  { %v6164_v50 = vpop.f32.mrf.mxu0  ;;  %v6187_v46 = vpop.f32.mrf.mxu1 }
 0x7ae   :  { %v6165_v7 = vadd.f32 %v6164_v50, %v6142_v60 }
 0x7b0   :  { %v6188_v45 = vadd.f32 %v6187_v46, %v6165_v7 }
 0x7b1   :  { %v6207_v48 = vpop.f32.mrf.mxu2  ;;  %v6230_v49 = vpop.f32.mrf.mxu3 }
 0x7b2   :  { %v6208_v29 = vadd.f32 %v6207_v48, %v6185_v33 }
 0x7b4   :  { %v10587_v19 = vadd.f32 %v6230_v49, %v6208_v29 }
 0x7b6   :  { %v10590_v54 = vmul.f32 0.70710677, %v10587_v19 }
 0x7b8   :  { %v6372_v2 = vmul.f32 %v10590_v54, %v10590_v54 }
 0x7b9   :  { %v6210_v59 = vpop.f32.mrf.mxu2  ;;  %v6233_v42 = vpop.f32.mrf.mxu3 }
 0x7ba   :  { %v6373_v63 = vmin.f32 %v6372_v2, 16.0  ;;  %v6211_v26 = vadd.f32 %v6210_v59, %v6188_v45 }
 0x7bc   :  { %v6374_v62 = vmul.f32 2.1237322e-06, %v6373_v63  ;;  %v6385_v47 = vmul.f32 3.8918573e-05, %v6373_v63  ;;  %v10594_v44 = vadd.f32 %v6233_v42, %v6211_v26 }
 0x7be   :  { %v6375_v20 = vadd.f32 0.00028619796, %v6374_v62  ;;  %v6386_v41 = vadd.f32 0.001143296, %v6385_v47  ;;  %v10597_v14 = vmul.f32 0.70710677, %v10594_v44 }
 0x7bf   :  { %v6239_v47 = vmul.f32 0.5, %v10587_v19  ;;  %v6243_v19 = vmul.f32 0.5, %v10594_v44 }
 0x7c0   :  { %v6376_v53 = vmul.f32 %v6375_v20, %v6373_v63  ;;  %v6387_v16 = vmul.f32 %v6386_v41, %v6373_v63  ;;  %v6532_v0 = vmul.f32 %v10597_v14, %v10597_v14 }
 0x7c2   :  { %v6388_v31 = vadd.f32 0.014752088, %v6387_v16  ;;  %v6377_v23 = vadd.f32 0.0036580483, %v6376_v53  ;;  %v6533_v17 = vmin.f32 %v6532_v0, 16.0 }
 0x7c4   :  { %v6389_v30 = vmul.f32 %v6388_v31, %v6373_v63  ;;  %v6534_v34 = vmul.f32 2.1237322e-06, %v6533_v17  ;;  %v6545_v61 = vmul.f32 3.8918573e-05, %v6533_v17  ;;  %v6378_v1 = vmul.f32 %v6377_v23, %v6373_v63 }
 0x7c6   :  { %v6390_v56 = vadd.f32 0.112945676, %v6389_v30  ;;  %v6535_v36 = vadd.f32 0.00028619796, %v6534_v34  ;;  %v6546_v9 = vadd.f32 0.001143296, %v6545_v61 }
 0x7c7   :  { %v6379_v13 = vadd.f32 0.05243302, %v6378_v1 }
 0x7c8   :  { %v6391_v24 = vmul.f32 %v6390_v56, %v6373_v63  ;;  %v6536_v28 = vmul.f32 %v6535_v36, %v6533_v17  ;;  %v6547_v40 = vmul.f32 %v6546_v9, %v6533_v17 }
 0x7c9   :  { %v6380_v12 = vmul.f32 %v6379_v13, %v6373_v63 }
 0x7ca   :  { %v6392_v6 = vadd.f32 0.4994258, %v6391_v24  ;;  %v6548_v21 = vadd.f32 0.014752088, %v6547_v40  ;;  %v6537_v32 = vadd.f32 0.0036580483, %v6536_v28 }
 0x7cb   :  { %v6381_v11 = vadd.f32 0.18741608, %v6380_v12 }
 0x7cc   :  { %v6393_v43 = vmul.f32 %v6392_v6, %v6373_v63  ;;  %v6549_v18 = vmul.f32 %v6548_v21, %v6533_v17  ;;  %v6538_v37 = vmul.f32 %v6537_v32, %v6533_v17 }
 0x7cd   :  { %v6382_v5 = vmul.f32 %v6381_v11, %v6373_v63 }
 0x7ce   :  { %v6394_v8 = vadd.f32 1.0, %v6393_v43  ;;  %v6550_v55 = vadd.f32 0.112945676, %v6549_v18  ;;  %v6539_v27 = vadd.f32 0.05243302, %v6538_v37 }
 0x7cf   :  { %v6383_v35 = vadd.f32 1.1283791, %v6382_v5 }
 0x7d0   :  { %7010 = vrcp.f32 %v6394_v8  ;;  %v6551_v15 = vmul.f32 %v6550_v55, %v6533_v17  ;;  %v6540_v10 = vmul.f32 %v6539_v27, %v6533_v17  ;;  %v6406_v58 = vand.u32 2147483648, %v6394_v8 }
 0x7d1   :  { %v6404_v51 = vand.u32 2147483647, %v6394_v8  ;;  %vm6400_vm13 = vweird.f32 %v6394_v8  ;;  %v6384_v49 = vmul.f32 %v6383_v35, %v10590_v54 }
 0x7d2   :  { %v6552_v39 = vadd.f32 0.4994258, %v6551_v15  ;;  %v6541_v52 = vadd.f32 0.18741608, %v6540_v10  ;;  %v6407_v50 = vor.u32 1.1754944e-38, %v6406_v58 }
 0x7d3   :  { %vm6405_vm15 = vcmp.eq.f32.partialorder %v6404_v51, 8.507059e+37 }
 0x7d4   :  { %v6553_v3 = vmul.f32 %v6552_v39, %v6533_v17  ;;  %v6542_v7 = vmul.f32 %v6541_v52, %v6533_v17 }
 0x7d6   :  { %v7011_v38 = vpop.eup %7010  ;;  %v6554_v25 = vadd.f32 1.0, %v6553_v3  ;;  %v6543_v26 = vadd.f32 1.1283791, %v6542_v7 }
 0x7d7   :  { %v6396_v4 = vmul.f32 %v7011_v38, %v6394_v8  ;;  %vm6401_vm12 = vweird.f32 %v7011_v38 }
 0x7d8   :  { %7012 = vrcp.f32 %v6554_v25  ;;  %vm6402_vm14 = vmor %vm6400_vm13, %vm6401_vm12  ;;  %v6566_v63 = vand.u32 2147483648, %v6554_v25  ;;  %v6564_v62 = vand.u32 2147483647, %v6554_v25  ;;  %vm6560_vm3 = vweird.f32 %v6554_v25 }
 0x7d9   :  { %v6397_v57 = vsub.f32 1.0, %v6396_v4  ;;  %v6544_v16 = vmul.f32 %v6543_v26, %v10597_v14 }
 0x7da   :  { %v6567_v54 = vor.u32 1.1754944e-38, %v6566_v63  ;;  %vm6565_vm5 = vcmp.eq.f32.partialorder %v6564_v62, 8.507059e+37 }
 0x7db   :  { %v6398_v22 = vmul.f32 %v7011_v38, %v6397_v57 }
 0x7dd   :  { %v6399_v33 = vadd.f32 %v7011_v38, %v6398_v22 }
 0x7de   :  { %v7013_v48 = vpop.eup %7012 }
 0x7df   :  { %v6403_v60 = vsel %vm6402_vm14, %v7011_v38, %v6399_v33  ;;  %v6556_v46 = vmul.f32 %v7013_v48, %v6554_v25  ;;  %vm6561_vm2 = vweird.f32 %v7013_v48 }
 0x7e0   :  { %v6408_v29 = vsel %vm6405_vm15, %v6407_v50, %v6403_v60  ;;  %vm6562_vm4 = vmor %vm6560_vm3, %vm6561_vm2 }
 0x7e1   :  { %v6409_v45 = vmul.f32 %v6408_v29, %v6384_v49  ;;  %v6557_v2 = vsub.f32 1.0, %v6556_v46 }
 0x7e3   :  { %v6718_v59 = vclamps-f32 %v6409_v45, 1.0  ;;  %v6558_v42 = vmul.f32 %v7013_v48, %v6557_v2 }
 0x7e5   :  { %v6575_v20 = vadd.f32 1.0, %v6718_v59  ;;  %v6559_v41 = vadd.f32 %v7013_v48, %v6558_v42 }
 0x7e7   :  { %v6583_v53 = vmul.f32 %v6575_v20, %v6239_v47  ;;  %v6563_v0 = vsel %vm6562_vm4, %v7013_v48, %v6559_v41 }
 0x7e8   :  { %v6568_v31 = vsel %vm6565_vm5, %v6567_v54, %v6563_v0 }
 0x7e9   :  { %6591 = vst [vmem:[#allocation16 + $0x18] sm:$0xff] %v6583_v53  ;;  %v6569_v23 = vmul.f32 %v6568_v31, %v6544_v16 }
 0x7eb   :  { %v6722_v17 = vclamps-f32 %v6569_v23, 1.0 }
 0x7ed   :  { %v6579_v30 = vadd.f32 1.0, %v6722_v17 }
 0x7ef   :  { %v6587_v34 = vmul.f32 %v6579_v30, %v6243_v19 }
 0x7f1   :  { %6595 = vst [vmem:[#allocation16 + $0x38] sm:$0xff] %v6587_v34 }
 0x7f2   :  { %6608 = dma.vmem_to_hbm [thread:$0]  %s6601_s6, 1024, %s6603_s13, [#allocation4], %s7774_s0, %s7774_s0, %s7775_s14  }
 0x7f3   :  { %7755 = dma.done.wait [#allocation4], 1024  }
 0x7f4   :  { %7756 = vsyncadd [#allocation4], 4294966272 }
 0x7f5   :  { %6613 = vsyncpa [#allocation3], 1 }
 0x7f6   :  { %6614 = vsyncpa [#allocation6], 1 }
 0x7f7   :  { %6615 = vsyncpa [#allocation9], 1 }
 0x7f8   :  { %6616 = vsyncpa [#allocation12], 1 }
 0x7f9   :  { %6617 = vsyncpa [#allocation15], 1 }
 0x7fa   :  { %6618 = vsyncpa [#allocation4], 1 }

</bundles_post_ra>
